<compile_context>
chip_gen: v6e
topology: v6e:2x2x1
jax: 0.10.0
libtpu: 0.0.40
codegen_flags: <defaults>
</compile_context>

<pallas_src>
import functools

import jax
import jax.numpy as jnp
from jax.experimental import pallas as pl
from jax.experimental.pallas import tpu as pltpu

_VMEM_LIMIT = 48 * 1024 * 1024   # explicit scoped-VMEM limit (headroom on v7x's 64 MiB)


# ----------------------------------------------------------------------------
# Small helpers
# ----------------------------------------------------------------------------
def _round_up(x, m):
    return ((x + m - 1) // m) * m


def _tile_dim(d, max_tile, align):
    """Pick (tile, padded_dim). If d <= max_tile use the full dim as one block
    (no alignment needed); otherwise use max_tile (a multiple of `align`) and
    pad d up to a multiple of it."""
    if d <= max_tile:
        return d, d
    return max_tile, _round_up(d, max_tile)


def _row_tile(m):
    """Row-tile for the BN kernels: full block when small, else a multiple of 8
    that divides m."""
    if m <= 2048:
        return m
    for t in (1024, 512, 256, 128, 64, 32, 16, 8):
        if m % t == 0:
            return t
    return m


def _cparams(*sem):
    return pltpu.CompilerParams(dimension_semantics=sem,
                                vmem_limit_bytes=_VMEM_LIMIT)


# ----------------------------------------------------------------------------
# Pallas kernels
# ----------------------------------------------------------------------------
def _matmul_kernel(a_ref, b_ref, o_ref, acc_ref):
    # Tiled matmul: grid (M/TM, N/TN, K/TK); bf16 inputs, f32 VMEM accumulator.
    @pl.when(pl.program_id(2) == 0)
    def _():
        acc_ref[...] = jnp.zeros_like(acc_ref)

    acc_ref[...] += jnp.dot(a_ref[...], b_ref[...],
                            preferred_element_type=jnp.float32)

    @pl.when(pl.program_id(2) == pl.num_programs(2) - 1)
    def _():
        o_ref[...] = acc_ref[...].astype(o_ref.dtype)


def _conv3x3_kernel(x_ref, w_ref, o_ref, *, mz, wp):
    # 3x3, stride 1, pad 1 conv without im2col.
    #  x_ref: (1, Hp*Wp, Cin) bf16 -- spatially padded image, rows flattened
    #  w_ref: (9, Cin, TN)    bf16 -- taps in (kh, kw) order
    #  o_ref: (1, Mz, TN)     f32  -- rows p = ho*Wp + wo (wo >= W cols are junk,
    #                                 trimmed by the wrapper)
    acc = jnp.zeros(o_ref.shape[1:], jnp.float32)
    for kh in range(3):
        for kw in range(3):
            off = kh * wp + kw
            a = x_ref[0, off:off + mz, :]                  # row-offset view of the tap
            acc = acc + jnp.dot(a, w_ref[kh * 3 + kw],
                                preferred_element_type=jnp.float32)
    o_ref[0] = acc


def _bn_stats_kernel(x_ref, sum_ref, ssq_ref):
    # Pass 1: per-channel sum / sum-of-squares, accumulated across row tiles.
    @pl.when(pl.program_id(0) == 0)
    def _():
        sum_ref[...] = jnp.zeros_like(sum_ref)
        ssq_ref[...] = jnp.zeros_like(ssq_ref)

    x = x_ref[...].astype(jnp.float32)
    sum_ref[...] += jnp.sum(x, axis=0, keepdims=True)
    ssq_ref[...] += jnp.sum(x * x, axis=0, keepdims=True)


def _bn_affine(x, sum_v, ssq_v, gamma, beta, inv_count):
    mean = sum_v * inv_count
    var = jnp.maximum(ssq_v * inv_count - mean * mean, 0.0)   # biased var (PyTorch BN fwd)
    inv = jax.lax.rsqrt(var + 1e-5)
    y = (x - mean) * (inv * gamma) + beta
    return jnp.where(y >= 0, y, 0.1 * y)                      # LeakyReLU(0.1)


def _bn_act_kernel(x_ref, sum_ref, ssq_ref, g_ref, b_ref, o_ref, *, inv_count):
    y = _bn_affine(x_ref[...].astype(jnp.float32), sum_ref[...], ssq_ref[...],
                   g_ref[...], b_ref[...], inv_count)
    o_ref[...] = y.astype(o_ref.dtype)


def _bn_act_res_kernel(x_ref, sum_ref, ssq_ref, g_ref, b_ref, r_ref, o_ref, *,
                       inv_count):
    y = _bn_affine(x_ref[...].astype(jnp.float32), sum_ref[...], ssq_ref[...],
                   g_ref[...], b_ref[...], inv_count)
    o_ref[...] = (y + r_ref[...].astype(jnp.float32)).astype(o_ref.dtype)


# ----------------------------------------------------------------------------
# Pallas wrappers
# ----------------------------------------------------------------------------
def pallas_matmul(a, b, out_dtype=jnp.float32):
    """(M, K) @ (K, N) -> (M, N); a, b expected bf16, f32 MXU accumulation."""
    M, K = a.shape
    _, N = b.shape
    TM, Mp = _tile_dim(M, 512, 8)
    TK, Kp = _tile_dim(K, 512, 128)
    TN, Np = _tile_dim(N, 256, 128)
    if Mp != M or Kp != K:                      # fallback only; test shapes need no pad
        a = jnp.zeros((Mp, Kp), a.dtype).at[:M, :K].set(a)
    if Kp != K or Np != N:
        b = jnp.zeros((Kp, Np), b.dtype).at[:K, :N].set(b)

    out = pl.pallas_call(
        _matmul_kernel,
        out_shape=jax.ShapeDtypeStruct((Mp, Np), out_dtype),
        grid=(Mp // TM, Np // TN, Kp // TK),
        in_specs=[pl.BlockSpec((TM, TK), lambda i, j, k: (i, k)),
                  pl.BlockSpec((TK, TN), lambda i, j, k: (k, j))],
        out_specs=pl.BlockSpec((TM, TN), lambda i, j, k: (i, j)),
        scratch_shapes=[pltpu.VMEM((TM, TN), jnp.float32)],
        compiler_params=_cparams("parallel", "parallel", "arbitrary"),
    )(a, b)
    if Mp != M or Np != N:
        out = out[:M, :N]
    return out


def pallas_conv3x3_same(x_nhwc, w):
    """3x3 / stride 1 / pad 1 conv. x: (B,H,W,Cin) bf16, w: (3,3,Cin,Cout) bf16.
    Returns (B*H*W, Cout) f32."""
    B, H, W, Cin = x_nhwc.shape
    Cout = w.shape[-1]
    Wp = W + 2
    Hp = H + 3                     # 1 top + 2 bottom pad rows keep all tap reads in-bounds
    Mz = H * Wp                    # computed rows per image (junk cols wo>=W trimmed later)

    xpad = jnp.pad(x_nhwc, ((0, 0), (1, 2), (1, 1), (0, 0)))
    xflat = xpad.reshape(B, Hp * Wp, Cin)

    TN, Np = _tile_dim(Cout, 256, 128)
    w9 = w.reshape(9, Cin, Cout)
    if Np != Cout:                 # fallback only
        w9 = jnp.zeros((9, Cin, Np), w.dtype).at[:, :, :Cout].set(w9)

    out = pl.pallas_call(
        functools.partial(_conv3x3_kernel, mz=Mz, wp=Wp),
        out_shape=jax.ShapeDtypeStruct((B, Mz, Np), jnp.float32),
        grid=(B, Np // TN),
        in_specs=[pl.BlockSpec((1, Hp * Wp, Cin), lambda b, j: (b, 0, 0)),
                  pl.BlockSpec((9, Cin, TN), lambda b, j: (0, 0, j))],
        out_specs=pl.BlockSpec((1, Mz, TN), lambda b, j: (b, 0, j)),
        compiler_params=_cparams("parallel", "parallel"),
    )(xflat, w9)

    y = out.reshape(B, H, Wp, Np)[:, :, :W, :Cout]          # drop junk cols / pad chans
    return y.reshape(B * H * W, Cout)


def pallas_bn_stats(x):
    """x: (M, C) f32 -> (per-channel sum, per-channel sum of squares), each (1, C)."""
    M, C = x.shape
    TM = _row_tile(M)
    vec = pl.BlockSpec((1, C), lambda i: (0, 0))
    return pl.pallas_call(
        _bn_stats_kernel,
        out_shape=(jax.ShapeDtypeStruct((1, C), jnp.float32),
                   jax.ShapeDtypeStruct((1, C), jnp.float32)),
        grid=(M // TM,),
        in_specs=[pl.BlockSpec((TM, C), lambda i: (i, 0))],
        out_specs=(vec, vec),
        compiler_params=_cparams("arbitrary"),
    )(x)


def pallas_bn_act(x, s, q, gamma, beta, residual=None, out_dtype=jnp.float32):
    """Row-tiled BN(batch stats) + LeakyReLU(0.1) (+ residual add)."""
    M, C = x.shape
    TM = _row_tile(M)
    inv_count = 1.0 / M
    row = pl.BlockSpec((TM, C), lambda i: (i, 0))
    vec = pl.BlockSpec((1, C), lambda i: (0, 0))
    if residual is None:
        kern = functools.partial(_bn_act_kernel, inv_count=inv_count)
        in_specs = [row, vec, vec, vec, vec]
        args = (x, s, q, gamma, beta)
    else:
        kern = functools.partial(_bn_act_res_kernel, inv_count=inv_count)
        in_specs = [row, vec, vec, vec, vec, row]
        args = (x, s, q, gamma, beta, residual)
    return pl.pallas_call(
        kern,
        out_shape=jax.ShapeDtypeStruct((M, C), out_dtype),
        grid=(M // TM,),
        in_specs=in_specs,
        out_specs=row,
        compiler_params=_cparams("parallel"),
    )(*args)


# ----------------------------------------------------------------------------
# ResidualBlock forward (Pallas) + plain-JAX reference
# ----------------------------------------------------------------------------
def residual_block(params, x_nchw):
    """x: (B, Cin, H, W) f32.  Returns (B, Cin, H, W) f32."""
    x = jnp.transpose(x_nchw, (0, 2, 3, 1)).astype(jnp.float32)      # NHWC
    B, H, W, Cin = x.shape
    M = B * H * W
    x_rows = x.reshape(M, Cin)
    c0 = params["w1"].shape[1]

    # conv1 (1x1, no bias) -> bn1 (batch stats) -> LeakyReLU(0.1)
    y1 = pallas_matmul(x_rows.astype(jnp.bfloat16), params["w1"])     # (M, c0) f32
    s1, q1 = pallas_bn_stats(y1)
    h1 = pallas_bn_act(y1, s1, q1, params["g1"], params["b1"],
                       out_dtype=jnp.bfloat16)                        # bf16: feeds MXU next

    # conv2 (3x3, pad 1, no bias) -> bn2 -> LeakyReLU(0.1) -> + residual
    y2 = pallas_conv3x3_same(h1.reshape(B, H, W, c0), params["w2"])   # (M, Cin) f32
    s2, q2 = pallas_bn_stats(y2)
    out_rows = pallas_bn_act(y2, s2, q2, params["g2"], params["b2"],
                             residual=x_rows, out_dtype=jnp.float32)

    return jnp.transpose(out_rows.reshape(B, H, W, Cin), (0, 3, 1, 2))


def residual_block_reference(params, x_nchw):
    """Plain-JAX reference with the same dtype flow (bf16 MXU inputs, f32 elsewhere)."""
    x = jnp.transpose(x_nchw, (0, 2, 3, 1)).astype(jnp.float32)
    B, H, W, Cin = x.shape

    def bn_lrelu(y, gamma, beta):
        mean = jnp.mean(y, axis=(0, 1, 2), keepdims=True)
        var = jnp.mean(jnp.square(y - mean), axis=(0, 1, 2), keepdims=True)
        z = (y - mean) * jax.lax.rsqrt(var + 1e-5)
        z = z * gamma.reshape(1, 1, 1, -1) + beta.reshape(1, 1, 1, -1)
        return jnp.where(z >= 0, z, 0.1 * z)

    y1 = jax.lax.dot_general(x.reshape(-1, Cin).astype(jnp.bfloat16), params["w1"],
                             (((1,), (0,)), ((), ())),
                             preferred_element_type=jnp.float32)
    h1 = bn_lrelu(y1.reshape(B, H, W, -1), params["g1"], params["b1"])
    y2 = jax.lax.conv_general_dilated(h1.astype(jnp.bfloat16), params["w2"],
                                      (1, 1), ((1, 1), (1, 1)),
                                      dimension_numbers=("NHWC", "HWIO", "NHWC"),
                                      preferred_element_type=jnp.float32)
    out = x + bn_lrelu(y2, params["g2"], params["b2"])
    return jnp.transpose(out, (0, 3, 1, 2))


# ----------------------------------------------------------------------------
# Deterministic parameter init (mirrors the module's __init__ shapes)
# ----------------------------------------------------------------------------
def init_params(key, inchannels, outchannels):
    c0, c1 = outchannels
    k1, k2 = jax.random.split(key)
    # Conv weights in (cin, cout) / (kh, kw, cin, cout) layout, stored bf16 once.
    w1 = (jax.random.normal(k1, (inchannels, c0), jnp.float32)
          * inchannels ** -0.5).astype(jnp.bfloat16)
    w2 = (jax.random.normal(k2, (3, 3, c0, c1), jnp.float32)
          * (9 * c0) ** -0.5).astype(jnp.bfloat16)
    return {
        "w1": w1, "w2": w2,
        "g1": jnp.ones((1, c0), jnp.float32), "b1": jnp.zeros((1, c0), jnp.float32),
        "g2": jnp.ones((1, c1), jnp.float32), "b2": jnp.zeros((1, c1), jnp.float32),
    }


# ----------------------------------------------------------------------------
if __name__ == "__main__":
    key = jax.random.PRNGKey(0)
    kp, kx = jax.random.split(key)

    inchannels, outchannels = 32, (16, 32)      # residual add requires outchannels[1]==in
    assert outchannels[1] == inchannels
    B, H, W = 2, 16, 16

    params = init_params(kp, inchannels, outchannels)
    x = jax.random.normal(kx, (B, inchannels, H, W), jnp.float32)   # NCHW input

    fwd = jax.jit(residual_block)
    out = fwd(params, x)
    jax.block_until_ready(out)

    assert out.shape == (B, inchannels, H, W), out.shape
    assert out.dtype == jnp.float32

    ref = jax.jit(residual_block_reference)(params, x)
    err = float(jnp.max(jnp.abs(out - ref)))
    assert err < 5e-2, f"max abs error vs reference: {err}"

    print("KERNEL_OK")
</pallas_src>

<mosaic_0001>
module attributes {stable_mosaic.version = 11 : i64} {
  func.func @_matmul_kernel(%arg0: i32, %arg1: i32, %arg2: i32, %arg3: memref<512x32xbf16, #tpu.memory_space<vmem>>, %arg4: memref<32x16xbf16, #tpu.memory_space<vmem>>, %arg5: memref<512x16xf32, #tpu.memory_space<vmem>>, %arg6: memref<512x16xf32, #tpu.memory_space<vmem>>) attributes {dimension_semantics = [#tpu.dimension_semantics<parallel>, #tpu.dimension_semantics<parallel>, #tpu.dimension_semantics<arbitrary>], iteration_bounds = array<i64: 1, 1, 1>, scalar_prefetch = 0 : i64, scratch_operands = 1 : i64, tpu.core_type = #tpu.core_type<tc>, window_params = [{transform_indices = @transform_0, window_bounds = array<i64: 512, 32>}, {transform_indices = @transform_1, window_bounds = array<i64: 32, 16>}, {transform_indices = @transform_2, window_bounds = array<i64: 512, 16>}]} {
    %c0_i32 = arith.constant 0 : i32
    %0 = arith.cmpi eq, %arg2, %c0_i32 : i32
    %1 = arith.extui %0 : i1 to i32
    %c0_i32_0 = arith.constant 0 : i32
    %2 = arith.cmpi ne, %1, %c0_i32_0 : i32
    scf.if %2 {
      %cst_10 = arith.constant 0.000000e+00 : f32
      %12 = vector.broadcast %cst_10 : f32 to vector<512x16xf32>
      %c0_11 = arith.constant 0 : index
      %c0_12 = arith.constant 0 : index
      %13 = vector.load %arg6[%c0_11, %c0_12] : memref<512x16xf32, #tpu.memory_space<vmem>>, vector<512x16xf32>
      tpu.vector_store %arg6[%c0_11, %c0_12], %12 {strides = array<i32>} : memref<512x16xf32, #tpu.memory_space<vmem>>, vector<512x16xf32>,
    } else {
    }
    %c0 = arith.constant 0 : index
    %c0_1 = arith.constant 0 : index
    %3 = vector.load %arg6[%c0, %c0_1] : memref<512x16xf32, #tpu.memory_space<vmem>>, vector<512x16xf32>
    %c0_2 = arith.constant 0 : index
    %c0_3 = arith.constant 0 : index
    %4 = vector.load %arg3[%c0_2, %c0_3] : memref<512x32xbf16, #tpu.memory_space<vmem>>, vector<512x32xbf16>
    %c0_4 = arith.constant 0 : index
    %c0_5 = arith.constant 0 : index
    %5 = vector.load %arg4[%c0_4, %c0_5] : memref<32x16xbf16, #tpu.memory_space<vmem>>, vector<32x16xbf16>
    %cst = arith.constant dense<0.000000e+00> : vector<512x16xf32>
    %6 = tpu.matmul %4, %5, %cst {dimension_numbers = #tpu.dot_dimension_numbers<[1], [0], [0], [1], [0, 0, 1, 1], [], []>} : vector<512x32xbf16>, vector<32x16xbf16>, vector<512x16xf32> -> vector<512x16xf32>
    %7 = arith.addf %3, %6 : vector<512x16xf32>
    %c0_6 = arith.constant 0 : index
    %c0_7 = arith.constant 0 : index
    %8 = vector.load %arg6[%c0_6, %c0_7] : memref<512x16xf32, #tpu.memory_space<vmem>>, vector<512x16xf32>
    tpu.vector_store %arg6[%c0_6, %c0_7], %7 {strides = array<i32>} : memref<512x16xf32, #tpu.memory_space<vmem>>, vector<512x16xf32>,
    %c0_i32_8 = arith.constant 0 : i32
    %9 = arith.cmpi eq, %arg2, %c0_i32_8 : i32
    %10 = arith.extui %9 : i1 to i32
    %c0_i32_9 = arith.constant 0 : i32
    %11 = arith.cmpi ne, %10, %c0_i32_9 : i32
    scf.if %11 {
      %c0_10 = arith.constant 0 : index
      %c0_11 = arith.constant 0 : index
      %12 = vector.load %arg6[%c0_10, %c0_11] : memref<512x16xf32, #tpu.memory_space<vmem>>, vector<512x16xf32>
      %c0_12 = arith.constant 0 : index
      %c0_13 = arith.constant 0 : index
      %13 = vector.load %arg5[%c0_12, %c0_13] : memref<512x16xf32, #tpu.memory_space<vmem>>, vector<512x16xf32>
      tpu.vector_store %arg5[%c0_12, %c0_13], %12 {strides = array<i32>} : memref<512x16xf32, #tpu.memory_space<vmem>>, vector<512x16xf32>,
    } else {
    }
    return
  }
  func.func @transform_0(%arg0: i32, %arg1: i32, %arg2: i32) -> (i32, i32) {
    %c0_i32 = arith.constant 0 : i32
    return %arg0, %arg2 : i32, i32
  }
  func.func @transform_1(%arg0: i32, %arg1: i32, %arg2: i32) -> (i32, i32) {
    %c0_i32 = arith.constant 0 : i32
    return %arg2, %arg1 : i32, i32
  }
  func.func @transform_2(%arg0: i32, %arg1: i32, %arg2: i32) -> (i32, i32) {
    %c0_i32 = arith.constant 0 : i32
    return %arg0, %arg1 : i32, i32
  }
}

module attributes {stable_mosaic.version = 11 : i64} {
  func.func @_bn_stats_kernel(%arg0: i32, %arg1: memref<512x16xf32, #tpu.memory_space<vmem>>, %arg2: memref<1x16xf32, #tpu.memory_space<vmem>>, %arg3: memref<1x16xf32, #tpu.memory_space<vmem>>) attributes {dimension_semantics = [#tpu.dimension_semantics<arbitrary>], iteration_bounds = array<i64: 1>, scalar_prefetch = 0 : i64, scratch_operands = 0 : i64, tpu.core_type = #tpu.core_type<tc>, window_params = [{transform_indices = @transform_0, window_bounds = array<i64: 512, 16>}, {pipeline_mode = #tpu.pipeline_mode<synchronous>, transform_indices = @transform_1, window_bounds = array<i64: 1, 16>}, {pipeline_mode = #tpu.pipeline_mode<synchronous>, transform_indices = @transform_2, window_bounds = array<i64: 1, 16>}]} {
    %c0_i32 = arith.constant 0 : i32
    %0 = arith.cmpi eq, %arg0, %c0_i32 : i32
    %1 = arith.extui %0 : i1 to i32
    %c0_i32_0 = arith.constant 0 : i32
    %2 = arith.cmpi ne, %1, %c0_i32_0 : i32
    scf.if %2 {
      %cst_11 = arith.constant 0.000000e+00 : f32
      %15 = vector.broadcast %cst_11 : f32 to vector<1x16xf32>
      %c0_12 = arith.constant 0 : index
      %c0_13 = arith.constant 0 : index
      %16 = vector.load %arg2[%c0_12, %c0_13] : memref<1x16xf32, #tpu.memory_space<vmem>>, vector<1x16xf32>
      tpu.vector_store %arg2[%c0_12, %c0_13], %15 {strides = array<i32>} : memref<1x16xf32, #tpu.memory_space<vmem>>, vector<1x16xf32>,
      %cst_14 = arith.constant 0.000000e+00 : f32
      %17 = vector.broadcast %cst_14 : f32 to vector<1x16xf32>
      %c0_15 = arith.constant 0 : index
      %c0_16 = arith.constant 0 : index
      %18 = vector.load %arg3[%c0_15, %c0_16] : memref<1x16xf32, #tpu.memory_space<vmem>>, vector<1x16xf32>
      tpu.vector_store %arg3[%c0_15, %c0_16], %17 {strides = array<i32>} : memref<1x16xf32, #tpu.memory_space<vmem>>, vector<1x16xf32>,
    } else {
    }
    %c0 = arith.constant 0 : index
    %c0_1 = arith.constant 0 : index
    %3 = vector.load %arg1[%c0, %c0_1] : memref<512x16xf32, #tpu.memory_space<vmem>>, vector<512x16xf32>
    %c0_2 = arith.constant 0 : index
    %c0_3 = arith.constant 0 : index
    %4 = vector.load %arg2[%c0_2, %c0_3] : memref<1x16xf32, #tpu.memory_space<vmem>>, vector<1x16xf32>
    %cst = arith.constant dense<0.000000e+00> : vector<16xf32>
    %5 = vector.multi_reduction <add>, %3, %cst [0] : vector<512x16xf32> to vector<16xf32>
    %6 = vector.shape_cast %5 : vector<16xf32> to vector<1x16xf32>
    %7 = arith.addf %4, %6 : vector<1x16xf32>
    %c0_4 = arith.constant 0 : index
    %c0_5 = arith.constant 0 : index
    %8 = vector.load %arg2[%c0_4, %c0_5] : memref<1x16xf32, #tpu.memory_space<vmem>>, vector<1x16xf32>
    tpu.vector_store %arg2[%c0_4, %c0_5], %7 {strides = array<i32>} : memref<1x16xf32, #tpu.memory_space<vmem>>, vector<1x16xf32>,
    %c0_6 = arith.constant 0 : index
    %c0_7 = arith.constant 0 : index
    %9 = vector.load %arg3[%c0_6, %c0_7] : memref<1x16xf32, #tpu.memory_space<vmem>>, vector<1x16xf32>
    %10 = arith.mulf %3, %3 : vector<512x16xf32>
    %cst_8 = arith.constant dense<0.000000e+00> : vector<16xf32>
    %11 = vector.multi_reduction <add>, %10, %cst_8 [0] : vector<512x16xf32> to vector<16xf32>
    %12 = vector.shape_cast %11 : vector<16xf32> to vector<1x16xf32>
    %13 = arith.addf %9, %12 : vector<1x16xf32>
    %c0_9 = arith.constant 0 : index
    %c0_10 = arith.constant 0 : index
    %14 = vector.load %arg3[%c0_9, %c0_10] : memref<1x16xf32, #tpu.memory_space<vmem>>, vector<1x16xf32>
    tpu.vector_store %arg3[%c0_9, %c0_10], %13 {strides = array<i32>} : memref<1x16xf32, #tpu.memory_space<vmem>>, vector<1x16xf32>,
    return
  }
  func.func @transform_0(%arg0: i32) -> (i32, i32) {
    %c0_i32 = arith.constant 0 : i32
    %c0_i32_0 = arith.constant 0 : i32
    return %arg0, %c0_i32 : i32, i32
  }
  func.func @transform_1(%arg0: i32) -> (i32, i32) {
    %c0_i32 = arith.constant 0 : i32
    %c0_i32_0 = arith.constant 0 : i32
    %c0_i32_1 = arith.constant 0 : i32
    return %c0_i32, %c0_i32_0 : i32, i32
  }
  func.func @transform_2(%arg0: i32) -> (i32, i32) {
    %c0_i32 = arith.constant 0 : i32
    %c0_i32_0 = arith.constant 0 : i32
    %c0_i32_1 = arith.constant 0 : i32
    return %c0_i32, %c0_i32_0 : i32, i32
  }
}

module attributes {stable_mosaic.version = 11 : i64} {
  func.func @_bn_act_kernel(%arg0: i32, %arg1: memref<512x16xf32, #tpu.memory_space<vmem>>, %arg2: memref<1x16xf32, #tpu.memory_space<vmem>>, %arg3: memref<1x16xf32, #tpu.memory_space<vmem>>, %arg4: memref<1x16xf32, #tpu.memory_space<vmem>>, %arg5: memref<1x16xf32, #tpu.memory_space<vmem>>, %arg6: memref<512x16xbf16, #tpu.memory_space<vmem>>) attributes {dimension_semantics = [#tpu.dimension_semantics<parallel>], iteration_bounds = array<i64: 1>, scalar_prefetch = 0 : i64, scratch_operands = 0 : i64, tpu.core_type = #tpu.core_type<tc>, window_params = [{transform_indices = @transform_0, window_bounds = array<i64: 512, 16>}, {pipeline_mode = #tpu.pipeline_mode<synchronous>, transform_indices = @transform_1, window_bounds = array<i64: 1, 16>}, {pipeline_mode = #tpu.pipeline_mode<synchronous>, transform_indices = @transform_2, window_bounds = array<i64: 1, 16>}, {pipeline_mode = #tpu.pipeline_mode<synchronous>, transform_indices = @transform_3, window_bounds = array<i64: 1, 16>}, {pipeline_mode = #tpu.pipeline_mode<synchronous>, transform_indices = @transform_4, window_bounds = array<i64: 1, 16>}, {transform_indices = @transform_5, window_bounds = array<i64: 512, 16>}]} {
    %c0 = arith.constant 0 : index
    %c0_0 = arith.constant 0 : index
    %0 = vector.load %arg1[%c0, %c0_0] : memref<512x16xf32, #tpu.memory_space<vmem>>, vector<512x16xf32>
    %c0_1 = arith.constant 0 : index
    %c0_2 = arith.constant 0 : index
    %1 = vector.load %arg2[%c0_1, %c0_2] : memref<1x16xf32, #tpu.memory_space<vmem>>, vector<1x16xf32>
    %c0_3 = arith.constant 0 : index
    %c0_4 = arith.constant 0 : index
    %2 = vector.load %arg3[%c0_3, %c0_4] : memref<1x16xf32, #tpu.memory_space<vmem>>, vector<1x16xf32>
    %c0_5 = arith.constant 0 : index
    %c0_6 = arith.constant 0 : index
    %3 = vector.load %arg4[%c0_5, %c0_6] : memref<1x16xf32, #tpu.memory_space<vmem>>, vector<1x16xf32>
    %c0_7 = arith.constant 0 : index
    %c0_8 = arith.constant 0 : index
    %4 = vector.load %arg5[%c0_7, %c0_8] : memref<1x16xf32, #tpu.memory_space<vmem>>, vector<1x16xf32>
    %cst = arith.constant 0.001953125 : f32
    %5 = vector.broadcast %cst : f32 to vector<1x16xf32>
    %6 = arith.mulf %1, %5 : vector<1x16xf32>
    %cst_9 = arith.constant 0.001953125 : f32
    %7 = vector.broadcast %cst_9 : f32 to vector<1x16xf32>
    %8 = arith.mulf %2, %7 : vector<1x16xf32>
    %9 = arith.mulf %6, %6 : vector<1x16xf32>
    %10 = arith.subf %8, %9 : vector<1x16xf32>
    %cst_10 = arith.constant 0.000000e+00 : f32
    %11 = vector.broadcast %cst_10 : f32 to vector<1x16xf32>
    %12 = arith.maximumf %10, %11 : vector<1x16xf32>
    %cst_11 = arith.constant 9.99999974E-6 : f32
    %13 = vector.broadcast %cst_11 : f32 to vector<1x16xf32>
    %14 = arith.addf %12, %13 : vector<1x16xf32>
    %15 = math.rsqrt %14 : vector<1x16xf32>
    %16 = vector.broadcast %6 : vector<1x16xf32> to vector<512x16xf32>
    %17 = arith.subf %0, %16 : vector<512x16xf32>
    %18 = arith.mulf %15, %3 : vector<1x16xf32>
    %19 = vector.broadcast %18 : vector<1x16xf32> to vector<512x16xf32>
    %20 = arith.mulf %17, %19 : vector<512x16xf32>
    %21 = vector.broadcast %4 : vector<1x16xf32> to vector<512x16xf32>
    %22 = arith.addf %20, %21 : vector<512x16xf32>
    %cst_12 = arith.constant 0.000000e+00 : f32
    %23 = vector.broadcast %cst_12 : f32 to vector<512x16xf32>
    %24 = arith.cmpf oge, %22, %23 : vector<512x16xf32>
    %cst_13 = arith.constant 1.000000e-01 : f32
    %25 = vector.broadcast %cst_13 : f32 to vector<512x16xf32>
    %26 = arith.mulf %25, %22 : vector<512x16xf32>
    %27 = arith.select %24, %22, %26 : vector<512x16xi1>, vector<512x16xf32>
    %28 = arith.truncf %27 : vector<512x16xf32> to vector<512x16xbf16>
    %c0_14 = arith.constant 0 : index
    %c0_15 = arith.constant 0 : index
    %29 = vector.load %arg6[%c0_14, %c0_15] : memref<512x16xbf16, #tpu.memory_space<vmem>>, vector<512x16xbf16>
    tpu.vector_store %arg6[%c0_14, %c0_15], %28 {strides = array<i32>} : memref<512x16xbf16, #tpu.memory_space<vmem>>, vector<512x16xbf16>,
    return
  }
  func.func @transform_0(%arg0: i32) -> (i32, i32) {
    %c0_i32 = arith.constant 0 : i32
    %c0_i32_0 = arith.constant 0 : i32
    return %arg0, %c0_i32 : i32, i32
  }
  func.func @transform_1(%arg0: i32) -> (i32, i32) {
    %c0_i32 = arith.constant 0 : i32
    %c0_i32_0 = arith.constant 0 : i32
    %c0_i32_1 = arith.constant 0 : i32
    return %c0_i32, %c0_i32_0 : i32, i32
  }
  func.func @transform_2(%arg0: i32) -> (i32, i32) {
    %c0_i32 = arith.constant 0 : i32
    %c0_i32_0 = arith.constant 0 : i32
    %c0_i32_1 = arith.constant 0 : i32
    return %c0_i32, %c0_i32_0 : i32, i32
  }
  func.func @transform_3(%arg0: i32) -> (i32, i32) {
    %c0_i32 = arith.constant 0 : i32
    %c0_i32_0 = arith.constant 0 : i32
    %c0_i32_1 = arith.constant 0 : i32
    return %c0_i32, %c0_i32_0 : i32, i32
  }
  func.func @transform_4(%arg0: i32) -> (i32, i32) {
    %c0_i32 = arith.constant 0 : i32
    %c0_i32_0 = arith.constant 0 : i32
    %c0_i32_1 = arith.constant 0 : i32
    return %c0_i32, %c0_i32_0 : i32, i32
  }
  func.func @transform_5(%arg0: i32) -> (i32, i32) {
    %c0_i32 = arith.constant 0 : i32
    %c0_i32_0 = arith.constant 0 : i32
    return %arg0, %c0_i32 : i32, i32
  }
}

module attributes {stable_mosaic.version = 11 : i64} {
  func.func @_conv3x3_kernel(%arg0: i32, %arg1: i32, %arg2: memref<1x342x16xbf16, #tpu.memory_space<vmem>>, %arg3: memref<9x16x32xbf16, #tpu.memory_space<vmem>>, %arg4: memref<1x288x32xf32, #tpu.memory_space<vmem>>) attributes {dimension_semantics = [#tpu.dimension_semantics<parallel>, #tpu.dimension_semantics<parallel>], iteration_bounds = array<i64: 2, 1>, scalar_prefetch = 0 : i64, scratch_operands = 0 : i64, tpu.core_type = #tpu.core_type<tc>, window_params = [{transform_indices = @transform_0, window_bounds = array<i64: 1, 342, 16>}, {transform_indices = @transform_1, window_bounds = array<i64: 9, 16, 32>}, {transform_indices = @transform_2, window_bounds = array<i64: 1, 288, 32>}]} {
    %cst = arith.constant 0.000000e+00 : f32
    %0 = vector.broadcast %cst : f32 to vector<288x32xf32>
    %c0 = arith.constant 0 : index
    %c0_0 = arith.constant 0 : index
    %c0_1 = arith.constant 0 : index
    %1 = vector.load %arg2[%c0, %c0_0, %c0_1] : memref<1x342x16xbf16, #tpu.memory_space<vmem>>, vector<1x288x16xbf16>
    %2 = vector.shape_cast %1 : vector<1x288x16xbf16> to vector<288x16xbf16>
    %c0_2 = arith.constant 0 : index
    %c0_3 = arith.constant 0 : index
    %c0_4 = arith.constant 0 : index
    %3 = vector.load %arg3[%c0_2, %c0_3, %c0_4] : memref<9x16x32xbf16, #tpu.memory_space<vmem>>, vector<1x16x32xbf16>
    %4 = vector.shape_cast %3 : vector<1x16x32xbf16> to vector<16x32xbf16>
    %cst_5 = arith.constant dense<0.000000e+00> : vector<288x32xf32>
    %5 = tpu.matmul %2, %4, %cst_5 {dimension_numbers = #tpu.dot_dimension_numbers<[1], [0], [0], [1], [0, 0, 1, 1], [], []>} : vector<288x16xbf16>, vector<16x32xbf16>, vector<288x32xf32> -> vector<288x32xf32>
    %6 = arith.addf %0, %5 : vector<288x32xf32>
    %c0_6 = arith.constant 0 : index
    %c1 = arith.constant 1 : index
    %c0_7 = arith.constant 0 : index
    %7 = vector.load %arg2[%c0_6, %c1, %c0_7] : memref<1x342x16xbf16, #tpu.memory_space<vmem>>, vector<1x288x16xbf16>
    %8 = vector.shape_cast %7 : vector<1x288x16xbf16> to vector<288x16xbf16>
    %c1_8 = arith.constant 1 : index
    %c0_9 = arith.constant 0 : index
    %c0_10 = arith.constant 0 : index
    %9 = vector.load %arg3[%c1_8, %c0_9, %c0_10] : memref<9x16x32xbf16, #tpu.memory_space<vmem>>, vector<1x16x32xbf16>
    %10 = vector.shape_cast %9 : vector<1x16x32xbf16> to vector<16x32xbf16>
    %cst_11 = arith.constant dense<0.000000e+00> : vector<288x32xf32>
    %11 = tpu.matmul %8, %10, %cst_11 {dimension_numbers = #tpu.dot_dimension_numbers<[1], [0], [0], [1], [0, 0, 1, 1], [], []>} : vector<288x16xbf16>, vector<16x32xbf16>, vector<288x32xf32> -> vector<288x32xf32>
    %12 = arith.addf %6, %11 : vector<288x32xf32>
    %c0_12 = arith.constant 0 : index
    %c2 = arith.constant 2 : index
    %c0_13 = arith.constant 0 : index
    %13 = vector.load %arg2[%c0_12, %c2, %c0_13] : memref<1x342x16xbf16, #tpu.memory_space<vmem>>, vector<1x288x16xbf16>
    %14 = vector.shape_cast %13 : vector<1x288x16xbf16> to vector<288x16xbf16>
    %c2_14 = arith.constant 2 : index
    %c0_15 = arith.constant 0 : index
    %c0_16 = arith.constant 0 : index
    %15 = vector.load %arg3[%c2_14, %c0_15, %c0_16] : memref<9x16x32xbf16, #tpu.memory_space<vmem>>, vector<1x16x32xbf16>
    %16 = vector.shape_cast %15 : vector<1x16x32xbf16> to vector<16x32xbf16>
    %cst_17 = arith.constant dense<0.000000e+00> : vector<288x32xf32>
    %17 = tpu.matmul %14, %16, %cst_17 {dimension_numbers = #tpu.dot_dimension_numbers<[1], [0], [0], [1], [0, 0, 1, 1], [], []>} : vector<288x16xbf16>, vector<16x32xbf16>, vector<288x32xf32> -> vector<288x32xf32>
    %18 = arith.addf %12, %17 : vector<288x32xf32>
    %c0_18 = arith.constant 0 : index
    %c18 = arith.constant 18 : index
    %c0_19 = arith.constant 0 : index
    %19 = vector.load %arg2[%c0_18, %c18, %c0_19] : memref<1x342x16xbf16, #tpu.memory_space<vmem>>, vector<1x288x16xbf16>
    %20 = vector.shape_cast %19 : vector<1x288x16xbf16> to vector<288x16xbf16>
    %c3 = arith.constant 3 : index
    %c0_20 = arith.constant 0 : index
    %c0_21 = arith.constant 0 : index
    %21 = vector.load %arg3[%c3, %c0_20, %c0_21] : memref<9x16x32xbf16, #tpu.memory_space<vmem>>, vector<1x16x32xbf16>
    %22 = vector.shape_cast %21 : vector<1x16x32xbf16> to vector<16x32xbf16>
    %cst_22 = arith.constant dense<0.000000e+00> : vector<288x32xf32>
    %23 = tpu.matmul %20, %22, %cst_22 {dimension_numbers = #tpu.dot_dimension_numbers<[1], [0], [0], [1], [0, 0, 1, 1], [], []>} : vector<288x16xbf16>, vector<16x32xbf16>, vector<288x32xf32> -> vector<288x32xf32>
    %24 = arith.addf %18, %23 : vector<288x32xf32>
    %c0_23 = arith.constant 0 : index
    %c19 = arith.constant 19 : index
    %c0_24 = arith.constant 0 : index
    %25 = vector.load %arg2[%c0_23, %c19, %c0_24] : memref<1x342x16xbf16, #tpu.memory_space<vmem>>, vector<1x288x16xbf16>
    %26 = vector.shape_cast %25 : vector<1x288x16xbf16> to vector<288x16xbf16>
    %c4 = arith.constant 4 : index
    %c0_25 = arith.constant 0 : index
    %c0_26 = arith.constant 0 : index
    %27 = vector.load %arg3[%c4, %c0_25, %c0_26] : memref<9x16x32xbf16, #tpu.memory_space<vmem>>, vector<1x16x32xbf16>
    %28 = vector.shape_cast %27 : vector<1x16x32xbf16> to vector<16x32xbf16>
    %cst_27 = arith.constant dense<0.000000e+00> : vector<288x32xf32>
    %29 = tpu.matmul %26, %28, %cst_27 {dimension_numbers = #tpu.dot_dimension_numbers<[1], [0], [0], [1], [0, 0, 1, 1], [], []>} : vector<288x16xbf16>, vector<16x32xbf16>, vector<288x32xf32> -> vector<288x32xf32>
    %30 = arith.addf %24, %29 : vector<288x32xf32>
    %c0_28 = arith.constant 0 : index
    %c20 = arith.constant 20 : index
    %c0_29 = arith.constant 0 : index
    %31 = vector.load %arg2[%c0_28, %c20, %c0_29] : memref<1x342x16xbf16, #tpu.memory_space<vmem>>, vector<1x288x16xbf16>
    %32 = vector.shape_cast %31 : vector<1x288x16xbf16> to vector<288x16xbf16>
    %c5 = arith.constant 5 : index
    %c0_30 = arith.constant 0 : index
    %c0_31 = arith.constant 0 : index
    %33 = vector.load %arg3[%c5, %c0_30, %c0_31] : memref<9x16x32xbf16, #tpu.memory_space<vmem>>, vector<1x16x32xbf16>
    %34 = vector.shape_cast %33 : vector<1x16x32xbf16> to vector<16x32xbf16>
    %cst_32 = arith.constant dense<0.000000e+00> : vector<288x32xf32>
    %35 = tpu.matmul %32, %34, %cst_32 {dimension_numbers = #tpu.dot_dimension_numbers<[1], [0], [0], [1], [0, 0, 1, 1], [], []>} : vector<288x16xbf16>, vector<16x32xbf16>, vector<288x32xf32> -> vector<288x32xf32>
    %36 = arith.addf %30, %35 : vector<288x32xf32>
    %c0_33 = arith.constant 0 : index
    %c36 = arith.constant 36 : index
    %c0_34 = arith.constant 0 : index
    %37 = vector.load %arg2[%c0_33, %c36, %c0_34] : memref<1x342x16xbf16, #tpu.memory_space<vmem>>, vector<1x288x16xbf16>
    %38 = vector.shape_cast %37 : vector<1x288x16xbf16> to vector<288x16xbf16>
    %c6 = arith.constant 6 : index
    %c0_35 = arith.constant 0 : index
    %c0_36 = arith.constant 0 : index
    %39 = vector.load %arg3[%c6, %c0_35, %c0_36] : memref<9x16x32xbf16, #tpu.memory_space<vmem>>, vector<1x16x32xbf16>
    %40 = vector.shape_cast %39 : vector<1x16x32xbf16> to vector<16x32xbf16>
    %cst_37 = arith.constant dense<0.000000e+00> : vector<288x32xf32>
    %41 = tpu.matmul %38, %40, %cst_37 {dimension_numbers = #tpu.dot_dimension_numbers<[1], [0], [0], [1], [0, 0, 1, 1], [], []>} : vector<288x16xbf16>, vector<16x32xbf16>, vector<288x32xf32> -> vector<288x32xf32>
    %42 = arith.addf %36, %41 : vector<288x32xf32>
    %c0_38 = arith.constant 0 : index
    %c37 = arith.constant 37 : index
    %c0_39 = arith.constant 0 : index
    %43 = vector.load %arg2[%c0_38, %c37, %c0_39] : memref<1x342x16xbf16, #tpu.memory_space<vmem>>, vector<1x288x16xbf16>
    %44 = vector.shape_cast %43 : vector<1x288x16xbf16> to vector<288x16xbf16>
    %c7 = arith.constant 7 : index
    %c0_40 = arith.constant 0 : index
    %c0_41 = arith.constant 0 : index
    %45 = vector.load %arg3[%c7, %c0_40, %c0_41] : memref<9x16x32xbf16, #tpu.memory_space<vmem>>, vector<1x16x32xbf16>
    %46 = vector.shape_cast %45 : vector<1x16x32xbf16> to vector<16x32xbf16>
    %cst_42 = arith.constant dense<0.000000e+00> : vector<288x32xf32>
    %47 = tpu.matmul %44, %46, %cst_42 {dimension_numbers = #tpu.dot_dimension_numbers<[1], [0], [0], [1], [0, 0, 1, 1], [], []>} : vector<288x16xbf16>, vector<16x32xbf16>, vector<288x32xf32> -> vector<288x32xf32>
    %48 = arith.addf %42, %47 : vector<288x32xf32>
    %c0_43 = arith.constant 0 : index
    %c38 = arith.constant 38 : index
    %c0_44 = arith.constant 0 : index
    %49 = vector.load %arg2[%c0_43, %c38, %c0_44] : memref<1x342x16xbf16, #tpu.memory_space<vmem>>, vector<1x288x16xbf16>
    %50 = vector.shape_cast %49 : vector<1x288x16xbf16> to vector<288x16xbf16>
    %c8 = arith.constant 8 : index
    %c0_45 = arith.constant 0 : index
    %c0_46 = arith.constant 0 : index
    %51 = vector.load %arg3[%c8, %c0_45, %c0_46] : memref<9x16x32xbf16, #tpu.memory_space<vmem>>, vector<1x16x32xbf16>
    %52 = vector.shape_cast %51 : vector<1x16x32xbf16> to vector<16x32xbf16>
    %cst_47 = arith.constant dense<0.000000e+00> : vector<288x32xf32>
    %53 = tpu.matmul %50, %52, %cst_47 {dimension_numbers = #tpu.dot_dimension_numbers<[1], [0], [0], [1], [0, 0, 1, 1], [], []>} : vector<288x16xbf16>, vector<16x32xbf16>, vector<288x32xf32> -> vector<288x32xf32>
    %54 = arith.addf %48, %53 : vector<288x32xf32>
    %c0_48 = arith.constant 0 : index
    %c0_49 = arith.constant 0 : index
    %c0_50 = arith.constant 0 : index
    %55 = vector.load %arg4[%c0_48, %c0_49, %c0_50] : memref<1x288x32xf32, #tpu.memory_space<vmem>>, vector<1x288x32xf32>
    %56 = vector.shape_cast %55 : vector<1x288x32xf32> to vector<288x32xf32>
    %57 = vector.shape_cast %54 : vector<288x32xf32> to vector<1x288x32xf32>
    tpu.vector_store %arg4[%c0_48, %c0_49, %c0_50], %57 {strides = array<i32>} : memref<1x288x32xf32, #tpu.memory_space<vmem>>, vector<1x288x32xf32>,
    return
  }
  func.func @transform_0(%arg0: i32, %arg1: i32) -> (i32, i32, i32) {
    %c0_i32 = arith.constant 0 : i32
    %c0_i32_0 = arith.constant 0 : i32
    %c0_i32_1 = arith.constant 0 : i32
    return %arg0, %c0_i32, %c0_i32_0 : i32, i32, i32
  }
  func.func @transform_1(%arg0: i32, %arg1: i32) -> (i32, i32, i32) {
    %c0_i32 = arith.constant 0 : i32
    %c0_i32_0 = arith.constant 0 : i32
    %c0_i32_1 = arith.constant 0 : i32
    return %c0_i32, %c0_i32_0, %arg1 : i32, i32, i32
  }
  func.func @transform_2(%arg0: i32, %arg1: i32) -> (i32, i32, i32) {
    %c0_i32 = arith.constant 0 : i32
    %c0_i32_0 = arith.constant 0 : i32
    return %arg0, %c0_i32, %arg1 : i32, i32, i32
  }
}

module attributes {stable_mosaic.version = 11 : i64} {
  func.func @_bn_stats_kernel(%arg0: i32, %arg1: memref<512x32xf32, #tpu.memory_space<vmem>>, %arg2: memref<1x32xf32, #tpu.memory_space<vmem>>, %arg3: memref<1x32xf32, #tpu.memory_space<vmem>>) attributes {dimension_semantics = [#tpu.dimension_semantics<arbitrary>], iteration_bounds = array<i64: 1>, scalar_prefetch = 0 : i64, scratch_operands = 0 : i64, tpu.core_type = #tpu.core_type<tc>, window_params = [{transform_indices = @transform_0, window_bounds = array<i64: 512, 32>}, {pipeline_mode = #tpu.pipeline_mode<synchronous>, transform_indices = @transform_1, window_bounds = array<i64: 1, 32>}, {pipeline_mode = #tpu.pipeline_mode<synchronous>, transform_indices = @transform_2, window_bounds = array<i64: 1, 32>}]} {
    %c0_i32 = arith.constant 0 : i32
    %0 = arith.cmpi eq, %arg0, %c0_i32 : i32
    %1 = arith.extui %0 : i1 to i32
    %c0_i32_0 = arith.constant 0 : i32
    %2 = arith.cmpi ne, %1, %c0_i32_0 : i32
    scf.if %2 {
      %cst_11 = arith.constant 0.000000e+00 : f32
      %15 = vector.broadcast %cst_11 : f32 to vector<1x32xf32>
      %c0_12 = arith.constant 0 : index
      %c0_13 = arith.constant 0 : index
      %16 = vector.load %arg2[%c0_12, %c0_13] : memref<1x32xf32, #tpu.memory_space<vmem>>, vector<1x32xf32>
      tpu.vector_store %arg2[%c0_12, %c0_13], %15 {strides = array<i32>} : memref<1x32xf32, #tpu.memory_space<vmem>>, vector<1x32xf32>,
      %cst_14 = arith.constant 0.000000e+00 : f32
      %17 = vector.broadcast %cst_14 : f32 to vector<1x32xf32>
      %c0_15 = arith.constant 0 : index
      %c0_16 = arith.constant 0 : index
      %18 = vector.load %arg3[%c0_15, %c0_16] : memref<1x32xf32, #tpu.memory_space<vmem>>, vector<1x32xf32>
      tpu.vector_store %arg3[%c0_15, %c0_16], %17 {strides = array<i32>} : memref<1x32xf32, #tpu.memory_space<vmem>>, vector<1x32xf32>,
    } else {
    }
    %c0 = arith.constant 0 : index
    %c0_1 = arith.constant 0 : index
    %3 = vector.load %arg1[%c0, %c0_1] : memref<512x32xf32, #tpu.memory_space<vmem>>, vector<512x32xf32>
    %c0_2 = arith.constant 0 : index
    %c0_3 = arith.constant 0 : index
    %4 = vector.load %arg2[%c0_2, %c0_3] : memref<1x32xf32, #tpu.memory_space<vmem>>, vector<1x32xf32>
    %cst = arith.constant dense<0.000000e+00> : vector<32xf32>
    %5 = vector.multi_reduction <add>, %3, %cst [0] : vector<512x32xf32> to vector<32xf32>
    %6 = vector.shape_cast %5 : vector<32xf32> to vector<1x32xf32>
    %7 = arith.addf %4, %6 : vector<1x32xf32>
    %c0_4 = arith.constant 0 : index
    %c0_5 = arith.constant 0 : index
    %8 = vector.load %arg2[%c0_4, %c0_5] : memref<1x32xf32, #tpu.memory_space<vmem>>, vector<1x32xf32>
    tpu.vector_store %arg2[%c0_4, %c0_5], %7 {strides = array<i32>} : memref<1x32xf32, #tpu.memory_space<vmem>>, vector<1x32xf32>,
    %c0_6 = arith.constant 0 : index
    %c0_7 = arith.constant 0 : index
    %9 = vector.load %arg3[%c0_6, %c0_7] : memref<1x32xf32, #tpu.memory_space<vmem>>, vector<1x32xf32>
    %10 = arith.mulf %3, %3 : vector<512x32xf32>
    %cst_8 = arith.constant dense<0.000000e+00> : vector<32xf32>
    %11 = vector.multi_reduction <add>, %10, %cst_8 [0] : vector<512x32xf32> to vector<32xf32>
    %12 = vector.shape_cast %11 : vector<32xf32> to vector<1x32xf32>
    %13 = arith.addf %9, %12 : vector<1x32xf32>
    %c0_9 = arith.constant 0 : index
    %c0_10 = arith.constant 0 : index
    %14 = vector.load %arg3[%c0_9, %c0_10] : memref<1x32xf32, #tpu.memory_space<vmem>>, vector<1x32xf32>
    tpu.vector_store %arg3[%c0_9, %c0_10], %13 {strides = array<i32>} : memref<1x32xf32, #tpu.memory_space<vmem>>, vector<1x32xf32>,
    return
  }
  func.func @transform_0(%arg0: i32) -> (i32, i32) {
    %c0_i32 = arith.constant 0 : i32
    %c0_i32_0 = arith.constant 0 : i32
    return %arg0, %c0_i32 : i32, i32
  }
  func.func @transform_1(%arg0: i32) -> (i32, i32) {
    %c0_i32 = arith.constant 0 : i32
    %c0_i32_0 = arith.constant 0 : i32
    %c0_i32_1 = arith.constant 0 : i32
    return %c0_i32, %c0_i32_0 : i32, i32
  }
  func.func @transform_2(%arg0: i32) -> (i32, i32) {
    %c0_i32 = arith.constant 0 : i32
    %c0_i32_0 = arith.constant 0 : i32
    %c0_i32_1 = arith.constant 0 : i32
    return %c0_i32, %c0_i32_0 : i32, i32
  }
}

module attributes {stable_mosaic.version = 11 : i64} {
  func.func @_bn_act_res_kernel(%arg0: i32, %arg1: memref<512x32xf32, #tpu.memory_space<vmem>>, %arg2: memref<1x32xf32, #tpu.memory_space<vmem>>, %arg3: memref<1x32xf32, #tpu.memory_space<vmem>>, %arg4: memref<1x32xf32, #tpu.memory_space<vmem>>, %arg5: memref<1x32xf32, #tpu.memory_space<vmem>>, %arg6: memref<512x32xf32, #tpu.memory_space<vmem>>, %arg7: memref<512x32xf32, #tpu.memory_space<vmem>>) attributes {dimension_semantics = [#tpu.dimension_semantics<parallel>], iteration_bounds = array<i64: 1>, scalar_prefetch = 0 : i64, scratch_operands = 0 : i64, tpu.core_type = #tpu.core_type<tc>, window_params = [{transform_indices = @transform_0, window_bounds = array<i64: 512, 32>}, {pipeline_mode = #tpu.pipeline_mode<synchronous>, transform_indices = @transform_1, window_bounds = array<i64: 1, 32>}, {pipeline_mode = #tpu.pipeline_mode<synchronous>, transform_indices = @transform_2, window_bounds = array<i64: 1, 32>}, {pipeline_mode = #tpu.pipeline_mode<synchronous>, transform_indices = @transform_3, window_bounds = array<i64: 1, 32>}, {pipeline_mode = #tpu.pipeline_mode<synchronous>, transform_indices = @transform_4, window_bounds = array<i64: 1, 32>}, {transform_indices = @transform_5, window_bounds = array<i64: 512, 32>}, {transform_indices = @transform_6, window_bounds = array<i64: 512, 32>}]} {
    %c0 = arith.constant 0 : index
    %c0_0 = arith.constant 0 : index
    %0 = vector.load %arg1[%c0, %c0_0] : memref<512x32xf32, #tpu.memory_space<vmem>>, vector<512x32xf32>
    %c0_1 = arith.constant 0 : index
    %c0_2 = arith.constant 0 : index
    %1 = vector.load %arg2[%c0_1, %c0_2] : memref<1x32xf32, #tpu.memory_space<vmem>>, vector<1x32xf32>
    %c0_3 = arith.constant 0 : index
    %c0_4 = arith.constant 0 : index
    %2 = vector.load %arg3[%c0_3, %c0_4] : memref<1x32xf32, #tpu.memory_space<vmem>>, vector<1x32xf32>
    %c0_5 = arith.constant 0 : index
    %c0_6 = arith.constant 0 : index
    %3 = vector.load %arg4[%c0_5, %c0_6] : memref<1x32xf32, #tpu.memory_space<vmem>>, vector<1x32xf32>
    %c0_7 = arith.constant 0 : index
    %c0_8 = arith.constant 0 : index
    %4 = vector.load %arg5[%c0_7, %c0_8] : memref<1x32xf32, #tpu.memory_space<vmem>>, vector<1x32xf32>
    %cst = arith.constant 0.001953125 : f32
    %5 = vector.broadcast %cst : f32 to vector<1x32xf32>
    %6 = arith.mulf %1, %5 : vector<1x32xf32>
    %cst_9 = arith.constant 0.001953125 : f32
    %7 = vector.broadcast %cst_9 : f32 to vector<1x32xf32>
    %8 = arith.mulf %2, %7 : vector<1x32xf32>
    %9 = arith.mulf %6, %6 : vector<1x32xf32>
    %10 = arith.subf %8, %9 : vector<1x32xf32>
    %cst_10 = arith.constant 0.000000e+00 : f32
    %11 = vector.broadcast %cst_10 : f32 to vector<1x32xf32>
    %12 = arith.maximumf %10, %11 : vector<1x32xf32>
    %cst_11 = arith.constant 9.99999974E-6 : f32
    %13 = vector.broadcast %cst_11 : f32 to vector<1x32xf32>
    %14 = arith.addf %12, %13 : vector<1x32xf32>
    %15 = math.rsqrt %14 : vector<1x32xf32>
    %16 = vector.broadcast %6 : vector<1x32xf32> to vector<512x32xf32>
    %17 = arith.subf %0, %16 : vector<512x32xf32>
    %18 = arith.mulf %15, %3 : vector<1x32xf32>
    %19 = vector.broadcast %18 : vector<1x32xf32> to vector<512x32xf32>
    %20 = arith.mulf %17, %19 : vector<512x32xf32>
    %21 = vector.broadcast %4 : vector<1x32xf32> to vector<512x32xf32>
    %22 = arith.addf %20, %21 : vector<512x32xf32>
    %cst_12 = arith.constant 0.000000e+00 : f32
    %23 = vector.broadcast %cst_12 : f32 to vector<512x32xf32>
    %24 = arith.cmpf oge, %22, %23 : vector<512x32xf32>
    %cst_13 = arith.constant 1.000000e-01 : f32
    %25 = vector.broadcast %cst_13 : f32 to vector<512x32xf32>
    %26 = arith.mulf %25, %22 : vector<512x32xf32>
    %27 = arith.select %24, %22, %26 : vector<512x32xi1>, vector<512x32xf32>
    %c0_14 = arith.constant 0 : index
    %c0_15 = arith.constant 0 : index
    %28 = vector.load %arg6[%c0_14, %c0_15] : memref<512x32xf32, #tpu.memory_space<vmem>>, vector<512x32xf32>
    %29 = arith.addf %27, %28 : vector<512x32xf32>
    %c0_16 = arith.constant 0 : index
    %c0_17 = arith.constant 0 : index
    %30 = vector.load %arg7[%c0_16, %c0_17] : memref<512x32xf32, #tpu.memory_space<vmem>>, vector<512x32xf32>
    tpu.vector_store %arg7[%c0_16, %c0_17], %29 {strides = array<i32>} : memref<512x32xf32, #tpu.memory_space<vmem>>, vector<512x32xf32>,
    return
  }
  func.func @transform_0(%arg0: i32) -> (i32, i32) {
    %c0_i32 = arith.constant 0 : i32
    %c0_i32_0 = arith.constant 0 : i32
    return %arg0, %c0_i32 : i32, i32
  }
  func.func @transform_1(%arg0: i32) -> (i32, i32) {
    %c0_i32 = arith.constant 0 : i32
    %c0_i32_0 = arith.constant 0 : i32
    %c0_i32_1 = arith.constant 0 : i32
    return %c0_i32, %c0_i32_0 : i32, i32
  }
  func.func @transform_2(%arg0: i32) -> (i32, i32) {
    %c0_i32 = arith.constant 0 : i32
    %c0_i32_0 = arith.constant 0 : i32
    %c0_i32_1 = arith.constant 0 : i32
    return %c0_i32, %c0_i32_0 : i32, i32
  }
  func.func @transform_3(%arg0: i32) -> (i32, i32) {
    %c0_i32 = arith.constant 0 : i32
    %c0_i32_0 = arith.constant 0 : i32
    %c0_i32_1 = arith.constant 0 : i32
    return %c0_i32, %c0_i32_0 : i32, i32
  }
  func.func @transform_4(%arg0: i32) -> (i32, i32) {
    %c0_i32 = arith.constant 0 : i32
    %c0_i32_0 = arith.constant 0 : i32
    %c0_i32_1 = arith.constant 0 : i32
    return %c0_i32, %c0_i32_0 : i32, i32
  }
  func.func @transform_5(%arg0: i32) -> (i32, i32) {
    %c0_i32 = arith.constant 0 : i32
    %c0_i32_0 = arith.constant 0 : i32
    return %arg0, %c0_i32 : i32, i32
  }
  func.func @transform_6(%arg0: i32) -> (i32, i32) {
    %c0_i32 = arith.constant 0 : i32
    %c0_i32_0 = arith.constant 0 : i32
    return %arg0, %c0_i32 : i32, i32
  }
}

</mosaic_0001>

<bundles_post_ra>
// kernel: residual_block.7
= control target key start
LH: loop header
LB: loop body
LE: loop exit
PB: predicated region body
PF: predicated region fallthrough
CT: control target
= control target key end

     0   :  { %vm14_vm0 = vcmask 122880   ;;  %vm82_vm1 = vcmask 130048   ;;  %v428_v0 = vmov 0.0   ;;  %s1318_s0 = inlined_call_operand.vmem [shape: f32[512,16], index: 0, kind: input, shape index: {}]   ;;  %s1319_s1 = inlined_call_operand.vmem [shape: f32[1,16], index: 1, kind: output, shape index: {0}]   ;;  %s1320_s2 = inlined_call_operand.vmem [shape: f32[1,16], index: 2, kind: output, shape index: {1}]  }
   0x1   :  { %15 = vst.msk [vmem:[%s1319_s1] sm:$0x1] %vm14_vm0, %v428_v0  ;;  %16 = vst.msk [vmem:[%s1320_s2] sm:$0x1] %vm14_vm0, %v428_v0  ;;  %v455_v1 = vld [vmem:[%s1318_s0] sm:$0xff]  ;;  %v460_v2 = vld [vmem:[%s1318_s0 + $0x8] sm:$0xff] }
   0x2   :  { %v465_v3 = vld [vmem:[%s1318_s0 + $0x10] sm:$0xff]  ;;  %v83_v4 = vsel %vm82_vm1, %v455_v1, 0.0  ;;  %v84_v5 = vsel %vm82_vm1, %v460_v2, 0.0  ;;  %v476_v7 = vld [vmem:[%s1318_s0 + $0x18] sm:$0xff]  ;;  %v483_v10 = vld [vmem:[%s1318_s0 + $0x20] sm:$0xff] }
   0x3   :  { %v86_v6 = vsel %vm82_vm1, %v465_v3, 0.0  ;;  %v85_v8 = vadd.f32 %v84_v5, %v83_v4  ;;  %v88_v9 = vsel %vm82_vm1, %v476_v7, 0.0  ;;  %v90_v12 = vsel %vm82_vm1, %v483_v10, 0.0  ;;  %v490_v13 = vld [vmem:[%s1318_s0 + $0x28] sm:$0xff]  ;;  %v497_v16 = vld [vmem:[%s1318_s0 + $0x30] sm:$0xff]  ;;  %v502_v18 = vld [vmem:[%s1318_s0 + $0x38] sm:$0xff] }
   0x4   :  { %v92_v15 = vsel %vm82_vm1, %v490_v13, 0.0  ;;  %v507_v19 = vld [vmem:[%s1318_s0 + $0x40] sm:$0xff]  ;;  %v94_v20 = vsel %vm82_vm1, %v497_v16, 0.0  ;;  %v514_v21 = vld [vmem:[%s1318_s0 + $0x48] sm:$0xff]  ;;  %v519_v22 = vld [vmem:[%s1318_s0 + $0x50] sm:$0xff]  ;;  %v96_v25 = vsel %vm82_vm1, %v502_v18, 0.0 }
   0x5   :  { %v87_v11 = vadd.f32 %v86_v6, %v85_v8  ;;  %v524_v23 = vld [vmem:[%s1318_s0 + $0x58] sm:$0xff]  ;;  %v98_v26 = vsel %vm82_vm1, %v507_v19, 0.0  ;;  %v533_v27 = vld [vmem:[%s1318_s0 + $0x108] sm:$0xff]  ;;  %v538_v28 = vld [vmem:[%s1318_s0 + $0x110] sm:$0xff]  ;;  %v100_v30 = vsel %vm82_vm1, %v514_v21, 0.0  ;;  %v102_v31 = vsel %vm82_vm1, %v519_v22, 0.0 }
   0x6   :  { %v543_v29 = vld [vmem:[%s1318_s0 + $0x118] sm:$0xff]  ;;  %v551_v32 = vsel %vm82_vm1, %v524_v23, 0.0  ;;  %v556_v33 = vld [vmem:[%s1318_s0 + $0x120] sm:$0xff]  ;;  %v561_v34 = vld [vmem:[%s1318_s0 + $0x128] sm:$0xff]  ;;  %v570_v37 = vsel %vm82_vm1, %v533_v27, 0.0  ;;  %v574_v38 = vsel %vm82_vm1, %v538_v28, 0.0 }
   0x7   :  { %v89_v14 = vadd.f32 %v88_v9, %v87_v11  ;;  %v566_v35 = vld [vmem:[%s1318_s0 + $0x130] sm:$0xff]  ;;  %1339 = vst [vmem:[#allocation2_spill] sm:$0xff] %v570_v37  ;;  %1340 = vst [vmem:[#allocation3_spill] sm:$0xff] %v574_v38  ;;  %v578_v39 = vsel %vm82_vm1, %v543_v29, 0.0  ;;  %v583_v40 = vld [vmem:[%s1318_s0 + $0x138] sm:$0xff]  ;;  %v597_v43 = vsel %vm82_vm1, %v556_v33, 0.0  ;;  %v222_v37 = vmul.f32 %v465_v3, %v465_v3 }
   0x8   :  { %1341 = vst [vmem:[#allocation4_spill] sm:$0xff] %v578_v39  ;;  %v588_v41 = vld [vmem:[%s1318_s0 + $0x140] sm:$0xff]  ;;  %v593_v42 = vld [vmem:[%s1318_s0 + $0x148] sm:$0xff]  ;;  %1342 = vst [vmem:[#allocation5_spill] sm:$0xff] %v597_v43  ;;  %v601_v44 = vsel %vm82_vm1, %v561_v34, 0.0  ;;  %v605_v45 = vsel %vm82_vm1, %v566_v35, 0.0 }
   0x9   :  { %v91_v17 = vadd.f32 %v90_v12, %v89_v14  ;;  %1343 = vst [vmem:[#allocation6_spill] sm:$0xff] %v601_v44  ;;  %1344 = vst [vmem:[#allocation7_spill] sm:$0xff] %v605_v45  ;;  %v610_v46 = vld [vmem:[%s1318_s0 + $0x150] sm:$0xff]  ;;  %v615_v47 = vld [vmem:[%s1318_s0 + $0x158] sm:$0xff]  ;;  %v624_v50 = vsel %vm82_vm1, %v583_v40, 0.0  ;;  %v628_v51 = vsel %vm82_vm1, %v588_v41, 0.0 }
   0xa   :  { %v620_v48 = vld [vmem:[%s1318_s0 + $0x160] sm:$0xff]  ;;  %1345 = vst [vmem:[#allocation8_spill] sm:$0xff] %v624_v50  ;;  %1346 = vst [vmem:[#allocation9_spill] sm:$0xff] %v628_v51  ;;  %v632_v52 = vsel %vm82_vm1, %v593_v42, 0.0  ;;  %v637_v53 = vld [vmem:[%s1318_s0 + $0x168] sm:$0xff]  ;;  %v651_v56 = vsel %vm82_vm1, %v610_v46, 0.0 }
   0xb   :  { %v93_v24 = vadd.f32 %v92_v15, %v91_v17  ;;  %1347 = vst [vmem:[#allocation10_spill] sm:$0xff] %v632_v52  ;;  %v642_v54 = vld [vmem:[%s1318_s0 + $0x170] sm:$0xff]  ;;  %v647_v55 = vld [vmem:[%s1318_s0 + $0x178] sm:$0xff]  ;;  %1348 = vst [vmem:[#allocation11_spill] sm:$0xff] %v651_v56  ;;  %v655_v57 = vsel %vm82_vm1, %v615_v47, 0.0  ;;  %v659_v58 = vsel %vm82_vm1, %v620_v48, 0.0 }
   0xc   :  { %1349 = vst [vmem:[#allocation12_spill] sm:$0xff] %v655_v57  ;;  %1350 = vst [vmem:[#allocation13_spill] sm:$0xff] %v659_v58  ;;  %v664_v59 = vld [vmem:[%s1318_s0 + $0x180] sm:$0xff]  ;;  %v669_v60 = vld [vmem:[%s1318_s0 + $0x188] sm:$0xff]  ;;  %v678_v63 = vsel %vm82_vm1, %v637_v53, 0.0  ;;  %v682_v0 = vsel %vm82_vm1, %v642_v54, 0.0 }
   0xd   :  { %v95_v36 = vadd.f32 %v94_v20, %v93_v24  ;;  %v674_v61 = vld [vmem:[%s1318_s0 + $0x190] sm:$0xff]  ;;  %1351 = vst [vmem:[#allocation14_spill] sm:$0xff] %v678_v63  ;;  %1352 = vst [vmem:[#allocation15_spill] sm:$0xff] %v682_v0  ;;  %v686_v4 = vsel %vm82_vm1, %v647_v55, 0.0  ;;  %v691_v5 = vld [vmem:[%s1318_s0 + $0x198] sm:$0xff]  ;;  %v705_v9 = vsel %vm82_vm1, %v664_v59, 0.0 }
   0xe   :  { %1353 = vst [vmem:[#allocation16_spill] sm:$0xff] %v686_v4  ;;  %v696_v6 = vld [vmem:[%s1318_s0 + $0x1a0] sm:$0xff]  ;;  %v701_v8 = vld [vmem:[%s1318_s0 + $0x1a8] sm:$0xff]  ;;  %1354 = vst [vmem:[#allocation17_spill] sm:$0xff] %v705_v9  ;;  %v709_v11 = vsel %vm82_vm1, %v669_v60, 0.0  ;;  %v713_v12 = vsel %vm82_vm1, %v674_v61, 0.0 }
   0xf   :  { %v97_v49 = vadd.f32 %v96_v25, %v95_v36  ;;  %1355 = vst [vmem:[#allocation18_spill] sm:$0xff] %v709_v11  ;;  %1356 = vst [vmem:[#allocation19_spill] sm:$0xff] %v713_v12  ;;  %v718_v14 = vld [vmem:[%s1318_s0 + $0x60] sm:$0xff]  ;;  %v723_v15 = vld [vmem:[%s1318_s0 + $0x1b0] sm:$0xff]  ;;  %v737_v25 = vsel %vm82_vm1, %v691_v5, 0.0  ;;  %v745_v36 = vsel %vm82_vm1, %v701_v8, 0.0 }
  0x10   :  { %v728_v17 = vld [vmem:[%s1318_s0 + $0x1b8] sm:$0xff]  ;;  %v733_v20 = vld [vmem:[%s1318_s0 + $0x1c0] sm:$0xff]  ;;  %1357 = vst [vmem:[#allocation20_spill] sm:$0xff] %v737_v25  ;;  %1359 = vst [vmem:[#allocation22_spill] sm:$0xff] %v745_v36 }
  0x11   :  { %v99_v62 = vadd.f32 %v98_v26, %v97_v49  ;;  %v741_v26 = vsel %vm82_vm1, %v696_v6, 0.0  ;;  %v750_v49 = vld [vmem:[%s1318_s0 + $0x1c8] sm:$0xff]  ;;  %v768_v36 = vsel %vm82_vm1, %v728_v17, 0.0  ;;  %v772_v25 = vsel %vm82_vm1, %v733_v20, 0.0  ;;  %v777_v12 = vld [vmem:[%s1318_s0 + $0x1e0] sm:$0xff]  ;;  %v804_v0 = vld [vmem:[%s1318_s0 + $0x1f8] sm:$0xff] }
  0x12   :  { %1358 = vst [vmem:[#allocation21_spill] sm:$0xff] %v741_v26  ;;  %v764_v26 = vsel %vm82_vm1, %v723_v15, 0.0  ;;  %1361 = vst [vmem:[#allocation24_spill] sm:$0xff] %v768_v36  ;;  %v782_v11 = vld [vmem:[%s1318_s0 + $0x1e8] sm:$0xff]  ;;  %v791_v9 = vsel %vm82_vm1, %v750_v49, 0.0  ;;  %v826_v58 = vsel %vm82_vm1, %v804_v0, 0.0 }
  0x13   :  { %v101_v24 = vadd.f32 %v100_v30, %v99_v62  ;;  %v755_v30 = vld [vmem:[%s1318_s0 + $0x1d0] sm:$0xff]  ;;  %v760_v62 = vld [vmem:[%s1318_s0 + $0x1d8] sm:$0xff]  ;;  %1360 = vst [vmem:[#allocation23_spill] sm:$0xff] %v764_v26  ;;  %1362 = vst [vmem:[#allocation25_spill] sm:$0xff] %v772_v25 }
  0x14   :  { %v787_v26 = vld [vmem:[%s1318_s0 + $0x1f0] sm:$0xff]  ;;  %1364 = vst [vmem:[#allocation27_spill] sm:$0xff] %v791_v9  ;;  %v795_v25 = vsel %vm82_vm1, %v755_v30, 0.0  ;;  %v799_v4 = vsel %vm82_vm1, %v760_v62, 0.0  ;;  %1367 = vst [vmem:[#allocation30_spill] sm:$0xff] %v804_v0  ;;  %v814_v9 = vsel %vm82_vm1, %v782_v11, 0.0 }
  0x15   :  { %1363 = vst [vmem:[#allocation26_spill] sm:$0xff] %v787_v26  ;;  %v103_v36 = vadd.f32 %v102_v31, %v101_v24  ;;  %1365 = vst [vmem:[#allocation28_spill] sm:$0xff] %v795_v25  ;;  %v106_v31 = vsel %vm82_vm1, %v718_v14, 0.0  ;;  %v810_v24 = vsel %vm82_vm1, %v777_v12, 0.0  ;;  %v818_v25 = vsel %vm82_vm1, %v787_v26, 0.0  ;;  %v855_v56 = vld [vmem:[%s1318_s0 + $0x90] sm:$0xff] }
  0x16   :  { %1366 = vst [vmem:[#allocation29_spill] sm:$0xff] %v799_v4  ;;  %1368 = vst [vmem:[#allocation31_spill] sm:$0xff] %v810_v24  ;;  %v30_v4 = vld [vmem:[%s1318_s0 + $0x68] sm:$0xff]  ;;  %v860_v52 = vld [vmem:[%s1318_s0 + $0x98] sm:$0xff] }
  0x17   :  { %1369 = vst [vmem:[#allocation32_spill] sm:$0xff] %v814_v9  ;;  %1370 = vst [vmem:[#allocation33_spill] sm:$0xff] %v818_v25  ;;  %v105_v63 = vadd.f32 %v551_v32, %v103_v36  ;;  %v108_v24 = vsel %vm82_vm1, %v30_v4, 0.0  ;;  %v31_v9 = vld [vmem:[%s1318_s0 + $0x70] sm:$0xff]  ;;  %v835_v25 = vld [vmem:[%s1318_s0 + $0x78] sm:$0xff]  ;;  %v120_v39 = vsel %vm82_vm1, %v860_v52, 0.0 }
  0x18   :  { %1371 = vst [vmem:[#allocation34_spill] sm:$0xff] %v826_v58  ;;  %1372 = vst [vmem:[#allocation35_spill] sm:$0xff] %v835_v25  ;;  %v840_v32 = vld [vmem:[%s1318_s0 + $0x80] sm:$0xff]  ;;  %v845_v36 = vld [vmem:[%s1318_s0 + $0x88] sm:$0xff]  ;;  %v110_v58 = vsel %vm82_vm1, %v31_v9, 0.0 }
  0x19   :  { %v107_v57 = vadd.f32 %v106_v31, %v105_v63  ;;  %1373 = vst [vmem:[#allocation36_spill] sm:$0xff] %v840_v32  ;;  %1374 = vst [vmem:[#allocation37_spill] sm:$0xff] %v845_v36  ;;  %v220_v63 = vmul.f32 %v455_v1, %v455_v1  ;;  %v221_v31 = vmul.f32 %v460_v2, %v460_v2  ;;  %v865_v51 = vld [vmem:[%s1318_s0 + $0xa0] sm:$0xff]  ;;  %v112_v1 = vsel %vm82_vm1, %v835_v25, 0.0  ;;  %v876_v44 = vld [vmem:[%s1318_s0 + $0xa8] sm:$0xff] }
  0x1a   :  { %1375 = vst [vmem:[#allocation38_spill] sm:$0xff] %v855_v56  ;;  %1376 = vst [vmem:[#allocation39_spill] sm:$0xff] %v860_v52  ;;  %v114_v2 = vsel %vm82_vm1, %v840_v32, 0.0  ;;  %v116_v45 = vsel %vm82_vm1, %v845_v36, 0.0  ;;  %v881_v43 = vld [vmem:[%s1318_s0 + $0xb0] sm:$0xff]  ;;  %v122_v38 = vsel %vm82_vm1, %v865_v51, 0.0  ;;  %v223_v25 = vmul.f32 %v476_v7, %v476_v7 }
  0x1b   :  { %1377 = vst [vmem:[#allocation40_spill] sm:$0xff] %v865_v51  ;;  %v109_v50 = vadd.f32 %v108_v24, %v107_v57  ;;  %1378 = vst [vmem:[#allocation41_spill] sm:$0xff] %v876_v44  ;;  %v886_v57 = vld [vmem:[%s1318_s0 + $0xb8] sm:$0xff]  ;;  %v118_v24 = vsel %vm82_vm1, %v855_v56, 0.0  ;;  %v899_v36 = vld [vmem:[%s1318_s0 + $0xc0] sm:$0xff]  ;;  %v124_v51 = vsel %vm82_vm1, %v876_v44, 0.0 }
  0x1c   :  { %1379 = vst [vmem:[#allocation42_spill] sm:$0xff] %v881_v43  ;;  %1380 = vst [vmem:[#allocation43_spill] sm:$0xff] %v886_v57  ;;  %v904_v32 = vld [vmem:[%s1318_s0 + $0xc8] sm:$0xff]  ;;  %v909_v52 = vld [vmem:[%s1318_s0 + $0xd0] sm:$0xff]  ;;  %v915_v3 = vsel %vm82_vm1, %v881_v43, 0.0 }
  0x1d   :  { %1381 = vst [vmem:[#allocation44_spill] sm:$0xff] %v899_v36  ;;  %1382 = vst [vmem:[#allocation45_spill] sm:$0xff] %v904_v32  ;;  %v111_v56 = vadd.f32 %v110_v58, %v109_v50  ;;  %v922_v0 = vld [vmem:[%s1318_s0 + $0xd8] sm:$0xff]  ;;  %v927_v26 = vld [vmem:[%s1318_s0 + $0xe0] sm:$0xff]  ;;  %v931_v50 = vsel %vm82_vm1, %v886_v57, 0.0  ;;  %v935_v58 = vsel %vm82_vm1, %v899_v36, 0.0 }
  0x1e   :  { %1383 = vst [vmem:[#allocation46_spill] sm:$0xff] %v909_v52  ;;  %1384 = vst [vmem:[#allocation47_spill] sm:$0xff] %v922_v0  ;;  %v939_v7 = vsel %vm82_vm1, %v904_v32, 0.0  ;;  %v943_v43 = vsel %vm82_vm1, %v909_v52, 0.0  ;;  %v948_v44 = vld [vmem:[%s1318_s0 + $0xe8] sm:$0xff]  ;;  %v953_v57 = vld [vmem:[%s1318_s0 + $0xf0] sm:$0xff]  ;;  %v224_v52 = vmul.f32 %v483_v10, %v483_v10  ;;  %v228_v10 = vmul.f32 %v507_v19, %v507_v19 }
  0x1f   :  { %1385 = vst [vmem:[#allocation48_spill] sm:$0xff] %v927_v26  ;;  %1386 = vst [vmem:[#allocation49_spill] sm:$0xff] %v935_v58  ;;  %v113_v36 = vadd.f32 %v112_v1, %v111_v56  ;;  %v957_v58 = vsel %vm82_vm1, %v922_v0, 0.0  ;;  %v961_v32 = vsel %vm82_vm1, %v927_v26, 0.0  ;;  %v225_v56 = vmul.f32 %v490_v13, %v490_v13 }
  0x20   :  { %1387 = vst [vmem:[#allocation50_spill] sm:$0xff] %v939_v7  ;;  %1388 = vst [vmem:[#allocation51_spill] sm:$0xff] %v943_v43  ;;  %v967_v43 = vsel %vm82_vm1, %v948_v44, 0.0  ;;  %v971_v7 = vsel %vm82_vm1, %v953_v57, 0.0  ;;  %v226_v1 = vmul.f32 %v497_v16, %v497_v16  ;;  %v227_v26 = vmul.f32 %v502_v18, %v502_v18 }
  0x21   :  { %1389 = vst [vmem:[#allocation52_spill] sm:$0xff] %v948_v44  ;;  %1390 = vst [vmem:[#allocation53_spill] sm:$0xff] %v953_v57  ;;  %v115_v0 = vadd.f32 %v114_v2, %v113_v36  ;;  %v229_v44 = vmul.f32 %v514_v21, %v514_v21  ;;  %v230_v57 = vmul.f32 %v519_v22, %v519_v22 }
  0x22   :  { %1391 = vst [vmem:[#allocation54_spill] sm:$0xff] %v971_v7  ;;  %v231_v7 = vmul.f32 %v524_v23, %v524_v23  ;;  %v232_v13 = vmul.f32 %v718_v14, %v718_v14  ;;  %v989_v16 = vmul.f32 %v30_v4, %v30_v4  ;;  %v991_v2 = vmul.f32 %v31_v9, %v31_v9 }
  0x23   :  { %v117_v36 = vadd.f32 %v116_v45, %v115_v0  ;;  %v253_v18 = vmul.f32 %v533_v27, %v533_v27  ;;  %v254_v19 = vmul.f32 %v538_v28, %v538_v28  ;;  %v255_v21 = vmul.f32 %v543_v29, %v543_v29 }
  0x24   :  { %v256_v22 = vmul.f32 %v556_v33, %v556_v33  ;;  %v257_v23 = vmul.f32 %v561_v34, %v561_v34  ;;  %v258_v45 = vmul.f32 %v566_v35, %v566_v35  ;;  %v259_v4 = vmul.f32 %v583_v40, %v583_v40 }
  0x25   :  { %v119_v0 = vadd.f32 %v118_v24, %v117_v36  ;;  %v260_v27 = vmul.f32 %v588_v41, %v588_v41  ;;  %v261_v28 = vmul.f32 %v593_v42, %v593_v42  ;;  %v262_v29 = vmul.f32 %v610_v46, %v610_v46 }
  0x26   :  { %v263_v33 = vmul.f32 %v615_v47, %v615_v47  ;;  %v284_v34 = vsel %vm82_vm1, %v220_v63, 0.0  ;;  %v285_v35 = vsel %vm82_vm1, %v221_v31, 0.0  ;;  %v264_v40 = vmul.f32 %v620_v48, %v620_v48 }
  0x27   :  { %v121_v9 = vadd.f32 %v120_v39, %v119_v0  ;;  %v286_v14 = vadd.f32 %v285_v35, %v284_v34  ;;  %v287_v41 = vsel %vm82_vm1, %v222_v37, 0.0  ;;  %v265_v42 = vmul.f32 %v637_v53, %v637_v53  ;;  %v1392_v0 = vld [vmem:[#allocation26_spill] sm:$0xff] }
  0x28   :  { %v266_v46 = vmul.f32 %v642_v54, %v642_v54  ;;  %v267_v47 = vmul.f32 %v647_v55, %v647_v55  ;;  %v289_v63 = vsel %vm82_vm1, %v223_v25, 0.0  ;;  %v268_v39 = vmul.f32 %v664_v59, %v664_v59  ;;  %v1393_v34 = vld [vmem:[#allocation30_spill] sm:$0xff] }
  0x29   :  { %v123_v24 = vadd.f32 %v122_v38, %v121_v9  ;;  %v269_v48 = vmul.f32 %v669_v60, %v669_v60  ;;  %v288_v31 = vadd.f32 %v287_v41, %v286_v14  ;;  %v270_v37 = vmul.f32 %v674_v61, %v674_v61  ;;  %v1394_v41 = vld [vmem:[#allocation49_spill] sm:$0xff] }
  0x2a   :  { %v271_v53 = vmul.f32 %v691_v5, %v691_v5  ;;  %v272_v54 = vmul.f32 %v696_v6, %v696_v6  ;;  %v291_v55 = vsel %vm82_vm1, %v224_v52, 0.0  ;;  %v273_v38 = vmul.f32 %v701_v8, %v701_v8 }
  0x2b   :  { %v125_v25 = vadd.f32 %v124_v51, %v123_v24  ;;  %v274_v59 = vmul.f32 %v723_v15, %v723_v15  ;;  %v290_v60 = vadd.f32 %v289_v63, %v288_v31  ;;  %v275_v36 = vmul.f32 %v728_v17, %v728_v17 }
  0x2c   :  { %v276_v61 = vmul.f32 %v733_v20, %v733_v20  ;;  %v277_v5 = vmul.f32 %v750_v49, %v750_v49  ;;  %v293_v6 = vsel %vm82_vm1, %v225_v56, 0.0  ;;  %v278_v52 = vmul.f32 %v755_v30, %v755_v30 }
  0x2d   :  { %v127_v51 = vadd.f32 %v915_v3, %v125_v25  ;;  %v279_v8 = vmul.f32 %v760_v62, %v760_v62  ;;  %v292_v15 = vadd.f32 %v291_v55, %v290_v60  ;;  %v280_v17 = vmul.f32 %v777_v12, %v777_v12  ;;  %v1396_v25 = vld [vmem:[#allocation51_spill] sm:$0xff] }
  0x2e   :  { %v281_v20 = vmul.f32 %v782_v11, %v782_v11  ;;  %v282_v49 = vmul.f32 %v1392_v0, %v1392_v0  ;;  %v295_v56 = vsel %vm82_vm1, %v226_v1, 0.0  ;;  %v283_v30 = vmul.f32 %v1393_v34, %v1393_v34  ;;  %v1398_v34 = vld [vmem:[#allocation54_spill] sm:$0xff] }
  0x2f   :  { %v129_v3 = vadd.f32 %v931_v50, %v127_v51  ;;  %v294_v35 = vadd.f32 %v293_v6, %v292_v15  ;;  %v297_v62 = vsel %vm82_vm1, %v227_v26, 0.0  ;;  %v299_v9 = vsel %vm82_vm1, %v228_v10, 0.0 }
  0x30   :  { %v301_v12 = vsel %vm82_vm1, %v229_v44, 0.0  ;;  %v303_v14 = vsel %vm82_vm1, %v230_v57, 0.0  ;;  %v305_v11 = vsel %vm82_vm1, %v231_v7, 0.0  ;;  %v307_v1 = vsel %vm82_vm1, %v232_v13, 0.0  ;;  %v1395_v7 = vld [vmem:[#allocation50_spill] sm:$0xff] }
  0x31   :  { %v131_v63 = vadd.f32 %v1394_v41, %v129_v3  ;;  %v296_v24 = vadd.f32 %v295_v56, %v294_v35  ;;  %v1072_v50 = vsel %vm82_vm1, %v253_v18, 0.0  ;;  %v1075_v31 = vsel %vm82_vm1, %v254_v19, 0.0  ;;  %v1397_v56 = vld [vmem:[#allocation35_spill] sm:$0xff] }
  0x32   :  { %v1078_v26 = vsel %vm82_vm1, %v255_v21, 0.0  ;;  %v1081_v44 = vsel %vm82_vm1, %v256_v22, 0.0  ;;  %v1084_v57 = vsel %vm82_vm1, %v257_v23, 0.0  ;;  %v1088_v13 = vsel %vm82_vm1, %v258_v45, 0.0 }
  0x33   :  { %v133_v10 = vadd.f32 %v1395_v7, %v131_v63  ;;  %v298_v55 = vadd.f32 %v297_v62, %v296_v24  ;;  %v1091_v18 = vsel %vm82_vm1, %v259_v4, 0.0  ;;  %v1094_v19 = vsel %vm82_vm1, %v260_v27, 0.0  ;;  %v1399_v62 = vld [vmem:[#allocation36_spill] sm:$0xff] }
  0x34   :  { %v1097_v21 = vsel %vm82_vm1, %v261_v28, 0.0  ;;  %v1100_v22 = vsel %vm82_vm1, %v262_v29, 0.0  ;;  %v1103_v23 = vsel %vm82_vm1, %v263_v33, 0.0  ;;  %v1107_v45 = vsel %vm82_vm1, %v264_v40, 0.0 }
  0x35   :  { %v135_v60 = vadd.f32 %v1396_v25, %v133_v10  ;;  %v300_v6 = vadd.f32 %v299_v9, %v298_v55  ;;  %v1110_v4 = vsel %vm82_vm1, %v265_v42, 0.0  ;;  %v1113_v27 = vsel %vm82_vm1, %v266_v46, 0.0  ;;  %v1401_v10 = vld [vmem:[#allocation38_spill] sm:$0xff] }
  0x36   :  { %v1116_v28 = vsel %vm82_vm1, %v267_v47, 0.0  ;;  %v1119_v29 = vsel %vm82_vm1, %v268_v39, 0.0  ;;  %v1122_v33 = vsel %vm82_vm1, %v269_v48, 0.0  ;;  %v1126_v40 = vsel %vm82_vm1, %v270_v37, 0.0  ;;  %v1402_v25 = vld [vmem:[#allocation2_spill] sm:$0xff] }
  0x37   :  { %v137_v51 = vadd.f32 %v957_v58, %v135_v60  ;;  %v302_v15 = vadd.f32 %v301_v12, %v300_v6  ;;  %v1129_v42 = vsel %vm82_vm1, %v271_v53, 0.0  ;;  %v1132_v46 = vsel %vm82_vm1, %v272_v54, 0.0 }
  0x38   :  { %v1135_v47 = vsel %vm82_vm1, %v273_v38, 0.0  ;;  %v1138_v39 = vsel %vm82_vm1, %v274_v59, 0.0  ;;  %v1141_v48 = vsel %vm82_vm1, %v275_v36, 0.0  ;;  %v1145_v37 = vsel %vm82_vm1, %v276_v61, 0.0 }
  0x39   :  { %v139_v58 = vadd.f32 %v961_v32, %v137_v51  ;;  %v304_v0 = vadd.f32 %v303_v14, %v302_v15  ;;  %v1148_v53 = vsel %vm82_vm1, %v277_v5, 0.0  ;;  %v1151_v54 = vsel %vm82_vm1, %v278_v52, 0.0  ;;  %v1165_v32 = vld [vmem:[%s1318_s0 + $0xf8] sm:$0xff]  ;;  %v1403_v51 = vld [vmem:[#allocation39_spill] sm:$0xff] }
  0x3a   :  { %v1154_v38 = vsel %vm82_vm1, %v279_v8, 0.0  ;;  %v1157_v59 = vsel %vm82_vm1, %v280_v17, 0.0  ;;  %v1160_v36 = vsel %vm82_vm1, %v281_v20, 0.0  ;;  %v1169_v52 = vsel %vm82_vm1, %v282_v49, 0.0 }
  0x3b   :  { %v141_v61 = vadd.f32 %v967_v43, %v139_v58  ;;  %v306_v5 = vadd.f32 %v305_v11, %v304_v0  ;;  %v1172_v8 = vsel %vm82_vm1, %v283_v30, 0.0  ;;  %v144_v17 = vsel %vm82_vm1, %v1165_v32, 0.0  ;;  %v1183_v43 = vld [vmem:[%s1318_s0 + $0x100] sm:$0xff]  ;;  %v1404_v58 = vld [vmem:[#allocation3_spill] sm:$0xff] }
  0x3c   :  { %v235_v20 = vmul.f32 %v1397_v56, %v1397_v56  ;;  %v309_v3 = vsel %vm82_vm1, %v989_v16, 0.0  ;;  %v146_v30 = vsel %vm82_vm1, %v1183_v43, 0.0  ;;  %v236_v9 = vmul.f32 %v1399_v62, %v1399_v62  ;;  %v1400_v16 = vld [vmem:[#allocation37_spill] sm:$0xff] }
  0x3d   :  { %v143_v49 = vadd.f32 %v1398_v34, %v141_v61  ;;  %v308_v35 = vadd.f32 %v307_v1, %v306_v5  ;;  %v311_v12 = vsel %vm82_vm1, %v991_v2, 0.0  ;;  %v237_v41 = vmul.f32 %v1400_v16, %v1400_v16  ;;  %v1405_v5 = vld [vmem:[#allocation40_spill] sm:$0xff]  ;;  %v1408_v62 = vld [vmem:[#allocation5_spill] sm:$0xff] }
  0x3e   :  { %v313_v63 = vsel %vm82_vm1, %v235_v20, 0.0  ;;  %v238_v1 = vmul.f32 %v1401_v10, %v1401_v10  ;;  %v315_v55 = vsel %vm82_vm1, %v236_v9, 0.0  ;;  %v239_v2 = vmul.f32 %v1403_v51, %v1403_v51  ;;  %v1406_v20 = vld [vmem:[#allocation4_spill] sm:$0xff] }
  0x3f   :  { %v145_v14 = vadd.f32 %v144_v17, %v143_v49  ;;  %v310_v11 = vadd.f32 %v309_v3, %v308_v35  ;;  %v317_v15 = vsel %vm82_vm1, %v237_v41, 0.0  ;;  %v240_v17 = vmul.f32 %v1405_v5, %v1405_v5  ;;  %v1407_v49 = vld [vmem:[#allocation41_spill] sm:$0xff]  ;;  %v1410_v41 = vld [vmem:[#allocation6_spill] sm:$0xff] }
  0x40   :  { %v319_v56 = vsel %vm82_vm1, %v238_v1, 0.0  ;;  %v241_v35 = vmul.f32 %v1407_v49, %v1407_v49 }
  0x41   :  { %v147_v24 = vadd.f32 %v146_v30, %v145_v14  ;;  %v312_v7 = vadd.f32 %v311_v12, %v310_v11  ;;  %v321_v30 = vsel %vm82_vm1, %v239_v2, 0.0  ;;  %v1409_v14 = vld [vmem:[#allocation42_spill] sm:$0xff]  ;;  %v323_v16 = vsel %vm82_vm1, %v240_v17, 0.0 }
  0x42   :  { %v242_v11 = vmul.f32 %v1409_v14, %v1409_v14  ;;  %v325_v1 = vsel %vm82_vm1, %v241_v35, 0.0 }
  0x43   :  { %v149_v60 = vadd.f32 %v1402_v25, %v147_v24  ;;  %v314_v6 = vadd.f32 %v313_v63, %v312_v7  ;;  %v1411_v7 = vld [vmem:[#allocation43_spill] sm:$0xff] }
  0x44   :  { %v243_v10 = vmul.f32 %v1411_v7, %v1411_v7  ;;  %v327_v2 = vsel %vm82_vm1, %v242_v11, 0.0 }
  0x45   :  { %v151_v0 = vadd.f32 %v1404_v58, %v149_v60  ;;  %v316_v61 = vadd.f32 %v315_v55, %v314_v6  ;;  %v1412_v55 = vld [vmem:[#allocation7_spill] sm:$0xff]  ;;  %v1413_v6 = vld [vmem:[#allocation44_spill] sm:$0xff] }
  0x46   :  { %v244_v51 = vmul.f32 %v1413_v6, %v1413_v6  ;;  %v329_v17 = vsel %vm82_vm1, %v243_v10, 0.0 }
  0x47   :  { %v153_v3 = vadd.f32 %v1406_v20, %v151_v0  ;;  %v318_v34 = vadd.f32 %v317_v15, %v316_v61  ;;  %v1414_v15 = vld [vmem:[#allocation8_spill] sm:$0xff]  ;;  %v1415_v61 = vld [vmem:[#allocation45_spill] sm:$0xff] }
  0x48   :  { %v245_v5 = vmul.f32 %v1415_v61, %v1415_v61  ;;  %v331_v35 = vsel %vm82_vm1, %v244_v51, 0.0 }
  0x49   :  { %v155_v9 = vadd.f32 %v1408_v62, %v153_v3  ;;  %v320_v12 = vadd.f32 %v319_v56, %v318_v34  ;;  %v1416_v56 = vld [vmem:[#allocation9_spill] sm:$0xff]  ;;  %v1417_v34 = vld [vmem:[#allocation46_spill] sm:$0xff] }
  0x4a   :  { %v246_v49 = vmul.f32 %v1417_v34, %v1417_v34  ;;  %v333_v11 = vsel %vm82_vm1, %v245_v5, 0.0 }
  0x4b   :  { %v157_v63 = vadd.f32 %v1410_v41, %v155_v9  ;;  %v322_v24 = vadd.f32 %v321_v30, %v320_v12  ;;  %v1418_v30 = vld [vmem:[#allocation10_spill] sm:$0xff]  ;;  %v1419_v12 = vld [vmem:[#allocation47_spill] sm:$0xff] }
  0x4c   :  { %v247_v14 = vmul.f32 %v1419_v12, %v1419_v12  ;;  %v335_v10 = vsel %vm82_vm1, %v246_v49, 0.0  ;;  %v1427_v49 = vld [vmem:[#allocation15_spill] sm:$0xff]  ;;  %v1428_v12 = vld [vmem:[#allocation16_spill] sm:$0xff] }
  0x4d   :  { %v159_v25 = vadd.f32 %v1412_v55, %v157_v63  ;;  %v324_v60 = vadd.f32 %v323_v16, %v322_v24  ;;  %v1420_v16 = vld [vmem:[#allocation11_spill] sm:$0xff]  ;;  %v1421_v24 = vld [vmem:[#allocation48_spill] sm:$0xff] }
  0x4e   :  { %v248_v7 = vmul.f32 %v1421_v24, %v1421_v24  ;;  %v337_v51 = vsel %vm82_vm1, %v247_v14, 0.0 }
  0x4f   :  { %v161_v58 = vadd.f32 %v1414_v15, %v159_v25  ;;  %v326_v0 = vadd.f32 %v325_v1, %v324_v60  ;;  %v1422_v1 = vld [vmem:[#allocation12_spill] sm:$0xff] }
  0x50   :  { %v1423_v60 = vld [vmem:[#allocation52_spill] sm:$0xff]  ;;  %v339_v5 = vsel %vm82_vm1, %v248_v7, 0.0  ;;  %v1430_v7 = vld [vmem:[#allocation18_spill] sm:$0xff] }
  0x51   :  { %v163_v20 = vadd.f32 %v1416_v56, %v161_v58  ;;  %v328_v3 = vadd.f32 %v327_v2, %v326_v0  ;;  %v249_v6 = vmul.f32 %v1423_v60, %v1423_v60  ;;  %v1424_v2 = vld [vmem:[#allocation13_spill] sm:$0xff] }
  0x52   :  { %v1425_v0 = vld [vmem:[#allocation53_spill] sm:$0xff] }
  0x53   :  { %v165_v62 = vadd.f32 %v1418_v30, %v163_v20  ;;  %v330_v9 = vadd.f32 %v329_v17, %v328_v3  ;;  %v250_v61 = vmul.f32 %v1425_v0, %v1425_v0  ;;  %v1426_v17 = vld [vmem:[#allocation14_spill] sm:$0xff]  ;;  %v251_v3 = vmul.f32 %v1165_v32, %v1165_v32 }
  0x54   :  { %v341_v34 = vsel %vm82_vm1, %v249_v6, 0.0  ;;  %v1432_v6 = vld [vmem:[#allocation20_spill] sm:$0xff]  ;;  %v1434_v0 = vld [vmem:[#allocation22_spill] sm:$0xff] }
  0x55   :  { %v167_v41 = vadd.f32 %v1420_v16, %v165_v62  ;;  %v332_v63 = vadd.f32 %v331_v35, %v330_v9  ;;  %v252_v62 = vmul.f32 %v1183_v43, %v1183_v43  ;;  %v343_v9 = vsel %vm82_vm1, %v250_v61, 0.0 }
  0x56   :  { %v345_v16 = vsel %vm82_vm1, %v251_v3, 0.0  ;;  %v1436_v3 = vld [vmem:[#allocation24_spill] sm:$0xff] }
  0x57   :  { %v169_v55 = vadd.f32 %v1422_v1, %v167_v41  ;;  %v334_v25 = vadd.f32 %v333_v11, %v332_v63  ;;  %v1429_v41 = vld [vmem:[#allocation17_spill] sm:$0xff]  ;;  %v347_v32 = vsel %vm82_vm1, %v252_v62, 0.0  ;;  %v1438_v62 = vld [vmem:[#allocation27_spill] sm:$0xff] }
  0x59   :  { %v171_v15 = vadd.f32 %v1424_v2, %v169_v55  ;;  %v336_v58 = vadd.f32 %v335_v10, %v334_v25  ;;  %v1431_v55 = vld [vmem:[#allocation19_spill] sm:$0xff]  ;;  %v1433_v2 = vld [vmem:[#allocation21_spill] sm:$0xff] }
  0x5b   :  { %v173_v56 = vadd.f32 %v1426_v17, %v171_v15  ;;  %v338_v20 = vadd.f32 %v337_v51, %v336_v58  ;;  %v1435_v17 = vld [vmem:[#allocation23_spill] sm:$0xff] }
  0x5d   :  { %v175_v35 = vadd.f32 %v1427_v49, %v173_v56  ;;  %v340_v30 = vadd.f32 %v339_v5, %v338_v20 }
  0x5f   :  { %v177_v14 = vadd.f32 %v1428_v12, %v175_v35  ;;  %v342_v11 = vadd.f32 %v341_v34, %v340_v30  ;;  %v1437_v35 = vld [vmem:[#allocation25_spill] sm:$0xff]  ;;  %v1439_v12 = vld [vmem:[#allocation28_spill] sm:$0xff] }
  0x61   :  { %v179_v63 = vadd.f32 %v1429_v41, %v177_v14  ;;  %v344_v24 = vadd.f32 %v343_v9, %v342_v11  ;;  %v1440_v11 = vld [vmem:[#allocation29_spill] sm:$0xff]  ;;  %v1441_v41 = vld [vmem:[#allocation31_spill] sm:$0xff] }
  0x63   :  { %v181_v10 = vadd.f32 %v1430_v7, %v179_v63  ;;  %v346_v1 = vadd.f32 %v345_v16, %v344_v24  ;;  %v1442_v24 = vld [vmem:[#allocation32_spill] sm:$0xff]  ;;  %v1443_v7 = vld [vmem:[#allocation33_spill] sm:$0xff] }
  0x65   :  { %v183_v25 = vadd.f32 %v1431_v55, %v181_v10  ;;  %v348_v60 = vadd.f32 %v347_v32, %v346_v1  ;;  %v1444_v1 = vld [vmem:[#allocation34_spill] sm:$0xff] }
  0x67   :  { %v185_v43 = vadd.f32 %v1432_v6, %v183_v25  ;;  %v350_v51 = vadd.f32 %v1072_v50, %v348_v60 }
  0x69   :  { %v187_v15 = vadd.f32 %v1433_v2, %v185_v43  ;;  %v352_v58 = vadd.f32 %v1075_v31, %v350_v51 }
  0x6b   :  { %v189_v61 = vadd.f32 %v1434_v0, %v187_v15  ;;  %v354_v5 = vadd.f32 %v1078_v26, %v352_v58 }
  0x6d   :  { %v191_v56 = vadd.f32 %v1435_v17, %v189_v61  ;;  %v356_v20 = vadd.f32 %v1081_v44, %v354_v5 }
  0x6f   :  { %v193_v34 = vadd.f32 %v1436_v3, %v191_v56  ;;  %v358_v49 = vadd.f32 %v1084_v57, %v356_v20 }
  0x71   :  { %v195_v30 = vadd.f32 %v1437_v35, %v193_v34  ;;  %v360_v50 = vadd.f32 %v1088_v13, %v358_v49 }
  0x73   :  { %v197_v9 = vadd.f32 %v1438_v62, %v195_v30  ;;  %v362_v31 = vadd.f32 %v1091_v18, %v360_v50 }
  0x75   :  { %v199_v14 = vadd.f32 %v1439_v12, %v197_v9  ;;  %v364_v26 = vadd.f32 %v1094_v19, %v362_v31 }
  0x77   :  { %v201_v16 = vadd.f32 %v1440_v11, %v199_v14  ;;  %v366_v44 = vadd.f32 %v1097_v21, %v364_v26 }
  0x79   :  { %v203_v63 = vadd.f32 %v1441_v41, %v201_v16  ;;  %v368_v57 = vadd.f32 %v1100_v22, %v366_v44 }
  0x7b   :  { %v205_v32 = vadd.f32 %v1442_v24, %v203_v63  ;;  %v370_v13 = vadd.f32 %v1103_v23, %v368_v57 }
  0x7d   :  { %v207_v10 = vadd.f32 %v1443_v7, %v205_v32  ;;  %v372_v18 = vadd.f32 %v1107_v45, %v370_v13  ;;  %v81_v45 = vld [vmem:[%s1319_s1] sm:$0x1] }
  0x7f   :  { %v209_v55 = vadd.f32 %v1444_v1, %v207_v10  ;;  %v374_v19 = vadd.f32 %v1110_v4, %v372_v18 }
  0x81   :  { %v210_v25 = vrot.slane %v209_v55, 4  ;;  %v376_v60 = vadd.f32 %v1113_v27, %v374_v19 }
  0x83   :  { %v211_v21 = vadd.f32 %v210_v25, %v209_v55  ;;  %v378_v6 = vadd.f32 %v1116_v28, %v376_v60 }
  0x85   :  { %v212_v43 = vrot.slane %v211_v21, 2  ;;  %v380_v22 = vadd.f32 %v1119_v29, %v378_v6 }
  0x87   :  { %v213_v51 = vadd.f32 %v212_v43, %v211_v21  ;;  %v382_v23 = vadd.f32 %v1122_v33, %v380_v22 }
  0x89   :  { %v214_v2 = vrot.slane %v213_v51, 1  ;;  %v384_v15 = vadd.f32 %v1126_v40, %v382_v23 }
  0x8b   :  { %v215_v4 = vadd.f32 %v214_v2, %v213_v51  ;;  %v386_v58 = vadd.f32 %v1129_v42, %v384_v15 }
  0x8d   :  { %v216_v27 = vadd.f32 %v215_v4, %v81_v45  ;;  %v388_v0 = vadd.f32 %v1132_v46, %v386_v58 }
  0x8f   :  { %218 = vst.msk [vmem:[%s1319_s1] sm:$0x1] %vm14_vm0, %v216_v27  ;;  %v390_v28 = vadd.f32 %v1135_v47, %v388_v0 }
  0x91   :  { %v392_v29 = vadd.f32 %v1138_v39, %v390_v28 }
  0x93   :  { %v394_v33 = vadd.f32 %v1141_v48, %v392_v29 }
  0x95   :  { %v396_v40 = vadd.f32 %v1145_v37, %v394_v33  ;;  %v219_v37 = vld [vmem:[%s1320_s2] sm:$0x1] }
  0x97   :  { %v398_v61 = vadd.f32 %v1148_v53, %v396_v40 }
  0x99   :  { %v400_v42 = vadd.f32 %v1151_v54, %v398_v61 }
  0x9b   :  { %v402_v5 = vadd.f32 %v1154_v38, %v400_v42 }
  0x9d   :  { %v404_v46 = vadd.f32 %v1157_v59, %v402_v5 }
  0x9f   :  { %v406_v17 = vadd.f32 %v1160_v36, %v404_v46 }
  0xa1   :  { %v408_v56 = vadd.f32 %v1169_v52, %v406_v17 }
  0xa3   :  { %v410_v47 = vadd.f32 %v1172_v8, %v408_v56 }
  0xa5   :  { %v411_v20 = vrot.slane %v410_v47, 4 }
  0xa7   :  { %v412_v39 = vadd.f32 %v411_v20, %v410_v47 }
  0xa9   :  { %v413_v3 = vrot.slane %v412_v39, 2 }
  0xab   :  { %v414_v48 = vadd.f32 %v413_v3, %v412_v39 }
  0xad   :  { %v415_v34 = vrot.slane %v414_v48, 1 }
  0xaf   :  { %v416_v53 = vadd.f32 %v415_v34, %v414_v48 }
  0xb1   :  { %v417_v54 = vadd.f32 %v416_v53, %v219_v37 }
  0xb3   :  { %418 = vst.msk [vmem:[%s1320_s2] sm:$0x1] %vm14_vm0, %v417_v54 }

// kernel: residual_block.8
= control target key start
LH: loop header
LB: loop body
LE: loop exit
PB: predicated region body
PF: predicated region fallthrough
CT: control target
= control target key end

     0   :  { %v96_v0 = vlaneseq  ;;  %vm754_vm0 = vcmask 125952   ;;  %s2033_s1 = inlined_call_operand.vmem [shape: f32[1,16], index: 1, kind: input, shape index: {}]   ;;  %s2034_s2 = inlined_call_operand.vmem [shape: f32[1,16], index: 2, kind: input, shape index: {}]   ;;  %s2035_s0 = inlined_call_operand.vmem [shape: f32[512,16], index: 0, kind: input, shape index: {}]   ;;  %s2036_s3 = inlined_call_operand.vmem [shape: f32[1,16], index: 3, kind: input, shape index: {}]   ;;  %s2037_s4 = inlined_call_operand.vmem [shape: f32[1,16], index: 4, kind: input, shape index: {}]   ;;  %s2038_s5 = inlined_call_operand.vmem [shape: bf16[512,16], index: 5, kind: output, shape index: {}]  }
   0x1   :  { %v84_v1 = vld [vmem:[%s2033_s1] sm:$0x1]  ;;  %v1001_v11 = vld [vmem:[%s2035_s0 + $0x8] sm:$0xff]  ;;  %v1010_v13 = vld [vmem:[%s2035_s0 + $0x10] sm:$0xff] }
   0x2   :  { %v85_v2 = vld [vmem:[%s2034_s2] sm:$0x1]  ;;  %v88_v3 = vmul.f32 0.001953125, %v84_v1  ;;  %v990_v5 = vshrl.u32 %v96_v0, 7  ;;  %v1015_v14 = vld [vmem:[%s2035_s0 + $0x18] sm:$0xff]  ;;  %v1025_v16 = vld [vmem:[%s2035_s0 + $0x28] sm:$0xff] }
   0x3   :  { %v89_v4 = vmul.f32 0.001953125, %v85_v2  ;;  %v996_v9 = vld [vmem:[%s2035_s0] sm:$0xff]  ;;  %v1030_v18 = vld [vmem:[%s2035_s0 + $0x30] sm:$0xff]  ;;  %v1035_v19 = vld [vmem:[%s2035_s0 + $0x38] sm:$0xff] }
   0x4   :  { %v90_v6 = vmul.f32 %v88_v3, %v88_v3  ;;  %v2039_v7 = vsub.s32 0, %v990_v5  ;;  %v1020_v15 = vld [vmem:[%s2035_s0 + $0x20] sm:$0xff]  ;;  %v1045_v21 = vld [vmem:[%s2035_s0 + $0x48] sm:$0xff]  ;;  %v1050_v22 = vld [vmem:[%s2035_s0 + $0x50] sm:$0xff] }
   0x5   :  { %v1040_v20 = vld [vmem:[%s2035_s0 + $0x40] sm:$0xff]  ;;  %v1055_v23 = vld [vmem:[%s2035_s0 + $0x58] sm:$0xff]  ;;  %v1065_v25 = vld [vmem:[%s2035_s0 + $0x68] sm:$0xff] }
   0x6   :  { %v91_v8 = vsub.f32 %v89_v4, %v90_v6  ;;  %v1005_v12 = vrot.slane %v88_v3, %v2039_v7  ;;  %v1060_v24 = vld [vmem:[%s2035_s0 + $0x60] sm:$0xff]  ;;  %v1070_v26 = vld [vmem:[%s2035_s0 + $0x70] sm:$0xff]  ;;  %v1079_v29 = vld [vmem:[%s2035_s0 + $0x78] sm:$0xff] }
   0x7   :  { %v1084_v30 = vld [vmem:[%s2035_s0 + $0x80] sm:$0xff]  ;;  %v1089_v31 = vld [vmem:[%s2035_s0 + $0x88] sm:$0xff]  ;;  %v1102_v36 = vld [vmem:[%s2035_s0 + $0x90] sm:$0xff] }
   0x8   :  { %v92_v10 = vmax.f32 %v91_v8, 0.0  ;;  %v1107_v37 = vld [vmem:[%s2035_s0 + $0x98] sm:$0xff]  ;;  %v1112_v38 = vld [vmem:[%s2035_s0 + $0xa0] sm:$0xff]  ;;  %v1125_v43 = vld [vmem:[%s2035_s0 + $0xa8] sm:$0xff] }
   0x9   :  { %v1130_v44 = vld [vmem:[%s2035_s0 + $0xb0] sm:$0xff]  ;;  %v1135_v45 = vld [vmem:[%s2035_s0 + $0xb8] sm:$0xff]  ;;  %v1148_v50 = vld [vmem:[%s2035_s0 + $0xc0] sm:$0xff] }
   0xa   :  { %v93_v17 = vadd.f32 1e-05, %v92_v10  ;;  %v1153_v51 = vld [vmem:[%s2035_s0 + $0xc8] sm:$0xff]  ;;  %v1158_v52 = vld [vmem:[%s2035_s0 + $0xd0] sm:$0xff]  ;;  %v1171_v57 = vld [vmem:[%s2035_s0 + $0xd8] sm:$0xff] }
   0xb   :  { %v1176_v58 = vld [vmem:[%s2035_s0 + $0xe0] sm:$0xff]  ;;  %v1181_v59 = vld [vmem:[%s2035_s0 + $0xe8] sm:$0xff]  ;;  %v1194_v0 = vld [vmem:[%s2035_s0 + $0x170] sm:$0xff] }
   0xc   :  { %952 = vrsqrt.f32 %v93_v17  ;;  %2058 = vst [vmem:[#allocation2_spill] sm:$0xff] %v1194_v0  ;;  %v1199_v1 = vld [vmem:[%s2035_s0 + $0x178] sm:$0xff]  ;;  %v1204_v2 = vld [vmem:[%s2035_s0 + $0x180] sm:$0xff]  ;;  %v1217_v10 = vld [vmem:[%s2035_s0 + $0x188] sm:$0xff] }
   0xd   :  { %2059 = vst [vmem:[#allocation3_spill] sm:$0xff] %v1199_v1  ;;  %2060 = vst [vmem:[#allocation4_spill] sm:$0xff] %v1204_v2  ;;  %v1222_v17 = vld [vmem:[%s2035_s0 + $0x190] sm:$0xff]  ;;  %v1227_v4 = vld [vmem:[%s2035_s0 + $0x198] sm:$0xff] }
   0xe   :  { %2061 = vst [vmem:[#allocation5_spill] sm:$0xff] %v1217_v10  ;;  %2062 = vst [vmem:[#allocation6_spill] sm:$0xff] %v1222_v17  ;;  %v1240_v62 = vld [vmem:[%s2035_s0 + $0xf0] sm:$0xff]  ;;  %v1245_v61 = vld [vmem:[%s2035_s0 + $0xf8] sm:$0xff] }
   0xf   :  { %2063 = vst [vmem:[#allocation7_spill] sm:$0xff] %v1227_v4  ;;  %v1250_v8 = vld [vmem:[%s2035_s0 + $0x1a0] sm:$0xff]  ;;  %v1255_v3 = vld [vmem:[%s2035_s0 + $0x1a8] sm:$0xff]  ;;  %v1260_v63 = vld [vmem:[%s2035_s0 + $0x1b0] sm:$0xff] }
  0x10   :  { %2064 = vst [vmem:[#allocation8_spill] sm:$0xff] %v1250_v8  ;;  %2065 = vst [vmem:[#allocation9_spill] sm:$0xff] %v1255_v3  ;;  %v86_v6 = vld [vmem:[%s2036_s3] sm:$0x1]  ;;  %v1273_v56 = vld [vmem:[%s2035_s0 + $0x108] sm:$0xff] }
  0x11   :  { %2066 = vst [vmem:[#allocation10_spill] sm:$0xff] %v1260_v63  ;;  %v1268_v60 = vld [vmem:[%s2035_s0 + $0x100] sm:$0xff]  ;;  %v1278_v55 = vld [vmem:[%s2035_s0 + $0x110] sm:$0xff]  ;;  %v1291_v47 = vld [vmem:[%s2035_s0 + $0x1b8] sm:$0xff]  ;;  %v2077_v63 = vsub.f32 %v996_v9, %v1005_v12  ;;  %v2081_v9 = vsub.f32 %v1020_v15, %v1005_v12 }
  0x12   :  { %2067 = vst [vmem:[#allocation11_spill] sm:$0xff] %v1291_v47  ;;  %v1296_v46 = vld [vmem:[%s2035_s0 + $0x1c0] sm:$0xff]  ;;  %v1301_v53 = vld [vmem:[%s2035_s0 + $0x1c8] sm:$0xff]  ;;  %v1306_v49 = vld [vmem:[%s2035_s0 + $0x118] sm:$0xff] }
  0x13   :  { %2068 = vst [vmem:[#allocation12_spill] sm:$0xff] %v1296_v46  ;;  %2069 = vst [vmem:[#allocation13_spill] sm:$0xff] %v1301_v53  ;;  %v1311_v48 = vld [vmem:[%s2035_s0 + $0x120] sm:$0xff]  ;;  %v1324_v39 = vld [vmem:[%s2035_s0 + $0x1d0] sm:$0xff] }
  0x14   :  { %2070 = vst [vmem:[#allocation14_spill] sm:$0xff] %v1324_v39  ;;  %v1329_v35 = vld [vmem:[%s2035_s0 + $0x1d8] sm:$0xff]  ;;  %v1334_v42 = vld [vmem:[%s2035_s0 + $0x1e0] sm:$0xff]  ;;  %v1347_v33 = vld [vmem:[%s2035_s0 + $0x1e8] sm:$0xff] }
  0x15   :  { %2071 = vst [vmem:[#allocation15_spill] sm:$0xff] %v1329_v35  ;;  %2072 = vst [vmem:[#allocation16_spill] sm:$0xff] %v1334_v42  ;;  %v1352_v32 = vld [vmem:[%s2035_s0 + $0x1f0] sm:$0xff]  ;;  %v1357_v40 = vld [vmem:[%s2035_s0 + $0x1f8] sm:$0xff]  ;;  %v2078_v42 = vsub.f32 %v1001_v11, %v1005_v12  ;;  %v2082_v11 = vsub.f32 %v1025_v16, %v1005_v12 }
  0x16   :  { %2073 = vst [vmem:[#allocation17_spill] sm:$0xff] %v1347_v33  ;;  %2074 = vst [vmem:[#allocation18_spill] sm:$0xff] %v1352_v32  ;;  %v1362_v54 = vld [vmem:[%s2035_s0 + $0x128] sm:$0xff]  ;;  %v1367_v34 = vld [vmem:[%s2035_s0 + $0x130] sm:$0xff]  ;;  %v2076_v33 = vsub.s32 0, %v990_v5  ;;  %v2079_v5 = vsub.f32 %v1010_v13, %v1005_v12  ;;  %v2083_v13 = vsub.f32 %v1030_v18, %v1005_v12 }
  0x17   :  { %2075 = vst [vmem:[#allocation19_spill] sm:$0xff] %v1357_v40  ;;  %v1372_v41 = vld [vmem:[%s2035_s0 + $0x138] sm:$0xff]  ;;  %v1389_v28 = vld [vmem:[%s2035_s0 + $0x140] sm:$0xff]  ;;  %v1394_v27 = vld [vmem:[%s2035_s0 + $0x148] sm:$0xff] }
  0x18   :  { %v1399_v53 = vld [vmem:[%s2035_s0 + $0x150] sm:$0xff]  ;;  %v1414_v39 = vld [vmem:[%s2035_s0 + $0x158] sm:$0xff]  ;;  %v1419_v7 = vld [vmem:[%s2035_s0 + $0x160] sm:$0xff] }
  0x19   :  { %v953_v46 = vpop.eup %952  ;;  %v1447_v35 = vld [vmem:[%s2037_s4] ss:$0 sm:$0xff] }
  0x1a   :  { %v165_v47 = vmul.f32 %v953_v46, %v86_v6  ;;  %v1424_v46 = vld [vmem:[%s2035_s0 + $0x168] sm:$0xff] }
  0x1c   :  { %v1436_v40 = vrot.slane %v165_v47, %v2076_v33  ;;  %v2080_v47 = vsub.f32 %v1015_v14, %v1005_v12  ;;  %v2084_v14 = vsub.f32 %v1035_v19, %v1005_v12 }
  0x1e   :  { %v172_v32 = vmul.f32 %v1436_v40, %v2077_v63  ;;  %v173_v3 = vmul.f32 %v1436_v40, %v2078_v42  ;;  %v174_v33 = vmul.f32 %v1436_v40, %v2079_v5  ;;  %v175_v6 = vmul.f32 %v1436_v40, %v2080_v47 }
  0x1f   :  { %v176_v63 = vmul.f32 %v1436_v40, %v2081_v9  ;;  %v177_v42 = vmul.f32 %v1436_v40, %v2082_v11  ;;  %v178_v5 = vmul.f32 %v1436_v40, %v2083_v13  ;;  %v179_v47 = vmul.f32 %v1436_v40, %v2084_v14 }
  0x20   :  { %v242_v8 = vadd.f32 %v1447_v35, %v172_v32  ;;  %v243_v15 = vadd.f32 %v1447_v35, %v173_v3  ;;  %v244_v9 = vadd.f32 %v1447_v35, %v174_v33  ;;  %v245_v16 = vadd.f32 %v1447_v35, %v175_v6 }
  0x21   :  { %v246_v11 = vadd.f32 %v1447_v35, %v176_v63  ;;  %v247_v4 = vadd.f32 %v1447_v35, %v177_v42  ;;  %v248_v18 = vadd.f32 %v1447_v35, %v178_v5  ;;  %v249_v13 = vadd.f32 %v1447_v35, %v179_v47 }
  0x22   :  { %vm306_vm1 = vcmp.ge.f32.partialorder %v242_v8, 0.0  ;;  %v370_v19 = vmul.f32 0.1, %v242_v8  ;;  %vm307_vm2 = vcmp.ge.f32.partialorder %v243_v15, 0.0  ;;  %v371_v14 = vmul.f32 0.1, %v243_v15 }
  0x23   :  { %vm308_vm3 = vcmp.ge.f32.partialorder %v244_v9, 0.0  ;;  %v372_v32 = vmul.f32 0.1, %v244_v9  ;;  %vm309_vm4 = vcmp.ge.f32.partialorder %v245_v16, 0.0  ;;  %v373_v3 = vmul.f32 0.1, %v245_v16 }
  0x24   :  { %v434_v17 = vsel %vm306_vm1, %v242_v8, %v370_v19  ;;  %v435_v33 = vsel %vm307_vm2, %v243_v15, %v371_v14  ;;  %vm310_vm5 = vcmp.ge.f32.partialorder %v246_v11, 0.0  ;;  %v374_v6 = vmul.f32 0.1, %v246_v11 }
  0x25   :  { %v888_v10 = vpack.c.bf16 %v434_v17, %v434_v17  ;;  %v889_v63 = vpack.c.bf16 %v435_v33, %v435_v33  ;;  %v436_v2 = vsel %vm308_vm3, %v244_v9, %v372_v32  ;;  %v437_v42 = vsel %vm309_vm4, %v245_v16, %v373_v3 }
  0x26   :  { %v890_v1 = vpack.c.bf16 %v436_v2, %v436_v2  ;;  %v891_v5 = vpack.c.bf16 %v437_v42, %v437_v42  ;;  %v438_v0 = vsel %vm310_vm5, %v246_v11, %v374_v6  ;;  %vm311_vm6 = vcmp.ge.f32.partialorder %v247_v4, 0.0 }
  0x27   :  { %755 = vst.msk [vmem:[%s2038_s5] sm:$0xf] %vm754_vm0, %v888_v10  ;;  %756 = vst.msk [vmem:[%s2038_s5 + $0x4] sm:$0xf] %vm754_vm0, %v889_v63  ;;  %v892_v8 = vpack.c.bf16 %v438_v0, %v438_v0  ;;  %v375_v47 = vmul.f32 0.1, %v247_v4  ;;  %v2085_v10 = vsub.f32 %v1040_v20, %v1005_v12  ;;  %v2086_v15 = vsub.f32 %v1045_v21, %v1005_v12 }
  0x28   :  { %vm312_vm7 = vcmp.ge.f32.partialorder %v248_v18, 0.0  ;;  %v376_v17 = vmul.f32 0.1, %v248_v18  ;;  %757 = vst.msk [vmem:[%s2038_s5 + $0x8] sm:$0xf] %vm754_vm0, %v890_v1  ;;  %vm313_vm8 = vcmp.ge.f32.partialorder %v249_v13, 0.0  ;;  %v2087_v11 = vsub.f32 %v1050_v22, %v1005_v12 }
  0x29   :  { %758 = vst.msk [vmem:[%s2038_s5 + $0xc] sm:$0xf] %vm754_vm0, %v891_v5  ;;  %v377_v2 = vmul.f32 0.1, %v249_v13  ;;  %v180_v0 = vmul.f32 %v1436_v40, %v2085_v10  ;;  %v181_v9 = vmul.f32 %v1436_v40, %v2086_v15  ;;  %759 = vst.msk [vmem:[%s2038_s5 + $0x10] sm:$0xf] %vm754_vm0, %v892_v8  ;;  %v439_v1 = vsel %vm311_vm6, %v247_v4, %v375_v47 }
  0x2a   :  { %v440_v16 = vsel %vm312_vm7, %v248_v18, %v376_v17  ;;  %v182_v19 = vmul.f32 %v1436_v40, %v2087_v11  ;;  %v2088_v20 = vsub.f32 %v1055_v23, %v1005_v12  ;;  %v893_v21 = vpack.c.bf16 %v439_v1, %v439_v1 }
  0x2b   :  { %v894_v32 = vpack.c.bf16 %v440_v16, %v440_v16  ;;  %v441_v3 = vsel %vm313_vm8, %v249_v13, %v377_v2  ;;  %v250_v33 = vadd.f32 %v1447_v35, %v180_v0  ;;  %v251_v63 = vadd.f32 %v1447_v35, %v181_v9 }
  0x2c   :  { %v183_v14 = vmul.f32 %v1436_v40, %v2088_v20  ;;  %v895_v6 = vpack.c.bf16 %v441_v3, %v441_v3  ;;  %v252_v4 = vadd.f32 %v1447_v35, %v182_v19  ;;  %760 = vst.msk [vmem:[%s2038_s5 + $0x14] sm:$0xf] %vm754_vm0, %v893_v21  ;;  %v2089_v23 = vsub.f32 %v1060_v24, %v1005_v12 }
  0x2d   :  { %761 = vst.msk [vmem:[%s2038_s5 + $0x18] sm:$0xf] %vm754_vm0, %v894_v32  ;;  %vm314_vm9 = vcmp.ge.f32.partialorder %v250_v33, 0.0  ;;  %v378_v22 = vmul.f32 0.1, %v250_v33  ;;  %v2090_v42 = vsub.f32 %v1065_v25, %v1005_v12  ;;  %vm315_vm10 = vcmp.ge.f32.partialorder %v251_v63, 0.0 }
  0x2e   :  { %v253_v18 = vadd.f32 %v1447_v35, %v183_v14  ;;  %v184_v13 = vmul.f32 %v1436_v40, %v2089_v23  ;;  %762 = vst.msk [vmem:[%s2038_s5 + $0x1c] sm:$0xf] %vm754_vm0, %v895_v6  ;;  %v379_v8 = vmul.f32 0.1, %v251_v63  ;;  %vm316_vm11 = vcmp.ge.f32.partialorder %v252_v4, 0.0 }
  0x2f   :  { %v185_v5 = vmul.f32 %v1436_v40, %v2090_v42  ;;  %v380_v47 = vmul.f32 0.1, %v252_v4  ;;  %v442_v17 = vsel %vm314_vm9, %v250_v33, %v378_v22  ;;  %v2091_v14 = vsub.f32 %v1070_v26, %v1005_v12 }
  0x30   :  { %vm317_vm12 = vcmp.ge.f32.partialorder %v253_v18, 0.0  ;;  %v381_v2 = vmul.f32 0.1, %v253_v18  ;;  %v254_v24 = vadd.f32 %v1447_v35, %v184_v13  ;;  %v896_v10 = vpack.c.bf16 %v442_v17, %v442_v17 }
  0x31   :  { %v443_v0 = vsel %vm315_vm10, %v251_v63, %v379_v8  ;;  %v444_v15 = vsel %vm316_vm11, %v252_v4, %v380_v47  ;;  %v255_v25 = vadd.f32 %v1447_v35, %v185_v5  ;;  %v186_v21 = vmul.f32 %v1436_v40, %v2091_v14 }
  0x32   :  { %v897_v9 = vpack.c.bf16 %v443_v0, %v443_v0  ;;  %v898_v1 = vpack.c.bf16 %v444_v15, %v444_v15  ;;  %v445_v16 = vsel %vm317_vm12, %v253_v18, %v381_v2  ;;  %vm318_vm13 = vcmp.ge.f32.partialorder %v254_v24, 0.0  ;;  %763 = vst.msk [vmem:[%s2038_s5 + $0x20] sm:$0xf] %vm754_vm0, %v896_v10 }
  0x33   :  { %v899_v11 = vpack.c.bf16 %v445_v16, %v445_v16  ;;  %v382_v19 = vmul.f32 0.1, %v254_v24  ;;  %vm319_vm14 = vcmp.ge.f32.partialorder %v255_v25, 0.0  ;;  %v383_v20 = vmul.f32 0.1, %v255_v25 }
  0x34   :  { %764 = vst.msk [vmem:[%s2038_s5 + $0x24] sm:$0xf] %vm754_vm0, %v897_v9  ;;  %765 = vst.msk [vmem:[%s2038_s5 + $0x28] sm:$0xf] %vm754_vm0, %v898_v1  ;;  %v2092_v32 = vsub.f32 %v1079_v29, %v1005_v12  ;;  %v2093_v33 = vsub.f32 %v1084_v30, %v1005_v12  ;;  %v2094_v63 = vsub.f32 %v1089_v31, %v1005_v12 }
  0x35   :  { %766 = vst.msk [vmem:[%s2038_s5 + $0x2c] sm:$0xf] %vm754_vm0, %v899_v11  ;;  %v446_v26 = vsel %vm318_vm13, %v254_v24, %v382_v19  ;;  %v447_v18 = vsel %vm319_vm14, %v255_v25, %v383_v20  ;;  %v2095_v29 = vsub.f32 %v1102_v36, %v1005_v12  ;;  %v2096_v30 = vsub.f32 %v1107_v37, %v1005_v12 }
  0x36   :  { %v187_v3 = vmul.f32 %v1436_v40, %v2092_v32  ;;  %v188_v6 = vmul.f32 %v1436_v40, %v2093_v33  ;;  %v189_v4 = vmul.f32 %v1436_v40, %v2094_v63  ;;  %v900_v31 = vpack.c.bf16 %v446_v26, %v446_v26 }
  0x37   :  { %v190_v22 = vmul.f32 %v1436_v40, %v2095_v29  ;;  %v191_v23 = vmul.f32 %v1436_v40, %v2096_v30  ;;  %v901_v13 = vpack.c.bf16 %v447_v18, %v447_v18  ;;  %v256_v42 = vadd.f32 %v1447_v35, %v186_v21 }
  0x38   :  { %v257_v5 = vadd.f32 %v1447_v35, %v187_v3  ;;  %v258_v8 = vadd.f32 %v1447_v35, %v188_v6  ;;  %v259_v47 = vadd.f32 %v1447_v35, %v189_v4  ;;  %767 = vst.msk [vmem:[%s2038_s5 + $0x30] sm:$0xf] %vm754_vm0, %v900_v31  ;;  %v2097_v3 = vsub.f32 %v1112_v38, %v1005_v12 }
  0x39   :  { %v260_v17 = vadd.f32 %v1447_v35, %v190_v22  ;;  %v261_v36 = vadd.f32 %v1447_v35, %v191_v23  ;;  %768 = vst.msk [vmem:[%s2038_s5 + $0x34] sm:$0xf] %vm754_vm0, %v901_v13  ;;  %vm320_vm15 = vcmp.ge.f32.partialorder %v256_v42, 0.0  ;;  %v384_v37 = vmul.f32 0.1, %v256_v42 }
  0x3a   :  { %vm321_vm1 = vcmp.ge.f32.partialorder %v257_v5, 0.0  ;;  %v385_v2 = vmul.f32 0.1, %v257_v5  ;;  %vm322_vm2 = vcmp.ge.f32.partialorder %v258_v8, 0.0  ;;  %v386_v24 = vmul.f32 0.1, %v258_v8 }
  0x3b   :  { %vm323_vm3 = vcmp.ge.f32.partialorder %v259_v47, 0.0  ;;  %v387_v10 = vmul.f32 0.1, %v259_v47  ;;  %v448_v0 = vsel %vm320_vm15, %v256_v42, %v384_v37  ;;  %vm324_vm4 = vcmp.ge.f32.partialorder %v260_v17, 0.0 }
  0x3c   :  { %v449_v15 = vsel %vm321_vm1, %v257_v5, %v385_v2  ;;  %v388_v25 = vmul.f32 0.1, %v260_v17  ;;  %v902_v9 = vpack.c.bf16 %v448_v0, %v448_v0  ;;  %v450_v16 = vsel %vm322_vm2, %v258_v8, %v386_v24 }
  0x3d   :  { %v903_v1 = vpack.c.bf16 %v449_v15, %v449_v15  ;;  %v451_v11 = vsel %vm323_vm3, %v259_v47, %v387_v10  ;;  %v904_v19 = vpack.c.bf16 %v450_v16, %v450_v16  ;;  %vm325_vm5 = vcmp.ge.f32.partialorder %v261_v36, 0.0 }
  0x3e   :  { %v905_v20 = vpack.c.bf16 %v451_v11, %v451_v11  ;;  %v452_v14 = vsel %vm324_vm4, %v260_v17, %v388_v25  ;;  %769 = vst.msk [vmem:[%s2038_s5 + $0x38] sm:$0xf] %vm754_vm0, %v902_v9  ;;  %v389_v32 = vmul.f32 0.1, %v261_v36  ;;  %v192_v33 = vmul.f32 %v1436_v40, %v2097_v3 }
  0x3f   :  { %770 = vst.msk [vmem:[%s2038_s5 + $0x3c] sm:$0xf] %vm754_vm0, %v903_v1  ;;  %v906_v21 = vpack.c.bf16 %v452_v14, %v452_v14  ;;  %v2098_v6 = vsub.f32 %v1125_v43, %v1005_v12  ;;  %771 = vst.msk [vmem:[%s2038_s5 + $0x40] sm:$0xf] %vm754_vm0, %v904_v19  ;;  %v2099_v38 = vsub.f32 %v1130_v44, %v1005_v12 }
  0x40   :  { %772 = vst.msk [vmem:[%s2038_s5 + $0x44] sm:$0xf] %vm754_vm0, %v905_v20  ;;  %v2100_v43 = vsub.f32 %v1135_v45, %v1005_v12  ;;  %v2101_v18 = vsub.f32 %v1148_v50, %v1005_v12  ;;  %v2102_v22 = vsub.f32 %v1153_v51, %v1005_v12  ;;  %v453_v44 = vsel %vm325_vm5, %v261_v36, %v389_v32 }
  0x41   :  { %v193_v63 = vmul.f32 %v1436_v40, %v2098_v6  ;;  %v194_v4 = vmul.f32 %v1436_v40, %v2099_v38  ;;  %773 = vst.msk [vmem:[%s2038_s5 + $0x48] sm:$0xf] %vm754_vm0, %v906_v21  ;;  %v262_v45 = vadd.f32 %v1447_v35, %v192_v33  ;;  %v2103_v50 = vsub.f32 %v1158_v52, %v1005_v12 }
  0x42   :  { %v195_v26 = vmul.f32 %v1436_v40, %v2100_v43  ;;  %v196_v29 = vmul.f32 %v1436_v40, %v2101_v18  ;;  %v197_v30 = vmul.f32 %v1436_v40, %v2102_v22  ;;  %v907_v13 = vpack.c.bf16 %v453_v44, %v453_v44 }
  0x43   :  { %v263_v23 = vadd.f32 %v1447_v35, %v193_v63  ;;  %v198_v31 = vmul.f32 %v1436_v40, %v2103_v50  ;;  %v264_v51 = vadd.f32 %v1447_v35, %v194_v4  ;;  %vm326_vm6 = vcmp.ge.f32.partialorder %v262_v45, 0.0 }
  0x44   :  { %v265_v42 = vadd.f32 %v1447_v35, %v195_v26  ;;  %v266_v5 = vadd.f32 %v1447_v35, %v196_v29  ;;  %v390_v8 = vmul.f32 0.1, %v262_v45  ;;  %774 = vst.msk [vmem:[%s2038_s5 + $0x4c] sm:$0xf] %vm754_vm0, %v907_v13  ;;  %v267_v16 = vadd.f32 %v1447_v35, %v197_v30 }
  0x45   :  { %vm327_vm7 = vcmp.ge.f32.partialorder %v263_v23, 0.0  ;;  %v391_v47 = vmul.f32 0.1, %v263_v23  ;;  %vm328_vm8 = vcmp.ge.f32.partialorder %v264_v51, 0.0  ;;  %v392_v52 = vmul.f32 0.1, %v264_v51 }
  0x46   :  { %vm329_vm9 = vcmp.ge.f32.partialorder %v265_v42, 0.0  ;;  %v393_v17 = vmul.f32 0.1, %v265_v42  ;;  %v454_v36 = vsel %vm326_vm6, %v262_v45, %v390_v8  ;;  %vm330_vm10 = vcmp.ge.f32.partialorder %v266_v5, 0.0 }
  0x47   :  { %v455_v37 = vsel %vm327_vm7, %v263_v23, %v391_v47  ;;  %v394_v2 = vmul.f32 0.1, %v266_v5  ;;  %v908_v24 = vpack.c.bf16 %v454_v36, %v454_v36  ;;  %v456_v0 = vsel %vm328_vm8, %v264_v51, %v392_v52 }
  0x48   :  { %v909_v10 = vpack.c.bf16 %v455_v37, %v455_v37  ;;  %v457_v15 = vsel %vm329_vm9, %v265_v42, %v393_v17  ;;  %v910_v25 = vpack.c.bf16 %v456_v0, %v456_v0  ;;  %v268_v19 = vadd.f32 %v1447_v35, %v198_v31 }
  0x49   :  { %v911_v9 = vpack.c.bf16 %v457_v15, %v457_v15  ;;  %v458_v1 = vsel %vm330_vm10, %v266_v5, %v394_v2  ;;  %775 = vst.msk [vmem:[%s2038_s5 + $0x50] sm:$0xf] %vm754_vm0, %v908_v24  ;;  %v2104_v20 = vsub.f32 %v1171_v57, %v1005_v12  ;;  %v2105_v21 = vsub.f32 %v1176_v58, %v1005_v12 }
  0x4a   :  { %776 = vst.msk [vmem:[%s2038_s5 + $0x54] sm:$0xf] %vm754_vm0, %v909_v10  ;;  %v912_v11 = vpack.c.bf16 %v458_v1, %v458_v1  ;;  %777 = vst.msk [vmem:[%s2038_s5 + $0x58] sm:$0xf] %vm754_vm0, %v910_v25  ;;  %vm331_vm11 = vcmp.ge.f32.partialorder %v267_v16, 0.0  ;;  %v2106_v57 = vsub.f32 %v1181_v59, %v1005_v12  ;;  %v2107_v58 = vsub.f32 %v1240_v62, %v1005_v12 }
  0x4b   :  { %v199_v14 = vmul.f32 %v1436_v40, %v2104_v20  ;;  %v200_v32 = vmul.f32 %v1436_v40, %v2105_v21  ;;  %778 = vst.msk [vmem:[%s2038_s5 + $0x5c] sm:$0xf] %vm754_vm0, %v911_v9  ;;  %v395_v3 = vmul.f32 0.1, %v267_v16  ;;  %vm332_vm12 = vcmp.ge.f32.partialorder %v268_v19, 0.0 }
  0x4c   :  { %v201_v33 = vmul.f32 %v1436_v40, %v2106_v57  ;;  %v202_v6 = vmul.f32 %v1436_v40, %v2107_v58  ;;  %779 = vst.msk [vmem:[%s2038_s5 + $0x60] sm:$0xf] %vm754_vm0, %v912_v11  ;;  %v396_v63 = vmul.f32 0.1, %v268_v19  ;;  %v2108_v62 = vsub.f32 %v1245_v61, %v1005_v12 }
  0x4d   :  { %v269_v38 = vadd.f32 %v1447_v35, %v199_v14  ;;  %v270_v4 = vadd.f32 %v1447_v35, %v200_v32  ;;  %v459_v43 = vsel %vm331_vm11, %v267_v16, %v395_v3  ;;  %v2109_v42 = vsub.f32 %v1268_v60, %v1005_v12 }
  0x4e   :  { %v271_v59 = vadd.f32 %v1447_v35, %v201_v33  ;;  %v272_v26 = vadd.f32 %v1447_v35, %v202_v6  ;;  %v203_v18 = vmul.f32 %v1436_v40, %v2108_v62  ;;  %v913_v29 = vpack.c.bf16 %v459_v43, %v459_v43 }
  0x4f   :  { %v460_v22 = vsel %vm332_vm12, %v268_v19, %v396_v63  ;;  %vm333_vm13 = vcmp.ge.f32.partialorder %v269_v38, 0.0  ;;  %v397_v30 = vmul.f32 0.1, %v269_v38  ;;  %vm334_vm14 = vcmp.ge.f32.partialorder %v270_v4, 0.0 }
  0x50   :  { %v914_v44 = vpack.c.bf16 %v460_v22, %v460_v22  ;;  %v398_v45 = vmul.f32 0.1, %v270_v4  ;;  %vm335_vm15 = vcmp.ge.f32.partialorder %v271_v59, 0.0  ;;  %780 = vst.msk [vmem:[%s2038_s5 + $0x64] sm:$0xf] %vm754_vm0, %v913_v29  ;;  %vm336_vm1 = vcmp.ge.f32.partialorder %v272_v26, 0.0 }
  0x51   :  { %v461_v23 = vsel %vm333_vm13, %v269_v38, %v397_v30  ;;  %v399_v50 = vmul.f32 0.1, %v271_v59  ;;  %v400_v31 = vmul.f32 0.1, %v272_v26  ;;  %v273_v51 = vadd.f32 %v1447_v35, %v203_v18 }
  0x52   :  { %781 = vst.msk [vmem:[%s2038_s5 + $0x68] sm:$0xf] %vm754_vm0, %v914_v44  ;;  %v915_v61 = vpack.c.bf16 %v461_v23, %v461_v23  ;;  %v462_v13 = vsel %vm334_vm14, %v270_v4, %v398_v45  ;;  %v204_v5 = vmul.f32 %v1436_v40, %v2109_v42  ;;  %v2110_v17 = vsub.f32 %v1273_v56, %v1005_v12 }
  0x53   :  { %v916_v8 = vpack.c.bf16 %v462_v13, %v462_v13  ;;  %v463_v47 = vsel %vm335_vm15, %v271_v59, %v399_v50  ;;  %v464_v52 = vsel %vm336_vm1, %v272_v26, %v400_v31  ;;  %vm337_vm2 = vcmp.ge.f32.partialorder %v273_v51, 0.0 }
  0x54   :  { %v205_v36 = vmul.f32 %v1436_v40, %v2110_v17  ;;  %782 = vst.msk [vmem:[%s2038_s5 + $0x6c] sm:$0xf] %vm754_vm0, %v915_v61  ;;  %v917_v37 = vpack.c.bf16 %v463_v47, %v463_v47  ;;  %v918_v2 = vpack.c.bf16 %v464_v52, %v464_v52  ;;  %v401_v24 = vmul.f32 0.1, %v273_v51 }
  0x55   :  { %783 = vst.msk [vmem:[%s2038_s5 + $0x70] sm:$0xf] %vm754_vm0, %v916_v8  ;;  %v274_v60 = vadd.f32 %v1447_v35, %v204_v5  ;;  %v2111_v10 = vsub.f32 %v1278_v55, %v1005_v12  ;;  %v2112_v15 = vsub.f32 %v1306_v49, %v1005_v12  ;;  %v2113_v55 = vsub.f32 %v1311_v48, %v1005_v12 }
  0x56   :  { %v275_v56 = vadd.f32 %v1447_v35, %v205_v36  ;;  %784 = vst.msk [vmem:[%s2038_s5 + $0x74] sm:$0xf] %vm754_vm0, %v917_v37  ;;  %785 = vst.msk [vmem:[%s2038_s5 + $0x78] sm:$0xf] %vm754_vm0, %v918_v2  ;;  %v465_v9 = vsel %vm337_vm2, %v273_v51, %v401_v24  ;;  %v2114_v49 = vsub.f32 %v1362_v54, %v1005_v12 }
  0x57   :  { %v206_v0 = vmul.f32 %v1436_v40, %v2111_v10  ;;  %v207_v25 = vmul.f32 %v1436_v40, %v2112_v15  ;;  %v208_v1 = vmul.f32 %v1436_v40, %v2113_v55  ;;  %v2115_v11 = vsub.f32 %v1367_v34, %v1005_v12 }
  0x58   :  { %v209_v16 = vmul.f32 %v1436_v40, %v2114_v49  ;;  %v919_v20 = vpack.c.bf16 %v465_v9, %v465_v9  ;;  %vm338_vm3 = vcmp.ge.f32.partialorder %v274_v60, 0.0  ;;  %v402_v14 = vmul.f32 0.1, %v274_v60 }
  0x59   :  { %v210_v19 = vmul.f32 %v1436_v40, %v2115_v11  ;;  %vm339_vm4 = vcmp.ge.f32.partialorder %v275_v56, 0.0  ;;  %v403_v21 = vmul.f32 0.1, %v275_v56  ;;  %v276_v32 = vadd.f32 %v1447_v35, %v206_v0 }
  0x5a   :  { %v277_v48 = vadd.f32 %v1447_v35, %v207_v25  ;;  %v278_v3 = vadd.f32 %v1447_v35, %v208_v1  ;;  %786 = vst.msk [vmem:[%s2038_s5 + $0x7c] sm:$0xf] %vm754_vm0, %v919_v20  ;;  %v466_v54 = vsel %vm338_vm3, %v274_v60, %v402_v14  ;;  %v279_v34 = vadd.f32 %v1447_v35, %v209_v16  ;;  %v2123_v60 = vld [vmem:[#allocation2_spill] sm:$0xff] }
  0x5b   :  { %v280_v57 = vadd.f32 %v1447_v35, %v210_v19  ;;  %v2116_v33 = vsub.f32 %v1372_v41, %v1005_v12  ;;  %v920_v6 = vpack.c.bf16 %v466_v54, %v466_v54  ;;  %v467_v63 = vsel %vm339_vm4, %v275_v56, %v403_v21 }
  0x5c   :  { %vm340_vm5 = vcmp.ge.f32.partialorder %v276_v32, 0.0  ;;  %v404_v38 = vmul.f32 0.1, %v276_v32  ;;  %v921_v4 = vpack.c.bf16 %v467_v63, %v467_v63  ;;  %vm341_vm6 = vcmp.ge.f32.partialorder %v277_v48, 0.0 }
  0x5d   :  { %v211_v58 = vmul.f32 %v1436_v40, %v2116_v33  ;;  %v405_v43 = vmul.f32 0.1, %v277_v48  ;;  %vm342_vm7 = vcmp.ge.f32.partialorder %v278_v3, 0.0  ;;  %787 = vst.msk [vmem:[%s2038_s5 + $0x80] sm:$0xf] %vm754_vm0, %v920_v6  ;;  %vm343_vm8 = vcmp.ge.f32.partialorder %v279_v34, 0.0 }
  0x5e   :  { %v468_v59 = vsel %vm340_vm5, %v276_v32, %v404_v38  ;;  %v406_v26 = vmul.f32 0.1, %v278_v3  ;;  %v407_v62 = vmul.f32 0.1, %v279_v34  ;;  %788 = vst.msk [vmem:[%s2038_s5 + $0x84] sm:$0xf] %vm754_vm0, %v921_v4  ;;  %v2117_v61 = vsub.f32 %v1389_v28, %v1005_v12 }
  0x5f   :  { %v922_v41 = vpack.c.bf16 %v468_v59, %v468_v59  ;;  %v469_v18 = vsel %vm341_vm6, %v277_v48, %v405_v43  ;;  %vm344_vm9 = vcmp.ge.f32.partialorder %v280_v57, 0.0  ;;  %v408_v29 = vmul.f32 0.1, %v280_v57  ;;  %v2125_v33 = vld [vmem:[#allocation3_spill] sm:$0xff]  ;;  %v2127_v4 = vld [vmem:[#allocation4_spill] sm:$0xff] }
  0x60   :  { %v923_v22 = vpack.c.bf16 %v469_v18, %v469_v18  ;;  %v470_v30 = vsel %vm342_vm7, %v278_v3, %v406_v26  ;;  %v471_v44 = vsel %vm343_vm8, %v279_v34, %v407_v62  ;;  %v281_v45 = vadd.f32 %v1447_v35, %v211_v58  ;;  %v2129_v26 = vld [vmem:[#allocation5_spill] sm:$0xff] }
  0x61   :  { %789 = vst.msk [vmem:[%s2038_s5 + $0x88] sm:$0xf] %vm754_vm0, %v922_v41  ;;  %v924_v23 = vpack.c.bf16 %v470_v30, %v470_v30  ;;  %v925_v50 = vpack.c.bf16 %v471_v44, %v471_v44  ;;  %v472_v31 = vsel %vm344_vm9, %v280_v57, %v408_v29  ;;  %v212_v13 = vmul.f32 %v1436_v40, %v2117_v61 }
  0x62   :  { %790 = vst.msk [vmem:[%s2038_s5 + $0x8c] sm:$0xf] %vm754_vm0, %v923_v22  ;;  %v926_v51 = vpack.c.bf16 %v472_v31, %v472_v31  ;;  %vm345_vm10 = vcmp.ge.f32.partialorder %v281_v45, 0.0  ;;  %v409_v42 = vmul.f32 0.1, %v281_v45  ;;  %v2118_v5 = vsub.f32 %v1394_v27, %v1005_v12  ;;  %v2133_v31 = vld [vmem:[#allocation7_spill] sm:$0xff] }
  0x63   :  { %791 = vst.msk [vmem:[%s2038_s5 + $0x90] sm:$0xf] %vm754_vm0, %v924_v23  ;;  %792 = vst.msk [vmem:[%s2038_s5 + $0x94] sm:$0xf] %vm754_vm0, %v925_v50  ;;  %v282_v28 = vadd.f32 %v1447_v35, %v212_v13  ;;  %v2119_v47 = vsub.f32 %v1399_v53, %v1005_v12  ;;  %v2120_v27 = vsub.f32 %v1414_v39, %v1005_v12 }
  0x64   :  { %v213_v8 = vmul.f32 %v1436_v40, %v2118_v5  ;;  %v2121_v36 = vsub.f32 %v1419_v7, %v1005_v12  ;;  %793 = vst.msk [vmem:[%s2038_s5 + $0x98] sm:$0xf] %vm754_vm0, %v926_v51  ;;  %v473_v2 = vsel %vm345_vm10, %v281_v45, %v409_v42  ;;  %v2122_v24 = vsub.f32 %v1424_v46, %v1005_v12  ;;  %v2131_v45 = vld [vmem:[#allocation6_spill] sm:$0xff]  ;;  %v2135_v5 = vld [vmem:[#allocation8_spill] sm:$0xff] }
  0x65   :  { %v214_v52 = vmul.f32 %v1436_v40, %v2119_v47  ;;  %v215_v17 = vmul.f32 %v1436_v40, %v2120_v27  ;;  %v2124_v56 = vsub.f32 %v2123_v60, %v1005_v12  ;;  %v927_v10 = vpack.c.bf16 %v473_v2, %v473_v2 }
  0x66   :  { %v216_v37 = vmul.f32 %v1436_v40, %v2121_v36  ;;  %v283_v53 = vadd.f32 %v1447_v35, %v213_v8  ;;  %v217_v39 = vmul.f32 %v1436_v40, %v2122_v24  ;;  %vm346_vm11 = vcmp.ge.f32.partialorder %v282_v28, 0.0 }
  0x67   :  { %v218_v7 = vmul.f32 %v1436_v40, %v2124_v56  ;;  %v410_v0 = vmul.f32 0.1, %v282_v28  ;;  %v284_v15 = vadd.f32 %v1447_v35, %v214_v52  ;;  %v285_v9 = vadd.f32 %v1447_v35, %v215_v17  ;;  %794 = vst.msk [vmem:[%s2038_s5 + $0x9c] sm:$0xf] %vm754_vm0, %v927_v10 }
  0x68   :  { %vm347_vm12 = vcmp.ge.f32.partialorder %v283_v53, 0.0  ;;  %v411_v25 = vmul.f32 0.1, %v283_v53  ;;  %v286_v55 = vadd.f32 %v1447_v35, %v216_v37  ;;  %v287_v49 = vadd.f32 %v1447_v35, %v217_v39  ;;  %v2137_v39 = vld [vmem:[#allocation9_spill] sm:$0xff] }
  0x69   :  { %v474_v46 = vsel %vm346_vm11, %v282_v28, %v410_v0  ;;  %vm348_vm13 = vcmp.ge.f32.partialorder %v284_v15, 0.0  ;;  %v412_v1 = vmul.f32 0.1, %v284_v15  ;;  %vm349_vm14 = vcmp.ge.f32.partialorder %v285_v9, 0.0 }
  0x6a   :  { %v928_v16 = vpack.c.bf16 %v474_v46, %v474_v46  ;;  %v475_v11 = vsel %vm347_vm12, %v283_v53, %v411_v25  ;;  %v413_v19 = vmul.f32 0.1, %v285_v9  ;;  %vm350_vm15 = vcmp.ge.f32.partialorder %v286_v55, 0.0 }
  0x6b   :  { %v929_v20 = vpack.c.bf16 %v475_v11, %v475_v11  ;;  %v476_v14 = vsel %vm348_vm13, %v284_v15, %v412_v1  ;;  %v414_v21 = vmul.f32 0.1, %v286_v55  ;;  %vm351_vm1 = vcmp.ge.f32.partialorder %v287_v49, 0.0  ;;  %v2139_v1 = vld [vmem:[#allocation10_spill] sm:$0xff] }
  0x6c   :  { %795 = vst.msk [vmem:[%s2038_s5 + $0xa0] sm:$0xf] %vm754_vm0, %v928_v16  ;;  %v930_v32 = vpack.c.bf16 %v476_v14, %v476_v14  ;;  %v477_v48 = vsel %vm349_vm14, %v285_v9, %v413_v19  ;;  %v415_v3 = vmul.f32 0.1, %v287_v49  ;;  %v288_v57 = vadd.f32 %v1447_v35, %v218_v7 }
  0x6d   :  { %796 = vst.msk [vmem:[%s2038_s5 + $0xa4] sm:$0xf] %vm754_vm0, %v929_v20  ;;  %v931_v54 = vpack.c.bf16 %v477_v48, %v477_v48  ;;  %v478_v34 = vsel %vm350_vm15, %v286_v55, %v414_v21  ;;  %v2126_v58 = vsub.f32 %v2125_v33, %v1005_v12  ;;  %v2128_v43 = vsub.f32 %v2127_v4, %v1005_v12  ;;  %v2141_v20 = vld [vmem:[#allocation11_spill] sm:$0xff]  ;;  %v2145_v4 = vld [vmem:[#allocation13_spill] sm:$0xff] }
  0x6e   :  { %797 = vst.msk [vmem:[%s2038_s5 + $0xa8] sm:$0xf] %vm754_vm0, %v930_v32  ;;  %v932_v63 = vpack.c.bf16 %v478_v34, %v478_v34  ;;  %v479_v38 = vsel %vm351_vm1, %v287_v49, %v415_v3  ;;  %v2130_v62 = vsub.f32 %v2129_v26, %v1005_v12  ;;  %vm352_vm2 = vcmp.ge.f32.partialorder %v288_v57, 0.0  ;;  %v2143_v32 = vld [vmem:[#allocation12_spill] sm:$0xff]  ;;  %v2147_v26 = vld [vmem:[#allocation14_spill] sm:$0xff] }
  0x6f   :  { %v219_v6 = vmul.f32 %v1436_v40, %v2126_v58  ;;  %v220_v59 = vmul.f32 %v1436_v40, %v2128_v43  ;;  %798 = vst.msk [vmem:[%s2038_s5 + $0xac] sm:$0xf] %vm754_vm0, %v931_v54  ;;  %v933_v18 = vpack.c.bf16 %v479_v38, %v479_v38  ;;  %v416_v29 = vmul.f32 0.1, %v288_v57 }
  0x70   :  { %v221_v41 = vmul.f32 %v1436_v40, %v2130_v62  ;;  %799 = vst.msk [vmem:[%s2038_s5 + $0xb0] sm:$0xf] %vm754_vm0, %v932_v63  ;;  %v2132_v23 = vsub.f32 %v2131_v45, %v1005_v12  ;;  %v2134_v61 = vsub.f32 %v2133_v31, %v1005_v12  ;;  %v2136_v8 = vsub.f32 %v2135_v5, %v1005_v12 }
  0x71   :  { %v289_v22 = vadd.f32 %v1447_v35, %v219_v6  ;;  %v290_v30 = vadd.f32 %v1447_v35, %v220_v59  ;;  %800 = vst.msk [vmem:[%s2038_s5 + $0xb4] sm:$0xf] %vm754_vm0, %v933_v18  ;;  %v480_v51 = vsel %vm352_vm2, %v288_v57, %v416_v29  ;;  %v2138_v60 = vsub.f32 %v2137_v39, %v1005_v12  ;;  %v2149_v18 = vld [vmem:[#allocation15_spill] sm:$0xff] }
  0x72   :  { %v291_v44 = vadd.f32 %v1447_v35, %v221_v41  ;;  %v222_v50 = vmul.f32 %v1436_v40, %v2132_v23  ;;  %v223_v13 = vmul.f32 %v1436_v40, %v2134_v61  ;;  %v224_v28 = vmul.f32 %v1436_v40, %v2136_v8 }
  0x73   :  { %vm353_vm3 = vcmp.ge.f32.partialorder %v289_v22, 0.0  ;;  %v417_v42 = vmul.f32 0.1, %v289_v22  ;;  %v934_v47 = vpack.c.bf16 %v480_v51, %v480_v51  ;;  %vm354_vm4 = vcmp.ge.f32.partialorder %v290_v30, 0.0  ;;  %v2151_v51 = vld [vmem:[#allocation16_spill] sm:$0xff] }
  0x74   :  { %v418_v52 = vmul.f32 0.1, %v290_v30  ;;  %vm355_vm5 = vcmp.ge.f32.partialorder %v291_v44, 0.0  ;;  %v419_v17 = vmul.f32 0.1, %v291_v44  ;;  %v292_v36 = vadd.f32 %v1447_v35, %v222_v50 }
  0x75   :  { %v481_v27 = vsel %vm353_vm3, %v289_v22, %v417_v42  ;;  %v293_v37 = vadd.f32 %v1447_v35, %v223_v13  ;;  %801 = vst.msk [vmem:[%s2038_s5 + $0xb8] sm:$0xf] %vm754_vm0, %v934_v47  ;;  %v294_v24 = vadd.f32 %v1447_v35, %v224_v28  ;;  %v225_v56 = vmul.f32 %v1436_v40, %v2138_v60 }
  0x76   :  { %v935_v2 = vpack.c.bf16 %v481_v27, %v481_v27  ;;  %v482_v53 = vsel %vm354_vm4, %v290_v30, %v418_v52  ;;  %v483_v10 = vsel %vm355_vm5, %v291_v44, %v419_v17  ;;  %vm356_vm6 = vcmp.ge.f32.partialorder %v292_v36, 0.0 }
  0x77   :  { %v936_v7 = vpack.c.bf16 %v482_v53, %v482_v53  ;;  %v420_v0 = vmul.f32 0.1, %v292_v36  ;;  %v937_v15 = vpack.c.bf16 %v483_v10, %v483_v10  ;;  %vm357_vm7 = vcmp.ge.f32.partialorder %v293_v37, 0.0 }
  0x78   :  { %802 = vst.msk [vmem:[%s2038_s5 + $0xbc] sm:$0xf] %vm754_vm0, %v935_v2  ;;  %v421_v25 = vmul.f32 0.1, %v293_v37  ;;  %vm358_vm8 = vcmp.ge.f32.partialorder %v294_v24, 0.0  ;;  %v295_v46 = vadd.f32 %v1447_v35, %v225_v56  ;;  %v2140_v49 = vsub.f32 %v2139_v1, %v1005_v12  ;;  %v2155_v56 = vld [vmem:[#allocation18_spill] sm:$0xff] }
  0x79   :  { %803 = vst.msk [vmem:[%s2038_s5 + $0xc0] sm:$0xf] %vm754_vm0, %v936_v7  ;;  %v484_v9 = vsel %vm356_vm6, %v292_v36, %v420_v0  ;;  %v422_v55 = vmul.f32 0.1, %v294_v24  ;;  %804 = vst.msk [vmem:[%s2038_s5 + $0xc4] sm:$0xf] %vm754_vm0, %v937_v15  ;;  %v2142_v14 = vsub.f32 %v2141_v20, %v1005_v12  ;;  %v2144_v48 = vsub.f32 %v2143_v32, %v1005_v12 }
  0x7a   :  { %v226_v16 = vmul.f32 %v1436_v40, %v2140_v49  ;;  %v938_v11 = vpack.c.bf16 %v484_v9, %v484_v9  ;;  %v485_v19 = vsel %vm357_vm7, %v293_v37, %v421_v25  ;;  %vm359_vm9 = vcmp.ge.f32.partialorder %v295_v46, 0.0  ;;  %v2157_v0 = vld [vmem:[#allocation19_spill] sm:$0xff] }
  0x7b   :  { %v227_v21 = vmul.f32 %v1436_v40, %v2142_v14  ;;  %v228_v3 = vmul.f32 %v1436_v40, %v2144_v48  ;;  %v939_v54 = vpack.c.bf16 %v485_v19, %v485_v19  ;;  %v486_v34 = vsel %vm358_vm8, %v294_v24, %v422_v55  ;;  %v2153_v24 = vld [vmem:[#allocation17_spill] sm:$0xff] }
  0x7c   :  { %v423_v57 = vmul.f32 0.1, %v295_v46  ;;  %805 = vst.msk [vmem:[%s2038_s5 + $0xc8] sm:$0xf] %vm754_vm0, %v938_v11  ;;  %v940_v33 = vpack.c.bf16 %v486_v34, %v486_v34  ;;  %v296_v58 = vadd.f32 %v1447_v35, %v226_v16  ;;  %v2146_v43 = vsub.f32 %v2145_v4, %v1005_v12 }
  0x7d   :  { %v297_v6 = vadd.f32 %v1447_v35, %v227_v21  ;;  %v298_v63 = vadd.f32 %v1447_v35, %v228_v3  ;;  %806 = vst.msk [vmem:[%s2038_s5 + $0xcc] sm:$0xf] %vm754_vm0, %v939_v54  ;;  %v2148_v62 = vsub.f32 %v2147_v26, %v1005_v12  ;;  %v2150_v29 = vsub.f32 %v2149_v18, %v1005_v12 }
  0x7e   :  { %v487_v38 = vsel %vm359_vm9, %v295_v46, %v423_v57  ;;  %v229_v59 = vmul.f32 %v1436_v40, %v2146_v43  ;;  %807 = vst.msk [vmem:[%s2038_s5 + $0xd0] sm:$0xf] %vm754_vm0, %v940_v33  ;;  %vm360_vm10 = vcmp.ge.f32.partialorder %v296_v58, 0.0  ;;  %v424_v44 = vmul.f32 0.1, %v296_v58 }
  0x7f   :  { %v230_v41 = vmul.f32 %v1436_v40, %v2148_v62  ;;  %v231_v22 = vmul.f32 %v1436_v40, %v2150_v29  ;;  %v941_v30 = vpack.c.bf16 %v487_v38, %v487_v38  ;;  %vm361_vm11 = vcmp.ge.f32.partialorder %v297_v6, 0.0 }
  0x80   :  { %v425_v45 = vmul.f32 0.1, %v297_v6  ;;  %vm362_vm12 = vcmp.ge.f32.partialorder %v298_v63, 0.0  ;;  %v426_v23 = vmul.f32 0.1, %v298_v63  ;;  %v299_v50 = vadd.f32 %v1447_v35, %v229_v59 }
  0x81   :  { %808 = vst.msk [vmem:[%s2038_s5 + $0xd4] sm:$0xf] %vm754_vm0, %v941_v30  ;;  %v488_v31 = vsel %vm360_vm10, %v296_v58, %v424_v44  ;;  %v300_v61 = vadd.f32 %v1447_v35, %v230_v41  ;;  %v301_v13 = vadd.f32 %v1447_v35, %v231_v22  ;;  %v2152_v42 = vsub.f32 %v2151_v51, %v1005_v12 }
  0x82   :  { %v942_v8 = vpack.c.bf16 %v488_v31, %v488_v31  ;;  %v489_v28 = vsel %vm361_vm11, %v297_v6, %v425_v45  ;;  %v490_v47 = vsel %vm362_vm12, %v298_v63, %v426_v23  ;;  %vm363_vm13 = vcmp.ge.f32.partialorder %v299_v50, 0.0 }
  0x83   :  { %v232_v5 = vmul.f32 %v1436_v40, %v2152_v42  ;;  %v943_v52 = vpack.c.bf16 %v489_v28, %v489_v28  ;;  %v944_v27 = vpack.c.bf16 %v490_v47, %v490_v47  ;;  %v427_v17 = vmul.f32 0.1, %v299_v50 }
  0x84   :  { %vm364_vm14 = vcmp.ge.f32.partialorder %v300_v61, 0.0  ;;  %809 = vst.msk [vmem:[%s2038_s5 + $0xd8] sm:$0xf] %vm754_vm0, %v942_v8  ;;  %v428_v36 = vmul.f32 0.1, %v300_v61  ;;  %vm365_vm15 = vcmp.ge.f32.partialorder %v301_v13, 0.0  ;;  %v2154_v39 = vsub.f32 %v2153_v24, %v1005_v12 }
  0x85   :  { %v429_v37 = vmul.f32 0.1, %v301_v13  ;;  %v302_v2 = vadd.f32 %v1447_v35, %v232_v5  ;;  %810 = vst.msk [vmem:[%s2038_s5 + $0xdc] sm:$0xf] %vm754_vm0, %v943_v52  ;;  %811 = vst.msk [vmem:[%s2038_s5 + $0xe0] sm:$0xf] %vm754_vm0, %v944_v27  ;;  %v491_v53 = vsel %vm363_vm13, %v299_v50, %v427_v17  ;;  %v2156_v7 = vsub.f32 %v2155_v56, %v1005_v12 }
  0x86   :  { %v233_v60 = vmul.f32 %v1436_v40, %v2154_v39  ;;  %v2158_v15 = vsub.f32 %v2157_v0, %v1005_v12  ;;  %v945_v9 = vpack.c.bf16 %v491_v53, %v491_v53  ;;  %v492_v55 = vsel %vm364_vm14, %v300_v61, %v428_v36 }
  0x87   :  { %v234_v10 = vmul.f32 %v1436_v40, %v2156_v7  ;;  %v493_v46 = vsel %vm365_vm15, %v301_v13, %v429_v37  ;;  %vm366_vm1 = vcmp.ge.f32.partialorder %v302_v2, 0.0  ;;  %v946_v1 = vpack.c.bf16 %v492_v55, %v492_v55 }
  0x88   :  { %v235_v25 = vmul.f32 %v1436_v40, %v2158_v15  ;;  %v947_v49 = vpack.c.bf16 %v493_v46, %v493_v46  ;;  %v430_v16 = vmul.f32 0.1, %v302_v2  ;;  %v303_v11 = vadd.f32 %v1447_v35, %v233_v60  ;;  %812 = vst.msk [vmem:[%s2038_s5 + $0xe4] sm:$0xf] %vm754_vm0, %v945_v9 }
  0x89   :  { %v304_v19 = vadd.f32 %v1447_v35, %v234_v10  ;;  %813 = vst.msk [vmem:[%s2038_s5 + $0xe8] sm:$0xf] %vm754_vm0, %v946_v1 }
  0x8a   :  { %v305_v12 = vadd.f32 %v1447_v35, %v235_v25  ;;  %814 = vst.msk [vmem:[%s2038_s5 + $0xec] sm:$0xf] %vm754_vm0, %v947_v49  ;;  %v494_v40 = vsel %vm366_vm1, %v302_v2, %v430_v16  ;;  %vm367_vm2 = vcmp.ge.f32.partialorder %v303_v11, 0.0  ;;  %v431_v20 = vmul.f32 0.1, %v303_v11 }
  0x8b   :  { %v948_v14 = vpack.c.bf16 %v494_v40, %v494_v40  ;;  %vm368_vm3 = vcmp.ge.f32.partialorder %v304_v19, 0.0  ;;  %v432_v21 = vmul.f32 0.1, %v304_v19 }
  0x8c   :  { %vm369_vm4 = vcmp.ge.f32.partialorder %v305_v12, 0.0  ;;  %v495_v32 = vsel %vm367_vm2, %v303_v11, %v431_v20  ;;  %v433_v48 = vmul.f32 0.1, %v305_v12 }
  0x8d   :  { %815 = vst.msk [vmem:[%s2038_s5 + $0xf0] sm:$0xf] %vm754_vm0, %v948_v14  ;;  %v949_v35 = vpack.c.bf16 %v495_v32, %v495_v32  ;;  %v496_v3 = vsel %vm368_vm3, %v304_v19, %v432_v21 }
  0x8e   :  { %v950_v54 = vpack.c.bf16 %v496_v3, %v496_v3  ;;  %v497_v34 = vsel %vm369_vm4, %v305_v12, %v433_v48 }
  0x8f   :  { %816 = vst.msk [vmem:[%s2038_s5 + $0xf4] sm:$0xf] %vm754_vm0, %v949_v35  ;;  %v951_v57 = vpack.c.bf16 %v497_v34, %v497_v34 }
  0x90   :  { %817 = vst.msk [vmem:[%s2038_s5 + $0xf8] sm:$0xf] %vm754_vm0, %v950_v54 }
  0x91   :  { %818 = vst.msk [vmem:[%s2038_s5 + $0xfc] sm:$0xf] %vm754_vm0, %v951_v57 }

// kernel: residual_block.6
= control target key start
LH: loop header
LB: loop body
LE: loop exit
PB: predicated region body
PF: predicated region fallthrough
CT: control target
= control target key end

     0   :  { %vm16_vm0 = vcmask 130048   ;;  %v1242_v1 = vmov 0.0   ;;  %vm385_vm1 = vcmask 261120   ;;  %s1846_s1 = inlined_call_operand.vmem [shape: bf16[32,16], index: 1, kind: input, shape index: {}]   ;;  %s1847_s0 = inlined_call_operand.vmem [shape: bf16[512,32], index: 0, kind: input, shape index: {}]   ;;  %s1848_s2 = inlined_call_operand.vmem [shape: f32[512,16], index: 2, kind: output, shape index: {}]  }
   0x1   :  { %v1261_v0 = vld [vmem:[%s1846_s1 + $0x8] sm:$0xff]   ;;  %19 = vst.msk [vmem:[#allocation2 + $0x10] sm:$0xff] %vm16_vm0, %v1242_v1  ;;  %17 = vst.msk [vmem:[#allocation2] sm:$0xff] %vm16_vm0, %v1242_v1  ;;  %v1209_v2 = vld [vmem:[%s1846_s1] sm:$0xff]  }
   0x2   :  { %18 = vst.msk [vmem:[#allocation2 + $0x8] sm:$0xff] %vm16_vm0, %v1242_v1  ;;  %20 = vst.msk [vmem:[#allocation2 + $0x18] sm:$0xff] %vm16_vm0, %v1242_v1  ;;  %1135 = vmatprep.subr.bf16.mxu0 %v1261_v0  ;;  %1203 = vmatprep.subr.bf16.mxu1 %v1261_v0  ;;  %v1210_v3 = vld [vmem:[%s1847_s0] sm:$0xff]   ;;  %v1212_v5 = vld [vmem:[%s1847_s0 + $0x8] sm:$0xff]  }
   0x3   :  { %21 = vst.msk [vmem:[#allocation2 + $0x20] sm:$0xff] %vm16_vm0, %v1242_v1  ;;  %22 = vst.msk [vmem:[#allocation2 + $0x28] sm:$0xff] %vm16_vm0, %v1242_v1  ;;  %1136 = vmatpush3.bf16.msra.mxu0 %v1261_v0  ;;  %1205 = vmatpush3.bf16.msra.mxu1 %v1261_v0  ;;  %v1211_v4 = vld [vmem:[%s1847_s0 + $0x80] sm:$0xff]   ;;  %v1213_v6 = vld [vmem:[%s1847_s0 + $0x88] sm:$0xff]  }
   0x4   :  { %23 = vst.msk [vmem:[#allocation2 + $0x30] sm:$0xff] %vm16_vm0, %v1242_v1  ;;  %24 = vst.msk [vmem:[#allocation2 + $0x38] sm:$0xff] %vm16_vm0, %v1242_v1  ;;  %1137 = vmatprep.subr.bf16.mxu0 %v1209_v2  ;;  %1204 = vmatprep.subr.bf16.mxu1 %v1209_v2  ;;  %v1214_v7 = vld [vmem:[%s1847_s0 + $0x10] sm:$0xff]   ;;  %v1216_v9 = vld [vmem:[%s1847_s0 + $0x18] sm:$0xff]  }
   0x5   :  { %25 = vst.msk [vmem:[#allocation2 + $0x40] sm:$0xff] %vm16_vm0, %v1242_v1  ;;  %26 = vst.msk [vmem:[#allocation2 + $0x48] sm:$0xff] %vm16_vm0, %v1242_v1  ;;  %1139 = vmatprep.mubr.msk.bf16.mxu0 %vm385_vm1, %v1210_v3  ;;  %1171 = vmatprep.mubr.msk.bf16.mxu1 %vm385_vm1, %v1211_v4  ;;  %v1215_v8 = vld [vmem:[%s1847_s0 + $0x90] sm:$0xff]   ;;  %v1217_v10 = vld [vmem:[%s1847_s0 + $0x98] sm:$0xff]  }
   0x6   :  { %27 = vst.msk [vmem:[#allocation2 + $0x50] sm:$0xff] %vm16_vm0, %v1242_v1  ;;  %28 = vst.msk [vmem:[#allocation2 + $0x58] sm:$0xff] %vm16_vm0, %v1242_v1  ;;  %v1218_v11 = vld [vmem:[%s1847_s0 + $0x20] sm:$0xff]   ;;  %v1220_v13 = vld [vmem:[%s1847_s0 + $0x28] sm:$0xff]  }
   0x7   :  { %29 = vst.msk [vmem:[#allocation2 + $0x60] sm:$0xff] %vm16_vm0, %v1242_v1  ;;  %30 = vst.msk [vmem:[#allocation2 + $0x68] sm:$0xff] %vm16_vm0, %v1242_v1  ;;  %1138 = vmatpush3.bf16.msra.mxu0 %v1209_v2  ;;  %1206 = vmatpush3.bf16.msra.mxu1 %v1209_v2  ;;  %v1219_v12 = vld [vmem:[%s1847_s0 + $0xa0] sm:$0xff]   ;;  %v1221_v14 = vld [vmem:[%s1847_s0 + $0xa8] sm:$0xff]  }
   0x8   :  { %31 = vst.msk [vmem:[#allocation2 + $0x70] sm:$0xff] %vm16_vm0, %v1242_v1  ;;  %32 = vst.msk [vmem:[#allocation2 + $0x78] sm:$0xff] %vm16_vm0, %v1242_v1  ;;  %v1222_v15 = vld [vmem:[%s1847_s0 + $0x30] sm:$0xff]   ;;  %v1224_v17 = vld [vmem:[%s1847_s0 + $0x38] sm:$0xff]  }
   0x9   :  { %33 = vst.msk [vmem:[#allocation2 + $0x80] sm:$0xff] %vm16_vm0, %v1242_v1  ;;  %34 = vst.msk [vmem:[#allocation2 + $0x88] sm:$0xff] %vm16_vm0, %v1242_v1  ;;  %v1223_v16 = vld [vmem:[%s1847_s0 + $0xb0] sm:$0xff]   ;;  %v1225_v18 = vld [vmem:[%s1847_s0 + $0xb8] sm:$0xff]  }
   0xa   :  { %35 = vst.msk [vmem:[#allocation2 + $0x90] sm:$0xff] %vm16_vm0, %v1242_v1  ;;  %36 = vst.msk [vmem:[#allocation2 + $0x98] sm:$0xff] %vm16_vm0, %v1242_v1  ;;  %1140 = vmatmul.mubr.msk.bf16.vlgmr.msra.gmra.mxu0 %vm385_vm1, %v1212_v5  ;;  %1172 = vmatmul.mubr.msk.bf16.vlgmr.msra.gmra.mxu1 %vm385_vm1, %v1213_v6  ;;  %v1226_v19 = vld [vmem:[%s1847_s0 + $0x40] sm:$0xff]   ;;  %v1228_v21 = vld [vmem:[%s1847_s0 + $0x48] sm:$0xff]  }
   0xb   :  { %37 = vst.msk [vmem:[#allocation2 + $0xa0] sm:$0xff] %vm16_vm0, %v1242_v1  ;;  %38 = vst.msk [vmem:[#allocation2 + $0xa8] sm:$0xff] %vm16_vm0, %v1242_v1  ;;  %1143 = vmatprep.mubr.msk.bf16.mxu0 %vm385_vm1, %v1214_v7  ;;  %1175 = vmatprep.mubr.msk.bf16.mxu1 %vm385_vm1, %v1215_v8  ;;  %v1227_v20 = vld [vmem:[%s1847_s0 + $0xc0] sm:$0xff]   ;;  %v1229_v22 = vld [vmem:[%s1847_s0 + $0xc8] sm:$0xff]  }
   0xc   :  { %39 = vst.msk [vmem:[#allocation2 + $0xb0] sm:$0xff] %vm16_vm0, %v1242_v1  ;;  %40 = vst.msk [vmem:[#allocation2 + $0xb8] sm:$0xff] %vm16_vm0, %v1242_v1  ;;  %v1230_v23 = vld [vmem:[%s1847_s0 + $0x50] sm:$0xff]   ;;  %v1232_v25 = vld [vmem:[%s1847_s0 + $0x58] sm:$0xff]  }
   0xd   :  { %41 = vst.msk [vmem:[#allocation2 + $0xc0] sm:$0xff] %vm16_vm0, %v1242_v1  ;;  %42 = vst.msk [vmem:[#allocation2 + $0xc8] sm:$0xff] %vm16_vm0, %v1242_v1  ;;  %v1231_v24 = vld [vmem:[%s1847_s0 + $0xd0] sm:$0xff]   ;;  %v1233_v26 = vld [vmem:[%s1847_s0 + $0xd8] sm:$0xff]  }
   0xe   :  { %43 = vst.msk [vmem:[#allocation2 + $0xd0] sm:$0xff] %vm16_vm0, %v1242_v1  ;;  %44 = vst.msk [vmem:[#allocation2 + $0xd8] sm:$0xff] %vm16_vm0, %v1242_v1  ;;  %v1234_v27 = vld [vmem:[%s1847_s0 + $0x60] sm:$0xff]   ;;  %v1236_v29 = vld [vmem:[%s1847_s0 + $0x68] sm:$0xff]  }
   0xf   :  { %45 = vst.msk [vmem:[#allocation2 + $0xe0] sm:$0xff] %vm16_vm0, %v1242_v1  ;;  %46 = vst.msk [vmem:[#allocation2 + $0xe8] sm:$0xff] %vm16_vm0, %v1242_v1  ;;  %v1235_v28 = vld [vmem:[%s1847_s0 + $0xe0] sm:$0xff]   ;;  %v1237_v30 = vld [vmem:[%s1847_s0 + $0xe8] sm:$0xff]  }
  0x10   :  { %47 = vst.msk [vmem:[#allocation2 + $0xf0] sm:$0xff] %vm16_vm0, %v1242_v1  ;;  %48 = vst.msk [vmem:[#allocation2 + $0xf8] sm:$0xff] %vm16_vm0, %v1242_v1  ;;  %v1238_v31 = vld [vmem:[%s1847_s0 + $0x70] sm:$0xff]   ;;  %v1240_v33 = vld [vmem:[%s1847_s0 + $0x78] sm:$0xff]  }
  0x11   :  { %49 = vst.msk [vmem:[#allocation2 + $0x100] sm:$0xff] %vm16_vm0, %v1242_v1  ;;  %50 = vst.msk [vmem:[#allocation2 + $0x108] sm:$0xff] %vm16_vm0, %v1242_v1  ;;  %v1239_v32 = vld [vmem:[%s1847_s0 + $0xf0] sm:$0xff]   ;;  %v1241_v34 = vld [vmem:[%s1847_s0 + $0xf8] sm:$0xff]  }
  0x12   :  { %51 = vst.msk [vmem:[#allocation2 + $0x110] sm:$0xff] %vm16_vm0, %v1242_v1  ;;  %52 = vst.msk [vmem:[#allocation2 + $0x118] sm:$0xff] %vm16_vm0, %v1242_v1  ;;  %1144 = vmatmul.mubr.msk.bf16.gmra.mxu0 %vm385_vm1, %v1216_v9  ;;  %1176 = vmatmul.mubr.msk.bf16.gmra.mxu1 %vm385_vm1, %v1217_v10  ;;  %v83_v35 = vld [vmem:[#allocation2 + $0x10] sm:$0xff]  ;;  %v81_v39 = vld [vmem:[#allocation2] sm:$0xff] }
  0x13   :  { %53 = vst.msk [vmem:[#allocation2 + $0x120] sm:$0xff] %vm16_vm0, %v1242_v1  ;;  %54 = vst.msk [vmem:[#allocation2 + $0x128] sm:$0xff] %vm16_vm0, %v1242_v1  ;;  %1147 = vmatprep.mubr.msk.bf16.mxu0 %vm385_vm1, %v1218_v11  ;;  %1179 = vmatprep.mubr.msk.bf16.mxu1 %vm385_vm1, %v1219_v12  ;;  %v84_v45 = vld [vmem:[#allocation2 + $0x18] sm:$0xff]  ;;  %v82_v51 = vld [vmem:[#allocation2 + $0x8] sm:$0xff] }
  0x14   :  { %55 = vst.msk [vmem:[#allocation2 + $0x130] sm:$0xff] %vm16_vm0, %v1242_v1  ;;  %56 = vst.msk [vmem:[#allocation2 + $0x138] sm:$0xff] %vm16_vm0, %v1242_v1  ;;  %v87_v57 = vld [vmem:[#allocation2 + $0x30] sm:$0xff]  ;;  %v85_v63 = vld [vmem:[#allocation2 + $0x20] sm:$0xff] }
  0x15   :  { %57 = vst.msk [vmem:[#allocation2 + $0x140] sm:$0xff] %vm16_vm0, %v1242_v1  ;;  %58 = vst.msk [vmem:[#allocation2 + $0x148] sm:$0xff] %vm16_vm0, %v1242_v1  ;;  %v88_v3 = vld [vmem:[#allocation2 + $0x38] sm:$0xff]  ;;  %v86_v11 = vld [vmem:[#allocation2 + $0x28] sm:$0xff] }
  0x16   :  { %59 = vst.msk [vmem:[#allocation2 + $0x150] sm:$0xff] %vm16_vm0, %v1242_v1  ;;  %60 = vst.msk [vmem:[#allocation2 + $0x158] sm:$0xff] %vm16_vm0, %v1242_v1 }
  0x17   :  { %61 = vst.msk [vmem:[#allocation2 + $0x160] sm:$0xff] %vm16_vm0, %v1242_v1  ;;  %62 = vst.msk [vmem:[#allocation2 + $0x168] sm:$0xff] %vm16_vm0, %v1242_v1 }
  0x18   :  { %63 = vst.msk [vmem:[#allocation2 + $0x170] sm:$0xff] %vm16_vm0, %v1242_v1  ;;  %64 = vst.msk [vmem:[#allocation2 + $0x178] sm:$0xff] %vm16_vm0, %v1242_v1  ;;  %v113_v40 = vld [vmem:[#allocation2 + $0x100] sm:$0xff]  ;;  %v114_v52 = vld [vmem:[#allocation2 + $0x108] sm:$0xff] }
  0x19   :  { %65 = vst.msk [vmem:[#allocation2 + $0x180] sm:$0xff] %vm16_vm0, %v1242_v1  ;;  %66 = vst.msk [vmem:[#allocation2 + $0x188] sm:$0xff] %vm16_vm0, %v1242_v1  ;;  %v115_v36 = vld [vmem:[#allocation2 + $0x110] sm:$0xff]  ;;  %v116_v46 = vld [vmem:[#allocation2 + $0x118] sm:$0xff] }
  0x1a   :  { %67 = vst.msk [vmem:[#allocation2 + $0x190] sm:$0xff] %vm16_vm0, %v1242_v1  ;;  %68 = vst.msk [vmem:[#allocation2 + $0x198] sm:$0xff] %vm16_vm0, %v1242_v1  ;;  %1148 = vmatmul.mubr.msk.bf16.gmra.mxu0 %vm385_vm1, %v1220_v13  ;;  %1180 = vmatmul.mubr.msk.bf16.gmra.mxu1 %vm385_vm1, %v1221_v14  ;;  %v117_v0 = vld [vmem:[#allocation2 + $0x120] sm:$0xff] }
  0x1b   :  { %69 = vst.msk [vmem:[#allocation2 + $0x1a0] sm:$0xff] %vm16_vm0, %v1242_v1  ;;  %70 = vst.msk [vmem:[#allocation2 + $0x1a8] sm:$0xff] %vm16_vm0, %v1242_v1  ;;  %1151 = vmatprep.mubr.msk.bf16.mxu0 %vm385_vm1, %v1222_v15  ;;  %1183 = vmatprep.mubr.msk.bf16.mxu1 %vm385_vm1, %v1223_v16  ;;  %v119_v58 = vld [vmem:[#allocation2 + $0x130] sm:$0xff]  ;;  %v120_v8 = vld [vmem:[#allocation2 + $0x138] sm:$0xff] }
  0x1c   :  { %71 = vst.msk [vmem:[#allocation2 + $0x1b0] sm:$0xff] %vm16_vm0, %v1242_v1  ;;  %72 = vst.msk [vmem:[#allocation2 + $0x1b8] sm:$0xff] %vm16_vm0, %v1242_v1  ;;  %v118_v16 = vld [vmem:[#allocation2 + $0x128] sm:$0xff] }
  0x1d   :  { %73 = vst.msk [vmem:[#allocation2 + $0x1c0] sm:$0xff] %vm16_vm0, %v1242_v1  ;;  %74 = vst.msk [vmem:[#allocation2 + $0x1c8] sm:$0xff] %vm16_vm0, %v1242_v1 }
  0x1e   :  { %75 = vst.msk [vmem:[#allocation2 + $0x1d0] sm:$0xff] %vm16_vm0, %v1242_v1  ;;  %76 = vst.msk [vmem:[#allocation2 + $0x1d8] sm:$0xff] %vm16_vm0, %v1242_v1 }
  0x1f   :  { %77 = vst.msk [vmem:[#allocation2 + $0x1e0] sm:$0xff] %vm16_vm0, %v1242_v1  ;;  %78 = vst.msk [vmem:[#allocation2 + $0x1e8] sm:$0xff] %vm16_vm0, %v1242_v1 }
  0x20   :  { %79 = vst.msk [vmem:[#allocation2 + $0x1f0] sm:$0xff] %vm16_vm0, %v1242_v1  ;;  %80 = vst.msk [vmem:[#allocation2 + $0x1f8] sm:$0xff] %vm16_vm0, %v1242_v1 }
  0x22   :  { %1152 = vmatmul.mubr.msk.bf16.gmra.mxu0 %vm385_vm1, %v1224_v17  ;;  %1184 = vmatmul.mubr.msk.bf16.gmra.mxu1 %vm385_vm1, %v1225_v18 }
  0x23   :  { %1155 = vmatprep.mubr.msk.bf16.mxu0 %vm385_vm1, %v1226_v19  ;;  %1187 = vmatprep.mubr.msk.bf16.mxu1 %vm385_vm1, %v1227_v20  ;;  %v91_v19 = vld [vmem:[#allocation2 + $0x50] sm:$0xff] }
  0x2a   :  { %1156 = vmatmul.mubr.msk.bf16.gmra.mxu0 %vm385_vm1, %v1228_v21  ;;  %1188 = vmatmul.mubr.msk.bf16.gmra.mxu1 %vm385_vm1, %v1229_v22 }
  0x2b   :  { %1159 = vmatprep.mubr.msk.bf16.mxu0 %vm385_vm1, %v1230_v23  ;;  %1191 = vmatprep.mubr.msk.bf16.mxu1 %vm385_vm1, %v1231_v24  ;;  %v123_v24 = vld [vmem:[#allocation2 + $0x150] sm:$0xff] }
  0x32   :  { %1160 = vmatmul.mubr.msk.bf16.gmra.mxu0 %vm385_vm1, %v1232_v25  ;;  %1192 = vmatmul.mubr.msk.bf16.gmra.mxu1 %vm385_vm1, %v1233_v26 }
  0x33   :  { %1163 = vmatprep.mubr.msk.bf16.mxu0 %vm385_vm1, %v1234_v27  ;;  %1195 = vmatprep.mubr.msk.bf16.mxu1 %vm385_vm1, %v1235_v28  ;;  %v89_v27 = vld [vmem:[#allocation2 + $0x40] sm:$0xff] }
  0x3a   :  { %1164 = vmatmul.mubr.msk.bf16.gmra.mxu0 %vm385_vm1, %v1236_v29  ;;  %1196 = vmatmul.mubr.msk.bf16.gmra.mxu1 %vm385_vm1, %v1237_v30 }
  0x3b   :  { %1167 = vmatprep.mubr.msk.bf16.mxu0 %vm385_vm1, %v1238_v31  ;;  %1199 = vmatprep.mubr.msk.bf16.mxu1 %vm385_vm1, %v1239_v32  ;;  %v121_v32 = vld [vmem:[#allocation2 + $0x140] sm:$0xff] }
  0x42   :  { %1168 = vmatmul.mubr.msk.bf16.gmra.mxu0 %vm385_vm1, %v1240_v33  ;;  %1200 = vmatmul.mubr.msk.bf16.gmra.mxu1 %vm385_vm1, %v1241_v34 }
  0xca   :  { %v1141_v37 = vpop.f32.mrf.mxu0  ;;  %v1173_v38 = vpop.f32.mrf.mxu1 }
  0xcb   :  { %v773_v41 = vadd.f32 %v1141_v37, %v83_v35  ;;  %v805_v42 = vadd.f32 %v1173_v38, %v115_v36  ;;  %v92_v35 = vld [vmem:[#allocation2 + $0x58] sm:$0xff] }
  0xcc   :  { %v516_v43 = vpop.f32.mrf.mxu0  ;;  %v644_v44 = vpop.f32.mrf.mxu1 }
  0xcd   :  { %838 = vst.msk [vmem:[#allocation2 + $0x10] sm:$0xff] %vm16_vm0, %v773_v41  ;;  %870 = vst.msk [vmem:[#allocation2 + $0x110] sm:$0xff] %vm16_vm0, %v805_v42  ;;  %v771_v47 = vadd.f32 %v516_v43, %v81_v39  ;;  %v803_v48 = vadd.f32 %v644_v44, %v113_v40  ;;  %v124_v40 = vld [vmem:[#allocation2 + $0x158] sm:$0xff]  ;;  %v90_v43 = vld [vmem:[#allocation2 + $0x48] sm:$0xff] }
  0xce   :  { %v1142_v49 = vpop.f32.mrf.mxu0  ;;  %v1174_v50 = vpop.f32.mrf.mxu1 }
  0xcf   :  { %836 = vst.msk [vmem:[#allocation2] sm:$0xff] %vm16_vm0, %v771_v47  ;;  %868 = vst.msk [vmem:[#allocation2 + $0x100] sm:$0xff] %vm16_vm0, %v803_v48  ;;  %v774_v53 = vadd.f32 %v1142_v49, %v84_v45  ;;  %v806_v54 = vadd.f32 %v1174_v50, %v116_v46  ;;  %v122_v48 = vld [vmem:[#allocation2 + $0x148] sm:$0xff] }
  0xd0   :  { %v519_v55 = vpop.f32.mrf.mxu0  ;;  %v647_v56 = vpop.f32.mrf.mxu1 }
  0xd1   :  { %839 = vst.msk [vmem:[#allocation2 + $0x18] sm:$0xff] %vm16_vm0, %v774_v53  ;;  %871 = vst.msk [vmem:[#allocation2 + $0x118] sm:$0xff] %vm16_vm0, %v806_v54  ;;  %v772_v59 = vadd.f32 %v519_v55, %v82_v51  ;;  %v804_v60 = vadd.f32 %v647_v56, %v114_v52  ;;  %v95_v51 = vld [vmem:[#allocation2 + $0x70] sm:$0xff] }
  0xd2   :  { %v1145_v61 = vpop.f32.mrf.mxu0  ;;  %v1177_v62 = vpop.f32.mrf.mxu1  ;;  %v127_v56 = vld [vmem:[#allocation2 + $0x170] sm:$0xff] }
  0xd3   :  { %837 = vst.msk [vmem:[#allocation2 + $0x8] sm:$0xff] %vm16_vm0, %v772_v59  ;;  %869 = vst.msk [vmem:[#allocation2 + $0x108] sm:$0xff] %vm16_vm0, %v804_v60  ;;  %v777_v1 = vadd.f32 %v1145_v61, %v87_v57  ;;  %v809_v2 = vadd.f32 %v1177_v62, %v119_v58  ;;  %v93_v59 = vld [vmem:[#allocation2 + $0x60] sm:$0xff] }
  0xd4   :  { %v905_v4 = vld [vmem:[#allocation2 + $0x10] sm:$0xff]  ;;  %v532_v6 = vpop.f32.mrf.mxu0  ;;  %v660_v7 = vpop.f32.mrf.mxu1 }
  0xd5   :  { %v937_v5 = vld [vmem:[#allocation2 + $0x110] sm:$0xff]  ;;  %969 = vst.msk [vmem:[%s1848_s2 + $0x10] sm:$0xff] %vm16_vm0, %v905_v4  ;;  %842 = vst.msk [vmem:[#allocation2 + $0x30] sm:$0xff] %vm16_vm0, %v777_v1  ;;  %v775_v9 = vadd.f32 %v532_v6, %v85_v63  ;;  %v807_v10 = vadd.f32 %v660_v7, %v117_v0  ;;  %v125_v0 = vld [vmem:[#allocation2 + $0x160] sm:$0xff] }
  0xd6   :  { %1001 = vst.msk [vmem:[%s1848_s2 + $0x110] sm:$0xff] %vm16_vm0, %v937_v5  ;;  %874 = vst.msk [vmem:[#allocation2 + $0x130] sm:$0xff] %vm16_vm0, %v809_v2  ;;  %v903_v12 = vld [vmem:[#allocation2] sm:$0xff]  ;;  %v1146_v14 = vpop.f32.mrf.mxu0  ;;  %v1178_v15 = vpop.f32.mrf.mxu1 }
  0xd7   :  { %v935_v13 = vld [vmem:[#allocation2 + $0x100] sm:$0xff]  ;;  %967 = vst.msk [vmem:[%s1848_s2] sm:$0xff] %vm16_vm0, %v903_v12  ;;  %840 = vst.msk [vmem:[#allocation2 + $0x20] sm:$0xff] %vm16_vm0, %v775_v9  ;;  %v778_v17 = vadd.f32 %v1146_v14, %v88_v3  ;;  %v810_v18 = vadd.f32 %v1178_v15, %v120_v8  ;;  %v96_v3 = vld [vmem:[#allocation2 + $0x78] sm:$0xff] }
  0xd8   :  { %999 = vst.msk [vmem:[%s1848_s2 + $0x100] sm:$0xff] %vm16_vm0, %v935_v13  ;;  %872 = vst.msk [vmem:[#allocation2 + $0x120] sm:$0xff] %vm16_vm0, %v807_v10  ;;  %v906_v20 = vld [vmem:[#allocation2 + $0x18] sm:$0xff]  ;;  %v535_v22 = vpop.f32.mrf.mxu0  ;;  %v663_v23 = vpop.f32.mrf.mxu1 }
  0xd9   :  { %v938_v21 = vld [vmem:[#allocation2 + $0x118] sm:$0xff]  ;;  %970 = vst.msk [vmem:[%s1848_s2 + $0x18] sm:$0xff] %vm16_vm0, %v906_v20  ;;  %843 = vst.msk [vmem:[#allocation2 + $0x38] sm:$0xff] %vm16_vm0, %v778_v17  ;;  %v776_v25 = vadd.f32 %v535_v22, %v86_v11  ;;  %v808_v26 = vadd.f32 %v663_v23, %v118_v16  ;;  %v94_v11 = vld [vmem:[#allocation2 + $0x68] sm:$0xff] }
  0xda   :  { %1002 = vst.msk [vmem:[%s1848_s2 + $0x118] sm:$0xff] %vm16_vm0, %v938_v21  ;;  %875 = vst.msk [vmem:[#allocation2 + $0x138] sm:$0xff] %vm16_vm0, %v810_v18  ;;  %v904_v28 = vld [vmem:[#allocation2 + $0x8] sm:$0xff]  ;;  %v1149_v30 = vpop.f32.mrf.mxu0  ;;  %v1181_v31 = vpop.f32.mrf.mxu1  ;;  %v128_v8 = vld [vmem:[#allocation2 + $0x178] sm:$0xff] }
  0xdb   :  { %v936_v29 = vld [vmem:[#allocation2 + $0x108] sm:$0xff]  ;;  %968 = vst.msk [vmem:[%s1848_s2 + $0x8] sm:$0xff] %vm16_vm0, %v904_v28  ;;  %841 = vst.msk [vmem:[#allocation2 + $0x28] sm:$0xff] %vm16_vm0, %v776_v25  ;;  %v781_v33 = vadd.f32 %v1149_v30, %v91_v19  ;;  %v813_v34 = vadd.f32 %v1181_v31, %v123_v24  ;;  %v99_v19 = vld [vmem:[#allocation2 + $0x90] sm:$0xff] }
  0xdc   :  { %1000 = vst.msk [vmem:[%s1848_s2 + $0x108] sm:$0xff] %vm16_vm0, %v936_v29  ;;  %873 = vst.msk [vmem:[#allocation2 + $0x128] sm:$0xff] %vm16_vm0, %v808_v26  ;;  %v909_v36 = vld [vmem:[#allocation2 + $0x30] sm:$0xff]  ;;  %v548_v38 = vpop.f32.mrf.mxu0  ;;  %v676_v39 = vpop.f32.mrf.mxu1  ;;  %v126_v16 = vld [vmem:[#allocation2 + $0x168] sm:$0xff] }
  0xdd   :  { %v941_v37 = vld [vmem:[#allocation2 + $0x130] sm:$0xff]  ;;  %973 = vst.msk [vmem:[%s1848_s2 + $0x30] sm:$0xff] %vm16_vm0, %v909_v36  ;;  %846 = vst.msk [vmem:[#allocation2 + $0x50] sm:$0xff] %vm16_vm0, %v781_v33  ;;  %v779_v41 = vadd.f32 %v548_v38, %v89_v27  ;;  %v811_v42 = vadd.f32 %v676_v39, %v121_v32  ;;  %v97_v27 = vld [vmem:[#allocation2 + $0x80] sm:$0xff] }
  0xde   :  { %1005 = vst.msk [vmem:[%s1848_s2 + $0x130] sm:$0xff] %vm16_vm0, %v941_v37  ;;  %878 = vst.msk [vmem:[#allocation2 + $0x150] sm:$0xff] %vm16_vm0, %v813_v34  ;;  %v907_v44 = vld [vmem:[#allocation2 + $0x20] sm:$0xff]  ;;  %v1150_v46 = vpop.f32.mrf.mxu0  ;;  %v1182_v47 = vpop.f32.mrf.mxu1  ;;  %v131_v24 = vld [vmem:[#allocation2 + $0x190] sm:$0xff] }
  0xdf   :  { %v939_v45 = vld [vmem:[#allocation2 + $0x120] sm:$0xff]  ;;  %971 = vst.msk [vmem:[%s1848_s2 + $0x20] sm:$0xff] %vm16_vm0, %v907_v44  ;;  %844 = vst.msk [vmem:[#allocation2 + $0x40] sm:$0xff] %vm16_vm0, %v779_v41  ;;  %v782_v49 = vadd.f32 %v1150_v46, %v92_v35  ;;  %v814_v50 = vadd.f32 %v1182_v47, %v124_v40  ;;  %v100_v35 = vld [vmem:[#allocation2 + $0x98] sm:$0xff] }
  0xe0   :  { %1003 = vst.msk [vmem:[%s1848_s2 + $0x120] sm:$0xff] %vm16_vm0, %v939_v45  ;;  %876 = vst.msk [vmem:[#allocation2 + $0x140] sm:$0xff] %vm16_vm0, %v811_v42  ;;  %v910_v52 = vld [vmem:[#allocation2 + $0x38] sm:$0xff]  ;;  %v551_v54 = vpop.f32.mrf.mxu0  ;;  %v679_v55 = vpop.f32.mrf.mxu1  ;;  %v129_v32 = vld [vmem:[#allocation2 + $0x180] sm:$0xff] }
  0xe1   :  { %v942_v53 = vld [vmem:[#allocation2 + $0x138] sm:$0xff]  ;;  %974 = vst.msk [vmem:[%s1848_s2 + $0x38] sm:$0xff] %vm16_vm0, %v910_v52  ;;  %847 = vst.msk [vmem:[#allocation2 + $0x58] sm:$0xff] %vm16_vm0, %v782_v49  ;;  %v780_v57 = vadd.f32 %v551_v54, %v90_v43  ;;  %v812_v58 = vadd.f32 %v679_v55, %v122_v48  ;;  %v98_v43 = vld [vmem:[#allocation2 + $0x88] sm:$0xff] }
  0xe2   :  { %1006 = vst.msk [vmem:[%s1848_s2 + $0x138] sm:$0xff] %vm16_vm0, %v942_v53  ;;  %879 = vst.msk [vmem:[#allocation2 + $0x158] sm:$0xff] %vm16_vm0, %v814_v50  ;;  %v908_v60 = vld [vmem:[#allocation2 + $0x28] sm:$0xff]  ;;  %v1153_v62 = vpop.f32.mrf.mxu0  ;;  %v1185_v63 = vpop.f32.mrf.mxu1  ;;  %v132_v40 = vld [vmem:[#allocation2 + $0x198] sm:$0xff] }
  0xe3   :  { %v940_v61 = vld [vmem:[#allocation2 + $0x128] sm:$0xff]  ;;  %972 = vst.msk [vmem:[%s1848_s2 + $0x28] sm:$0xff] %vm16_vm0, %v908_v60  ;;  %845 = vst.msk [vmem:[#allocation2 + $0x48] sm:$0xff] %vm16_vm0, %v780_v57  ;;  %v785_v1 = vadd.f32 %v1153_v62, %v95_v51  ;;  %v817_v2 = vadd.f32 %v1185_v63, %v127_v56  ;;  %v103_v51 = vld [vmem:[#allocation2 + $0xb0] sm:$0xff] }
  0xe4   :  { %1004 = vst.msk [vmem:[%s1848_s2 + $0x128] sm:$0xff] %vm16_vm0, %v940_v61  ;;  %877 = vst.msk [vmem:[#allocation2 + $0x148] sm:$0xff] %vm16_vm0, %v812_v58  ;;  %v913_v4 = vld [vmem:[#allocation2 + $0x50] sm:$0xff]  ;;  %v564_v6 = vpop.f32.mrf.mxu0  ;;  %v692_v7 = vpop.f32.mrf.mxu1  ;;  %v130_v48 = vld [vmem:[#allocation2 + $0x188] sm:$0xff] }
  0xe5   :  { %v945_v5 = vld [vmem:[#allocation2 + $0x150] sm:$0xff]  ;;  %977 = vst.msk [vmem:[%s1848_s2 + $0x50] sm:$0xff] %vm16_vm0, %v913_v4  ;;  %850 = vst.msk [vmem:[#allocation2 + $0x70] sm:$0xff] %vm16_vm0, %v785_v1  ;;  %v783_v9 = vadd.f32 %v564_v6, %v93_v59  ;;  %v815_v10 = vadd.f32 %v692_v7, %v125_v0  ;;  %v101_v59 = vld [vmem:[#allocation2 + $0xa0] sm:$0xff] }
  0xe6   :  { %1009 = vst.msk [vmem:[%s1848_s2 + $0x150] sm:$0xff] %vm16_vm0, %v945_v5  ;;  %882 = vst.msk [vmem:[#allocation2 + $0x170] sm:$0xff] %vm16_vm0, %v817_v2  ;;  %v911_v12 = vld [vmem:[#allocation2 + $0x40] sm:$0xff]  ;;  %v1154_v14 = vpop.f32.mrf.mxu0  ;;  %v1186_v15 = vpop.f32.mrf.mxu1  ;;  %v135_v56 = vld [vmem:[#allocation2 + $0x1b0] sm:$0xff] }
  0xe7   :  { %v943_v13 = vld [vmem:[#allocation2 + $0x140] sm:$0xff]  ;;  %975 = vst.msk [vmem:[%s1848_s2 + $0x40] sm:$0xff] %vm16_vm0, %v911_v12  ;;  %848 = vst.msk [vmem:[#allocation2 + $0x60] sm:$0xff] %vm16_vm0, %v783_v9  ;;  %v786_v17 = vadd.f32 %v1154_v14, %v96_v3  ;;  %v818_v18 = vadd.f32 %v1186_v15, %v128_v8  ;;  %v104_v3 = vld [vmem:[#allocation2 + $0xb8] sm:$0xff] }
  0xe8   :  { %1007 = vst.msk [vmem:[%s1848_s2 + $0x140] sm:$0xff] %vm16_vm0, %v943_v13  ;;  %880 = vst.msk [vmem:[#allocation2 + $0x160] sm:$0xff] %vm16_vm0, %v815_v10  ;;  %v914_v20 = vld [vmem:[#allocation2 + $0x58] sm:$0xff]  ;;  %v567_v22 = vpop.f32.mrf.mxu0  ;;  %v695_v23 = vpop.f32.mrf.mxu1  ;;  %v133_v0 = vld [vmem:[#allocation2 + $0x1a0] sm:$0xff] }
  0xe9   :  { %v946_v21 = vld [vmem:[#allocation2 + $0x158] sm:$0xff]  ;;  %978 = vst.msk [vmem:[%s1848_s2 + $0x58] sm:$0xff] %vm16_vm0, %v914_v20  ;;  %851 = vst.msk [vmem:[#allocation2 + $0x78] sm:$0xff] %vm16_vm0, %v786_v17  ;;  %v784_v25 = vadd.f32 %v567_v22, %v94_v11  ;;  %v816_v26 = vadd.f32 %v695_v23, %v126_v16  ;;  %v102_v11 = vld [vmem:[#allocation2 + $0xa8] sm:$0xff] }
  0xea   :  { %1010 = vst.msk [vmem:[%s1848_s2 + $0x158] sm:$0xff] %vm16_vm0, %v946_v21  ;;  %883 = vst.msk [vmem:[#allocation2 + $0x178] sm:$0xff] %vm16_vm0, %v818_v18  ;;  %v912_v28 = vld [vmem:[#allocation2 + $0x48] sm:$0xff]  ;;  %v1157_v30 = vpop.f32.mrf.mxu0  ;;  %v1189_v31 = vpop.f32.mrf.mxu1  ;;  %v136_v8 = vld [vmem:[#allocation2 + $0x1b8] sm:$0xff] }
  0xeb   :  { %v944_v29 = vld [vmem:[#allocation2 + $0x148] sm:$0xff]  ;;  %976 = vst.msk [vmem:[%s1848_s2 + $0x48] sm:$0xff] %vm16_vm0, %v912_v28  ;;  %849 = vst.msk [vmem:[#allocation2 + $0x68] sm:$0xff] %vm16_vm0, %v784_v25  ;;  %v789_v33 = vadd.f32 %v1157_v30, %v99_v19  ;;  %v821_v34 = vadd.f32 %v1189_v31, %v131_v24  ;;  %v107_v19 = vld [vmem:[#allocation2 + $0xd0] sm:$0xff] }
  0xec   :  { %1008 = vst.msk [vmem:[%s1848_s2 + $0x148] sm:$0xff] %vm16_vm0, %v944_v29  ;;  %881 = vst.msk [vmem:[#allocation2 + $0x168] sm:$0xff] %vm16_vm0, %v816_v26  ;;  %v917_v36 = vld [vmem:[#allocation2 + $0x70] sm:$0xff]  ;;  %v580_v38 = vpop.f32.mrf.mxu0  ;;  %v708_v39 = vpop.f32.mrf.mxu1  ;;  %v134_v16 = vld [vmem:[#allocation2 + $0x1a8] sm:$0xff] }
  0xed   :  { %v949_v37 = vld [vmem:[#allocation2 + $0x170] sm:$0xff]  ;;  %981 = vst.msk [vmem:[%s1848_s2 + $0x70] sm:$0xff] %vm16_vm0, %v917_v36  ;;  %854 = vst.msk [vmem:[#allocation2 + $0x90] sm:$0xff] %vm16_vm0, %v789_v33  ;;  %v787_v41 = vadd.f32 %v580_v38, %v97_v27  ;;  %v819_v42 = vadd.f32 %v708_v39, %v129_v32  ;;  %v105_v27 = vld [vmem:[#allocation2 + $0xc0] sm:$0xff] }
  0xee   :  { %1013 = vst.msk [vmem:[%s1848_s2 + $0x170] sm:$0xff] %vm16_vm0, %v949_v37  ;;  %886 = vst.msk [vmem:[#allocation2 + $0x190] sm:$0xff] %vm16_vm0, %v821_v34  ;;  %v915_v44 = vld [vmem:[#allocation2 + $0x60] sm:$0xff]  ;;  %v1158_v46 = vpop.f32.mrf.mxu0  ;;  %v1190_v47 = vpop.f32.mrf.mxu1  ;;  %v139_v24 = vld [vmem:[#allocation2 + $0x1d0] sm:$0xff] }
  0xef   :  { %v947_v45 = vld [vmem:[#allocation2 + $0x160] sm:$0xff]  ;;  %979 = vst.msk [vmem:[%s1848_s2 + $0x60] sm:$0xff] %vm16_vm0, %v915_v44  ;;  %852 = vst.msk [vmem:[#allocation2 + $0x80] sm:$0xff] %vm16_vm0, %v787_v41  ;;  %v790_v49 = vadd.f32 %v1158_v46, %v100_v35  ;;  %v822_v50 = vadd.f32 %v1190_v47, %v132_v40  ;;  %v108_v35 = vld [vmem:[#allocation2 + $0xd8] sm:$0xff] }
  0xf0   :  { %1011 = vst.msk [vmem:[%s1848_s2 + $0x160] sm:$0xff] %vm16_vm0, %v947_v45  ;;  %884 = vst.msk [vmem:[#allocation2 + $0x180] sm:$0xff] %vm16_vm0, %v819_v42  ;;  %v918_v52 = vld [vmem:[#allocation2 + $0x78] sm:$0xff]  ;;  %v583_v54 = vpop.f32.mrf.mxu0  ;;  %v711_v55 = vpop.f32.mrf.mxu1  ;;  %v137_v32 = vld [vmem:[#allocation2 + $0x1c0] sm:$0xff] }
  0xf1   :  { %v950_v53 = vld [vmem:[#allocation2 + $0x178] sm:$0xff]  ;;  %982 = vst.msk [vmem:[%s1848_s2 + $0x78] sm:$0xff] %vm16_vm0, %v918_v52  ;;  %855 = vst.msk [vmem:[#allocation2 + $0x98] sm:$0xff] %vm16_vm0, %v790_v49  ;;  %v788_v57 = vadd.f32 %v583_v54, %v98_v43  ;;  %v820_v58 = vadd.f32 %v711_v55, %v130_v48  ;;  %v106_v43 = vld [vmem:[#allocation2 + $0xc8] sm:$0xff] }
  0xf2   :  { %1014 = vst.msk [vmem:[%s1848_s2 + $0x178] sm:$0xff] %vm16_vm0, %v950_v53  ;;  %887 = vst.msk [vmem:[#allocation2 + $0x198] sm:$0xff] %vm16_vm0, %v822_v50  ;;  %v916_v60 = vld [vmem:[#allocation2 + $0x68] sm:$0xff]  ;;  %v1161_v62 = vpop.f32.mrf.mxu0  ;;  %v1193_v63 = vpop.f32.mrf.mxu1  ;;  %v140_v40 = vld [vmem:[#allocation2 + $0x1d8] sm:$0xff] }
  0xf3   :  { %v948_v61 = vld [vmem:[#allocation2 + $0x168] sm:$0xff]  ;;  %980 = vst.msk [vmem:[%s1848_s2 + $0x68] sm:$0xff] %vm16_vm0, %v916_v60  ;;  %853 = vst.msk [vmem:[#allocation2 + $0x88] sm:$0xff] %vm16_vm0, %v788_v57  ;;  %v793_v1 = vadd.f32 %v1161_v62, %v103_v51  ;;  %v825_v2 = vadd.f32 %v1193_v63, %v135_v56  ;;  %v111_v51 = vld [vmem:[#allocation2 + $0xf0] sm:$0xff] }
  0xf4   :  { %1012 = vst.msk [vmem:[%s1848_s2 + $0x168] sm:$0xff] %vm16_vm0, %v948_v61  ;;  %885 = vst.msk [vmem:[#allocation2 + $0x188] sm:$0xff] %vm16_vm0, %v820_v58  ;;  %v921_v4 = vld [vmem:[#allocation2 + $0x90] sm:$0xff]  ;;  %v596_v6 = vpop.f32.mrf.mxu0  ;;  %v724_v7 = vpop.f32.mrf.mxu1  ;;  %v138_v48 = vld [vmem:[#allocation2 + $0x1c8] sm:$0xff] }
  0xf5   :  { %v953_v5 = vld [vmem:[#allocation2 + $0x190] sm:$0xff]  ;;  %985 = vst.msk [vmem:[%s1848_s2 + $0x90] sm:$0xff] %vm16_vm0, %v921_v4  ;;  %858 = vst.msk [vmem:[#allocation2 + $0xb0] sm:$0xff] %vm16_vm0, %v793_v1  ;;  %v791_v9 = vadd.f32 %v596_v6, %v101_v59  ;;  %v823_v10 = vadd.f32 %v724_v7, %v133_v0  ;;  %v109_v59 = vld [vmem:[#allocation2 + $0xe0] sm:$0xff] }
  0xf6   :  { %1017 = vst.msk [vmem:[%s1848_s2 + $0x190] sm:$0xff] %vm16_vm0, %v953_v5  ;;  %890 = vst.msk [vmem:[#allocation2 + $0x1b0] sm:$0xff] %vm16_vm0, %v825_v2  ;;  %v919_v12 = vld [vmem:[#allocation2 + $0x80] sm:$0xff]  ;;  %v1162_v14 = vpop.f32.mrf.mxu0  ;;  %v1194_v15 = vpop.f32.mrf.mxu1  ;;  %v143_v56 = vld [vmem:[#allocation2 + $0x1f0] sm:$0xff] }
  0xf7   :  { %v951_v13 = vld [vmem:[#allocation2 + $0x180] sm:$0xff]  ;;  %983 = vst.msk [vmem:[%s1848_s2 + $0x80] sm:$0xff] %vm16_vm0, %v919_v12  ;;  %856 = vst.msk [vmem:[#allocation2 + $0xa0] sm:$0xff] %vm16_vm0, %v791_v9  ;;  %v794_v17 = vadd.f32 %v1162_v14, %v104_v3  ;;  %v826_v18 = vadd.f32 %v1194_v15, %v136_v8  ;;  %v112_v3 = vld [vmem:[#allocation2 + $0xf8] sm:$0xff] }
  0xf8   :  { %1015 = vst.msk [vmem:[%s1848_s2 + $0x180] sm:$0xff] %vm16_vm0, %v951_v13  ;;  %888 = vst.msk [vmem:[#allocation2 + $0x1a0] sm:$0xff] %vm16_vm0, %v823_v10  ;;  %v922_v20 = vld [vmem:[#allocation2 + $0x98] sm:$0xff]  ;;  %v599_v22 = vpop.f32.mrf.mxu0  ;;  %v727_v23 = vpop.f32.mrf.mxu1  ;;  %v141_v0 = vld [vmem:[#allocation2 + $0x1e0] sm:$0xff] }
  0xf9   :  { %v954_v21 = vld [vmem:[#allocation2 + $0x198] sm:$0xff]  ;;  %986 = vst.msk [vmem:[%s1848_s2 + $0x98] sm:$0xff] %vm16_vm0, %v922_v20  ;;  %859 = vst.msk [vmem:[#allocation2 + $0xb8] sm:$0xff] %vm16_vm0, %v794_v17  ;;  %v792_v25 = vadd.f32 %v599_v22, %v102_v11  ;;  %v824_v26 = vadd.f32 %v727_v23, %v134_v16  ;;  %v110_v11 = vld [vmem:[#allocation2 + $0xe8] sm:$0xff] }
  0xfa   :  { %1018 = vst.msk [vmem:[%s1848_s2 + $0x198] sm:$0xff] %vm16_vm0, %v954_v21  ;;  %891 = vst.msk [vmem:[#allocation2 + $0x1b8] sm:$0xff] %vm16_vm0, %v826_v18  ;;  %v920_v28 = vld [vmem:[#allocation2 + $0x88] sm:$0xff]  ;;  %v1165_v30 = vpop.f32.mrf.mxu0  ;;  %v1197_v31 = vpop.f32.mrf.mxu1  ;;  %v144_v8 = vld [vmem:[#allocation2 + $0x1f8] sm:$0xff] }
  0xfb   :  { %v952_v29 = vld [vmem:[#allocation2 + $0x188] sm:$0xff]  ;;  %984 = vst.msk [vmem:[%s1848_s2 + $0x88] sm:$0xff] %vm16_vm0, %v920_v28  ;;  %857 = vst.msk [vmem:[#allocation2 + $0xa8] sm:$0xff] %vm16_vm0, %v792_v25  ;;  %v797_v33 = vadd.f32 %v1165_v30, %v107_v19  ;;  %v829_v34 = vadd.f32 %v1197_v31, %v139_v24 }
  0xfc   :  { %1016 = vst.msk [vmem:[%s1848_s2 + $0x188] sm:$0xff] %vm16_vm0, %v952_v29  ;;  %889 = vst.msk [vmem:[#allocation2 + $0x1a8] sm:$0xff] %vm16_vm0, %v824_v26  ;;  %v925_v36 = vld [vmem:[#allocation2 + $0xb0] sm:$0xff]  ;;  %v612_v38 = vpop.f32.mrf.mxu0  ;;  %v740_v39 = vpop.f32.mrf.mxu1  ;;  %v142_v16 = vld [vmem:[#allocation2 + $0x1e8] sm:$0xff] }
  0xfd   :  { %v957_v37 = vld [vmem:[#allocation2 + $0x1b0] sm:$0xff]  ;;  %989 = vst.msk [vmem:[%s1848_s2 + $0xb0] sm:$0xff] %vm16_vm0, %v925_v36  ;;  %862 = vst.msk [vmem:[#allocation2 + $0xd0] sm:$0xff] %vm16_vm0, %v797_v33  ;;  %v795_v41 = vadd.f32 %v612_v38, %v105_v27  ;;  %v827_v42 = vadd.f32 %v740_v39, %v137_v32 }
  0xfe   :  { %1021 = vst.msk [vmem:[%s1848_s2 + $0x1b0] sm:$0xff] %vm16_vm0, %v957_v37  ;;  %894 = vst.msk [vmem:[#allocation2 + $0x1d0] sm:$0xff] %vm16_vm0, %v829_v34  ;;  %v923_v44 = vld [vmem:[#allocation2 + $0xa0] sm:$0xff]  ;;  %v1166_v46 = vpop.f32.mrf.mxu0  ;;  %v1198_v47 = vpop.f32.mrf.mxu1 }
  0xff   :  { %v955_v45 = vld [vmem:[#allocation2 + $0x1a0] sm:$0xff]  ;;  %987 = vst.msk [vmem:[%s1848_s2 + $0xa0] sm:$0xff] %vm16_vm0, %v923_v44  ;;  %860 = vst.msk [vmem:[#allocation2 + $0xc0] sm:$0xff] %vm16_vm0, %v795_v41  ;;  %v798_v49 = vadd.f32 %v1166_v46, %v108_v35  ;;  %v830_v50 = vadd.f32 %v1198_v47, %v140_v40 }
 0x100   :  { %1019 = vst.msk [vmem:[%s1848_s2 + $0x1a0] sm:$0xff] %vm16_vm0, %v955_v45  ;;  %892 = vst.msk [vmem:[#allocation2 + $0x1c0] sm:$0xff] %vm16_vm0, %v827_v42  ;;  %v926_v52 = vld [vmem:[#allocation2 + $0xb8] sm:$0xff]  ;;  %v615_v54 = vpop.f32.mrf.mxu0  ;;  %v743_v55 = vpop.f32.mrf.mxu1 }
 0x101   :  { %v958_v53 = vld [vmem:[#allocation2 + $0x1b8] sm:$0xff]  ;;  %990 = vst.msk [vmem:[%s1848_s2 + $0xb8] sm:$0xff] %vm16_vm0, %v926_v52  ;;  %863 = vst.msk [vmem:[#allocation2 + $0xd8] sm:$0xff] %vm16_vm0, %v798_v49  ;;  %v796_v57 = vadd.f32 %v615_v54, %v106_v43  ;;  %v828_v58 = vadd.f32 %v743_v55, %v138_v48 }
 0x102   :  { %1022 = vst.msk [vmem:[%s1848_s2 + $0x1b8] sm:$0xff] %vm16_vm0, %v958_v53  ;;  %895 = vst.msk [vmem:[#allocation2 + $0x1d8] sm:$0xff] %vm16_vm0, %v830_v50  ;;  %v924_v60 = vld [vmem:[#allocation2 + $0xa8] sm:$0xff]  ;;  %v1169_v62 = vpop.f32.mrf.mxu0  ;;  %v1201_v63 = vpop.f32.mrf.mxu1 }
 0x103   :  { %v956_v61 = vld [vmem:[#allocation2 + $0x1a8] sm:$0xff]  ;;  %988 = vst.msk [vmem:[%s1848_s2 + $0xa8] sm:$0xff] %vm16_vm0, %v924_v60  ;;  %861 = vst.msk [vmem:[#allocation2 + $0xc8] sm:$0xff] %vm16_vm0, %v796_v57  ;;  %v801_v1 = vadd.f32 %v1169_v62, %v111_v51  ;;  %v833_v2 = vadd.f32 %v1201_v63, %v143_v56 }
 0x104   :  { %1020 = vst.msk [vmem:[%s1848_s2 + $0x1a8] sm:$0xff] %vm16_vm0, %v956_v61  ;;  %893 = vst.msk [vmem:[#allocation2 + $0x1c8] sm:$0xff] %vm16_vm0, %v828_v58  ;;  %v929_v4 = vld [vmem:[#allocation2 + $0xd0] sm:$0xff]  ;;  %v628_v6 = vpop.f32.mrf.mxu0  ;;  %v756_v7 = vpop.f32.mrf.mxu1 }
 0x105   :  { %v961_v5 = vld [vmem:[#allocation2 + $0x1d0] sm:$0xff]  ;;  %993 = vst.msk [vmem:[%s1848_s2 + $0xd0] sm:$0xff] %vm16_vm0, %v929_v4  ;;  %866 = vst.msk [vmem:[#allocation2 + $0xf0] sm:$0xff] %vm16_vm0, %v801_v1  ;;  %v799_v9 = vadd.f32 %v628_v6, %v109_v59  ;;  %v831_v10 = vadd.f32 %v756_v7, %v141_v0 }
 0x106   :  { %1025 = vst.msk [vmem:[%s1848_s2 + $0x1d0] sm:$0xff] %vm16_vm0, %v961_v5  ;;  %898 = vst.msk [vmem:[#allocation2 + $0x1f0] sm:$0xff] %vm16_vm0, %v833_v2  ;;  %v927_v12 = vld [vmem:[#allocation2 + $0xc0] sm:$0xff]  ;;  %v1170_v14 = vpop.f32.mrf.mxu0  ;;  %v1202_v15 = vpop.f32.mrf.mxu1 }
 0x107   :  { %v959_v13 = vld [vmem:[#allocation2 + $0x1c0] sm:$0xff]  ;;  %991 = vst.msk [vmem:[%s1848_s2 + $0xc0] sm:$0xff] %vm16_vm0, %v927_v12  ;;  %864 = vst.msk [vmem:[#allocation2 + $0xe0] sm:$0xff] %vm16_vm0, %v799_v9  ;;  %v802_v17 = vadd.f32 %v1170_v14, %v112_v3  ;;  %v834_v18 = vadd.f32 %v1202_v15, %v144_v8 }
 0x108   :  { %1023 = vst.msk [vmem:[%s1848_s2 + $0x1c0] sm:$0xff] %vm16_vm0, %v959_v13  ;;  %896 = vst.msk [vmem:[#allocation2 + $0x1e0] sm:$0xff] %vm16_vm0, %v831_v10  ;;  %v930_v19 = vld [vmem:[#allocation2 + $0xd8] sm:$0xff]  ;;  %v631_v21 = vpop.f32.mrf.mxu0  ;;  %v759_v22 = vpop.f32.mrf.mxu1 }
 0x109   :  { %v962_v20 = vld [vmem:[#allocation2 + $0x1d8] sm:$0xff]  ;;  %994 = vst.msk [vmem:[%s1848_s2 + $0xd8] sm:$0xff] %vm16_vm0, %v930_v19  ;;  %867 = vst.msk [vmem:[#allocation2 + $0xf8] sm:$0xff] %vm16_vm0, %v802_v17  ;;  %v800_v23 = vadd.f32 %v631_v21, %v110_v11  ;;  %v832_v24 = vadd.f32 %v759_v22, %v142_v16 }
 0x10a   :  { %1026 = vst.msk [vmem:[%s1848_s2 + $0x1d8] sm:$0xff] %vm16_vm0, %v962_v20  ;;  %899 = vst.msk [vmem:[#allocation2 + $0x1f8] sm:$0xff] %vm16_vm0, %v834_v18  ;;  %v928_v25 = vld [vmem:[#allocation2 + $0xc8] sm:$0xff] }
 0x10b   :  { %v960_v26 = vld [vmem:[#allocation2 + $0x1c8] sm:$0xff]  ;;  %992 = vst.msk [vmem:[%s1848_s2 + $0xc8] sm:$0xff] %vm16_vm0, %v928_v25  ;;  %865 = vst.msk [vmem:[#allocation2 + $0xe8] sm:$0xff] %vm16_vm0, %v800_v23 }
 0x10c   :  { %1024 = vst.msk [vmem:[%s1848_s2 + $0x1c8] sm:$0xff] %vm16_vm0, %v960_v26  ;;  %897 = vst.msk [vmem:[#allocation2 + $0x1e8] sm:$0xff] %vm16_vm0, %v832_v24  ;;  %v933_v27 = vld [vmem:[#allocation2 + $0xf0] sm:$0xff] }
 0x10d   :  { %v965_v28 = vld [vmem:[#allocation2 + $0x1f0] sm:$0xff]  ;;  %997 = vst.msk [vmem:[%s1848_s2 + $0xf0] sm:$0xff] %vm16_vm0, %v933_v27 }
 0x10e   :  { %1029 = vst.msk [vmem:[%s1848_s2 + $0x1f0] sm:$0xff] %vm16_vm0, %v965_v28  ;;  %v931_v29 = vld [vmem:[#allocation2 + $0xe0] sm:$0xff] }
 0x10f   :  { %v963_v30 = vld [vmem:[#allocation2 + $0x1e0] sm:$0xff]  ;;  %995 = vst.msk [vmem:[%s1848_s2 + $0xe0] sm:$0xff] %vm16_vm0, %v931_v29 }
 0x110   :  { %1027 = vst.msk [vmem:[%s1848_s2 + $0x1e0] sm:$0xff] %vm16_vm0, %v963_v30  ;;  %v934_v31 = vld [vmem:[#allocation2 + $0xf8] sm:$0xff] }
 0x111   :  { %v966_v32 = vld [vmem:[#allocation2 + $0x1f8] sm:$0xff]  ;;  %998 = vst.msk [vmem:[%s1848_s2 + $0xf8] sm:$0xff] %vm16_vm0, %v934_v31 }
 0x112   :  { %1030 = vst.msk [vmem:[%s1848_s2 + $0x1f8] sm:$0xff] %vm16_vm0, %v966_v32  ;;  %v932_v33 = vld [vmem:[#allocation2 + $0xe8] sm:$0xff] }
 0x113   :  { %v964_v34 = vld [vmem:[#allocation2 + $0x1e8] sm:$0xff]  ;;  %996 = vst.msk [vmem:[%s1848_s2 + $0xe8] sm:$0xff] %vm16_vm0, %v932_v33 }
 0x114   :  { %1028 = vst.msk [vmem:[%s1848_s2 + $0x1e8] sm:$0xff] %vm16_vm0, %v964_v34 }

// kernel: residual_block.10
= control target key start
LH: loop header
LB: loop body
LE: loop exit
PB: predicated region body
PF: predicated region fallthrough
CT: control target
= control target key end

     0   :  { %vm14_vm0 = vcmask 253952   ;;  %vm82_vm1 = vcmask 261120   ;;  %v428_v0 = vmov 0.0   ;;  %s1318_s0 = inlined_call_operand.vmem [shape: f32[512,32], index: 0, kind: input, shape index: {}]   ;;  %s1319_s1 = inlined_call_operand.vmem [shape: f32[1,32], index: 1, kind: output, shape index: {0}]   ;;  %s1320_s2 = inlined_call_operand.vmem [shape: f32[1,32], index: 2, kind: output, shape index: {1}]  }
   0x1   :  { %15 = vst.msk [vmem:[%s1319_s1] sm:$0x1] %vm14_vm0, %v428_v0  ;;  %16 = vst.msk [vmem:[%s1320_s2] sm:$0x1] %vm14_vm0, %v428_v0  ;;  %v455_v1 = vld [vmem:[%s1318_s0] sm:$0xff]  ;;  %v460_v2 = vld [vmem:[%s1318_s0 + $0x8] sm:$0xff] }
   0x2   :  { %v465_v3 = vld [vmem:[%s1318_s0 + $0x10] sm:$0xff]  ;;  %v83_v4 = vsel %vm82_vm1, %v455_v1, 0.0  ;;  %v84_v5 = vsel %vm82_vm1, %v460_v2, 0.0  ;;  %v476_v7 = vld [vmem:[%s1318_s0 + $0x18] sm:$0xff]  ;;  %v483_v10 = vld [vmem:[%s1318_s0 + $0x20] sm:$0xff] }
   0x3   :  { %v86_v6 = vsel %vm82_vm1, %v465_v3, 0.0  ;;  %v85_v8 = vadd.f32 %v84_v5, %v83_v4  ;;  %v88_v9 = vsel %vm82_vm1, %v476_v7, 0.0  ;;  %v90_v12 = vsel %vm82_vm1, %v483_v10, 0.0  ;;  %v490_v13 = vld [vmem:[%s1318_s0 + $0x28] sm:$0xff]  ;;  %v497_v16 = vld [vmem:[%s1318_s0 + $0x30] sm:$0xff]  ;;  %v502_v18 = vld [vmem:[%s1318_s0 + $0x38] sm:$0xff] }
   0x4   :  { %v92_v15 = vsel %vm82_vm1, %v490_v13, 0.0  ;;  %v507_v19 = vld [vmem:[%s1318_s0 + $0x40] sm:$0xff]  ;;  %v94_v20 = vsel %vm82_vm1, %v497_v16, 0.0  ;;  %v514_v21 = vld [vmem:[%s1318_s0 + $0x48] sm:$0xff]  ;;  %v519_v22 = vld [vmem:[%s1318_s0 + $0x50] sm:$0xff]  ;;  %v96_v25 = vsel %vm82_vm1, %v502_v18, 0.0 }
   0x5   :  { %v87_v11 = vadd.f32 %v86_v6, %v85_v8  ;;  %v524_v23 = vld [vmem:[%s1318_s0 + $0x58] sm:$0xff]  ;;  %v98_v26 = vsel %vm82_vm1, %v507_v19, 0.0  ;;  %v533_v27 = vld [vmem:[%s1318_s0 + $0x108] sm:$0xff]  ;;  %v538_v28 = vld [vmem:[%s1318_s0 + $0x110] sm:$0xff]  ;;  %v100_v30 = vsel %vm82_vm1, %v514_v21, 0.0  ;;  %v102_v31 = vsel %vm82_vm1, %v519_v22, 0.0 }
   0x6   :  { %v543_v29 = vld [vmem:[%s1318_s0 + $0x118] sm:$0xff]  ;;  %v551_v32 = vsel %vm82_vm1, %v524_v23, 0.0  ;;  %v556_v33 = vld [vmem:[%s1318_s0 + $0x120] sm:$0xff]  ;;  %v561_v34 = vld [vmem:[%s1318_s0 + $0x128] sm:$0xff]  ;;  %v570_v37 = vsel %vm82_vm1, %v533_v27, 0.0  ;;  %v574_v38 = vsel %vm82_vm1, %v538_v28, 0.0 }
   0x7   :  { %v89_v14 = vadd.f32 %v88_v9, %v87_v11  ;;  %v566_v35 = vld [vmem:[%s1318_s0 + $0x130] sm:$0xff]  ;;  %1339 = vst [vmem:[#allocation2_spill] sm:$0xff] %v570_v37  ;;  %1340 = vst [vmem:[#allocation3_spill] sm:$0xff] %v574_v38  ;;  %v578_v39 = vsel %vm82_vm1, %v543_v29, 0.0  ;;  %v583_v40 = vld [vmem:[%s1318_s0 + $0x138] sm:$0xff]  ;;  %v597_v43 = vsel %vm82_vm1, %v556_v33, 0.0  ;;  %v222_v37 = vmul.f32 %v465_v3, %v465_v3 }
   0x8   :  { %1341 = vst [vmem:[#allocation4_spill] sm:$0xff] %v578_v39  ;;  %v588_v41 = vld [vmem:[%s1318_s0 + $0x140] sm:$0xff]  ;;  %v593_v42 = vld [vmem:[%s1318_s0 + $0x148] sm:$0xff]  ;;  %1342 = vst [vmem:[#allocation5_spill] sm:$0xff] %v597_v43  ;;  %v601_v44 = vsel %vm82_vm1, %v561_v34, 0.0  ;;  %v605_v45 = vsel %vm82_vm1, %v566_v35, 0.0 }
   0x9   :  { %v91_v17 = vadd.f32 %v90_v12, %v89_v14  ;;  %1343 = vst [vmem:[#allocation6_spill] sm:$0xff] %v601_v44  ;;  %1344 = vst [vmem:[#allocation7_spill] sm:$0xff] %v605_v45  ;;  %v610_v46 = vld [vmem:[%s1318_s0 + $0x150] sm:$0xff]  ;;  %v615_v47 = vld [vmem:[%s1318_s0 + $0x158] sm:$0xff]  ;;  %v624_v50 = vsel %vm82_vm1, %v583_v40, 0.0  ;;  %v628_v51 = vsel %vm82_vm1, %v588_v41, 0.0 }
   0xa   :  { %v620_v48 = vld [vmem:[%s1318_s0 + $0x160] sm:$0xff]  ;;  %1345 = vst [vmem:[#allocation8_spill] sm:$0xff] %v624_v50  ;;  %1346 = vst [vmem:[#allocation9_spill] sm:$0xff] %v628_v51  ;;  %v632_v52 = vsel %vm82_vm1, %v593_v42, 0.0  ;;  %v637_v53 = vld [vmem:[%s1318_s0 + $0x168] sm:$0xff]  ;;  %v651_v56 = vsel %vm82_vm1, %v610_v46, 0.0 }
   0xb   :  { %v93_v24 = vadd.f32 %v92_v15, %v91_v17  ;;  %1347 = vst [vmem:[#allocation10_spill] sm:$0xff] %v632_v52  ;;  %v642_v54 = vld [vmem:[%s1318_s0 + $0x170] sm:$0xff]  ;;  %v647_v55 = vld [vmem:[%s1318_s0 + $0x178] sm:$0xff]  ;;  %1348 = vst [vmem:[#allocation11_spill] sm:$0xff] %v651_v56  ;;  %v655_v57 = vsel %vm82_vm1, %v615_v47, 0.0  ;;  %v659_v58 = vsel %vm82_vm1, %v620_v48, 0.0 }
   0xc   :  { %1349 = vst [vmem:[#allocation12_spill] sm:$0xff] %v655_v57  ;;  %1350 = vst [vmem:[#allocation13_spill] sm:$0xff] %v659_v58  ;;  %v664_v59 = vld [vmem:[%s1318_s0 + $0x180] sm:$0xff]  ;;  %v669_v60 = vld [vmem:[%s1318_s0 + $0x188] sm:$0xff]  ;;  %v678_v63 = vsel %vm82_vm1, %v637_v53, 0.0  ;;  %v682_v0 = vsel %vm82_vm1, %v642_v54, 0.0 }
   0xd   :  { %v95_v36 = vadd.f32 %v94_v20, %v93_v24  ;;  %v674_v61 = vld [vmem:[%s1318_s0 + $0x190] sm:$0xff]  ;;  %1351 = vst [vmem:[#allocation14_spill] sm:$0xff] %v678_v63  ;;  %1352 = vst [vmem:[#allocation15_spill] sm:$0xff] %v682_v0  ;;  %v686_v4 = vsel %vm82_vm1, %v647_v55, 0.0  ;;  %v691_v5 = vld [vmem:[%s1318_s0 + $0x198] sm:$0xff]  ;;  %v705_v9 = vsel %vm82_vm1, %v664_v59, 0.0 }
   0xe   :  { %1353 = vst [vmem:[#allocation16_spill] sm:$0xff] %v686_v4  ;;  %v696_v6 = vld [vmem:[%s1318_s0 + $0x1a0] sm:$0xff]  ;;  %v701_v8 = vld [vmem:[%s1318_s0 + $0x1a8] sm:$0xff]  ;;  %1354 = vst [vmem:[#allocation17_spill] sm:$0xff] %v705_v9  ;;  %v709_v11 = vsel %vm82_vm1, %v669_v60, 0.0  ;;  %v713_v12 = vsel %vm82_vm1, %v674_v61, 0.0 }
   0xf   :  { %v97_v49 = vadd.f32 %v96_v25, %v95_v36  ;;  %1355 = vst [vmem:[#allocation18_spill] sm:$0xff] %v709_v11  ;;  %1356 = vst [vmem:[#allocation19_spill] sm:$0xff] %v713_v12  ;;  %v718_v14 = vld [vmem:[%s1318_s0 + $0x60] sm:$0xff]  ;;  %v723_v15 = vld [vmem:[%s1318_s0 + $0x1b0] sm:$0xff]  ;;  %v737_v25 = vsel %vm82_vm1, %v691_v5, 0.0  ;;  %v745_v36 = vsel %vm82_vm1, %v701_v8, 0.0 }
  0x10   :  { %v728_v17 = vld [vmem:[%s1318_s0 + $0x1b8] sm:$0xff]  ;;  %v733_v20 = vld [vmem:[%s1318_s0 + $0x1c0] sm:$0xff]  ;;  %1357 = vst [vmem:[#allocation20_spill] sm:$0xff] %v737_v25  ;;  %1359 = vst [vmem:[#allocation22_spill] sm:$0xff] %v745_v36 }
  0x11   :  { %v99_v62 = vadd.f32 %v98_v26, %v97_v49  ;;  %v741_v26 = vsel %vm82_vm1, %v696_v6, 0.0  ;;  %v750_v49 = vld [vmem:[%s1318_s0 + $0x1c8] sm:$0xff]  ;;  %v768_v36 = vsel %vm82_vm1, %v728_v17, 0.0  ;;  %v772_v25 = vsel %vm82_vm1, %v733_v20, 0.0  ;;  %v777_v12 = vld [vmem:[%s1318_s0 + $0x1e0] sm:$0xff]  ;;  %v804_v0 = vld [vmem:[%s1318_s0 + $0x1f8] sm:$0xff] }
  0x12   :  { %1358 = vst [vmem:[#allocation21_spill] sm:$0xff] %v741_v26  ;;  %v764_v26 = vsel %vm82_vm1, %v723_v15, 0.0  ;;  %1361 = vst [vmem:[#allocation24_spill] sm:$0xff] %v768_v36  ;;  %v782_v11 = vld [vmem:[%s1318_s0 + $0x1e8] sm:$0xff]  ;;  %v791_v9 = vsel %vm82_vm1, %v750_v49, 0.0  ;;  %v826_v58 = vsel %vm82_vm1, %v804_v0, 0.0 }
  0x13   :  { %v101_v24 = vadd.f32 %v100_v30, %v99_v62  ;;  %v755_v30 = vld [vmem:[%s1318_s0 + $0x1d0] sm:$0xff]  ;;  %v760_v62 = vld [vmem:[%s1318_s0 + $0x1d8] sm:$0xff]  ;;  %1360 = vst [vmem:[#allocation23_spill] sm:$0xff] %v764_v26  ;;  %1362 = vst [vmem:[#allocation25_spill] sm:$0xff] %v772_v25 }
  0x14   :  { %v787_v26 = vld [vmem:[%s1318_s0 + $0x1f0] sm:$0xff]  ;;  %1364 = vst [vmem:[#allocation27_spill] sm:$0xff] %v791_v9  ;;  %v795_v25 = vsel %vm82_vm1, %v755_v30, 0.0  ;;  %v799_v4 = vsel %vm82_vm1, %v760_v62, 0.0  ;;  %1367 = vst [vmem:[#allocation30_spill] sm:$0xff] %v804_v0  ;;  %v814_v9 = vsel %vm82_vm1, %v782_v11, 0.0 }
  0x15   :  { %1363 = vst [vmem:[#allocation26_spill] sm:$0xff] %v787_v26  ;;  %v103_v36 = vadd.f32 %v102_v31, %v101_v24  ;;  %1365 = vst [vmem:[#allocation28_spill] sm:$0xff] %v795_v25  ;;  %v106_v31 = vsel %vm82_vm1, %v718_v14, 0.0  ;;  %v810_v24 = vsel %vm82_vm1, %v777_v12, 0.0  ;;  %v818_v25 = vsel %vm82_vm1, %v787_v26, 0.0  ;;  %v855_v56 = vld [vmem:[%s1318_s0 + $0x90] sm:$0xff] }
  0x16   :  { %1366 = vst [vmem:[#allocation29_spill] sm:$0xff] %v799_v4  ;;  %1368 = vst [vmem:[#allocation31_spill] sm:$0xff] %v810_v24  ;;  %v30_v4 = vld [vmem:[%s1318_s0 + $0x68] sm:$0xff]  ;;  %v860_v52 = vld [vmem:[%s1318_s0 + $0x98] sm:$0xff] }
  0x17   :  { %1369 = vst [vmem:[#allocation32_spill] sm:$0xff] %v814_v9  ;;  %1370 = vst [vmem:[#allocation33_spill] sm:$0xff] %v818_v25  ;;  %v105_v63 = vadd.f32 %v551_v32, %v103_v36  ;;  %v108_v24 = vsel %vm82_vm1, %v30_v4, 0.0  ;;  %v31_v9 = vld [vmem:[%s1318_s0 + $0x70] sm:$0xff]  ;;  %v835_v25 = vld [vmem:[%s1318_s0 + $0x78] sm:$0xff]  ;;  %v120_v39 = vsel %vm82_vm1, %v860_v52, 0.0 }
  0x18   :  { %1371 = vst [vmem:[#allocation34_spill] sm:$0xff] %v826_v58  ;;  %1372 = vst [vmem:[#allocation35_spill] sm:$0xff] %v835_v25  ;;  %v840_v32 = vld [vmem:[%s1318_s0 + $0x80] sm:$0xff]  ;;  %v845_v36 = vld [vmem:[%s1318_s0 + $0x88] sm:$0xff]  ;;  %v110_v58 = vsel %vm82_vm1, %v31_v9, 0.0 }
  0x19   :  { %v107_v57 = vadd.f32 %v106_v31, %v105_v63  ;;  %1373 = vst [vmem:[#allocation36_spill] sm:$0xff] %v840_v32  ;;  %1374 = vst [vmem:[#allocation37_spill] sm:$0xff] %v845_v36  ;;  %v220_v63 = vmul.f32 %v455_v1, %v455_v1  ;;  %v221_v31 = vmul.f32 %v460_v2, %v460_v2  ;;  %v865_v51 = vld [vmem:[%s1318_s0 + $0xa0] sm:$0xff]  ;;  %v112_v1 = vsel %vm82_vm1, %v835_v25, 0.0  ;;  %v876_v44 = vld [vmem:[%s1318_s0 + $0xa8] sm:$0xff] }
  0x1a   :  { %1375 = vst [vmem:[#allocation38_spill] sm:$0xff] %v855_v56  ;;  %1376 = vst [vmem:[#allocation39_spill] sm:$0xff] %v860_v52  ;;  %v114_v2 = vsel %vm82_vm1, %v840_v32, 0.0  ;;  %v116_v45 = vsel %vm82_vm1, %v845_v36, 0.0  ;;  %v881_v43 = vld [vmem:[%s1318_s0 + $0xb0] sm:$0xff]  ;;  %v122_v38 = vsel %vm82_vm1, %v865_v51, 0.0  ;;  %v223_v25 = vmul.f32 %v476_v7, %v476_v7 }
  0x1b   :  { %1377 = vst [vmem:[#allocation40_spill] sm:$0xff] %v865_v51  ;;  %v109_v50 = vadd.f32 %v108_v24, %v107_v57  ;;  %1378 = vst [vmem:[#allocation41_spill] sm:$0xff] %v876_v44  ;;  %v886_v57 = vld [vmem:[%s1318_s0 + $0xb8] sm:$0xff]  ;;  %v118_v24 = vsel %vm82_vm1, %v855_v56, 0.0  ;;  %v899_v36 = vld [vmem:[%s1318_s0 + $0xc0] sm:$0xff]  ;;  %v124_v51 = vsel %vm82_vm1, %v876_v44, 0.0 }
  0x1c   :  { %1379 = vst [vmem:[#allocation42_spill] sm:$0xff] %v881_v43  ;;  %1380 = vst [vmem:[#allocation43_spill] sm:$0xff] %v886_v57  ;;  %v904_v32 = vld [vmem:[%s1318_s0 + $0xc8] sm:$0xff]  ;;  %v909_v52 = vld [vmem:[%s1318_s0 + $0xd0] sm:$0xff]  ;;  %v915_v3 = vsel %vm82_vm1, %v881_v43, 0.0 }
  0x1d   :  { %1381 = vst [vmem:[#allocation44_spill] sm:$0xff] %v899_v36  ;;  %1382 = vst [vmem:[#allocation45_spill] sm:$0xff] %v904_v32  ;;  %v111_v56 = vadd.f32 %v110_v58, %v109_v50  ;;  %v922_v0 = vld [vmem:[%s1318_s0 + $0xd8] sm:$0xff]  ;;  %v927_v26 = vld [vmem:[%s1318_s0 + $0xe0] sm:$0xff]  ;;  %v931_v50 = vsel %vm82_vm1, %v886_v57, 0.0  ;;  %v935_v58 = vsel %vm82_vm1, %v899_v36, 0.0 }
  0x1e   :  { %1383 = vst [vmem:[#allocation46_spill] sm:$0xff] %v909_v52  ;;  %1384 = vst [vmem:[#allocation47_spill] sm:$0xff] %v922_v0  ;;  %v939_v7 = vsel %vm82_vm1, %v904_v32, 0.0  ;;  %v943_v43 = vsel %vm82_vm1, %v909_v52, 0.0  ;;  %v948_v44 = vld [vmem:[%s1318_s0 + $0xe8] sm:$0xff]  ;;  %v953_v57 = vld [vmem:[%s1318_s0 + $0xf0] sm:$0xff]  ;;  %v224_v52 = vmul.f32 %v483_v10, %v483_v10  ;;  %v228_v10 = vmul.f32 %v507_v19, %v507_v19 }
  0x1f   :  { %1385 = vst [vmem:[#allocation48_spill] sm:$0xff] %v927_v26  ;;  %1386 = vst [vmem:[#allocation49_spill] sm:$0xff] %v935_v58  ;;  %v113_v36 = vadd.f32 %v112_v1, %v111_v56  ;;  %v957_v58 = vsel %vm82_vm1, %v922_v0, 0.0  ;;  %v961_v32 = vsel %vm82_vm1, %v927_v26, 0.0  ;;  %v225_v56 = vmul.f32 %v490_v13, %v490_v13 }
  0x20   :  { %1387 = vst [vmem:[#allocation50_spill] sm:$0xff] %v939_v7  ;;  %1388 = vst [vmem:[#allocation51_spill] sm:$0xff] %v943_v43  ;;  %v967_v43 = vsel %vm82_vm1, %v948_v44, 0.0  ;;  %v971_v7 = vsel %vm82_vm1, %v953_v57, 0.0  ;;  %v226_v1 = vmul.f32 %v497_v16, %v497_v16  ;;  %v227_v26 = vmul.f32 %v502_v18, %v502_v18 }
  0x21   :  { %1389 = vst [vmem:[#allocation52_spill] sm:$0xff] %v948_v44  ;;  %1390 = vst [vmem:[#allocation53_spill] sm:$0xff] %v953_v57  ;;  %v115_v0 = vadd.f32 %v114_v2, %v113_v36  ;;  %v229_v44 = vmul.f32 %v514_v21, %v514_v21  ;;  %v230_v57 = vmul.f32 %v519_v22, %v519_v22 }
  0x22   :  { %1391 = vst [vmem:[#allocation54_spill] sm:$0xff] %v971_v7  ;;  %v231_v7 = vmul.f32 %v524_v23, %v524_v23  ;;  %v232_v13 = vmul.f32 %v718_v14, %v718_v14  ;;  %v989_v16 = vmul.f32 %v30_v4, %v30_v4  ;;  %v991_v2 = vmul.f32 %v31_v9, %v31_v9 }
  0x23   :  { %v117_v36 = vadd.f32 %v116_v45, %v115_v0  ;;  %v253_v18 = vmul.f32 %v533_v27, %v533_v27  ;;  %v254_v19 = vmul.f32 %v538_v28, %v538_v28  ;;  %v255_v21 = vmul.f32 %v543_v29, %v543_v29 }
  0x24   :  { %v256_v22 = vmul.f32 %v556_v33, %v556_v33  ;;  %v257_v23 = vmul.f32 %v561_v34, %v561_v34  ;;  %v258_v45 = vmul.f32 %v566_v35, %v566_v35  ;;  %v259_v4 = vmul.f32 %v583_v40, %v583_v40 }
  0x25   :  { %v119_v0 = vadd.f32 %v118_v24, %v117_v36  ;;  %v260_v27 = vmul.f32 %v588_v41, %v588_v41  ;;  %v261_v28 = vmul.f32 %v593_v42, %v593_v42  ;;  %v262_v29 = vmul.f32 %v610_v46, %v610_v46 }
  0x26   :  { %v263_v33 = vmul.f32 %v615_v47, %v615_v47  ;;  %v284_v34 = vsel %vm82_vm1, %v220_v63, 0.0  ;;  %v285_v35 = vsel %vm82_vm1, %v221_v31, 0.0  ;;  %v264_v40 = vmul.f32 %v620_v48, %v620_v48 }
  0x27   :  { %v121_v9 = vadd.f32 %v120_v39, %v119_v0  ;;  %v286_v14 = vadd.f32 %v285_v35, %v284_v34  ;;  %v287_v41 = vsel %vm82_vm1, %v222_v37, 0.0  ;;  %v265_v42 = vmul.f32 %v637_v53, %v637_v53  ;;  %v1392_v0 = vld [vmem:[#allocation26_spill] sm:$0xff] }
  0x28   :  { %v266_v46 = vmul.f32 %v642_v54, %v642_v54  ;;  %v267_v47 = vmul.f32 %v647_v55, %v647_v55  ;;  %v289_v63 = vsel %vm82_vm1, %v223_v25, 0.0  ;;  %v268_v39 = vmul.f32 %v664_v59, %v664_v59  ;;  %v1393_v34 = vld [vmem:[#allocation30_spill] sm:$0xff] }
  0x29   :  { %v123_v24 = vadd.f32 %v122_v38, %v121_v9  ;;  %v269_v48 = vmul.f32 %v669_v60, %v669_v60  ;;  %v288_v31 = vadd.f32 %v287_v41, %v286_v14  ;;  %v270_v37 = vmul.f32 %v674_v61, %v674_v61  ;;  %v1394_v41 = vld [vmem:[#allocation49_spill] sm:$0xff] }
  0x2a   :  { %v271_v53 = vmul.f32 %v691_v5, %v691_v5  ;;  %v272_v54 = vmul.f32 %v696_v6, %v696_v6  ;;  %v291_v55 = vsel %vm82_vm1, %v224_v52, 0.0  ;;  %v273_v38 = vmul.f32 %v701_v8, %v701_v8 }
  0x2b   :  { %v125_v25 = vadd.f32 %v124_v51, %v123_v24  ;;  %v274_v59 = vmul.f32 %v723_v15, %v723_v15  ;;  %v290_v60 = vadd.f32 %v289_v63, %v288_v31  ;;  %v275_v36 = vmul.f32 %v728_v17, %v728_v17 }
  0x2c   :  { %v276_v61 = vmul.f32 %v733_v20, %v733_v20  ;;  %v277_v5 = vmul.f32 %v750_v49, %v750_v49  ;;  %v293_v6 = vsel %vm82_vm1, %v225_v56, 0.0  ;;  %v278_v52 = vmul.f32 %v755_v30, %v755_v30 }
  0x2d   :  { %v127_v51 = vadd.f32 %v915_v3, %v125_v25  ;;  %v279_v8 = vmul.f32 %v760_v62, %v760_v62  ;;  %v292_v15 = vadd.f32 %v291_v55, %v290_v60  ;;  %v280_v17 = vmul.f32 %v777_v12, %v777_v12  ;;  %v1396_v25 = vld [vmem:[#allocation51_spill] sm:$0xff] }
  0x2e   :  { %v281_v20 = vmul.f32 %v782_v11, %v782_v11  ;;  %v282_v49 = vmul.f32 %v1392_v0, %v1392_v0  ;;  %v295_v56 = vsel %vm82_vm1, %v226_v1, 0.0  ;;  %v283_v30 = vmul.f32 %v1393_v34, %v1393_v34  ;;  %v1398_v34 = vld [vmem:[#allocation54_spill] sm:$0xff] }
  0x2f   :  { %v129_v3 = vadd.f32 %v931_v50, %v127_v51  ;;  %v294_v35 = vadd.f32 %v293_v6, %v292_v15  ;;  %v297_v62 = vsel %vm82_vm1, %v227_v26, 0.0  ;;  %v299_v9 = vsel %vm82_vm1, %v228_v10, 0.0 }
  0x30   :  { %v301_v12 = vsel %vm82_vm1, %v229_v44, 0.0  ;;  %v303_v14 = vsel %vm82_vm1, %v230_v57, 0.0  ;;  %v305_v11 = vsel %vm82_vm1, %v231_v7, 0.0  ;;  %v307_v1 = vsel %vm82_vm1, %v232_v13, 0.0  ;;  %v1395_v7 = vld [vmem:[#allocation50_spill] sm:$0xff] }
  0x31   :  { %v131_v63 = vadd.f32 %v1394_v41, %v129_v3  ;;  %v296_v24 = vadd.f32 %v295_v56, %v294_v35  ;;  %v1072_v50 = vsel %vm82_vm1, %v253_v18, 0.0  ;;  %v1075_v31 = vsel %vm82_vm1, %v254_v19, 0.0  ;;  %v1397_v56 = vld [vmem:[#allocation35_spill] sm:$0xff] }
  0x32   :  { %v1078_v26 = vsel %vm82_vm1, %v255_v21, 0.0  ;;  %v1081_v44 = vsel %vm82_vm1, %v256_v22, 0.0  ;;  %v1084_v57 = vsel %vm82_vm1, %v257_v23, 0.0  ;;  %v1088_v13 = vsel %vm82_vm1, %v258_v45, 0.0 }
  0x33   :  { %v133_v10 = vadd.f32 %v1395_v7, %v131_v63  ;;  %v298_v55 = vadd.f32 %v297_v62, %v296_v24  ;;  %v1091_v18 = vsel %vm82_vm1, %v259_v4, 0.0  ;;  %v1094_v19 = vsel %vm82_vm1, %v260_v27, 0.0  ;;  %v1399_v62 = vld [vmem:[#allocation36_spill] sm:$0xff] }
  0x34   :  { %v1097_v21 = vsel %vm82_vm1, %v261_v28, 0.0  ;;  %v1100_v22 = vsel %vm82_vm1, %v262_v29, 0.0  ;;  %v1103_v23 = vsel %vm82_vm1, %v263_v33, 0.0  ;;  %v1107_v45 = vsel %vm82_vm1, %v264_v40, 0.0 }
  0x35   :  { %v135_v60 = vadd.f32 %v1396_v25, %v133_v10  ;;  %v300_v6 = vadd.f32 %v299_v9, %v298_v55  ;;  %v1110_v4 = vsel %vm82_vm1, %v265_v42, 0.0  ;;  %v1113_v27 = vsel %vm82_vm1, %v266_v46, 0.0  ;;  %v1401_v10 = vld [vmem:[#allocation38_spill] sm:$0xff] }
  0x36   :  { %v1116_v28 = vsel %vm82_vm1, %v267_v47, 0.0  ;;  %v1119_v29 = vsel %vm82_vm1, %v268_v39, 0.0  ;;  %v1122_v33 = vsel %vm82_vm1, %v269_v48, 0.0  ;;  %v1126_v40 = vsel %vm82_vm1, %v270_v37, 0.0  ;;  %v1402_v25 = vld [vmem:[#allocation2_spill] sm:$0xff] }
  0x37   :  { %v137_v51 = vadd.f32 %v957_v58, %v135_v60  ;;  %v302_v15 = vadd.f32 %v301_v12, %v300_v6  ;;  %v1129_v42 = vsel %vm82_vm1, %v271_v53, 0.0  ;;  %v1132_v46 = vsel %vm82_vm1, %v272_v54, 0.0 }
  0x38   :  { %v1135_v47 = vsel %vm82_vm1, %v273_v38, 0.0  ;;  %v1138_v39 = vsel %vm82_vm1, %v274_v59, 0.0  ;;  %v1141_v48 = vsel %vm82_vm1, %v275_v36, 0.0  ;;  %v1145_v37 = vsel %vm82_vm1, %v276_v61, 0.0 }
  0x39   :  { %v139_v58 = vadd.f32 %v961_v32, %v137_v51  ;;  %v304_v0 = vadd.f32 %v303_v14, %v302_v15  ;;  %v1148_v53 = vsel %vm82_vm1, %v277_v5, 0.0  ;;  %v1151_v54 = vsel %vm82_vm1, %v278_v52, 0.0  ;;  %v1165_v32 = vld [vmem:[%s1318_s0 + $0xf8] sm:$0xff]  ;;  %v1403_v51 = vld [vmem:[#allocation39_spill] sm:$0xff] }
  0x3a   :  { %v1154_v38 = vsel %vm82_vm1, %v279_v8, 0.0  ;;  %v1157_v59 = vsel %vm82_vm1, %v280_v17, 0.0  ;;  %v1160_v36 = vsel %vm82_vm1, %v281_v20, 0.0  ;;  %v1169_v52 = vsel %vm82_vm1, %v282_v49, 0.0 }
  0x3b   :  { %v141_v61 = vadd.f32 %v967_v43, %v139_v58  ;;  %v306_v5 = vadd.f32 %v305_v11, %v304_v0  ;;  %v1172_v8 = vsel %vm82_vm1, %v283_v30, 0.0  ;;  %v144_v17 = vsel %vm82_vm1, %v1165_v32, 0.0  ;;  %v1183_v43 = vld [vmem:[%s1318_s0 + $0x100] sm:$0xff]  ;;  %v1404_v58 = vld [vmem:[#allocation3_spill] sm:$0xff] }
  0x3c   :  { %v235_v20 = vmul.f32 %v1397_v56, %v1397_v56  ;;  %v309_v3 = vsel %vm82_vm1, %v989_v16, 0.0  ;;  %v146_v30 = vsel %vm82_vm1, %v1183_v43, 0.0  ;;  %v236_v9 = vmul.f32 %v1399_v62, %v1399_v62  ;;  %v1400_v16 = vld [vmem:[#allocation37_spill] sm:$0xff] }
  0x3d   :  { %v143_v49 = vadd.f32 %v1398_v34, %v141_v61  ;;  %v308_v35 = vadd.f32 %v307_v1, %v306_v5  ;;  %v311_v12 = vsel %vm82_vm1, %v991_v2, 0.0  ;;  %v237_v41 = vmul.f32 %v1400_v16, %v1400_v16  ;;  %v1405_v5 = vld [vmem:[#allocation40_spill] sm:$0xff]  ;;  %v1408_v62 = vld [vmem:[#allocation5_spill] sm:$0xff] }
  0x3e   :  { %v313_v63 = vsel %vm82_vm1, %v235_v20, 0.0  ;;  %v238_v1 = vmul.f32 %v1401_v10, %v1401_v10  ;;  %v315_v55 = vsel %vm82_vm1, %v236_v9, 0.0  ;;  %v239_v2 = vmul.f32 %v1403_v51, %v1403_v51  ;;  %v1406_v20 = vld [vmem:[#allocation4_spill] sm:$0xff] }
  0x3f   :  { %v145_v14 = vadd.f32 %v144_v17, %v143_v49  ;;  %v310_v11 = vadd.f32 %v309_v3, %v308_v35  ;;  %v317_v15 = vsel %vm82_vm1, %v237_v41, 0.0  ;;  %v240_v17 = vmul.f32 %v1405_v5, %v1405_v5  ;;  %v1407_v49 = vld [vmem:[#allocation41_spill] sm:$0xff]  ;;  %v1410_v41 = vld [vmem:[#allocation6_spill] sm:$0xff] }
  0x40   :  { %v319_v56 = vsel %vm82_vm1, %v238_v1, 0.0  ;;  %v241_v35 = vmul.f32 %v1407_v49, %v1407_v49 }
  0x41   :  { %v147_v24 = vadd.f32 %v146_v30, %v145_v14  ;;  %v312_v7 = vadd.f32 %v311_v12, %v310_v11  ;;  %v321_v30 = vsel %vm82_vm1, %v239_v2, 0.0  ;;  %v1409_v14 = vld [vmem:[#allocation42_spill] sm:$0xff]  ;;  %v323_v16 = vsel %vm82_vm1, %v240_v17, 0.0 }
  0x42   :  { %v242_v11 = vmul.f32 %v1409_v14, %v1409_v14  ;;  %v325_v1 = vsel %vm82_vm1, %v241_v35, 0.0 }
  0x43   :  { %v149_v60 = vadd.f32 %v1402_v25, %v147_v24  ;;  %v314_v6 = vadd.f32 %v313_v63, %v312_v7  ;;  %v1411_v7 = vld [vmem:[#allocation43_spill] sm:$0xff] }
  0x44   :  { %v243_v10 = vmul.f32 %v1411_v7, %v1411_v7  ;;  %v327_v2 = vsel %vm82_vm1, %v242_v11, 0.0 }
  0x45   :  { %v151_v0 = vadd.f32 %v1404_v58, %v149_v60  ;;  %v316_v61 = vadd.f32 %v315_v55, %v314_v6  ;;  %v1412_v55 = vld [vmem:[#allocation7_spill] sm:$0xff]  ;;  %v1413_v6 = vld [vmem:[#allocation44_spill] sm:$0xff] }
  0x46   :  { %v244_v51 = vmul.f32 %v1413_v6, %v1413_v6  ;;  %v329_v17 = vsel %vm82_vm1, %v243_v10, 0.0 }
  0x47   :  { %v153_v3 = vadd.f32 %v1406_v20, %v151_v0  ;;  %v318_v34 = vadd.f32 %v317_v15, %v316_v61  ;;  %v1414_v15 = vld [vmem:[#allocation8_spill] sm:$0xff]  ;;  %v1415_v61 = vld [vmem:[#allocation45_spill] sm:$0xff] }
  0x48   :  { %v245_v5 = vmul.f32 %v1415_v61, %v1415_v61  ;;  %v331_v35 = vsel %vm82_vm1, %v244_v51, 0.0 }
  0x49   :  { %v155_v9 = vadd.f32 %v1408_v62, %v153_v3  ;;  %v320_v12 = vadd.f32 %v319_v56, %v318_v34  ;;  %v1416_v56 = vld [vmem:[#allocation9_spill] sm:$0xff]  ;;  %v1417_v34 = vld [vmem:[#allocation46_spill] sm:$0xff] }
  0x4a   :  { %v246_v49 = vmul.f32 %v1417_v34, %v1417_v34  ;;  %v333_v11 = vsel %vm82_vm1, %v245_v5, 0.0 }
  0x4b   :  { %v157_v63 = vadd.f32 %v1410_v41, %v155_v9  ;;  %v322_v24 = vadd.f32 %v321_v30, %v320_v12  ;;  %v1418_v30 = vld [vmem:[#allocation10_spill] sm:$0xff]  ;;  %v1419_v12 = vld [vmem:[#allocation47_spill] sm:$0xff] }
  0x4c   :  { %v247_v14 = vmul.f32 %v1419_v12, %v1419_v12  ;;  %v335_v10 = vsel %vm82_vm1, %v246_v49, 0.0  ;;  %v1427_v49 = vld [vmem:[#allocation15_spill] sm:$0xff]  ;;  %v1428_v12 = vld [vmem:[#allocation16_spill] sm:$0xff] }
  0x4d   :  { %v159_v25 = vadd.f32 %v1412_v55, %v157_v63  ;;  %v324_v60 = vadd.f32 %v323_v16, %v322_v24  ;;  %v1420_v16 = vld [vmem:[#allocation11_spill] sm:$0xff]  ;;  %v1421_v24 = vld [vmem:[#allocation48_spill] sm:$0xff] }
  0x4e   :  { %v248_v7 = vmul.f32 %v1421_v24, %v1421_v24  ;;  %v337_v51 = vsel %vm82_vm1, %v247_v14, 0.0 }
  0x4f   :  { %v161_v58 = vadd.f32 %v1414_v15, %v159_v25  ;;  %v326_v0 = vadd.f32 %v325_v1, %v324_v60  ;;  %v1422_v1 = vld [vmem:[#allocation12_spill] sm:$0xff] }
  0x50   :  { %v1423_v60 = vld [vmem:[#allocation52_spill] sm:$0xff]  ;;  %v339_v5 = vsel %vm82_vm1, %v248_v7, 0.0  ;;  %v1430_v7 = vld [vmem:[#allocation18_spill] sm:$0xff] }
  0x51   :  { %v163_v20 = vadd.f32 %v1416_v56, %v161_v58  ;;  %v328_v3 = vadd.f32 %v327_v2, %v326_v0  ;;  %v249_v6 = vmul.f32 %v1423_v60, %v1423_v60  ;;  %v1424_v2 = vld [vmem:[#allocation13_spill] sm:$0xff] }
  0x52   :  { %v1425_v0 = vld [vmem:[#allocation53_spill] sm:$0xff] }
  0x53   :  { %v165_v62 = vadd.f32 %v1418_v30, %v163_v20  ;;  %v330_v9 = vadd.f32 %v329_v17, %v328_v3  ;;  %v250_v61 = vmul.f32 %v1425_v0, %v1425_v0  ;;  %v1426_v17 = vld [vmem:[#allocation14_spill] sm:$0xff]  ;;  %v251_v3 = vmul.f32 %v1165_v32, %v1165_v32 }
  0x54   :  { %v341_v34 = vsel %vm82_vm1, %v249_v6, 0.0  ;;  %v1432_v6 = vld [vmem:[#allocation20_spill] sm:$0xff]  ;;  %v1434_v0 = vld [vmem:[#allocation22_spill] sm:$0xff] }
  0x55   :  { %v167_v41 = vadd.f32 %v1420_v16, %v165_v62  ;;  %v332_v63 = vadd.f32 %v331_v35, %v330_v9  ;;  %v252_v62 = vmul.f32 %v1183_v43, %v1183_v43  ;;  %v343_v9 = vsel %vm82_vm1, %v250_v61, 0.0 }
  0x56   :  { %v345_v16 = vsel %vm82_vm1, %v251_v3, 0.0  ;;  %v1436_v3 = vld [vmem:[#allocation24_spill] sm:$0xff] }
  0x57   :  { %v169_v55 = vadd.f32 %v1422_v1, %v167_v41  ;;  %v334_v25 = vadd.f32 %v333_v11, %v332_v63  ;;  %v1429_v41 = vld [vmem:[#allocation17_spill] sm:$0xff]  ;;  %v347_v32 = vsel %vm82_vm1, %v252_v62, 0.0  ;;  %v1438_v62 = vld [vmem:[#allocation27_spill] sm:$0xff] }
  0x59   :  { %v171_v15 = vadd.f32 %v1424_v2, %v169_v55  ;;  %v336_v58 = vadd.f32 %v335_v10, %v334_v25  ;;  %v1431_v55 = vld [vmem:[#allocation19_spill] sm:$0xff]  ;;  %v1433_v2 = vld [vmem:[#allocation21_spill] sm:$0xff] }
  0x5b   :  { %v173_v56 = vadd.f32 %v1426_v17, %v171_v15  ;;  %v338_v20 = vadd.f32 %v337_v51, %v336_v58  ;;  %v1435_v17 = vld [vmem:[#allocation23_spill] sm:$0xff] }
  0x5d   :  { %v175_v35 = vadd.f32 %v1427_v49, %v173_v56  ;;  %v340_v30 = vadd.f32 %v339_v5, %v338_v20 }
  0x5f   :  { %v177_v14 = vadd.f32 %v1428_v12, %v175_v35  ;;  %v342_v11 = vadd.f32 %v341_v34, %v340_v30  ;;  %v1437_v35 = vld [vmem:[#allocation25_spill] sm:$0xff]  ;;  %v1439_v12 = vld [vmem:[#allocation28_spill] sm:$0xff] }
  0x61   :  { %v179_v63 = vadd.f32 %v1429_v41, %v177_v14  ;;  %v344_v24 = vadd.f32 %v343_v9, %v342_v11  ;;  %v1440_v11 = vld [vmem:[#allocation29_spill] sm:$0xff]  ;;  %v1441_v41 = vld [vmem:[#allocation31_spill] sm:$0xff] }
  0x63   :  { %v181_v10 = vadd.f32 %v1430_v7, %v179_v63  ;;  %v346_v1 = vadd.f32 %v345_v16, %v344_v24  ;;  %v1442_v24 = vld [vmem:[#allocation32_spill] sm:$0xff]  ;;  %v1443_v7 = vld [vmem:[#allocation33_spill] sm:$0xff] }
  0x65   :  { %v183_v25 = vadd.f32 %v1431_v55, %v181_v10  ;;  %v348_v60 = vadd.f32 %v347_v32, %v346_v1  ;;  %v1444_v1 = vld [vmem:[#allocation34_spill] sm:$0xff] }
  0x67   :  { %v185_v43 = vadd.f32 %v1432_v6, %v183_v25  ;;  %v350_v51 = vadd.f32 %v1072_v50, %v348_v60 }
  0x69   :  { %v187_v15 = vadd.f32 %v1433_v2, %v185_v43  ;;  %v352_v58 = vadd.f32 %v1075_v31, %v350_v51 }
  0x6b   :  { %v189_v61 = vadd.f32 %v1434_v0, %v187_v15  ;;  %v354_v5 = vadd.f32 %v1078_v26, %v352_v58 }
  0x6d   :  { %v191_v56 = vadd.f32 %v1435_v17, %v189_v61  ;;  %v356_v20 = vadd.f32 %v1081_v44, %v354_v5 }
  0x6f   :  { %v193_v34 = vadd.f32 %v1436_v3, %v191_v56  ;;  %v358_v49 = vadd.f32 %v1084_v57, %v356_v20 }
  0x71   :  { %v195_v30 = vadd.f32 %v1437_v35, %v193_v34  ;;  %v360_v50 = vadd.f32 %v1088_v13, %v358_v49 }
  0x73   :  { %v197_v9 = vadd.f32 %v1438_v62, %v195_v30  ;;  %v362_v31 = vadd.f32 %v1091_v18, %v360_v50 }
  0x75   :  { %v199_v14 = vadd.f32 %v1439_v12, %v197_v9  ;;  %v364_v26 = vadd.f32 %v1094_v19, %v362_v31 }
  0x77   :  { %v201_v16 = vadd.f32 %v1440_v11, %v199_v14  ;;  %v366_v44 = vadd.f32 %v1097_v21, %v364_v26 }
  0x79   :  { %v203_v63 = vadd.f32 %v1441_v41, %v201_v16  ;;  %v368_v57 = vadd.f32 %v1100_v22, %v366_v44 }
  0x7b   :  { %v205_v32 = vadd.f32 %v1442_v24, %v203_v63  ;;  %v370_v13 = vadd.f32 %v1103_v23, %v368_v57 }
  0x7d   :  { %v207_v10 = vadd.f32 %v1443_v7, %v205_v32  ;;  %v372_v18 = vadd.f32 %v1107_v45, %v370_v13  ;;  %v81_v45 = vld [vmem:[%s1319_s1] sm:$0x1] }
  0x7f   :  { %v209_v55 = vadd.f32 %v1444_v1, %v207_v10  ;;  %v374_v19 = vadd.f32 %v1110_v4, %v372_v18 }
  0x81   :  { %v210_v25 = vrot.slane %v209_v55, 4  ;;  %v376_v60 = vadd.f32 %v1113_v27, %v374_v19 }
  0x83   :  { %v211_v21 = vadd.f32 %v210_v25, %v209_v55  ;;  %v378_v6 = vadd.f32 %v1116_v28, %v376_v60 }
  0x85   :  { %v212_v43 = vrot.slane %v211_v21, 2  ;;  %v380_v22 = vadd.f32 %v1119_v29, %v378_v6 }
  0x87   :  { %v213_v51 = vadd.f32 %v212_v43, %v211_v21  ;;  %v382_v23 = vadd.f32 %v1122_v33, %v380_v22 }
  0x89   :  { %v214_v2 = vrot.slane %v213_v51, 1  ;;  %v384_v15 = vadd.f32 %v1126_v40, %v382_v23 }
  0x8b   :  { %v215_v4 = vadd.f32 %v214_v2, %v213_v51  ;;  %v386_v58 = vadd.f32 %v1129_v42, %v384_v15 }
  0x8d   :  { %v216_v27 = vadd.f32 %v215_v4, %v81_v45  ;;  %v388_v0 = vadd.f32 %v1132_v46, %v386_v58 }
  0x8f   :  { %218 = vst.msk [vmem:[%s1319_s1] sm:$0x1] %vm14_vm0, %v216_v27  ;;  %v390_v28 = vadd.f32 %v1135_v47, %v388_v0 }
  0x91   :  { %v392_v29 = vadd.f32 %v1138_v39, %v390_v28 }
  0x93   :  { %v394_v33 = vadd.f32 %v1141_v48, %v392_v29 }
  0x95   :  { %v396_v40 = vadd.f32 %v1145_v37, %v394_v33  ;;  %v219_v37 = vld [vmem:[%s1320_s2] sm:$0x1] }
  0x97   :  { %v398_v61 = vadd.f32 %v1148_v53, %v396_v40 }
  0x99   :  { %v400_v42 = vadd.f32 %v1151_v54, %v398_v61 }
  0x9b   :  { %v402_v5 = vadd.f32 %v1154_v38, %v400_v42 }
  0x9d   :  { %v404_v46 = vadd.f32 %v1157_v59, %v402_v5 }
  0x9f   :  { %v406_v17 = vadd.f32 %v1160_v36, %v404_v46 }
  0xa1   :  { %v408_v56 = vadd.f32 %v1169_v52, %v406_v17 }
  0xa3   :  { %v410_v47 = vadd.f32 %v1172_v8, %v408_v56 }
  0xa5   :  { %v411_v20 = vrot.slane %v410_v47, 4 }
  0xa7   :  { %v412_v39 = vadd.f32 %v411_v20, %v410_v47 }
  0xa9   :  { %v413_v3 = vrot.slane %v412_v39, 2 }
  0xab   :  { %v414_v48 = vadd.f32 %v413_v3, %v412_v39 }
  0xad   :  { %v415_v34 = vrot.slane %v414_v48, 1 }
  0xaf   :  { %v416_v53 = vadd.f32 %v415_v34, %v414_v48 }
  0xb1   :  { %v417_v54 = vadd.f32 %v416_v53, %v219_v37 }
  0xb3   :  { %418 = vst.msk [vmem:[%s1320_s2] sm:$0x1] %vm14_vm0, %v417_v54 }

// kernel: residual_block.11
= control target key start
LH: loop header
LB: loop body
LE: loop exit
PB: predicated region body
PF: predicated region fallthrough
CT: control target
= control target key end

     0   :  { %v100_v4 = vlaneseq  ;;  %vm630_vm0 = vcmask 261120   ;;  %s1691_s0 = inlined_call_operand.vmem [shape: f32[512,32], index: 0, kind: input, shape index: {}]   ;;  %s1692_s1 = inlined_call_operand.vmem [shape: f32[1,32], index: 1, kind: input, shape index: {}]   ;;  %s1693_s2 = inlined_call_operand.vmem [shape: f32[1,32], index: 2, kind: input, shape index: {}]   ;;  %s1694_s3 = inlined_call_operand.vmem [shape: f32[1,32], index: 3, kind: input, shape index: {}]   ;;  %s1695_s4 = inlined_call_operand.vmem [shape: f32[1,32], index: 4, kind: input, shape index: {}]   ;;  %s1696_s5 = inlined_call_operand.vmem [shape: f32[512,32], index: 5, kind: input, shape index: {}]   ;;  %s1697_s6 = inlined_call_operand.hbm [shape: f32[512,32], index: 6, kind: output, shape index: {}]  }
   0x1   :  { %v88_v0 = vld [vmem:[%s1692_s1] sm:$0x1]  ;;  %v795_v12 = vld [vmem:[%s1691_s0 + $0x8] sm:$0xff]  ;;  %v804_v14 = vld [vmem:[%s1691_s0 + $0x10] sm:$0xff] }
   0x2   :  { %v89_v1 = vld [vmem:[%s1693_s2] sm:$0x1]  ;;  %v92_v2 = vmul.f32 0.001953125, %v88_v0  ;;  %v784_v7 = vshrl.u32 %v100_v4, 7  ;;  %v809_v15 = vld [vmem:[%s1691_s0 + $0x18] sm:$0xff]  ;;  %v819_v17 = vld [vmem:[%s1691_s0 + $0x28] sm:$0xff] }
   0x3   :  { %v93_v3 = vmul.f32 0.001953125, %v89_v1  ;;  %v790_v11 = vld [vmem:[%s1691_s0] sm:$0xff]  ;;  %v824_v18 = vld [vmem:[%s1691_s0 + $0x30] sm:$0xff]  ;;  %v829_v19 = vld [vmem:[%s1691_s0 + $0x38] sm:$0xff] }
   0x4   :  { %v94_v5 = vmul.f32 %v92_v2, %v92_v2  ;;  %v102_v10 = vsub.s32 0, %v784_v7  ;;  %v814_v16 = vld [vmem:[%s1691_s0 + $0x20] sm:$0xff]  ;;  %v839_v21 = vld [vmem:[%s1691_s0 + $0x48] sm:$0xff]  ;;  %v844_v22 = vld [vmem:[%s1691_s0 + $0x50] sm:$0xff] }
   0x5   :  { %v834_v20 = vld [vmem:[%s1691_s0 + $0x40] sm:$0xff]  ;;  %v849_v23 = vld [vmem:[%s1691_s0 + $0x58] sm:$0xff]  ;;  %v859_v25 = vld [vmem:[%s1691_s0 + $0x68] sm:$0xff] }
   0x6   :  { %v95_v6 = vsub.f32 %v93_v3, %v94_v5  ;;  %v799_v13 = vrot.slane %v92_v2, %v102_v10  ;;  %v854_v24 = vld [vmem:[%s1691_s0 + $0x60] sm:$0xff]  ;;  %v864_v26 = vld [vmem:[%s1691_s0 + $0x70] sm:$0xff]  ;;  %v873_v29 = vld [vmem:[%s1691_s0 + $0x78] sm:$0xff] }
   0x7   :  { %v878_v30 = vld [vmem:[%s1691_s0 + $0x80] sm:$0xff]  ;;  %v883_v31 = vld [vmem:[%s1691_s0 + $0x88] sm:$0xff]  ;;  %v896_v36 = vld [vmem:[%s1691_s0 + $0x90] sm:$0xff] }
   0x8   :  { %v96_v8 = vmax.f32 %v95_v6, 0.0  ;;  %v105_v27 = vsub.f32 %v790_v11, %v799_v13  ;;  %v106_v28 = vsub.f32 %v795_v12, %v799_v13  ;;  %v107_v32 = vsub.f32 %v804_v14, %v799_v13  ;;  %v901_v37 = vld [vmem:[%s1691_s0 + $0x98] sm:$0xff]  ;;  %v906_v38 = vld [vmem:[%s1691_s0 + $0xa0] sm:$0xff]  ;;  %v922_v44 = vld [vmem:[%s1691_s0 + $0xa8] sm:$0xff] }
   0x9   :  { %v108_v33 = vsub.f32 %v809_v15, %v799_v13  ;;  %v109_v34 = vsub.f32 %v814_v16, %v799_v13  ;;  %v110_v35 = vsub.f32 %v819_v17, %v799_v13  ;;  %v90_v39 = vld [vmem:[%s1694_s3] sm:$0x1]  ;;  %v111_v40 = vsub.f32 %v824_v18, %v799_v13  ;;  %v927_v45 = vld [vmem:[%s1691_s0 + $0xb0] sm:$0xff]  ;;  %v932_v46 = vld [vmem:[%s1691_s0 + $0xb8] sm:$0xff] }
   0xa   :  { %v97_v9 = vadd.f32 1e-05, %v96_v8  ;;  %v112_v41 = vsub.f32 %v829_v19, %v799_v13  ;;  %v113_v42 = vsub.f32 %v834_v20, %v799_v13  ;;  %v945_v51 = vld [vmem:[%s1691_s0 + $0xc0] sm:$0xff]  ;;  %v950_v52 = vld [vmem:[%s1691_s0 + $0xc8] sm:$0xff]  ;;  %v955_v53 = vld [vmem:[%s1691_s0 + $0xd0] sm:$0xff]  ;;  %v1700_v20 = vsub.f32 %v849_v23, %v799_v13 }
   0xb   :  { %v968_v58 = vld [vmem:[%s1691_s0 + $0xd8] sm:$0xff]  ;;  %v973_v59 = vld [vmem:[%s1691_s0 + $0xe0] sm:$0xff]  ;;  %v978_v60 = vld [vmem:[%s1691_s0 + $0xe8] sm:$0xff] }
   0xc   :  { %715 = vrsqrt.f32 %v97_v9  ;;  %v991_v1 = vld [vmem:[%s1691_s0 + $0xf0] sm:$0xff]  ;;  %v996_v2 = vld [vmem:[%s1691_s0 + $0xf8] sm:$0xff]  ;;  %v1001_v3 = vld [vmem:[%s1691_s0 + $0x100] sm:$0xff] }
   0xd   :  { %v1014_v0 = vld [vmem:[%s1691_s0 + $0x108] sm:$0xff]  ;;  %v1019_v63 = vld [vmem:[%s1691_s0 + $0x110] sm:$0xff]  ;;  %v1030_v62 = vld [vmem:[%s1691_s0 + $0x118] sm:$0xff] }
   0xe   :  { %v1035_v61 = vld [vmem:[%s1691_s0 + $0x120] sm:$0xff]  ;;  %v1048_v6 = vld [vmem:[%s1691_s0 + $0x128] sm:$0xff]  ;;  %v1063_v9 = vld [vmem:[%s1691_s0 + $0x130] sm:$0xff] }
   0xf   :  { %v1068_v7 = vld [vmem:[%s1691_s0 + $0x138] sm:$0xff]  ;;  %v502_v16 = vld [vmem:[%s1696_s5] sm:$0xff]  ;;  %v503_v18 = vld [vmem:[%s1696_s5 + $0x8] sm:$0xff] }
  0x10   :  { %v504_v19 = vld [vmem:[%s1696_s5 + $0x10] sm:$0xff]  ;;  %v507_v43 = vld [vmem:[%s1696_s5 + $0x28] sm:$0xff]  ;;  %v510_v23 = vld [vmem:[%s1696_s5 + $0x40] sm:$0xff] }
  0x19   :  { %v716_v4 = vpop.eup %715 }
  0x1a   :  { %v169_v5 = vmul.f32 %v716_v4, %v90_v39 }
  0x1c   :  { %v1052_v57 = vrot.slane %v169_v5, %v102_v10  ;;  %v1073_v10 = vld [vmem:[%s1695_s4] ss:$0 sm:$0xff] }
  0x1e   :  { %v176_v56 = vmul.f32 %v1052_v57, %v105_v27  ;;  %v177_v55 = vmul.f32 %v1052_v57, %v106_v28  ;;  %v178_v8 = vmul.f32 %v1052_v57, %v107_v32  ;;  %v179_v39 = vmul.f32 %v1052_v57, %v108_v33  ;;  %v505_v33 = vld [vmem:[%s1696_s5 + $0x18] sm:$0xff] }
  0x1f   :  { %v180_v11 = vmul.f32 %v1052_v57, %v109_v34  ;;  %v181_v12 = vmul.f32 %v1052_v57, %v110_v35  ;;  %v182_v14 = vmul.f32 %v1052_v57, %v111_v40  ;;  %v183_v15 = vmul.f32 %v1052_v57, %v112_v41 }
  0x20   :  { %v246_v27 = vadd.f32 %v1073_v10, %v176_v56  ;;  %v247_v17 = vadd.f32 %v1073_v10, %v177_v55  ;;  %v248_v28 = vadd.f32 %v1073_v10, %v178_v8  ;;  %v249_v32 = vadd.f32 %v1073_v10, %v179_v39 }
  0x21   :  { %v250_v34 = vadd.f32 %v1073_v10, %v180_v11  ;;  %v251_v35 = vadd.f32 %v1073_v10, %v181_v12  ;;  %v252_v40 = vadd.f32 %v1073_v10, %v182_v14  ;;  %v253_v41 = vadd.f32 %v1073_v10, %v183_v15  ;;  %v506_v11 = vld [vmem:[%s1696_s5 + $0x20] sm:$0xff] }
  0x22   :  { %vm310_vm1 = vcmp.ge.f32.partialorder %v246_v27, 0.0  ;;  %v374_v55 = vmul.f32 0.1, %v246_v27  ;;  %vm311_vm2 = vcmp.ge.f32.partialorder %v247_v17, 0.0  ;;  %v375_v56 = vmul.f32 0.1, %v247_v17 }
  0x23   :  { %vm312_vm3 = vcmp.ge.f32.partialorder %v248_v28, 0.0  ;;  %v376_v8 = vmul.f32 0.1, %v248_v28  ;;  %vm313_vm4 = vcmp.ge.f32.partialorder %v249_v32, 0.0  ;;  %v377_v39 = vmul.f32 0.1, %v249_v32 }
  0x24   :  { %v438_v4 = vsel %vm310_vm1, %v246_v27, %v374_v55  ;;  %v439_v5 = vsel %vm311_vm2, %v247_v17, %v375_v56  ;;  %vm314_vm5 = vcmp.ge.f32.partialorder %v250_v34, 0.0  ;;  %v378_v54 = vmul.f32 0.1, %v250_v34 }
  0x25   :  { %v566_v12 = vadd.f32 %v502_v16, %v438_v4  ;;  %v567_v14 = vadd.f32 %v503_v18, %v439_v5  ;;  %v440_v50 = vsel %vm312_vm3, %v248_v28, %v376_v8  ;;  %v441_v15 = vsel %vm313_vm4, %v249_v32, %v377_v39  ;;  %v508_v4 = vld [vmem:[%s1696_s5 + $0x30] sm:$0xff] }
  0x26   :  { %v568_v49 = vadd.f32 %v504_v19, %v440_v50  ;;  %v569_v48 = vadd.f32 %v505_v33, %v441_v15  ;;  %v442_v47 = vsel %vm314_vm5, %v250_v34, %v378_v54  ;;  %vm315_vm6 = vcmp.ge.f32.partialorder %v251_v35, 0.0  ;;  %v509_v54 = vld [vmem:[%s1696_s5 + $0x38] sm:$0xff] }
  0x27   :  { %631 = vst.msk [vmem:[#allocation2] sm:$0xff] %vm630_vm0, %v566_v12  ;;  %632 = vst.msk [vmem:[#allocation2 + $0x8] sm:$0xff] %vm630_vm0, %v567_v14  ;;  %v570_v27 = vadd.f32 %v506_v11, %v442_v47  ;;  %v379_v17 = vmul.f32 0.1, %v251_v35  ;;  %vm316_vm7 = vcmp.ge.f32.partialorder %v252_v40, 0.0  ;;  %vm317_vm8 = vcmp.ge.f32.partialorder %v253_v41, 0.0 }
  0x28   :  { %v380_v55 = vmul.f32 0.1, %v252_v40  ;;  %633 = vst.msk [vmem:[#allocation2 + $0x10] sm:$0xff] %vm630_vm0, %v568_v49  ;;  %634 = vst.msk [vmem:[#allocation2 + $0x18] sm:$0xff] %vm630_vm0, %v569_v48  ;;  %v381_v50 = vmul.f32 0.1, %v253_v41  ;;  %v184_v47 = vmul.f32 %v1052_v57, %v113_v42  ;;  %v1698_v5 = vsub.f32 %v839_v21, %v799_v13 }
  0x29   :  { %635 = vst.msk [vmem:[#allocation2 + $0x20] sm:$0xff] %vm630_vm0, %v570_v27  ;;  %v443_v48 = vsel %vm315_vm6, %v251_v35, %v379_v17  ;;  %v1699_v28 = vsub.f32 %v844_v22, %v799_v13  ;;  %v187_v42 = vmul.f32 %v1052_v57, %v1700_v20  ;;  %v1701_v8 = vsub.f32 %v854_v24, %v799_v13  ;;  %v513_v24 = vld [vmem:[%s1696_s5 + $0x58] sm:$0xff]  ;;  %v515_v20 = vld [vmem:[%s1696_s5 + $0x68] sm:$0xff] }
  0x2a   :  { %v185_v16 = vmul.f32 %v1052_v57, %v1698_v5  ;;  %v444_v49 = vsel %vm316_vm7, %v252_v40, %v380_v55  ;;  %v571_v18 = vadd.f32 %v507_v43, %v443_v48  ;;  %v445_v21 = vsel %vm317_vm8, %v253_v41, %v381_v50  ;;  %v511_v43 = vld [vmem:[%s1696_s5 + $0x48] sm:$0xff]  ;;  %v512_v41 = vld [vmem:[%s1696_s5 + $0x50] sm:$0xff]  ;;  %v514_v48 = vld [vmem:[%s1696_s5 + $0x60] sm:$0xff] }
  0x2b   :  { %v186_v32 = vmul.f32 %v1052_v57, %v1699_v28  ;;  %v572_v19 = vadd.f32 %v508_v4, %v444_v49  ;;  %v254_v33 = vadd.f32 %v1073_v10, %v184_v47  ;;  %v573_v34 = vadd.f32 %v509_v54, %v445_v21 }
  0x2c   :  { %v255_v56 = vadd.f32 %v1073_v10, %v185_v16  ;;  %v257_v40 = vadd.f32 %v1073_v10, %v187_v42  ;;  %636 = vst.msk [vmem:[#allocation2 + $0x28] sm:$0xff] %vm630_vm0, %v571_v18  ;;  %v188_v39 = vmul.f32 %v1052_v57, %v1701_v8  ;;  %v1702_v11 = vsub.f32 %v859_v25, %v799_v13 }
  0x2d   :  { %v256_v35 = vadd.f32 %v1073_v10, %v186_v32  ;;  %637 = vst.msk [vmem:[#allocation2 + $0x30] sm:$0xff] %vm630_vm0, %v572_v19  ;;  %vm318_vm9 = vcmp.ge.f32.partialorder %v254_v33, 0.0  ;;  %v382_v22 = vmul.f32 0.1, %v254_v33  ;;  %638 = vst.msk [vmem:[#allocation2 + $0x38] sm:$0xff] %vm630_vm0, %v573_v34  ;;  %v1703_v42 = vsub.f32 %v864_v26, %v799_v13 }
  0x2e   :  { %v189_v12 = vmul.f32 %v1052_v57, %v1702_v11  ;;  %vm319_vm10 = vcmp.ge.f32.partialorder %v255_v56, 0.0  ;;  %v383_v14 = vmul.f32 0.1, %v255_v56  ;;  %vm321_vm12 = vcmp.ge.f32.partialorder %v257_v40, 0.0 }
  0x2f   :  { %vm320_vm11 = vcmp.ge.f32.partialorder %v256_v35, 0.0  ;;  %v384_v15 = vmul.f32 0.1, %v256_v35  ;;  %v446_v27 = vsel %vm318_vm9, %v254_v33, %v382_v22  ;;  %v385_v17 = vmul.f32 0.1, %v257_v40 }
  0x30   :  { %v258_v55 = vadd.f32 %v1073_v10, %v188_v39  ;;  %v574_v4 = vadd.f32 %v510_v23, %v446_v27  ;;  %v447_v50 = vsel %vm319_vm10, %v255_v56, %v383_v14  ;;  %v259_v54 = vadd.f32 %v1073_v10, %v189_v12 }
  0x31   :  { %v448_v25 = vsel %vm320_vm11, %v256_v35, %v384_v15  ;;  %v575_v47 = vadd.f32 %v511_v43, %v447_v50  ;;  %v449_v16 = vsel %vm321_vm12, %v257_v40, %v385_v17  ;;  %v190_v18 = vmul.f32 %v1052_v57, %v1703_v42 }
  0x32   :  { %v576_v5 = vadd.f32 %v512_v41, %v448_v25  ;;  %vm322_vm13 = vcmp.ge.f32.partialorder %v258_v55, 0.0  ;;  %639 = vst.msk [vmem:[#allocation2 + $0x40] sm:$0xff] %vm630_vm0, %v574_v4  ;;  %v577_v49 = vadd.f32 %v513_v24, %v449_v16  ;;  %v386_v28 = vmul.f32 0.1, %v258_v55 }
  0x33   :  { %vm323_vm14 = vcmp.ge.f32.partialorder %v259_v54, 0.0  ;;  %v387_v32 = vmul.f32 0.1, %v259_v54  ;;  %640 = vst.msk [vmem:[#allocation2 + $0x48] sm:$0xff] %vm630_vm0, %v575_v47  ;;  %v1704_v19 = vsub.f32 %v873_v29, %v799_v13  ;;  %v1705_v33 = vsub.f32 %v878_v30, %v799_v13 }
  0x34   :  { %641 = vst.msk [vmem:[#allocation2 + $0x50] sm:$0xff] %vm630_vm0, %v576_v5  ;;  %v1706_v56 = vsub.f32 %v883_v31, %v799_v13 }
  0x35   :  { %v191_v21 = vmul.f32 %v1052_v57, %v1704_v19  ;;  %v192_v34 = vmul.f32 %v1052_v57, %v1705_v33 }
  0x36   :  { %v193_v35 = vmul.f32 %v1052_v57, %v1706_v56 }
  0x37   :  { %11 = vsyncpa [#allocation3], 0  ;;  %642 = vst.msk [vmem:[#allocation2 + $0x58] sm:$0xff] %vm630_vm0, %v577_v49  ;;  %v450_v26 = vsel %vm322_vm13, %v258_v55, %v386_v28  ;;  %v451_v40 = vsel %vm323_vm14, %v259_v54, %v387_v32  ;;  %v1707_v29 = vsub.f32 %v896_v36, %v799_v13  ;;  %v1708_v30 = vsub.f32 %v901_v37, %v799_v13  ;;  %v516_v8 = vld [vmem:[%s1696_s5 + $0x70] sm:$0xff]  ;;  %v517_v36 = vld [vmem:[%s1696_s5 + $0x78] sm:$0xff]  ;;  %s740_s15 = smov [#allocation2]  }
  0x38   :  { %v578_v43 = vadd.f32 %v514_v48, %v450_v26  ;;  %v579_v31 = vadd.f32 %v515_v20, %v451_v40  ;;  %v260_v41 = vadd.f32 %v1073_v10, %v190_v18  ;;  %v261_v39 = vadd.f32 %v1073_v10, %v191_v21  ;;  %v518_v37 = vld [vmem:[%s1696_s5 + $0x80] sm:$0xff]  ;;  %v519_v14 = vld [vmem:[%s1696_s5 + $0x88] sm:$0xff]  ;;  %v520_v47 = vld [vmem:[%s1696_s5 + $0x90] sm:$0xff]  ;;  %s700_s16 = sshll.u32 %s740_s15, 4  ;;  %s701_s16 = int_to_ptr.vmem [resolvable:$true] %s700_s16 }
  0x39   :  { %v194_v22 = vmul.f32 %v1052_v57, %v1707_v29  ;;  %v195_v23 = vmul.f32 %v1052_v57, %v1708_v30  ;;  %v262_v11 = vadd.f32 %v1073_v10, %v192_v34  ;;  %v263_v12 = vadd.f32 %v1073_v10, %v193_v35  ;;  %v521_v19 = vld [vmem:[%s1696_s5 + $0x98] sm:$0xff]  ;;  %s718_s19 = scalar_lea.vmem %s701_s16, 8192  ;;  %p723_p1 = scmp.lt.s32.totalorder %s701_s16, %s701_s16 }
  0x3a   :  { %643 = vst.msk [vmem:[#allocation2 + $0x60] sm:$0xff] %vm630_vm0, %v578_v43  ;;  %644 = vst.msk [vmem:[#allocation2 + $0x68] sm:$0xff] %vm630_vm0, %v579_v31  ;;  %vm324_vm15 = vcmp.ge.f32.partialorder %v260_v41, 0.0  ;;  %v388_v17 = vmul.f32 0.1, %v260_v41  ;;  %vm325_vm1 = vcmp.ge.f32.partialorder %v261_v39, 0.0  ;;  %v1709_v21 = vsub.f32 %v906_v38, %v799_v13  ;;  %p719_p0 = scmp.ne.s32.totalorder %s701_s16, %s718_s19  ;;  %p724_p2 = scmp.lt.s32.totalorder %s718_s19, %s718_s19 }
  0x3b   :  { %v264_v15 = vadd.f32 %v1073_v10, %v194_v22  ;;  %v265_v27 = vadd.f32 %v1073_v10, %v195_v23  ;;  %v389_v24 = vmul.f32 0.1, %v261_v39  ;;  %vm326_vm2 = vcmp.ge.f32.partialorder %v262_v11, 0.0 }
  0x3c   :  { %v390_v55 = vmul.f32 0.1, %v262_v11  ;;  %vm327_vm3 = vcmp.ge.f32.partialorder %v263_v12, 0.0  ;;  %v391_v4 = vmul.f32 0.1, %v263_v12  ;;  %v452_v50 = vsel %vm324_vm15, %v260_v41, %v388_v17  ;;  %p725_p3 = por %p724_p2, %p723_p1 }
  0x3d   :  { %v453_v25 = vsel %vm325_vm1, %v261_v39, %v389_v24  ;;  %vm328_vm4 = vcmp.ge.f32.partialorder %v264_v15, 0.0  ;;  %v392_v54 = vmul.f32 0.1, %v264_v15  ;;  %v580_v5 = vadd.f32 %v516_v8, %v452_v50  ;;  %v524_v39 = vld [vmem:[%s1696_s5 + $0xb0] sm:$0xff] }
  0x3e   :  { %v581_v16 = vadd.f32 %v517_v36, %v453_v25  ;;  %v454_v48 = vsel %vm326_vm2, %v262_v11, %v390_v55  ;;  %v455_v49 = vsel %vm327_vm3, %v263_v12, %v391_v4  ;;  %vm329_vm5 = vcmp.ge.f32.partialorder %v265_v27, 0.0  ;;  %v525_v11 = vld [vmem:[%s1696_s5 + $0xb8] sm:$0xff]  ;;  %v526_v55 = vld [vmem:[%s1696_s5 + $0xc0] sm:$0xff]  ;;  %p726_p4 = pnand %p725_p3, %p719_p0 }
  0x3f   :  { %v582_v28 = vadd.f32 %v518_v37, %v454_v48  ;;  %v583_v32 = vadd.f32 %v519_v14, %v455_v49  ;;  %v456_v20 = vsel %vm328_vm4, %v264_v15, %v392_v54  ;;  %645 = vst.msk [vmem:[#allocation2 + $0x70] sm:$0xff] %vm630_vm0, %v580_v5  ;;  %v393_v18 = vmul.f32 0.1, %v265_v27 }
  0x40   :  { %646 = vst.msk [vmem:[#allocation2 + $0x78] sm:$0xff] %vm630_vm0, %v581_v16  ;;  %v584_v42 = vadd.f32 %v520_v47, %v456_v20  ;;  %v196_v33 = vmul.f32 %v1052_v57, %v1709_v21  ;;  %v1710_v34 = vsub.f32 %v922_v44, %v799_v13  ;;  %v1711_v35 = vsub.f32 %v927_v45, %v799_v13  ;;  %v527_v21 = vld [vmem:[%s1696_s5 + $0xc8] sm:$0xff] }
  0x41   :  { %647 = vst.msk [vmem:[#allocation2 + $0x80] sm:$0xff] %vm630_vm0, %v582_v28  ;;  %648 = vst.msk [vmem:[#allocation2 + $0x88] sm:$0xff] %vm630_vm0, %v583_v32  ;;  %v1712_v40 = vsub.f32 %v932_v46, %v799_v13  ;;  %v1713_v29 = vsub.f32 %v945_v51, %v799_v13  ;;  %v1714_v22 = vsub.f32 %v950_v52, %v799_v13  ;;  %v522_v46 = vld [vmem:[%s1696_s5 + $0xa0] sm:$0xff]  ;;  %v523_v52 = vld [vmem:[%s1696_s5 + $0xa8] sm:$0xff] }
  0x42   :  { %v197_v56 = vmul.f32 %v1052_v57, %v1710_v34  ;;  %v198_v26 = vmul.f32 %v1052_v57, %v1711_v35  ;;  %649 = vst.msk [vmem:[#allocation2 + $0x90] sm:$0xff] %vm630_vm0, %v584_v42  ;;  %v457_v45 = vsel %vm329_vm5, %v265_v27, %v393_v18  ;;  %v266_v23 = vadd.f32 %v1073_v10, %v196_v33  ;;  %v528_v35 = vld [vmem:[%s1696_s5 + $0xd0] sm:$0xff] }
  0x43   :  { %v199_v38 = vmul.f32 %v1052_v57, %v1712_v40  ;;  %v200_v44 = vmul.f32 %v1052_v57, %v1713_v29  ;;  %v201_v30 = vmul.f32 %v1052_v57, %v1714_v22  ;;  %v1715_v51 = vsub.f32 %v955_v53, %v799_v13 }
  0x44   :  { %v267_v43 = vadd.f32 %v1073_v10, %v197_v56  ;;  %v585_v41 = vadd.f32 %v521_v19, %v457_v45  ;;  %v268_v8 = vadd.f32 %v1073_v10, %v198_v26  ;;  %vm330_vm6 = vcmp.ge.f32.partialorder %v266_v23, 0.0 }
  0x45   :  { %v202_v31 = vmul.f32 %v1052_v57, %v1715_v51  ;;  %v269_v36 = vadd.f32 %v1073_v10, %v199_v38  ;;  %v270_v53 = vadd.f32 %v1073_v10, %v200_v44  ;;  %v394_v37 = vmul.f32 0.1, %v266_v23  ;;  %v530_v51 = vld [vmem:[%s1696_s5 + $0xe0] sm:$0xff] }
  0x46   :  { %vm331_vm7 = vcmp.ge.f32.partialorder %v267_v43, 0.0  ;;  %v395_v12 = vmul.f32 0.1, %v267_v43  ;;  %650 = vst.msk [vmem:[#allocation2 + $0x98] sm:$0xff] %vm630_vm0, %v585_v41  ;;  %vm332_vm8 = vcmp.ge.f32.partialorder %v268_v8, 0.0  ;;  %v271_v48 = vadd.f32 %v1073_v10, %v201_v30 }
  0x47   :  { %v396_v14 = vmul.f32 0.1, %v268_v8  ;;  %vm333_vm9 = vcmp.ge.f32.partialorder %v269_v36, 0.0  ;;  %v397_v15 = vmul.f32 0.1, %v269_v36  ;;  %v458_v27 = vsel %vm330_vm6, %v266_v23, %v394_v37  ;;  %v529_v23 = vld [vmem:[%s1696_s5 + $0xd8] sm:$0xff] }
  0x48   :  { %v459_v17 = vsel %vm331_vm7, %v267_v43, %v395_v12  ;;  %vm334_vm10 = vcmp.ge.f32.partialorder %v270_v53, 0.0  ;;  %v398_v24 = vmul.f32 0.1, %v270_v53  ;;  %v586_v4 = vadd.f32 %v522_v46, %v458_v27 }
  0x49   :  { %v587_v50 = vadd.f32 %v523_v52, %v459_v17  ;;  %v460_v25 = vsel %vm332_vm8, %v268_v8, %v396_v14  ;;  %v461_v54 = vsel %vm333_vm9, %v269_v36, %v397_v15  ;;  %v272_v28 = vadd.f32 %v1073_v10, %v202_v31  ;;  %v532_v8 = vld [vmem:[%s1696_s5 + $0xf0] sm:$0xff] }
  0x4a   :  { %v588_v47 = vadd.f32 %v524_v39, %v460_v25  ;;  %v589_v5 = vadd.f32 %v525_v11, %v461_v54  ;;  %v462_v16 = vsel %vm334_vm10, %v270_v53, %v398_v24  ;;  %651 = vst.msk [vmem:[#allocation2 + $0xa0] sm:$0xff] %vm630_vm0, %v586_v4  ;;  %v1716_v32 = vsub.f32 %v968_v58, %v799_v13 }
  0x4b   :  { %652 = vst.msk [vmem:[#allocation2 + $0xa8] sm:$0xff] %vm630_vm0, %v587_v50  ;;  %v590_v49 = vadd.f32 %v526_v55, %v462_v16  ;;  %v1717_v42 = vsub.f32 %v973_v59, %v799_v13  ;;  %vm335_vm11 = vcmp.ge.f32.partialorder %v271_v48, 0.0  ;;  %v399_v19 = vmul.f32 0.1, %v271_v48 }
  0x4c   :  { %v203_v20 = vmul.f32 %v1052_v57, %v1716_v32  ;;  %653 = vst.msk [vmem:[#allocation2 + $0xb0] sm:$0xff] %vm630_vm0, %v588_v47  ;;  %654 = vst.msk [vmem:[#allocation2 + $0xb8] sm:$0xff] %vm630_vm0, %v589_v5  ;;  %v1718_v58 = vsub.f32 %v978_v60, %v799_v13  ;;  %v1719_v59 = vsub.f32 %v991_v1, %v799_v13  ;;  %vm336_vm12 = vcmp.ge.f32.partialorder %v272_v28, 0.0 }
  0x4d   :  { %v204_v18 = vmul.f32 %v1052_v57, %v1717_v42  ;;  %655 = vst.msk [vmem:[#allocation2 + $0xc0] sm:$0xff] %vm630_vm0, %v590_v49  ;;  %v400_v56 = vmul.f32 0.1, %v272_v28  ;;  %v463_v60 = vsel %vm335_vm11, %v271_v48, %v399_v19  ;;  %v1720_v1 = vsub.f32 %v996_v2, %v799_v13  ;;  %v531_v2 = vld [vmem:[%s1696_s5 + $0xe8] sm:$0xff] }
  0x4e   :  { %v205_v33 = vmul.f32 %v1052_v57, %v1718_v58  ;;  %v206_v34 = vmul.f32 %v1052_v57, %v1719_v59  ;;  %v273_v26 = vadd.f32 %v1073_v10, %v203_v20  ;;  %v591_v22 = vadd.f32 %v527_v21, %v463_v60  ;;  %v536_v60 = vld [vmem:[%s1696_s5 + $0x110] sm:$0xff] }
  0x4f   :  { %v274_v40 = vadd.f32 %v1073_v10, %v204_v18  ;;  %v207_v44 = vmul.f32 %v1052_v57, %v1720_v1  ;;  %v464_v30 = vsel %vm336_vm12, %v272_v28, %v400_v56  ;;  %v1721_v53 = vsub.f32 %v1001_v3, %v799_v13  ;;  %v533_v3 = vld [vmem:[%s1696_s5 + $0xf8] sm:$0xff]  ;;  %v534_v18 = vld [vmem:[%s1696_s5 + $0x100] sm:$0xff] }
  0x50   :  { %v275_v38 = vadd.f32 %v1073_v10, %v205_v33  ;;  %v276_v29 = vadd.f32 %v1073_v10, %v206_v34  ;;  %vm337_vm13 = vcmp.ge.f32.partialorder %v273_v26, 0.0  ;;  %v401_v45 = vmul.f32 0.1, %v273_v26  ;;  %656 = vst.msk [vmem:[#allocation2 + $0xc8] sm:$0xff] %vm630_vm0, %v591_v22 }
  0x51   :  { %v592_v46 = vadd.f32 %v528_v35, %v464_v30  ;;  %vm338_vm14 = vcmp.ge.f32.partialorder %v274_v40, 0.0  ;;  %v402_v43 = vmul.f32 0.1, %v274_v40  ;;  %v277_v11 = vadd.f32 %v1073_v10, %v207_v44  ;;  %v539_v44 = vld [vmem:[%s1696_s5 + $0x128] sm:$0xff] }
  0x52   :  { %vm339_vm15 = vcmp.ge.f32.partialorder %v275_v38, 0.0  ;;  %v465_v31 = vsel %vm337_vm13, %v273_v26, %v401_v45  ;;  %v403_v41 = vmul.f32 0.1, %v275_v38  ;;  %vm340_vm1 = vcmp.ge.f32.partialorder %v276_v29, 0.0 }
  0x53   :  { %v404_v52 = vmul.f32 0.1, %v276_v29  ;;  %657 = vst.msk [vmem:[#allocation2 + $0xd0] sm:$0xff] %vm630_vm0, %v592_v46  ;;  %v593_v39 = vadd.f32 %v529_v23, %v465_v31  ;;  %v466_v36 = vsel %vm338_vm14, %v274_v40, %v402_v43  ;;  %v208_v37 = vmul.f32 %v1052_v57, %v1721_v53  ;;  %v64_v23 = vld [vmem:[%s1691_s0 + $0x140] sm:$0xff]  ;;  %v65_v31 = vld [vmem:[%s1691_s0 + $0x148] sm:$0xff] }
  0x54   :  { %v594_v12 = vadd.f32 %v530_v51, %v466_v36  ;;  %v467_v14 = vsel %vm339_vm15, %v275_v38, %v403_v41  ;;  %v1722_v27 = vsub.f32 %v1014_v0, %v799_v13  ;;  %vm341_vm2 = vcmp.ge.f32.partialorder %v277_v11, 0.0  ;;  %v537_v38 = vld [vmem:[%s1696_s5 + $0x118] sm:$0xff]  ;;  %v66_v36 = vld [vmem:[%s1691_s0 + $0x150] sm:$0xff]  ;;  %v68_v53 = vld [vmem:[%s1691_s0 + $0x160] sm:$0xff] }
  0x55   :  { %v468_v15 = vsel %vm340_vm1, %v276_v29, %v404_v52  ;;  %658 = vst.msk [vmem:[#allocation2 + $0xd8] sm:$0xff] %vm630_vm0, %v593_v39  ;;  %v595_v24 = vadd.f32 %v531_v2, %v467_v14  ;;  %v405_v4 = vmul.f32 0.1, %v277_v11  ;;  %v278_v50 = vadd.f32 %v1073_v10, %v208_v37  ;;  %v540_v2 = vld [vmem:[%s1696_s5 + $0x130] sm:$0xff] }
  0x56   :  { %v209_v17 = vmul.f32 %v1052_v57, %v1722_v27  ;;  %v596_v55 = vadd.f32 %v532_v8, %v468_v15  ;;  %659 = vst.msk [vmem:[#allocation2 + $0xe0] sm:$0xff] %vm630_vm0, %v594_v12  ;;  %v1723_v0 = vsub.f32 %v1019_v63, %v799_v13  ;;  %v1724_v47 = vsub.f32 %v1030_v62, %v799_v13  ;;  %v69_v27 = vld [vmem:[%s1691_s0 + $0x168] sm:$0xff] }
  0x57   :  { %660 = vst.msk [vmem:[#allocation2 + $0xe8] sm:$0xff] %vm630_vm0, %v595_v24  ;;  %v469_v16 = vsel %vm341_vm2, %v277_v11, %v405_v4  ;;  %v1725_v48 = vsub.f32 %v1035_v61, %v799_v13  ;;  %v1726_v63 = vsub.f32 %v1048_v6, %v799_v13  ;;  %v1727_v62 = vsub.f32 %v1063_v9, %v799_v13  ;;  %v535_v6 = vld [vmem:[%s1696_s5 + $0x108] sm:$0xff]  ;;  %v67_v11 = vld [vmem:[%s1691_s0 + $0x158] sm:$0xff] }
  0x58   :  { %v279_v25 = vadd.f32 %v1073_v10, %v209_v17  ;;  %v210_v54 = vmul.f32 %v1052_v57, %v1723_v0  ;;  %v211_v5 = vmul.f32 %v1052_v57, %v1724_v47  ;;  %661 = vst.msk [vmem:[#allocation2 + $0xf0] sm:$0xff] %vm630_vm0, %v596_v55  ;;  %v597_v20 = vadd.f32 %v533_v3, %v469_v16  ;;  %v70_v17 = vld [vmem:[%s1691_s0 + $0x170] sm:$0xff]  ;;  %v541_v4 = vld [vmem:[%s1696_s5 + $0x138] sm:$0xff] }
  0x59   :  { %v212_v49 = vmul.f32 %v1052_v57, %v1725_v48  ;;  %v213_v28 = vmul.f32 %v1052_v57, %v1726_v63  ;;  %v214_v32 = vmul.f32 %v1052_v57, %v1727_v62  ;;  %vm342_vm3 = vcmp.ge.f32.partialorder %v278_v50, 0.0 }
  0x5a   :  { %v406_v42 = vmul.f32 0.1, %v278_v50  ;;  %vm343_vm4 = vcmp.ge.f32.partialorder %v279_v25, 0.0  ;;  %v407_v61 = vmul.f32 0.1, %v279_v25  ;;  %v280_v19 = vadd.f32 %v1073_v10, %v210_v54  ;;  %662 = vst.msk [vmem:[#allocation2 + $0xf8] sm:$0xff] %vm630_vm0, %v597_v20 }
  0x5b   :  { %v281_v21 = vadd.f32 %v1073_v10, %v211_v5  ;;  %v282_v9 = vadd.f32 %v1073_v10, %v212_v49  ;;  %v283_v33 = vadd.f32 %v1073_v10, %v213_v28  ;;  %v284_v59 = vadd.f32 %v1073_v10, %v214_v32 }
  0x5c   :  { %v470_v58 = vsel %vm342_vm3, %v278_v50, %v406_v42  ;;  %v1728_v34 = vsub.f32 %v1068_v7, %v799_v13  ;;  %v471_v26 = vsel %vm343_vm4, %v279_v25, %v407_v61  ;;  %vm344_vm5 = vcmp.ge.f32.partialorder %v280_v19, 0.0  ;;  %v538_v7 = vld [vmem:[%s1696_s5 + $0x120] sm:$0xff] }
  0x5d   :  { %v598_v35 = vadd.f32 %v534_v18, %v470_v58  ;;  %v408_v40 = vmul.f32 0.1, %v280_v19  ;;  %v599_v29 = vadd.f32 %v535_v6, %v471_v26  ;;  %vm345_vm6 = vcmp.ge.f32.partialorder %v281_v21, 0.0  ;;  %v542_v6 = vld [vmem:[%s1696_s5 + $0x140] sm:$0xff]  ;;  %v543_v58 = vld [vmem:[%s1696_s5 + $0x148] sm:$0xff] }
  0x5e   :  { %v215_v56 = vmul.f32 %v1052_v57, %v1728_v34  ;;  %v409_v1 = vmul.f32 0.1, %v281_v21  ;;  %vm346_vm7 = vcmp.ge.f32.partialorder %v282_v9, 0.0  ;;  %v410_v30 = vmul.f32 0.1, %v282_v9 }
  0x5f   :  { %663 = vst.msk [vmem:[#allocation2 + $0x100] sm:$0xff] %vm630_vm0, %v598_v35  ;;  %v472_v22 = vsel %vm344_vm5, %v280_v19, %v408_v40  ;;  %vm347_vm8 = vcmp.ge.f32.partialorder %v283_v33, 0.0  ;;  %v411_v45 = vmul.f32 0.1, %v283_v33  ;;  %664 = vst.msk [vmem:[#allocation2 + $0x108] sm:$0xff] %vm630_vm0, %v599_v29  ;;  %vm348_vm9 = vcmp.ge.f32.partialorder %v284_v59, 0.0 }
  0x60   :  { %v600_v46 = vadd.f32 %v536_v60, %v472_v22  ;;  %v473_v43 = vsel %vm345_vm6, %v281_v21, %v409_v1  ;;  %v412_v51 = vmul.f32 0.1, %v284_v59  ;;  %v474_v52 = vsel %vm346_vm7, %v282_v9, %v410_v30  ;;  %v544_v35 = vld [vmem:[%s1696_s5 + $0x150] sm:$0xff]  ;;  %v71_v29 = vld [vmem:[%s1691_s0 + $0x178] sm:$0xff]  ;;  %v72_v1 = vld [vmem:[%s1691_s0 + $0x180] sm:$0xff] }
  0x61   :  { %v601_v41 = vadd.f32 %v537_v38, %v473_v43  ;;  %v475_v8 = vsel %vm347_vm8, %v283_v33, %v411_v45  ;;  %v285_v39 = vadd.f32 %v1073_v10, %v215_v56  ;;  %v602_v37 = vadd.f32 %v538_v7, %v474_v52  ;;  %v545_v38 = vld [vmem:[%s1696_s5 + $0x158] sm:$0xff]  ;;  %v546_v30 = vld [vmem:[%s1696_s5 + $0x160] sm:$0xff]  ;;  %v547_v43 = vld [vmem:[%s1696_s5 + $0x168] sm:$0xff] }
  0x62   :  { %665 = vst.msk [vmem:[#allocation2 + $0x110] sm:$0xff] %vm630_vm0, %v600_v46  ;;  %v603_v12 = vadd.f32 %v539_v44, %v475_v8  ;;  %v476_v14 = vsel %vm348_vm9, %v284_v59, %v412_v51  ;;  %v145_v15 = vsub.f32 %v64_v23, %v799_v13  ;;  %v146_v3 = vsub.f32 %v65_v31, %v799_v13 }
  0x63   :  { %666 = vst.msk [vmem:[#allocation2 + $0x118] sm:$0xff] %vm630_vm0, %v601_v41  ;;  %v604_v24 = vadd.f32 %v540_v2, %v476_v14  ;;  %vm349_vm10 = vcmp.ge.f32.partialorder %v285_v39, 0.0  ;;  %v413_v55 = vmul.f32 0.1, %v285_v39  ;;  %667 = vst.msk [vmem:[#allocation2 + $0x120] sm:$0xff] %vm630_vm0, %v602_v37  ;;  %v147_v25 = vsub.f32 %v66_v36, %v799_v13  ;;  %v73_v2 = vld [vmem:[%s1691_s0 + $0x188] sm:$0xff] }
  0x64   :  { %668 = vst.msk [vmem:[#allocation2 + $0x128] sm:$0xff] %vm630_vm0, %v603_v12  ;;  %v216_v50 = vmul.f32 %v1052_v57, %v145_v15  ;;  %v148_v0 = vsub.f32 %v67_v11, %v799_v13  ;;  %v149_v54 = vsub.f32 %v68_v53, %v799_v13  ;;  %v217_v5 = vmul.f32 %v1052_v57, %v146_v3  ;;  %v75_v36 = vld [vmem:[%s1691_s0 + $0x198] sm:$0xff]  ;;  %v76_v11 = vld [vmem:[%s1691_s0 + $0x1a0] sm:$0xff]  ;;  %v548_v14 = vld [vmem:[%s1696_s5 + $0x170] sm:$0xff] }
  0x65   :  { %669 = vst.msk [vmem:[#allocation2 + $0x130] sm:$0xff] %vm630_vm0, %v604_v24  ;;  %v477_v47 = vsel %vm349_vm10, %v285_v39, %v413_v55  ;;  %v150_v16 = vsub.f32 %v69_v27, %v799_v13  ;;  %v151_v48 = vsub.f32 %v70_v17, %v799_v13  ;;  %v218_v28 = vmul.f32 %v1052_v57, %v147_v25  ;;  %v74_v39 = vld [vmem:[%s1691_s0 + $0x190] sm:$0xff]  ;;  %v77_v55 = vld [vmem:[%s1691_s0 + $0x1a8] sm:$0xff] }
  0x66   :  { %v605_v49 = vadd.f32 %v541_v4, %v477_v47  ;;  %v286_v63 = vadd.f32 %v1073_v10, %v216_v50  ;;  %v219_v62 = vmul.f32 %v1052_v57, %v148_v0  ;;  %v287_v32 = vadd.f32 %v1073_v10, %v217_v5 }
  0x67   :  { %v220_v20 = vmul.f32 %v1052_v57, %v149_v54  ;;  %v221_v42 = vmul.f32 %v1052_v57, %v150_v16  ;;  %v222_v18 = vmul.f32 %v1052_v57, %v151_v48  ;;  %v288_v19 = vadd.f32 %v1073_v10, %v218_v28  ;;  %v549_v16 = vld [vmem:[%s1696_s5 + $0x178] sm:$0xff]  ;;  %v550_v48 = vld [vmem:[%s1696_s5 + $0x180] sm:$0xff] }
  0x68   :  { %670 = vst.msk [vmem:[#allocation2 + $0x138] sm:$0xff] %vm630_vm0, %v605_v49  ;;  %vm350_vm11 = vcmp.ge.f32.partialorder %v286_v63, 0.0  ;;  %v414_v61 = vmul.f32 0.1, %v286_v63  ;;  %v289_v21 = vadd.f32 %v1073_v10, %v219_v62  ;;  %vm351_vm12 = vcmp.ge.f32.partialorder %v287_v32, 0.0 }
  0x69   :  { %v415_v9 = vmul.f32 0.1, %v287_v32  ;;  %v290_v33 = vadd.f32 %v1073_v10, %v220_v20  ;;  %v291_v59 = vadd.f32 %v1073_v10, %v221_v42  ;;  %vm352_vm13 = vcmp.ge.f32.partialorder %v288_v19, 0.0 }
  0x6a   :  { %v478_v34 = vsel %vm350_vm11, %v286_v63, %v414_v61  ;;  %v416_v56 = vmul.f32 0.1, %v288_v19  ;;  %vm353_vm14 = vcmp.ge.f32.partialorder %v289_v21, 0.0  ;;  %v417_v60 = vmul.f32 0.1, %v289_v21 }
  0x6b   :  { %v606_v26 = vadd.f32 %v542_v6, %v478_v34  ;;  %v479_v40 = vsel %vm351_vm12, %v287_v32, %v415_v9  ;;  %vm354_vm15 = vcmp.ge.f32.partialorder %v290_v33, 0.0  ;;  %v418_v22 = vmul.f32 0.1, %v290_v33  ;;  %v78_v32 = vld [vmem:[%s1691_s0 + $0x1b0] sm:$0xff] }
  0x6c   :  { %v607_v7 = vadd.f32 %v543_v58, %v479_v40  ;;  %v480_v44 = vsel %vm352_vm13, %v288_v19, %v416_v56  ;;  %vm355_vm1 = vcmp.ge.f32.partialorder %v291_v59, 0.0  ;;  %v481_v23 = vsel %vm353_vm14, %v289_v21, %v417_v60  ;;  %v553_v40 = vld [vmem:[%s1696_s5 + $0x198] sm:$0xff] }
  0x6d   :  { %671 = vst.msk [vmem:[#allocation2 + $0x140] sm:$0xff] %vm630_vm0, %v606_v26  ;;  %v608_v45 = vadd.f32 %v544_v35, %v480_v44  ;;  %v419_v46 = vmul.f32 0.1, %v291_v59  ;;  %v292_v51 = vadd.f32 %v1073_v10, %v222_v18  ;;  %v609_v31 = vadd.f32 %v545_v38, %v481_v23  ;;  %v551_v35 = vld [vmem:[%s1696_s5 + $0x188] sm:$0xff]  ;;  %v552_v26 = vld [vmem:[%s1696_s5 + $0x190] sm:$0xff] }
  0x6e   :  { %672 = vst.msk [vmem:[#allocation2 + $0x148] sm:$0xff] %vm630_vm0, %v607_v7  ;;  %v482_v41 = vsel %vm354_vm15, %v290_v33, %v418_v22  ;;  %v152_v52 = vsub.f32 %v71_v29, %v799_v13  ;;  %v153_v8 = vsub.f32 %v72_v1, %v799_v13  ;;  %v154_v24 = vsub.f32 %v73_v2, %v799_v13  ;;  %v554_v7 = vld [vmem:[%s1696_s5 + $0x1a0] sm:$0xff]  ;;  %v79_v22 = vld [vmem:[%s1691_s0 + $0x1b8] sm:$0xff]  ;;  %v82_v2 = vld [vmem:[%s1691_s0 + $0x1d0] sm:$0xff] }
  0x6f   :  { %673 = vst.msk [vmem:[#allocation2 + $0x150] sm:$0xff] %vm630_vm0, %v608_v45  ;;  %v610_v53 = vadd.f32 %v546_v30, %v482_v41  ;;  %v483_v37 = vsel %vm355_vm1, %v291_v59, %v419_v46  ;;  %vm356_vm2 = vcmp.ge.f32.partialorder %v292_v51, 0.0  ;;  %v420_v12 = vmul.f32 0.1, %v292_v51  ;;  %674 = vst.msk [vmem:[#allocation2 + $0x158] sm:$0xff] %vm630_vm0, %v609_v31  ;;  %v80_v30 = vld [vmem:[%s1691_s0 + $0x1c0] sm:$0xff] }
  0x70   :  { %v611_v15 = vadd.f32 %v547_v43, %v483_v37  ;;  %v223_v27 = vmul.f32 %v1052_v57, %v152_v52  ;;  %v224_v17 = vmul.f32 %v1052_v57, %v153_v8  ;;  %v155_v3 = vsub.f32 %v74_v39, %v799_v13  ;;  %v83_v31 = vld [vmem:[%s1691_s0 + $0x1d8] sm:$0xff] }
  0x71   :  { %675 = vst.msk [vmem:[#allocation2 + $0x160] sm:$0xff] %vm630_vm0, %v610_v53  ;;  %v484_v4 = vsel %vm356_vm2, %v292_v51, %v420_v12  ;;  %v156_v50 = vsub.f32 %v75_v36, %v799_v13  ;;  %v157_v25 = vsub.f32 %v76_v11, %v799_v13  ;;  %v225_v5 = vmul.f32 %v1052_v57, %v154_v24  ;;  %v81_v51 = vld [vmem:[%s1691_s0 + $0x1c8] sm:$0xff] }
  0x72   :  { %676 = vst.msk [vmem:[#allocation2 + $0x168] sm:$0xff] %vm630_vm0, %v611_v15  ;;  %v612_v0 = vadd.f32 %v548_v14, %v484_v4  ;;  %v293_v54 = vadd.f32 %v1073_v10, %v223_v27  ;;  %v294_v47 = vadd.f32 %v1073_v10, %v224_v17  ;;  %v226_v49 = vmul.f32 %v1052_v57, %v155_v3  ;;  %v555_v11 = vld [vmem:[%s1696_s5 + $0x1a8] sm:$0xff]  ;;  %v84_v17 = vld [vmem:[%s1691_s0 + $0x1e0] sm:$0xff]  ;;  %v556_v4 = vld [vmem:[%s1696_s5 + $0x1b0] sm:$0xff] }
  0x73   :  { %v227_v63 = vmul.f32 %v1052_v57, %v156_v50  ;;  %v228_v28 = vmul.f32 %v1052_v57, %v157_v25  ;;  %v158_v62 = vsub.f32 %v77_v55, %v799_v13  ;;  %v295_v18 = vadd.f32 %v1073_v10, %v225_v5 }
  0x74   :  { %677 = vst.msk [vmem:[#allocation2 + $0x170] sm:$0xff] %vm630_vm0, %v612_v0  ;;  %vm357_vm3 = vcmp.ge.f32.partialorder %v293_v54, 0.0  ;;  %v421_v20 = vmul.f32 0.1, %v293_v54  ;;  %vm358_vm4 = vcmp.ge.f32.partialorder %v294_v47, 0.0  ;;  %v296_v61 = vadd.f32 %v1073_v10, %v226_v49 }
  0x75   :  { %v422_v42 = vmul.f32 0.1, %v294_v47  ;;  %v297_v6 = vadd.f32 %v1073_v10, %v227_v63  ;;  %v298_v19 = vadd.f32 %v1073_v10, %v228_v28  ;;  %v229_v58 = vmul.f32 %v1052_v57, %v158_v62  ;;  %v557_v63 = vld [vmem:[%s1696_s5 + $0x1b8] sm:$0xff] }
  0x76   :  { %v485_v21 = vsel %vm357_vm3, %v293_v54, %v421_v20  ;;  %v159_v33 = vsub.f32 %v78_v32, %v799_v13  ;;  %vm359_vm5 = vcmp.ge.f32.partialorder %v295_v18, 0.0  ;;  %v423_v56 = vmul.f32 0.1, %v295_v18 }
  0x77   :  { %v486_v9 = vsel %vm358_vm4, %v294_v47, %v422_v42  ;;  %v613_v59 = vadd.f32 %v549_v16, %v485_v21  ;;  %vm360_vm6 = vcmp.ge.f32.partialorder %v296_v61, 0.0  ;;  %v424_v60 = vmul.f32 0.1, %v296_v61  ;;  %v558_v42 = vld [vmem:[%s1696_s5 + $0x1c0] sm:$0xff] }
  0x78   :  { %v614_v34 = vadd.f32 %v550_v48, %v486_v9  ;;  %vm361_vm7 = vcmp.ge.f32.partialorder %v297_v6, 0.0  ;;  %v425_v38 = vmul.f32 0.1, %v297_v6  ;;  %v487_v29 = vsel %vm359_vm5, %v295_v18, %v423_v56  ;;  %v559_v18 = vld [vmem:[%s1696_s5 + $0x1c8] sm:$0xff] }
  0x79   :  { %678 = vst.msk [vmem:[#allocation2 + $0x178] sm:$0xff] %vm630_vm0, %v613_v59  ;;  %vm362_vm8 = vcmp.ge.f32.partialorder %v298_v19, 0.0  ;;  %v426_v1 = vmul.f32 0.1, %v298_v19  ;;  %v299_v44 = vadd.f32 %v1073_v10, %v229_v58  ;;  %v615_v45 = vadd.f32 %v551_v35, %v487_v29  ;;  %v85_v59 = vld [vmem:[%s1691_s0 + $0x1e8] sm:$0xff] }
  0x7a   :  { %679 = vst.msk [vmem:[#allocation2 + $0x180] sm:$0xff] %vm630_vm0, %v614_v34  ;;  %v488_v23 = vsel %vm360_vm6, %v296_v61, %v424_v60  ;;  %v489_v46 = vsel %vm361_vm7, %v297_v6, %v425_v38  ;;  %v230_v43 = vmul.f32 %v1052_v57, %v159_v33  ;;  %v160_v37 = vsub.f32 %v79_v22, %v799_v13  ;;  %v560_v61 = vld [vmem:[%s1696_s5 + $0x1d0] sm:$0xff]  ;;  %v87_v60 = vld [vmem:[%s1691_s0 + $0x1f8] sm:$0xff] }
  0x7b   :  { %v616_v41 = vadd.f32 %v552_v26, %v488_v23  ;;  %v617_v52 = vadd.f32 %v553_v40, %v489_v46  ;;  %v490_v8 = vsel %vm362_vm8, %v298_v19, %v426_v1  ;;  %vm363_vm9 = vcmp.ge.f32.partialorder %v299_v44, 0.0  ;;  %680 = vst.msk [vmem:[#allocation2 + $0x188] sm:$0xff] %vm630_vm0, %v615_v45  ;;  %v561_v40 = vld [vmem:[%s1696_s5 + $0x1d8] sm:$0xff] }
  0x7c   :  { %v618_v39 = vadd.f32 %v554_v7, %v490_v8  ;;  %v427_v36 = vmul.f32 0.1, %v299_v44  ;;  %v300_v53 = vadd.f32 %v1073_v10, %v230_v43  ;;  %v161_v12 = vsub.f32 %v80_v30, %v799_v13  ;;  %v717_v7 = vld [vmem:[%s1695_s4] ss:$0 sm:$0xff] }
  0x7d   :  { %681 = vst.msk [vmem:[#allocation2 + $0x190] sm:$0xff] %vm630_vm0, %v616_v41  ;;  %682 = vst.msk [vmem:[#allocation2 + $0x198] sm:$0xff] %vm630_vm0, %v617_v52  ;;  %v162_v14 = vsub.f32 %v81_v51, %v799_v13  ;;  %v163_v15 = vsub.f32 %v82_v2, %v799_v13  ;;  %v164_v27 = vsub.f32 %v83_v31, %v799_v13  ;;  %v562_v51 = vld [vmem:[%s1696_s5 + $0x1e0] sm:$0xff] }
  0x7e   :  { %683 = vst.msk [vmem:[#allocation2 + $0x1a0] sm:$0xff] %vm630_vm0, %v618_v39  ;;  %v491_v24 = vsel %vm363_vm9, %v299_v44, %v427_v36  ;;  %vm364_vm10 = vcmp.ge.f32.partialorder %v300_v53, 0.0  ;;  %v428_v55 = vmul.f32 0.1, %v300_v53  ;;  %v231_v3 = vmul.f32 %v1052_v57, %v160_v37 }
  0x7f   :  { %v619_v50 = vadd.f32 %v555_v11, %v491_v24  ;;  %v232_v25 = vmul.f32 %v1052_v57, %v161_v12  ;;  %v233_v0 = vmul.f32 %v1052_v57, %v162_v14  ;;  %v234_v54 = vmul.f32 %v1052_v57, %v163_v15  ;;  %v565_v15 = vld [vmem:[%s1696_s5 + $0x1f8] sm:$0xff] }
  0x80   :  { %v492_v47 = vsel %vm364_vm10, %v300_v53, %v428_v55  ;;  %v301_v5 = vadd.f32 %v1073_v10, %v231_v3  ;;  %v235_v16 = vmul.f32 %v1052_v57, %v164_v27  ;;  %v165_v48 = vsub.f32 %v84_v17, %v799_v13  ;;  %v563_v53 = vld [vmem:[%s1696_s5 + $0x1e8] sm:$0xff] }
  0x81   :  { %684 = vst.msk [vmem:[#allocation2 + $0x1a8] sm:$0xff] %vm630_vm0, %v619_v50  ;;  %v620_v49 = vadd.f32 %v556_v4, %v492_v47  ;;  %v302_v28 = vadd.f32 %v1073_v10, %v232_v25  ;;  %v303_v62 = vadd.f32 %v1073_v10, %v233_v0  ;;  %v304_v32 = vadd.f32 %v1073_v10, %v234_v54 }
  0x82   :  { %vm365_vm11 = vcmp.ge.f32.partialorder %v301_v5, 0.0  ;;  %v429_v20 = vmul.f32 0.1, %v301_v5  ;;  %v305_v6 = vadd.f32 %v1073_v10, %v235_v16  ;;  %v236_v19 = vmul.f32 %v1052_v57, %v165_v48  ;;  %v86_v10 = vld [vmem:[%s1691_s0 + $0x1f0] sm:$0xff] }
  0x83   :  { %685 = vst.msk [vmem:[#allocation2 + $0x1b0] sm:$0xff] %vm630_vm0, %v620_v49  ;;  %vm366_vm12 = vcmp.ge.f32.partialorder %v302_v28, 0.0  ;;  %v430_v21 = vmul.f32 0.1, %v302_v28  ;;  %vm367_vm13 = vcmp.ge.f32.partialorder %v303_v62, 0.0  ;;  %vm368_vm14 = vcmp.ge.f32.partialorder %v304_v32, 0.0 }
  0x84   :  { %v431_v9 = vmul.f32 0.1, %v303_v62  ;;  %v493_v58 = vsel %vm365_vm11, %v301_v5, %v429_v20  ;;  %v432_v33 = vmul.f32 0.1, %v304_v32  ;;  %vm369_vm15 = vcmp.ge.f32.partialorder %v305_v6, 0.0 }
  0x85   :  { %v621_v34 = vadd.f32 %v557_v63, %v493_v58  ;;  %v494_v56 = vsel %vm366_vm12, %v302_v28, %v430_v21  ;;  %v433_v26 = vmul.f32 0.1, %v305_v6  ;;  %v306_v44 = vadd.f32 %v717_v7, %v236_v19 }
  0x86   :  { %v495_v35 = vsel %vm367_vm13, %v303_v62, %v431_v9  ;;  %v622_v38 = vadd.f32 %v558_v42, %v494_v56  ;;  %v496_v1 = vsel %vm368_vm14, %v304_v32, %v432_v33  ;;  %v166_v45 = vsub.f32 %v85_v59, %v799_v13 }
  0x87   :  { %v623_v29 = vadd.f32 %v559_v18, %v495_v35  ;;  %686 = vst.msk [vmem:[#allocation2 + $0x1b8] sm:$0xff] %vm630_vm0, %v621_v34  ;;  %v624_v22 = vadd.f32 %v560_v61, %v496_v1  ;;  %v497_v30 = vsel %vm369_vm15, %v305_v6, %v433_v26  ;;  %v167_v23 = vsub.f32 %v86_v10, %v799_v13 }
  0x88   :  { %687 = vst.msk [vmem:[#allocation2 + $0x1c0] sm:$0xff] %vm630_vm0, %v622_v38  ;;  %v625_v46 = vadd.f32 %v561_v40, %v497_v30  ;;  %vm370_vm1 = vcmp.ge.f32.partialorder %v306_v44, 0.0  ;;  %v434_v43 = vmul.f32 0.1, %v306_v44  ;;  %v168_v2 = vsub.f32 %v87_v60, %v799_v13  ;;  %v564_v13 = vld [vmem:[%s1696_s5 + $0x1f0] sm:$0xff] }
  0x89   :  { %688 = vst.msk [vmem:[#allocation2 + $0x1c8] sm:$0xff] %vm630_vm0, %v623_v29  ;;  %689 = vst.msk [vmem:[#allocation2 + $0x1d0] sm:$0xff] %vm630_vm0, %v624_v22  ;;  %v237_v31 = vmul.f32 %v1052_v57, %v166_v45  ;;  %v238_v41 = vmul.f32 %v1052_v57, %v167_v23 }
  0x8a   :  { %690 = vst.msk [vmem:[#allocation2 + $0x1d8] sm:$0xff] %vm630_vm0, %v625_v46  ;;  %v498_v52 = vsel %vm370_vm1, %v306_v44, %v434_v43  ;;  %v239_v8 = vmul.f32 %v1052_v57, %v168_v2 }
  0x8b   :  { %v626_v39 = vadd.f32 %v562_v51, %v498_v52  ;;  %v307_v36 = vadd.f32 %v717_v7, %v237_v31  ;;  %v308_v11 = vadd.f32 %v717_v7, %v238_v41 }
  0x8c   :  { %v309_v37 = vadd.f32 %v717_v7, %v239_v8 }
  0x8d   :  { %691 = vst.msk [vmem:[#allocation2 + $0x1e0] sm:$0xff] %vm630_vm0, %v626_v39  ;;  %vm371_vm2 = vcmp.ge.f32.partialorder %v307_v36, 0.0  ;;  %v435_v12 = vmul.f32 0.1, %v307_v36  ;;  %vm372_vm3 = vcmp.ge.f32.partialorder %v308_v11, 0.0 }
  0x8e   :  { %v436_v57 = vmul.f32 0.1, %v308_v11  ;;  %vm373_vm4 = vcmp.ge.f32.partialorder %v309_v37, 0.0  ;;  %v437_v14 = vmul.f32 0.1, %v309_v37 }
  0x8f   :  { %v499_v27 = vsel %vm371_vm2, %v307_v36, %v435_v12 }
  0x90   :  { %v500_v17 = vsel %vm372_vm3, %v308_v11, %v436_v57  ;;  %v627_v24 = vadd.f32 %v563_v53, %v499_v27  ;;  %v501_v4 = vsel %vm373_vm4, %v309_v37, %v437_v14 }
  0x91   :  { %v628_v55 = vadd.f32 %v564_v13, %v500_v17  ;;  %v629_v3 = vadd.f32 %v565_v15, %v501_v4 }
  0x92   :  { %692 = vst.msk [vmem:[#allocation2 + $0x1e8] sm:$0xff] %vm630_vm0, %v627_v24 }
  0x93   :  { %693 = vst.msk [vmem:[#allocation2 + $0x1f0] sm:$0xff] %vm630_vm0, %v628_v55  ;;  %694 = vst.msk [vmem:[#allocation2 + $0x1f8] sm:$0xff] %vm630_vm0, %v629_v3 }
  0x94   :  { %729 = shalt.err (!%p726_p4)
}
  0x95   :  { %s741_s5 = smov 128   ;;  %s742_s20 = smov 8  }
  0x96   :  { %706 = dma.vmem_to_hbm [thread:$0]  %s701_s16, 8192, %s1697_s6, [#allocation3], %s741_s5, %s741_s5, %s742_s20  }
  0x97   :  { %738 = dma.done.wait [#allocation3], 8192  }
  0x98   :  { %739 = vsyncadd [#allocation3], 4294959104 }
  0x99   :  { %710 = vsyncpa [#allocation3], 1 }

// kernel: residual_block.9
= control target key start
LH: loop header
LB: loop body
LE: loop exit
PB: predicated region body
PF: predicated region fallthrough
CT: control target
= control target key end

     0   :  { %s4705_s9 = smov 0   ;;  %s4707_s10 = smov 0   ;;  %s6093_s0 = inlined_call_operand.vmem [shape: bf16[2,342,16], index: 0, kind: input, shape index: {}]   ;;  %s6094_s1 = inlined_call_operand.vmem [shape: bf16[9,16,32], index: 1, kind: input, shape index: {}]   ;;  %s6095_s2 = inlined_call_operand.vmem [shape: f32[2,288,32], index: 2, kind: output, shape index: {}]  }
   0x1   :  { %s4709_s11 = smov 0  }
   0x2 LB: > { %s24_s12 = sadd.s32 1, %s4684_s10  ;;  %p3800_p0 = scmp.ge.s32.totalorder %s4688_s11, 1  ;;  %s4688_s11 = sphi %s4709_s11, %s12_s11   ;;  %s4684_s10 = sphi %s4707_s10, %s6135_s10   ;;  %s4680_s9 = sphi %s4705_s9, %s6134_s9  }
   0x3   : > { %p26_p1 = scmp.ge.s32.totalorder %s24_s12, 2  ;;  %p135_p2 = scmp.lt.s32.totalorder %s4688_s11, 3 }
   0x5   : > { %s6137_s12 = smov (%p26_p1, %s24_s12), 0  ;;  %p136_p3 = pnand %p3800_p0, %p135_p2 }
   0x7   : > { %139 = sbr.rel (%p136_p3) target bundleno = 551 (0x227), region = 28 }
   0xc   : > { %v4595_v0 = vld [vmem:[%s6094_s1 + $0x8] sm:$0xff]   ;;  %p164_p4 = scmp.lt.s32.totalorder %s4680_s9, 1  ;;  %v4729_v1 = vld [vmem:[%s6094_s1 + $0x10] sm:$0xff]   ;;  %v4736_v2 = vld [vmem:[%s6094_s1] sm:$0xff]   ;;  %vm317_vm0 = vsmask.f32 7424 }
   0xd   : > { %4225 = vmatprep.subr.bf16.mxu0 %v4595_v0  ;;  %4567 = vmatprep.subr.bf16.mxu1 %v4595_v0  ;;  %vm472_vm1 = vcmask 130048   ;;  %v4785_v26 = vld [vmem:[%s6094_s1 + $0x20] sm:$0xff]   ;;  %v4802_v37 = vld [vmem:[%s6094_s1 + $0x18] sm:$0xff]   ;;  %vm930_vm2 = vcmask 1046528   ;;  %vm2142_vm3 = vcmask 1045504   ;;  %vm3354_vm5 = vcmask 1044480  }
   0xe   : > { %s6139_s9 = smov (!%p164_p4, %s4680_s9), 1  ;;  %4226 = vmatpush3.bf16.msra.mxu0 %v4595_v0  ;;  %4568 = vmatpush3.bf16.msra.mxu1 %v4595_v0  ;;  %vm1691_vm4 = vsmask.f32 6400  ;;  %vm2903_vm6 = vsmask.f32 5376  ;;  %vm3665_vm7 = vcmask 261120  }
   0xf   : > { %s4569_s19 = smul.u32 172, %s6139_s9  ;;  %4301 = vmatprep.subr.bf16.mxu0 %v4729_v1  ;;  %4263 = vmatprep.subr.bf16.mxu1 %v4736_v2 }
  0x10   : > { %s4570_s7 = smul.u32 288, %s6139_s9 }
  0x11   : > { %s4744_s22 = scalar_lea.vmem %s6093_s0, %s4569_s19 }
  0x12   : > { %v182_v3 = vld [vmem:[%s4744_s22] sm:$0xf]  ;;  %v4748_v4 = vld [vmem:[%s4744_s22 + $0x4] sm:$0xf]  ;;  %v4754_v6 = vld [vmem:[%s4744_s22 + $0x8] sm:$0xff]   ;;  %s5975_s14 = scalar_lea.vmem %s6095_s2, %s4570_s7 }
  0x13   : > { %v4751_v5 = vcombine.low %v182_v3, %v4748_v4  ;;  %v326_v9 = vshll.u32 %v4754_v6, 16  ;;  %v330_v10 = vshrl.u32 %v4754_v6, 16  ;;  %v4761_v11 = vld [vmem:[%s4744_s22 + $0x50] sm:$0xff]   ;;  %v4764_v12 = vld [vmem:[%s4744_s22 + $0x58] sm:$0xff]   ;;  %v4775_v21 = vld [vmem:[%s4744_s22 + $0x60] sm:$0xff]  }
  0x14   : > { %v4767_v13 = vld [vmem:[%s4744_s22 + $0x10] sm:$0xff]   ;;  %v398_v16 = vshll.u32 %v4761_v11, 16  ;;  %v402_v17 = vshrl.u32 %v4761_v11, 16  ;;  %v406_v18 = vshll.u32 %v4764_v12, 16  ;;  %v410_v19 = vshrl.u32 %v4764_v12, 16  ;;  %v4780_v25 = vld [vmem:[%s4744_s22 + $0x18] sm:$0xff]  }
  0x15   : > { %v319_v7 = vshrl.u32 %v4751_v5, 16  ;;  %v321_v8 = vshll.u32 %v4751_v5, 16  ;;  %v328_v15 = vrot.slane %v326_v9, 1  ;;  %v334_v20 = vshll.u32 %v4767_v13, 16  ;;  %v4793_v34 = vld [vmem:[%s4744_s22 + $0x68] sm:$0xff]   ;;  %v4797_v36 = vld [vmem:[%s4744_s22 + $0x20] sm:$0xff]  }
  0x16   : > { %v4777_v24 = vrot.slane %v398_v16, 1  ;;  %v408_v27 = vrot.slane %v406_v18, 1  ;;  %v414_v29 = vshll.u32 %v4775_v21, 16  ;;  %v338_v30 = vshrl.u32 %v4767_v13, 16  ;;  %v4807_v42 = vld [vmem:[%s4744_s22 + $0x70] sm:$0xff]   ;;  %v4814_v47 = vld [vmem:[%s4744_s22 + $0x28] sm:$0xff]  }
  0x17   : > { %v323_v14 = vrot.slane %v321_v8, 1  ;;  %v332_v23 = vor.u32 %v330_v10, %v328_v15  ;;  %v336_v28 = vrot.slane %v334_v20, 1  ;;  %v342_v33 = vshll.u32 %v4780_v25, 16  ;;  %v4830_v59 = vld [vmem:[%s4744_s22 + $0x78] sm:$0xff]   ;;  %v4842_v8 = vld [vmem:[%s4744_s22 + $0x80] sm:$0xff]  }
  0x18   : > { %v404_v32 = vor.u32 %v402_v17, %v4777_v24  ;;  %v418_v35 = vshrl.u32 %v4775_v21, 16  ;;  %v412_v38 = vor.u32 %v410_v19, %v408_v27  ;;  %v416_v40 = vrot.slane %v414_v29, 1  ;;  %v4851_v20 = vld [vmem:[%s4744_s22 + $0x38] sm:$0xff]  }
  0x19   : > { %v324_v22 = vor.u32 %v323_v14, %v319_v7  ;;  %v337_v39 = vsel %vm317_vm0, %v332_v23, %v336_v28  ;;  %v340_v41 = vor.u32 %v338_v30, %v336_v28  ;;  %v344_v44 = vrot.slane %v342_v33, 1  ;;  %v4839_v7 = vld [vmem:[%s4744_s22 + $0x30] sm:$0xff]   ;;  %v4856_v23 = vld [vmem:[%s4744_s22 + $0x88] sm:$0xff]  }
  0x1a   : > { %v409_v43 = vsel %vm317_vm0, %v404_v32, %v408_v27  ;;  %v422_v45 = vshll.u32 %v4793_v34, 16  ;;  %v346_v46 = vshrl.u32 %v4780_v25, 16  ;;  %v417_v48 = vsel %vm317_vm0, %v412_v38, %v416_v40  ;;  %v4868_v38 = vld [vmem:[%s4744_s22 + $0x48] sm:$0xff]  }
  0x1b   : > { %v329_v31 = vsel %vm317_vm0, %v324_v22, %v328_v15  ;;  %4247 = vmatprep.mubr.msk.bf16.mxu1 %vm472_vm1, %v409_v43  ;;  %v420_v49 = vor.u32 %v418_v35, %v416_v40  ;;  %v350_v50 = vshll.u32 %v4797_v36, 16  ;;  %v426_v51 = vshrl.u32 %v4793_v34, 16  ;;  %v4865_v35 = vld [vmem:[%s4744_s22 + $0x40] sm:$0xff]  }
  0x1c   : > { %4227 = vmatprep.mubr.msk.bf16.mxu0 %vm472_vm1, %v329_v31  ;;  %4248 = vmatmul.mubr.msk.bf16.vlgmr.msra.gmra.mxu1 %vm472_vm1, %v417_v48  ;;  %v345_v52 = vsel %vm317_vm0, %v340_v41, %v344_v44  ;;  %v424_v53 = vrot.slane %v422_v45, 1  ;;  %v348_v54 = vor.u32 %v346_v46, %v344_v44  ;;  %v430_v55 = vshll.u32 %v4807_v42, 16  ;;  %v4615_v41 = vld [vmem:[%s4744_s22 + $0x90] ss:$0 sps:$4 sm:$0x11]  }
  0x1d   : > { %4228 = vmatmul.mubr.msk.bf16.vlgmr.msra.gmra.mxu0 %vm472_vm1, %v337_v39  ;;  %4264 = vmatpush3.bf16.msra.mxu1 %v4736_v2  ;;  %v352_v56 = vrot.slane %v350_v50, 1  ;;  %v354_v57 = vshrl.u32 %v4797_v36, 16  ;;  %v358_v58 = vshll.u32 %v4814_v47, 16  ;;  %v434_v63 = vshrl.u32 %v4807_v42, 16 }
  0x1e   : > { %4302 = vmatpush3.bf16.msra.mxu0 %v4729_v1  ;;  %4231 = vmatprep.mubr.msk.bf16.mxu0 %vm472_vm1, %v345_v52  ;;  %v425_v60 = vsel %vm317_vm0, %v420_v49, %v424_v53  ;;  %v428_v61 = vor.u32 %v426_v51, %v424_v53  ;;  %v432_v62 = vrot.slane %v430_v55, 1  ;;  %v438_v3 = vshll.u32 %v4830_v59, 16 }
  0x1f   : > { %4377 = vmatprep.subr.bf16.mxu0 %v4785_v26  ;;  %4339 = vmatprep.subr.bf16.mxu1 %v4802_v37  ;;  %v353_v0 = vsel %vm317_vm0, %v348_v54, %v352_v56  ;;  %v356_v1 = vor.u32 %v354_v57, %v352_v56  ;;  %v360_v2 = vrot.slane %v358_v58, 1  ;;  %v362_v14 = vshrl.u32 %v4814_v47, 16 }
  0x20   : > { %4251 = vmatprep.mubr.msk.bf16.mxu1 %vm472_vm1, %v425_v60  ;;  %v433_v9 = vsel %vm317_vm0, %v428_v61, %v432_v62  ;;  %v436_v10 = vor.u32 %v434_v63, %v432_v62  ;;  %v442_v15 = vshrl.u32 %v4830_v59, 16  ;;  %v440_v17 = vrot.slane %v438_v3, 1  ;;  %v923_v60 = vld [vmem:[%s4744_s22] sm:$0xe] }
  0x21   : > { %v361_v16 = vsel %vm317_vm0, %v356_v1, %v360_v2  ;;  %v366_v18 = vshll.u32 %v4839_v7, 16  ;;  %v446_v19 = vshll.u32 %v4842_v8, 16  ;;  %v370_v22 = vshrl.u32 %v4839_v7, 16 }
  0x22   : > { %v441_v27 = vsel %vm317_vm0, %v436_v10, %v440_v17  ;;  %v364_v28 = vor.u32 %v362_v14, %v360_v2  ;;  %v374_v31 = vshll.u32 %v4851_v20, 16  ;;  %v450_v32 = vshrl.u32 %v4842_v8, 16 }
  0x23   : > { %v368_v29 = vrot.slane %v366_v18, 1  ;;  %v448_v30 = vrot.slane %v446_v19, 1  ;;  %v454_v33 = vshll.u32 %v4856_v23, 16  ;;  %v444_v39 = vor.u32 %v442_v15, %v440_v17 }
  0x24   : > { %4252 = vmatmul.mubr.msk.bf16.gmra.mxu1 %vm472_vm1, %v433_v9  ;;  %v376_v43 = vrot.slane %v374_v31, 1  ;;  %v382_v46 = vshll.u32 %v4865_v35, 16  ;;  %v378_v49 = vshrl.u32 %v4851_v20, 16  ;;  %v386_v51 = vshrl.u32 %v4865_v35, 16 }
  0x25   : > { %4232 = vmatmul.mubr.msk.bf16.gmra.mxu0 %vm472_vm1, %v353_v0  ;;  %4255 = vmatprep.mubr.msk.bf16.mxu1 %vm472_vm1, %v441_v27  ;;  %v372_v40 = vor.u32 %v370_v22, %v368_v29  ;;  %v452_v44 = vor.u32 %v450_v32, %v448_v30  ;;  %v456_v45 = vrot.slane %v454_v33, 1  ;;  %v369_v48 = vsel %vm317_vm0, %v364_v28, %v368_v29  ;;  %v4910_v27 = vld [vmem:[%s6094_s1 + $0x28] sm:$0xff]  }
  0x26   : > { %4235 = vmatprep.mubr.msk.bf16.mxu0 %vm472_vm1, %v361_v16  ;;  %v390_v52 = vshll.u32 %v4868_v38, 16  ;;  %v449_v53 = vsel %vm317_vm0, %v444_v39, %v448_v30  ;;  %v458_v54 = vshrl.u32 %v4856_v23, 16  ;;  %v462_v55 = vshll.u32 %v4615_v41, 16  ;;  %v4926_v30 = vld [vmem:[%s6094_s1 + $0x30] sm:$0xff]   ;;  %v2135_v39 = vld [vmem:[%s4744_s22 + $0x8] sm:$0xc] }
  0x27   : > { %v377_v50 = vsel %vm317_vm0, %v372_v40, %v376_v43  ;;  %v457_v56 = vsel %vm317_vm0, %v452_v44, %v456_v45  ;;  %v384_v57 = vrot.slane %v382_v46, 1  ;;  %v380_v58 = vor.u32 %v378_v49, %v376_v43  ;;  %v4963_v40 = vld [vmem:[%s4744_s22 + $0x10] sm:$0xff]   ;;  %v4968_v44 = vld [vmem:[%s4744_s22 + $0x18] sm:$0xff]   ;;  %v4978_v49 = vld [vmem:[%s4744_s22 + $0x28] sm:$0xff]  }
  0x28   : > { %v392_v62 = vrot.slane %v390_v52, 1  ;;  %v460_v63 = vor.u32 %v458_v54, %v456_v45  ;;  %v464_v0 = vrot.slane %v462_v55, 1  ;;  %v394_v2 = vshrl.u32 %v4868_v38, 16  ;;  %v4972_v45 = vld [vmem:[%s4744_s22 + $0x20] sm:$0xff]  }
  0x29   : > { %v388_v61 = vor.u32 %v386_v51, %v384_v57  ;;  %v385_v1 = vsel %vm317_vm0, %v380_v58, %v384_v57  ;;  %v3864_v9 = vcombine.low %v923_v60, %v4748_v4  ;;  %v964_v14 = vrot.slane %v4856_v23, 1 }
  0x2a   : > { %v465_v10 = vsel %vm317_vm0, %v460_v63, %v464_v0  ;;  %v396_v15 = vor.u32 %v394_v2, %v392_v62  ;;  %v966_v16 = vrot.slane %v4615_v41, 1  ;;  %v932_v18 = vrot.slane %v4754_v6, 1  ;;  %v5014_v0 = vld [vmem:[%s4744_s22 + $0x48] sm:$0xff]  }
  0x2b   : > { %v393_v3 = vsel %vm317_vm0, %v388_v61, %v392_v62  ;;  %v931_v17 = vrot.slane %v3864_v9, 1  ;;  %v936_v28 = vrot.slane %v4780_v25, 1  ;;  %v946_v33 = vrot.slane %v4865_v35, 1  ;;  %v5006_v61 = vld [vmem:[%s4744_s22 + $0x40] sm:$0xff]  }
  0x2c   : > { %4256 = vmatmul.mubr.msk.bf16.gmra.mxu1 %vm472_vm1, %v449_v53  ;;  %v4901_v4 = vsel %vm930_vm2, %v964_v14, %v966_v16  ;;  %v401_v19 = vsel %vm317_vm0, %v396_v15, %v4777_v24  ;;  %v2148_v51 = vrot.slane %v4972_v45, 2  ;;  %v950_v52 = vrot.slane %v4761_v11, 1  ;;  %v4987_v53 = vld [vmem:[%s4744_s22 + $0x30] sm:$0xff]  }
  0x2d   : > { %4236 = vmatmul.mubr.msk.bf16.gmra.mxu0 %vm472_vm1, %v369_v48  ;;  %4259 = vmatprep.mubr.msk.bf16.mxu1 %vm472_vm1, %v457_v56  ;;  %v933_v22 = vsel %vm930_vm2, %v931_v17, %v932_v18  ;;  %v2146_v48 = vrot.slane %v4968_v44, 2  ;;  %v952_v55 = vrot.slane %v4764_v12, 1  ;;  %v4996_v56 = vld [vmem:[%s4744_s22 + $0x38] sm:$0xff]   ;;  %v2150_v58 = vrot.slane %v4978_v49, 2 }
  0x2e   : > { %4239 = vmatprep.mubr.msk.bf16.mxu0 %vm472_vm1, %v377_v50  ;;  %v2152_v60 = vrot.slane %v4987_v53, 2  ;;  %v2158_v9 = vrot.slane %v5014_v0, 2  ;;  %v954_v15 = vrot.slane %v4775_v21, 1  ;;  %v956_v17 = vrot.slane %v4793_v34, 1 }
  0x2f   : > { %v4999_v57 = vsel %vm2142_vm3, %v2146_v48, %v2148_v51  ;;  %v5009_v62 = vsel %vm2142_vm3, %v2148_v51, %v2150_v58 }
  0x34   : > { %4260 = vmatmul.mubr.msk.bf16.gmra.mxu1 %vm472_vm1, %v465_v10 }
  0x35   : > { %4240 = vmatmul.mubr.msk.bf16.gmra.mxu0 %vm472_vm1, %v385_v1  ;;  %4265 = vmatprep.mubr.msk.bf16.mxu1 %vm472_vm1, %v4751_v5  ;;  %v934_v5 = vrot.slane %v4767_v13, 1  ;;  %v5017_v1 = vsel %vm2142_vm3, %v2150_v58, %v2152_v60 }
  0x36   : > { %4243 = vmatprep.mubr.msk.bf16.mxu0 %vm472_vm1, %v393_v3  ;;  %v2156_v3 = vrot.slane %v5006_v61, 2 }
  0x37   : > { %v935_v24 = vsel %vm930_vm2, %v932_v18, %v934_v5  ;;  %v937_v29 = vsel %vm930_vm2, %v934_v5, %v936_v28  ;;  %v5040_v18 = vld [vmem:[%s4744_s22 + $0x50] sm:$0xff]   ;;  %v957_v5 = vsel %vm930_vm2, %v954_v15, %v956_v17 }
  0x38   : > { %v5032_v16 = vsel %vm2142_vm3, %v2156_v3, %v2158_v9 }
  0x3c   : > { %4266 = vmatmul.mubr.msk.bf16.vlgmr.msra.gmra.mxu1 %vm472_vm1, %v4754_v6  ;;  %v938_v6 = vrot.slane %v4797_v36, 1 }
  0x3d   : > { %4244 = vmatmul.mubr.msk.bf16.gmra.mxu0 %vm472_vm1, %v401_v19  ;;  %4340 = vmatpush3.bf16.msra.mxu1 %v4802_v37  ;;  %v955_v19 = vsel %vm930_vm2, %v952_v55, %v954_v15 }
  0x3e   : > { %4303 = vmatprep.mubr.msk.bf16.mxu0 %vm472_vm1, %v933_v22  ;;  %4269 = vmatprep.mubr.msk.bf16.mxu1 %vm472_vm1, %v4767_v13  ;;  %v940_v13 = vrot.slane %v4814_v47, 1  ;;  %v939_v37 = vsel %vm930_vm2, %v936_v28, %v938_v6  ;;  %v5044_v22 = vld [vmem:[%s4744_s22 + $0x58] sm:$0xff]   ;;  %v2160_v28 = vrot.slane %v5040_v18, 2 }
  0x3f   : > { %4415 = vmatprep.subr.bf16.mxu1 %v4910_v27 }
  0x40   : > { %v941_v31 = vsel %vm930_vm2, %v938_v6, %v940_v13  ;;  %v960_v6 = vrot.slane %v4830_v59, 1 }
  0x44   : > { %4270 = vmatmul.mubr.msk.bf16.gmra.mxu1 %vm472_vm1, %v4780_v25  ;;  %v942_v25 = vrot.slane %v4839_v7, 1 }
  0x45   : > { %4304 = vmatmul.mubr.msk.bf16.vlgmr.msra.gmra.mxu0 %vm472_vm1, %v935_v24  ;;  %4273 = vmatprep.mubr.msk.bf16.mxu1 %vm472_vm1, %v4797_v36  ;;  %v5051_v24 = vsel %vm2142_vm3, %v2158_v9, %v2160_v28 }
  0x46   : > { %4378 = vmatpush3.bf16.msra.mxu0 %v4785_v26  ;;  %4307 = vmatprep.mubr.msk.bf16.mxu0 %vm472_vm1, %v937_v29  ;;  %v944_v26 = vrot.slane %v4851_v20, 1  ;;  %v943_v36 = vsel %vm930_vm2, %v940_v13, %v942_v25  ;;  %v1241_v13 = vld [vmem:[%s4744_s22 + $0x8] sm:$0xe] }
  0x47   : > { %4453 = vmatprep.subr.bf16.mxu0 %v4926_v30 }
  0x48   : > { %v945_v32 = vsel %vm930_vm2, %v942_v25, %v944_v26  ;;  %v947_v43 = vsel %vm930_vm2, %v944_v26, %v946_v33  ;;  %v5069_v25 = vld [vmem:[%s4744_s22 + $0x68] sm:$0xff]  }
  0x4c   : > { %4274 = vmatmul.mubr.msk.bf16.gmra.mxu1 %vm472_vm1, %v4814_v47  ;;  %v948_v47 = vrot.slane %v4868_v38, 1 }
  0x4d   : > { %4308 = vmatmul.mubr.msk.bf16.gmra.mxu0 %vm472_vm1, %v939_v37  ;;  %4277 = vmatprep.mubr.msk.bf16.mxu1 %vm472_vm1, %v4839_v7  ;;  %v4960_v7 = vld [vmem:[%s4744_s22 + $0xc] sm:$0xf]  ;;  %v5065_v37 = vld [vmem:[%s4744_s22 + $0x60] sm:$0xff]  }
  0x4e   : > { %4311 = vmatprep.mubr.msk.bf16.mxu0 %vm472_vm1, %v941_v31  ;;  %v3948_v41 = vcombine.low %v2135_v39, %v4960_v7  ;;  %v951_v63 = vsel %vm930_vm2, %v948_v47, %v950_v52 }
  0x50   : > { %v2143_v46 = vrot.slane %v3948_v41, 2  ;;  %v1701_v41 = vshrl.u32 %v4963_v40, 16 }
  0x52   : > { %v1703_v58 = vrot.slane %v1701_v41, 1  ;;  %v1731_v41 = vshll.u32 %v4978_v49, 16 }
  0x54   : > { %4278 = vmatmul.mubr.msk.bf16.gmra.mxu1 %vm472_vm1, %v4851_v20  ;;  %v949_v20 = vsel %vm930_vm2, %v946_v33, %v948_v47  ;;  %v962_v33 = vrot.slane %v4842_v8, 1 }
  0x55   : > { %4312 = vmatmul.mubr.msk.bf16.gmra.mxu0 %vm472_vm1, %v943_v36  ;;  %4281 = vmatprep.mubr.msk.bf16.mxu1 %vm472_vm1, %v4865_v35  ;;  %v2144_v35 = vrot.slane %v4963_v40, 2  ;;  %v2164_v36 = vrot.slane %v5065_v37, 2 }
  0x56   : > { %4315 = vmatprep.mubr.msk.bf16.mxu0 %vm472_vm1, %v945_v32  ;;  %v3886_v32 = vcombine.low %v1241_v13, %v4960_v7  ;;  %v965_v51 = vsel %vm930_vm2, %v962_v33, %v964_v14  ;;  %v1710_v14 = vshrl.u32 %v4968_v44, 16  ;;  %v5125_v13 = vld [vmem:[%s4744_s22 + $0x88] sm:$0xff]  }
  0x57   : > { %v4981_v50 = vsel %vm2142_vm3, %v2143_v46, %v2144_v35  ;;  %v4990_v54 = vsel %vm2142_vm3, %v2144_v35, %v2146_v48  ;;  %v1375_v46 = vrot.slane %v4963_v40, 1  ;;  %v5092_v35 = vld [vmem:[%s4744_s22 + $0x70] sm:$0xff]   ;;  %v963_v48 = vsel %vm930_vm2, %v960_v6, %v962_v33 }
  0x58   : > { %v1693_v39 = vshrl.u32 %v3886_v32, 16  ;;  %v1696_v7 = vshll.u32 %v3886_v32, 16 }
  0x5c   : > { %4282 = vmatmul.mubr.msk.bf16.gmra.mxu1 %vm472_vm1, %v4868_v38  ;;  %v2154_v38 = vrot.slane %v4996_v56, 2 }
  0x5d   : > { %4316 = vmatmul.mubr.msk.bf16.gmra.mxu0 %vm472_vm1, %v947_v43  ;;  %4285 = vmatprep.mubr.msk.bf16.mxu1 %vm472_vm1, %v4761_v11  ;;  %v953_v11 = vsel %vm930_vm2, %v950_v52, %v952_v55  ;;  %v1704_v43 = vshll.u32 %v4963_v40, 16  ;;  %v5099_v52 = vld [vmem:[%s4744_s22 + $0x78] sm:$0xff]   ;;  %v1698_v55 = vrot.slane %v1696_v7, 2  ;;  %v1728_v7 = vshrl.u32 %v4978_v49, 16 }
  0x5e   : > { %4319 = vmatprep.mubr.msk.bf16.mxu0 %vm472_vm1, %v949_v20  ;;  %v5021_v2 = vsel %vm2142_vm3, %v2152_v60, %v2154_v38  ;;  %v5027_v10 = vsel %vm2142_vm3, %v2154_v38, %v2156_v3  ;;  %v1374_v20 = vrot.slane %v3886_v32, 1  ;;  %v2168_v38 = vrot.slane %v5092_v35, 2 }
  0x5f   : > { %v1706_v60 = vrot.slane %v1704_v43, 2 }
  0x60   : > { %v1376_v40 = vsel %vm930_vm2, %v1374_v20, %v1375_v46  ;;  %v1737_v20 = vshrl.u32 %v4987_v53, 16 }
  0x61   : > { %v1707_v15 = vor.u32 %v1706_v60, %v1703_v58  ;;  %v1730_v58 = vrot.slane %v1728_v7, 1  ;;  %v1733_v60 = vrot.slane %v1731_v41, 2 }
  0x64   : > { %4286 = vmatmul.mubr.msk.bf16.gmra.mxu1 %vm472_vm1, %v4764_v12  ;;  %v2162_v12 = vrot.slane %v5044_v22, 2 }
  0x65   : > { %4320 = vmatmul.mubr.msk.bf16.gmra.mxu0 %vm472_vm1, %v951_v63  ;;  %4289 = vmatprep.mubr.msk.bf16.mxu1 %vm472_vm1, %v4775_v21  ;;  %v958_v21 = vrot.slane %v4807_v42, 1 }
  0x66   : > { %4323 = vmatprep.mubr.msk.bf16.mxu0 %vm472_vm1, %v953_v11  ;;  %v5056_v29 = vsel %vm2142_vm3, %v2160_v28, %v2162_v12  ;;  %v1713_v11 = vshll.u32 %v4968_v44, 16  ;;  %v1379_v28 = vrot.slane %v4972_v45, 1 }
  0x67   : > { %v959_v31 = vsel %vm930_vm2, %v956_v17, %v958_v21  ;;  %v961_v26 = vsel %vm930_vm2, %v958_v21, %v960_v6  ;;  %v1719_v17 = vshrl.u32 %v4972_v45, 16  ;;  %v1712_v21 = vrot.slane %v1710_v14, 1 }
  0x68   : > { %v1715_v6 = vrot.slane %v1713_v11, 2 }
  0x6c   : > { %4290 = vmatmul.mubr.msk.bf16.gmra.mxu1 %vm472_vm1, %v4793_v34  ;;  %v2166_v34 = vrot.slane %v5069_v25, 2 }
  0x6d   : > { %4324 = vmatmul.mubr.msk.bf16.gmra.mxu0 %vm472_vm1, %v955_v19  ;;  %4293 = vmatprep.mubr.msk.bf16.mxu1 %vm472_vm1, %v4807_v42  ;;  %v5077_v42 = vsel %vm2142_vm3, %v2162_v12, %v2164_v36  ;;  %v1722_v19 = vshll.u32 %v4972_v45, 16  ;;  %v5122_v12 = vld [vmem:[%s4744_s22 + $0x80] sm:$0xff]   ;;  %v5137_v45 = vld [vmem:[%s6094_s1 + $0x38] sm:$0xff]  }
  0x6e   : > { %4327 = vmatprep.mubr.msk.bf16.mxu0 %vm472_vm1, %v957_v5  ;;  %v5082_v47 = vsel %vm2142_vm3, %v2164_v36, %v2166_v34  ;;  %v5106_v63 = vsel %vm2142_vm3, %v2166_v34, %v2168_v38  ;;  %v1377_v5 = vrot.slane %v4968_v44, 1  ;;  %v2172_v36 = vrot.slane %v5122_v12, 2 }
  0x6f   : > { %v2174_v34 = vrot.slane %v5125_v13, 2 }
  0x70   : > { %v1378_v32 = vsel %vm930_vm2, %v1375_v46, %v1377_v5  ;;  %v1380_v44 = vsel %vm930_vm2, %v1377_v5, %v1379_v28  ;;  %v1740_v46 = vshll.u32 %v4987_v53, 16  ;;  %v1749_v5 = vshll.u32 %v4996_v56, 16 }
  0x74   : > { %4294 = vmatmul.mubr.msk.bf16.gmra.mxu1 %vm472_vm1, %v4830_v59  ;;  %v1695_v59 = vrot.slane %v1693_v39, 1  ;;  %v1716_v39 = vor.u32 %v1715_v6, %v1712_v21  ;;  %v1755_v6 = vshrl.u32 %v5006_v61, 16 }
  0x75   : > { %4328 = vmatmul.mubr.msk.bf16.gmra.mxu0 %vm472_vm1, %v959_v31  ;;  %4297 = vmatprep.mubr.msk.bf16.mxu1 %vm472_vm1, %v4842_v8  ;;  %v2170_v8 = vrot.slane %v5099_v52, 2  ;;  %v1721_v31 = vrot.slane %v1719_v17, 1  ;;  %v1734_v17 = vor.u32 %v1733_v60, %v1730_v58  ;;  %v5206_v58 = vld [vmem:[%s4744_s22 + $0x14] sm:$0xf]  ;;  %v3347_v60 = vld [vmem:[%s4744_s22 + $0x10] sm:$0x8] }
  0x76   : > { %4331 = vmatprep.mubr.msk.bf16.mxu0 %vm472_vm1, %v961_v26  ;;  %v1699_v9 = vor.u32 %v1698_v55, %v1695_v59  ;;  %v1724_v26 = vrot.slane %v1722_v19, 2  ;;  %v5156_v59 = vld [vmem:[%s4744_s22 + $0x90] sm:$0xff]   ;;  %v1717_v55 = vsel %vm1691_vm4, %v1707_v15, %v1716_v39  ;;  %v1746_v19 = vshrl.u32 %v4996_v56, 16 }
  0x77   : > { %v5112_v3 = vsel %vm2142_vm3, %v2168_v38, %v2170_v8  ;;  %v5140_v33 = vsel %vm2142_vm3, %v2170_v8, %v2172_v36  ;;  %v5161_v38 = vld [vmem:[%s4744_s22 + $0x98] ss:$0 sps:$4 sm:$0x33]  }
  0x78   : > { %v1725_v43 = vor.u32 %v1724_v26, %v1721_v31  ;;  %v2178_v11 = vrot.slane %v5161_v38, 2  ;;  %v1387_v31 = vrot.slane %v5006_v61, 1 }
  0x7a   : > { %v1726_v8 = vsel %vm1691_vm4, %v1716_v39, %v1725_v43  ;;  %v1735_v26 = vsel %vm1691_vm4, %v1725_v43, %v1734_v17  ;;  %v1767_v43 = vshll.u32 %v5014_v0, 16 }
  0x7c   : > { %4298 = vmatmul.mubr.msk.bf16.gmra.mxu1 %vm472_vm1, %v4856_v23  ;;  %v1708_v23 = vsel %vm1691_vm4, %v1699_v9, %v1707_v15 }
  0x7d   : > { %4332 = vmatmul.mubr.msk.bf16.gmra.mxu0 %vm472_vm1, %v963_v48  ;;  %4341 = vmatprep.mubr.msk.bf16.mxu1 %vm472_vm1, %v1376_v40  ;;  %v1381_v48 = vrot.slane %v4978_v49, 1  ;;  %v1739_v40 = vrot.slane %v1737_v20, 1  ;;  %v5167_v49 = vld [vmem:[%s6094_s1 + $0x40] sm:$0xff]  }
  0x7e   : > { %4335 = vmatprep.mubr.msk.bf16.mxu0 %vm472_vm1, %v965_v51  ;;  %v1383_v51 = vrot.slane %v4987_v53, 1  ;;  %v2176_v53 = vrot.slane %v5156_v59, 2 }
  0x7f   : > { %v1382_v14 = vsel %vm930_vm2, %v1379_v28, %v1381_v48 }
  0x80   : > { %v1384_v9 = vsel %vm930_vm2, %v1381_v48, %v1383_v51  ;;  %v5175_v15 = vsel %vm2142_vm3, %v2174_v34, %v2176_v53  ;;  %v5182_v28 = vsel %vm2142_vm3, %v2176_v53, %v2178_v11  ;;  %v1776_v48 = vshll.u32 %v5040_v18, 16  ;;  %v5211_v53 = vld [vmem:[%s4744_s22 + $0x18] sm:$0xff]  }
  0x84   : > { %4342 = vmatmul.mubr.msk.bf16.vlgmr.msra.gmra.mxu1 %vm472_vm1, %v1378_v32  ;;  %v1751_v32 = vrot.slane %v1749_v5, 2  ;;  %v3356_v5 = vrot.slane %v5211_v53, 3 }
  0x85   : > { %4336 = vmatmul.mubr.msk.bf16.gmra.mxu0 %vm472_vm1, %v4901_v4  ;;  %v5146_v4 = vsel %vm2142_vm3, %v2172_v36, %v2174_v34  ;;  %4416 = vmatpush3.bf16.msra.mxu1 %v4910_v27  ;;  %v1742_v27 = vrot.slane %v1740_v46, 2  ;;  %v1748_v36 = vrot.slane %v1746_v19, 1  ;;  %v1773_v46 = vshrl.u32 %v5040_v18, 16  ;;  %v5216_v19 = vld [vmem:[%s4744_s22 + $0x20] sm:$0xff]  }
  0x86   : > { %4379 = vmatprep.mubr.msk.bf16.mxu0 %vm472_vm1, %v1708_v23  ;;  %4345 = vmatprep.mubr.msk.bf16.mxu1 %vm472_vm1, %v1380_v44  ;;  %v1758_v23 = vshll.u32 %v5006_v61, 16  ;;  %v1757_v44 = vrot.slane %v1755_v6, 1  ;;  %v1764_v61 = vshrl.u32 %v5014_v0, 16  ;;  %v6096_v6 = vrot.slane %v5216_v19, 3 }
  0x87   : > { %4491 = vmatprep.subr.bf16.mxu1 %v5137_v45  ;;  %v1743_v21 = vor.u32 %v1742_v27, %v1739_v40  ;;  %v1769_v27 = vrot.slane %v1767_v43, 2 }
  0x88   : > { %v1760_v39 = vrot.slane %v1758_v23, 2  ;;  %v1766_v40 = vrot.slane %v1764_v61, 1 }
  0x89   : > { %v1744_v34 = vsel %vm1691_vm4, %v1734_v17, %v1743_v21  ;;  %v1778_v17 = vrot.slane %v1776_v48, 2 }
  0x8a   : > { %v1761_v20 = vor.u32 %v1760_v39, %v1757_v44  ;;  %v1770_v23 = vor.u32 %v1769_v27, %v1766_v40  ;;  %v5235_v44 = vsel %vm3354_vm5, %v3356_v5, %v6096_v6  ;;  %v1393_v39 = vrot.slane %v5044_v22, 1 }
  0x8b   : > { %v1809_v40 = vshrl.u32 %v5092_v35, 16  ;;  %v1812_v27 = vshll.u32 %v5092_v35, 16 }
  0x8c   : > { %4346 = vmatmul.mubr.msk.bf16.gmra.mxu1 %vm472_vm1, %v1382_v14  ;;  %v4032_v14 = vcombine.low %v3347_v60, %v5206_v58 }
  0x8d   : > { %4380 = vmatmul.mubr.msk.bf16.vlgmr.msra.gmra.mxu0 %vm472_vm1, %v1717_v55  ;;  %4349 = vmatprep.mubr.msk.bf16.mxu1 %vm472_vm1, %v1384_v9  ;;  %v1391_v55 = vrot.slane %v5040_v18, 1  ;;  %v1775_v9 = vrot.slane %v1773_v46, 1 }
  0x8e   : > { %4454 = vmatpush3.bf16.msra.mxu0 %v4926_v30  ;;  %4383 = vmatprep.mubr.msk.bf16.mxu0 %vm472_vm1, %v1726_v8  ;;  %v1385_v30 = vrot.slane %v4996_v56, 1  ;;  %v1752_v56 = vor.u32 %v1751_v32, %v1748_v36  ;;  %v3355_v18 = vrot.slane %v4032_v14, 3  ;;  %v1791_v32 = vshrl.u32 %v5065_v37, 16 }
  0x8f   : > { %4529 = vmatprep.subr.bf16.mxu0 %v5167_v49  ;;  %v1399_v14 = vrot.slane %v5092_v35, 1  ;;  %v1821_v35 = vshll.u32 %v5099_v52, 16 }
  0x90   : > { %v1386_v7 = vsel %vm930_vm2, %v1383_v51, %v1385_v30  ;;  %v1388_v41 = vsel %vm930_vm2, %v1385_v30, %v1387_v31  ;;  %v1389_v51 = vrot.slane %v5014_v0, 1  ;;  %v1753_v8 = vsel %vm1691_vm4, %v1743_v21, %v1752_v56 }
  0x91   : > { %v1762_v11 = vsel %vm1691_vm4, %v1752_v56, %v1761_v20  ;;  %v1782_v30 = vshrl.u32 %v5044_v22, 16  ;;  %v5227_v36 = vsel %vm3354_vm5, %v3355_v18, %v3356_v5  ;;  %v1793_v46 = vrot.slane %v1791_v32, 1 }
  0x92   : > { %v1390_v0 = vsel %vm930_vm2, %v1387_v31, %v1389_v51  ;;  %v1392_v21 = vsel %vm930_vm2, %v1389_v51, %v1391_v55  ;;  %v1779_v31 = vor.u32 %v1778_v17, %v1775_v9  ;;  %v1394_v51 = vsel %vm930_vm2, %v1391_v55, %v1393_v39 }
  0x93   : > { %v1784_v56 = vrot.slane %v1782_v30, 1  ;;  %v1397_v55 = vrot.slane %v5069_v25, 1  ;;  %v1811_v18 = vrot.slane %v1809_v40, 1  ;;  %v1814_v5 = vrot.slane %v1812_v27, 2 }
  0x94   : > { %4350 = vmatmul.mubr.msk.bf16.gmra.mxu1 %vm472_vm1, %v1386_v7  ;;  %v1395_v7 = vrot.slane %v5065_v37, 1  ;;  %v1780_v43 = vsel %vm1691_vm4, %v1770_v23, %v1779_v31  ;;  %v1830_v32 = vshll.u32 %v5122_v12, 16  ;;  %v1407_v40 = vrot.slane %v5156_v59, 1 }
  0x95   : > { %4384 = vmatmul.mubr.msk.bf16.gmra.mxu0 %vm472_vm1, %v1735_v26  ;;  %4353 = vmatprep.mubr.msk.bf16.mxu1 %vm472_vm1, %v1388_v41  ;;  %v1785_v26 = vshll.u32 %v5044_v22, 16  ;;  %v1771_v41 = vsel %vm1691_vm4, %v1761_v20, %v1770_v23  ;;  %v1800_v22 = vshrl.u32 %v5069_v25, 16  ;;  %v1400_v23 = vsel %vm930_vm2, %v1397_v55, %v1399_v14 }
  0x96   : > { %4387 = vmatprep.mubr.msk.bf16.mxu0 %vm472_vm1, %v1744_v34  ;;  %v1794_v34 = vshll.u32 %v5065_v37, 16  ;;  %v1396_v60 = vsel %vm930_vm2, %v1393_v39, %v1395_v7  ;;  %v1803_v37 = vshll.u32 %v5069_v25, 16  ;;  %v1818_v25 = vshrl.u32 %v5099_v52, 16 }
  0x97   : > { %v1787_v61 = vrot.slane %v1785_v26, 2  ;;  %v1802_v9 = vrot.slane %v1800_v22, 1  ;;  %v1815_v26 = vor.u32 %v1814_v5, %v1811_v18  ;;  %v1403_v39 = vrot.slane %v5122_v12, 1  ;;  %v4640_v18 = vld [vmem:[%s4744_s22 + $0x98] ss:$0 sps:$4 sm:$0x11]  }
  0x98   : > { %v1796_v48 = vrot.slane %v1794_v34, 2  ;;  %v1805_v17 = vrot.slane %v1803_v37, 2  ;;  %v1401_v34 = vrot.slane %v5099_v52, 1  ;;  %v1836_v52 = vshrl.u32 %v5125_v13, 16 }
  0x99   : > { %v1845_v22 = vshrl.u32 %v5156_v59, 16  ;;  %v1848_v37 = vshll.u32 %v5156_v59, 16  ;;  %v1854_v59 = vshrl.u32 %v5161_v38, 16 }
  0x9a   : > { %v1797_v20 = vor.u32 %v1796_v48, %v1793_v46  ;;  %v1806_v30 = vor.u32 %v1805_v17, %v1802_v9  ;;  %v1832_v46 = vrot.slane %v1830_v32, 2  ;;  %v1402_v48 = vsel %vm930_vm2, %v1399_v14, %v1401_v34 }
  0x9b   : > { %v1847_v9 = vrot.slane %v1845_v22, 1  ;;  %v1850_v17 = vrot.slane %v1848_v37, 2 }
  0x9c   : > { %4354 = vmatmul.mubr.msk.bf16.gmra.mxu1 %vm472_vm1, %v1390_v0 }
  0x9d   : > { %4388 = vmatmul.mubr.msk.bf16.gmra.mxu0 %vm472_vm1, %v1753_v8  ;;  %4357 = vmatprep.mubr.msk.bf16.mxu1 %vm472_vm1, %v1392_v21  ;;  %v1788_v8 = vor.u32 %v1787_v61, %v1784_v56  ;;  %v1398_v21 = vsel %vm930_vm2, %v1395_v7, %v1397_v55  ;;  %v1807_v7 = vsel %vm1691_vm4, %v1797_v20, %v1806_v30  ;;  %v1823_v56 = vrot.slane %v1821_v35, 2 }
  0x9e   : > { %4391 = vmatprep.mubr.msk.bf16.mxu0 %vm472_vm1, %v1762_v11  ;;  %v1816_v61 = vsel %vm1691_vm4, %v1806_v30, %v1815_v26  ;;  %v1838_v55 = vrot.slane %v1836_v52, 1  ;;  %v1409_v30 = vrot.slane %v4640_v18, 1  ;;  %v5340_v52 = vld [vmem:[%s4744_s22 + $0x40] sm:$0xff]  }
  0x9f   : > { %v1789_v11 = vsel %vm1691_vm4, %v1779_v31, %v1788_v8  ;;  %v1798_v0 = vsel %vm1691_vm4, %v1788_v8, %v1797_v20  ;;  %v1827_v31 = vshrl.u32 %v5122_v12, 16  ;;  %v1839_v12 = vshll.u32 %v5125_v13, 16 }
  0xa0   : > { %v1405_v20 = vrot.slane %v5125_v13, 1 }
  0xa1   : > { %v1841_v14 = vrot.slane %v1839_v12, 2 }
  0xa2   : > { %v1408_v5 = vsel %vm930_vm2, %v1405_v20, %v1407_v40 }
  0xa3   : > { %v1842_v13 = vor.u32 %v1841_v14, %v1838_v55  ;;  %v5366_v55 = vld [vmem:[%s4744_s22 + $0x50] sm:$0xff]  }
  0xa4   : > { %4358 = vmatmul.mubr.msk.bf16.gmra.mxu1 %vm472_vm1, %v1394_v51  ;;  %v1404_v51 = vsel %vm930_vm2, %v1401_v34, %v1403_v39 }
  0xa5   : > { %4392 = vmatmul.mubr.msk.bf16.gmra.mxu0 %vm472_vm1, %v1771_v41  ;;  %4361 = vmatprep.mubr.msk.bf16.mxu1 %vm472_vm1, %v1396_v60  ;;  %v1820_v41 = vrot.slane %v1818_v25, 1  ;;  %v2453_v25 = vld [vmem:[%s4744_s22 + $0x10] sm:$0xc] }
  0xa6   : > { %4395 = vmatprep.mubr.msk.bf16.mxu0 %vm472_vm1, %v1780_v43  ;;  %v1829_v43 = vrot.slane %v1827_v31, 1  ;;  %v5297_v34 = vcombine.low %v2453_v25, %v5206_v58 }
  0xa7   : > { %v1824_v60 = vor.u32 %v1823_v56, %v1820_v41  ;;  %v2587_v41 = vrot.slane %v5211_v53, 2 }
  0xa8   : > { %v1833_v8 = vor.u32 %v1832_v46, %v1829_v43  ;;  %v2589_v43 = vrot.slane %v5216_v19, 2 }
  0xa9   : > { %v1825_v27 = vsel %vm1691_vm4, %v1815_v26, %v1824_v60  ;;  %v1856_v26 = vrot.slane %v1854_v59, 1 }
  0xaa   : > { %v1843_v35 = vsel %vm1691_vm4, %v1833_v8, %v1842_v13 }
  0xac   : > { %4362 = vmatmul.mubr.msk.bf16.gmra.mxu1 %vm472_vm1, %v1398_v21  ;;  %v1857_v21 = vshll.u32 %v5161_v38, 16 }
  0xad   : > { %4396 = vmatmul.mubr.msk.bf16.gmra.mxu0 %vm472_vm1, %v1789_v11  ;;  %4365 = vmatprep.mubr.msk.bf16.mxu1 %vm472_vm1, %v1400_v23  ;;  %v1834_v11 = vsel %vm1691_vm4, %v1824_v60, %v1833_v8  ;;  %v1851_v23 = vor.u32 %v1850_v17, %v1847_v9  ;;  %v5327_v60 = vld [vmem:[%s4744_s22 + $0x38] sm:$0xff]  }
  0xae   : > { %4399 = vmatprep.mubr.msk.bf16.mxu0 %vm472_vm1, %v1798_v0  ;;  %v1406_v0 = vsel %vm930_vm2, %v1403_v39, %v1405_v20  ;;  %v1859_v31 = vrot.slane %v1857_v21, 2  ;;  %v1410_v39 = vsel %vm930_vm2, %v1407_v40, %v1409_v30  ;;  %v5374_v9 = vld [vmem:[%s4744_s22 + $0x58] sm:$0xff]   ;;  %v5398_v30 = vld [vmem:[%s4744_s22 + $0x60] sm:$0xff]  }
  0xaf   : > { %v1852_v32 = vsel %vm1691_vm4, %v1842_v13, %v1851_v23  ;;  %v2603_v13 = vrot.slane %v5374_v9, 2 }
  0xb0   : > { %v1860_v38 = vor.u32 %v1859_v31, %v1856_v26  ;;  %v5406_v26 = vld [vmem:[%s4744_s22 + $0x68] sm:$0xff]  }
  0xb2   : > { %v1861_v58 = vsel %vm1691_vm4, %v1851_v23, %v1860_v38 }
  0xb4   : > { %4366 = vmatmul.mubr.msk.bf16.gmra.mxu1 %vm472_vm1, %v1402_v48  ;;  %v5323_v48 = vld [vmem:[%s4744_s22 + $0x30] sm:$0xff]  }
  0xb5   : > { %4400 = vmatmul.mubr.msk.bf16.gmra.mxu0 %vm472_vm1, %v1807_v7  ;;  %4369 = vmatprep.mubr.msk.bf16.mxu1 %vm472_vm1, %v1404_v51  ;;  %v2586_v7 = vrot.slane %v5297_v34, 2 }
  0xb6   : > { %4403 = vmatprep.mubr.msk.bf16.mxu0 %vm472_vm1, %v1816_v61  ;;  %v5310_v61 = vld [vmem:[%s4744_s22 + $0x28] sm:$0xff]  }
  0xb7   : > { %v2588_v56 = vsel %vm2142_vm3, %v2586_v7, %v2587_v41  ;;  %v2591_v46 = vrot.slane %v5310_v61, 2  ;;  %v2607_v7 = vrot.slane %v5406_v26, 2 }
  0xb9   : > { %v2592_v51 = vsel %vm2142_vm3, %v2589_v43, %v2591_v46 }
  0xbc   : > { %4370 = vmatmul.mubr.msk.bf16.gmra.mxu1 %vm472_vm1, %v1406_v0  ;;  %v2601_v0 = vrot.slane %v5366_v55, 2 }
  0xbd   : > { %4404 = vmatmul.mubr.msk.bf16.gmra.mxu0 %vm472_vm1, %v1825_v27  ;;  %4373 = vmatprep.mubr.msk.bf16.mxu1 %vm472_vm1, %v1408_v5 }
  0xbe   : > { %4407 = vmatprep.mubr.msk.bf16.mxu0 %vm472_vm1, %v1834_v11 }
  0xc4   : > { %4374 = vmatmul.mubr.msk.bf16.gmra.mxu1 %vm472_vm1, %v1410_v39 }
  0xc5   : > { %4408 = vmatmul.mubr.msk.bf16.gmra.mxu0 %vm472_vm1, %v1843_v35  ;;  %4417 = vmatprep.mubr.msk.bf16.mxu1 %vm472_vm1, %v4981_v50  ;;  %v2590_v50 = vsel %vm2142_vm3, %v2587_v41, %v2589_v43  ;;  %v5430_v43 = vld [vmem:[%s4744_s22 + $0x70] sm:$0xff]  }
  0xc6   : > { %4411 = vmatprep.mubr.msk.bf16.mxu0 %vm472_vm1, %v1852_v32  ;;  %v2605_v32 = vrot.slane %v5398_v30, 2 }
  0xcc   : > { %4418 = vmatmul.mubr.msk.bf16.vlgmr.msra.gmra.mxu1 %vm472_vm1, %v4990_v54  ;;  %v2593_v54 = vrot.slane %v5323_v48, 2 }
  0xcd   : > { %4412 = vmatmul.mubr.msk.bf16.gmra.mxu0 %vm472_vm1, %v1861_v58  ;;  %4492 = vmatpush3.bf16.msra.mxu1 %v5137_v45 }
  0xce   : > { %4455 = vmatprep.mubr.msk.bf16.mxu0 %vm472_vm1, %v2588_v56  ;;  %4421 = vmatprep.mubr.msk.bf16.mxu1 %vm472_vm1, %v4999_v57  ;;  %v2595_v57 = vrot.slane %v5327_v60, 2  ;;  %v2594_v45 = vsel %vm2142_vm3, %v2591_v46, %v2593_v54  ;;  %v2606_v56 = vsel %vm2142_vm3, %v2603_v13, %v2605_v32 }
  0xd0   : > { %v2596_v12 = vsel %vm2142_vm3, %v2593_v54, %v2595_v57 }
  0xd4   : > { %4422 = vmatmul.mubr.msk.bf16.gmra.mxu1 %vm472_vm1, %v5009_v62  ;;  %v2597_v62 = vrot.slane %v5340_v52, 2 }
  0xd5   : > { %4456 = vmatmul.mubr.msk.bf16.vlgmr.msra.gmra.mxu0 %vm472_vm1, %v2590_v50  ;;  %4425 = vmatprep.mubr.msk.bf16.mxu1 %vm472_vm1, %v5017_v1 }
  0xd6   : > { %4530 = vmatpush3.bf16.msra.mxu0 %v5167_v49  ;;  %4459 = vmatprep.mubr.msk.bf16.mxu0 %vm472_vm1, %v2592_v51  ;;  %v5344_v49 = vld [vmem:[%s4744_s22 + $0x48] sm:$0xff]   ;;  %v2598_v27 = vsel %vm2142_vm3, %v2595_v57, %v2597_v62  ;;  %v5438_v51 = vld [vmem:[%s4744_s22 + $0x78] sm:$0xff]   ;;  %v2609_v57 = vrot.slane %v5430_v43, 2 }
  0xd7   : > { %v2599_v37 = vrot.slane %v5344_v49, 2 }
  0xd9   : > { %v2602_v23 = vsel %vm2142_vm3, %v2599_v37, %v2601_v0 }
  0xdc   : > { %v5351_v22 = vpop.f32.mrf.mxu1  ;;  %4426 = vmatmul.mubr.msk.bf16.gmra.mxu1 %vm472_vm1, %v5021_v2  ;;  %v2600_v2 = vsel %vm2142_vm3, %v2597_v62, %v2599_v37  ;;  %v2611_v62 = vrot.slane %v5438_v51, 2 }
  0xdd   : > { %v5346_v8 = vpop.f32.mrf.mxu0  ;;  %4460 = vmatmul.mubr.msk.bf16.gmra.mxu0 %vm472_vm1, %v2594_v45  ;;  %4429 = vmatprep.mubr.msk.bf16.mxu1 %vm472_vm1, %v5027_v10 }
  0xde   : > { %4463 = vmatprep.mubr.msk.bf16.mxu0 %vm472_vm1, %v2596_v12  ;;  %v5360_v20 = vpop.f32.mrf.mxu1 }
  0xdf   : > { %v5355_v1 = vpop.f32.mrf.mxu0 }
  0xe0   : > { %v5368_v14 = vpop.f32.mrf.mxu1 }
  0xe1   : > { %v5362_v40 = vpop.f32.mrf.mxu0 }
  0xe2   : > { %v5376_v17 = vpop.f32.mrf.mxu1 }
  0xe3   : > { %v5370_v11 = vpop.f32.mrf.mxu0 }
  0xe4   : > { %v5383_v18 = vpop.f32.mrf.mxu1  ;;  %4430 = vmatmul.mubr.msk.bf16.gmra.mxu1 %vm472_vm1, %v5032_v16  ;;  %v2604_v16 = vsel %vm2142_vm3, %v2601_v0, %v2603_v13  ;;  %v5462_v0 = vld [vmem:[%s4744_s22 + $0x80] sm:$0xff]  }
  0xe5   : > { %v5378_v10 = vpop.f32.mrf.mxu0  ;;  %4464 = vmatmul.mubr.msk.bf16.gmra.mxu0 %vm472_vm1, %v2598_v27  ;;  %4433 = vmatprep.mubr.msk.bf16.mxu1 %vm472_vm1, %v5051_v24  ;;  %6111 = vst [vmem:[#allocation10_spill] sm:$0xff] %v5462_v0 }
  0xe6   : > { %4467 = vmatprep.mubr.msk.bf16.mxu0 %vm472_vm1, %v2600_v2  ;;  %v5392_v59 = vpop.f32.mrf.mxu1  ;;  %v2610_v2 = vsel %vm2142_vm3, %v2607_v7, %v2609_v57 }
  0xe7   : > { %v5387_v5 = vpop.f32.mrf.mxu0 }
  0xe8   : > { %v5400_v25 = vpop.f32.mrf.mxu1 }
  0xe9   : > { %v5394_v21 = vpop.f32.mrf.mxu0  ;;  %6103 = vst [vmem:[#allocation2_spill] sm:$0xff] %v5400_v25 }
  0xea   : > { %v5408_v31 = vpop.f32.mrf.mxu1 }
  0xeb   : > { %v5402_v35 = vpop.f32.mrf.mxu0  ;;  %6104 = vst [vmem:[#allocation3_spill] sm:$0xff] %v5408_v31 }
  0xec   : > { %v5415_v39 = vpop.f32.mrf.mxu1  ;;  %4434 = vmatmul.mubr.msk.bf16.gmra.mxu1 %vm472_vm1, %v5056_v29  ;;  %v2608_v29 = vsel %vm2142_vm3, %v2605_v32, %v2607_v7 }
  0xed   : > { %v5410_v24 = vpop.f32.mrf.mxu0  ;;  %4468 = vmatmul.mubr.msk.bf16.gmra.mxu0 %vm472_vm1, %v2602_v23  ;;  %6105 = vst [vmem:[#allocation4_spill] sm:$0xff] %v5415_v39  ;;  %4437 = vmatprep.mubr.msk.bf16.mxu1 %vm472_vm1, %v5077_v42 }
  0xee   : > { %4471 = vmatprep.mubr.msk.bf16.mxu0 %vm472_vm1, %v2604_v16  ;;  %v5424_v41 = vpop.f32.mrf.mxu1  ;;  %v5470_v16 = vld [vmem:[%s4744_s22 + $0x88] sm:$0xff]  }
  0xef   : > { %v5419_v38 = vpop.f32.mrf.mxu0  ;;  %6106 = vst [vmem:[#allocation5_spill] sm:$0xff] %v5424_v41  ;;  %6113 = vst [vmem:[#allocation12_spill] sm:$0xff] %v5470_v16  ;;  %v5502_v41 = vld [vmem:[%s4744_s22 + $0x98] sm:$0xff]  }
  0xf0   : > { %v5432_v46 = vpop.f32.mrf.mxu1  ;;  %6115 = vst [vmem:[#allocation14_spill] sm:$0xff] %v5502_v41 }
  0xf1   : > { %v5426_v58 = vpop.f32.mrf.mxu0  ;;  %6107 = vst [vmem:[#allocation6_spill] sm:$0xff] %v5432_v46  ;;  %v5496_v46 = vld [vmem:[%s4744_s22 + $0x90] sm:$0xff]  }
  0xf2   : > { %v5440_v54 = vpop.f32.mrf.mxu1 }
  0xf3   : > { %v5434_v50 = vpop.f32.mrf.mxu0  ;;  %6108 = vst [vmem:[#allocation7_spill] sm:$0xff] %v5440_v54 }
  0xf4   : > { %v5447_v45 = vpop.f32.mrf.mxu1  ;;  %4438 = vmatmul.mubr.msk.bf16.gmra.mxu1 %vm472_vm1, %v5082_v47  ;;  %v2612_v47 = vsel %vm2142_vm3, %v2609_v57, %v2611_v62  ;;  %v2615_v57 = vrot.slane %v5470_v16, 2 }
  0xf5   : > { %v5442_v42 = vpop.f32.mrf.mxu0  ;;  %4472 = vmatmul.mubr.msk.bf16.gmra.mxu0 %vm472_vm1, %v2606_v56  ;;  %6109 = vst [vmem:[#allocation8_spill] sm:$0xff] %v5447_v45  ;;  %4441 = vmatprep.mubr.msk.bf16.mxu1 %vm472_vm1, %v5106_v63  ;;  %v2613_v63 = vrot.slane %v5462_v0, 2 }
  0xf6   : > { %4475 = vmatprep.mubr.msk.bf16.mxu0 %vm472_vm1, %v2608_v29  ;;  %v5456_v37 = vpop.f32.mrf.mxu1 }
  0xf7   : > { %v5451_v12 = vpop.f32.mrf.mxu0  ;;  %6110 = vst [vmem:[#allocation9_spill] sm:$0xff] %v5456_v37  ;;  %v2913_v37 = vshrl.u32 %v5211_v53, 16  ;;  %v2614_v54 = vsel %vm2142_vm3, %v2611_v62, %v2613_v63 }
  0xf8   : > { %v5464_v13 = vpop.f32.mrf.mxu1 }
  0xf9   : > { %v5458_v27 = vpop.f32.mrf.mxu0  ;;  %6112 = vst [vmem:[#allocation11_spill] sm:$0xff] %v5464_v13  ;;  %v2908_v13 = vshll.u32 %v5297_v34, 16 }
  0xfa   : > { %v5472_v32 = vpop.f32.mrf.mxu1 }
  0xfb   : > { %v5466_v23 = vpop.f32.mrf.mxu0  ;;  %6114 = vst [vmem:[#allocation13_spill] sm:$0xff] %v5472_v32  ;;  %v2910_v16 = vrot.slane %v2908_v13, 3 }
  0xfc   : > { %v4267_v7 = vpop.f32.mrf.mxu1  ;;  %4442 = vmatmul.mubr.msk.bf16.gmra.mxu1 %vm472_vm1, %v5112_v3  ;;  %v2916_v3 = vshll.u32 %v5211_v53, 16 }
  0xfd   : > { %v5474_v56 = vpop.f32.mrf.mxu0  ;;  %4476 = vmatmul.mubr.msk.bf16.gmra.mxu0 %vm472_vm1, %v2610_v2  ;;  %v789_v6 = vadd.f32 %v4267_v7, %v5346_v8  ;;  %4445 = vmatprep.mubr.msk.bf16.mxu1 %vm472_vm1, %v5140_v33  ;;  %v2616_v33 = vsel %vm2142_vm3, %v2613_v63, %v2615_v57  ;;  %v2617_v63 = vrot.slane %v5496_v46, 2 }
  0xfe   : > { %4479 = vmatprep.mubr.msk.bf16.mxu0 %vm472_vm1, %v2612_v47  ;;  %v780_v2 = vpop.f32.mrf.mxu1  ;;  %v2905_v47 = vshrl.u32 %v5297_v34, 16 }
  0xff   : > { %v5481_v29 = vpop.f32.mrf.mxu0  ;;  %v781_v45 = vadd.f32 %v780_v2, %v5355_v1  ;;  %v2915_v1 = vrot.slane %v2913_v37, 2  ;;  %v2918_v2 = vrot.slane %v2916_v3, 3 }
 0x100   : > { %v4268_v8 = vpop.f32.mrf.mxu1  ;;  %v2907_v53 = vrot.slane %v2905_v47, 2 }
 0x101   : > { %v5487_v32 = vpop.f32.mrf.mxu0  ;;  %v792_v39 = vadd.f32 %v4268_v8, %v5362_v40  ;;  %v2619_v8 = vrot.slane %v5502_v41, 2  ;;  %v2919_v3 = vor.u32 %v2918_v2, %v2915_v1 }
 0x102   : > { %v783_v34 = vpop.f32.mrf.mxu1  ;;  %v2911_v47 = vor.u32 %v2910_v16, %v2907_v53 }
 0x103   : > { %v5498_v7 = vpop.f32.mrf.mxu0  ;;  %v784_v62 = vadd.f32 %v783_v34, %v5370_v11  ;;  %v2925_v11 = vshll.u32 %v5216_v19, 16 }
 0x104   : > { %v4271_v25 = vpop.f32.mrf.mxu1  ;;  %4446 = vmatmul.mubr.msk.bf16.gmra.mxu1 %vm472_vm1, %v5146_v4  ;;  %v2931_v4 = vshrl.u32 %v5310_v61, 16 }
 0x105   : > { %v4305_v31 = vpop.f32.mrf.mxu0  ;;  %4480 = vmatmul.mubr.msk.bf16.gmra.mxu0 %vm472_vm1, %v2614_v54  ;;  %v805_v54 = vadd.f32 %v4271_v25, %v5378_v10  ;;  %4449 = vmatprep.mubr.msk.bf16.mxu1 %vm472_vm1, %v5175_v15  ;;  %v2618_v25 = vsel %vm2142_vm3, %v2615_v57, %v2617_v63  ;;  %v4663_v15 = vld [vmem:[%s4744_s22 + $0xa0] ss:$0 sps:$4 sm:$0x33]   ;;  %v2927_v1 = vrot.slane %v2925_v11, 3  ;;  %v2943_v11 = vshll.u32 %v5323_v48, 16 }
 0x106   : > { %v5507_v0 = vadd.f32 %v4305_v31, %v789_v6  ;;  %4483 = vmatprep.mubr.msk.bf16.mxu0 %vm472_vm1, %v2616_v33  ;;  %v2922_v6 = vshrl.u32 %v5216_v19, 16  ;;  %v796_v31 = vpop.f32.mrf.mxu1  ;;  %v2934_v33 = vshll.u32 %v5310_v61, 16 }
 0x107   : > { %v1062_v40 = vpop.f32.mrf.mxu0  ;;  %v797_v34 = vadd.f32 %v796_v31, %v5387_v5  ;;  %v2920_v5 = vsel %vm2903_vm6, %v2911_v47, %v2919_v3 }
 0x108   : > { %6116 = vst [vmem:[#allocation15_spill] sm:$0xff] %v5507_v0  ;;  %v5515_v37 = vadd.f32 %v1062_v40, %v781_v45  ;;  %v4272_v45 = vpop.f32.mrf.mxu1  ;;  %v2924_v53 = vrot.slane %v2922_v6, 2  ;;  %v2936_v57 = vrot.slane %v2934_v33, 3  ;;  %v2940_v6 = vshrl.u32 %v5323_v48, 16 }
 0x109   : > { %v4306_v13 = vpop.f32.mrf.mxu0  ;;  %v808_v0 = vadd.f32 %v4272_v45, %v5394_v21  ;;  %v2949_v33 = vshrl.u32 %v5327_v60, 16 }
 0x10a   : > { %6117 = vst [vmem:[#allocation16_spill] sm:$0xff] %v5515_v37  ;;  %v5524_v10 = vadd.f32 %v4306_v13, %v792_v39  ;;  %v2620_v37 = vsel %vm2142_vm3, %v2617_v63, %v2619_v8  ;;  %v799_v2 = vpop.f32.mrf.mxu1  ;;  %v2933_v39 = vrot.slane %v2931_v4, 2  ;;  %v2621_v63 = vrot.slane %v4663_v15, 2 }
 0x10b   : > { %v1065_v40 = vpop.f32.mrf.mxu0  ;;  %v800_v31 = vadd.f32 %v799_v2, %v5402_v35  ;;  %v2928_v35 = vor.u32 %v2927_v1, %v2924_v53  ;;  %v2945_v2 = vrot.slane %v2943_v11, 3 }
 0x10c   : > { %v5530_v16 = vadd.f32 %v1065_v40, %v784_v62  ;;  %v4275_v21 = vpop.f32.mrf.mxu1  ;;  %4450 = vmatmul.mubr.msk.bf16.gmra.mxu1 %vm472_vm1, %v5182_v28  ;;  %v2622_v45 = vsel %vm2142_vm3, %v2619_v8, %v2621_v63 }
 0x10d   : > { %v4309_v41 = vpop.f32.mrf.mxu0  ;;  %4484 = vmatmul.mubr.msk.bf16.gmra.mxu0 %vm472_vm1, %v2618_v25  ;;  %v821_v47 = vadd.f32 %v4275_v21, %v5410_v24  ;;  %4493 = vmatprep.mubr.msk.bf16.mxu1 %vm472_vm1, %v2920_v5  ;;  %v2952_v25 = vshll.u32 %v5327_v60, 16  ;;  %v2929_v1 = vsel %vm2903_vm6, %v2919_v3, %v2928_v35 }
 0x10e   : > { %v5535_v13 = vadd.f32 %v4309_v41, %v805_v54  ;;  %4487 = vmatprep.mubr.msk.bf16.mxu0 %vm472_vm1, %v2620_v37  ;;  %v812_v41 = vpop.f32.mrf.mxu1  ;;  %v2937_v37 = vor.u32 %v2936_v57, %v2933_v39 }
 0x10f   : > { %v1078_v62 = vpop.f32.mrf.mxu0  ;;  %v813_v28 = vadd.f32 %v812_v41, %v5419_v38  ;;  %v2954_v21 = vrot.slane %v2952_v25, 3 }
 0x110   : > { %v5543_v4 = vadd.f32 %v1078_v62, %v797_v34  ;;  %v4276_v40 = vpop.f32.mrf.mxu1  ;;  %v2942_v34 = vrot.slane %v2940_v6, 2  ;;  %v2938_v38 = vsel %vm2903_vm6, %v2928_v35, %v2937_v37  ;;  %v3360_v62 = vrot.slane %v5310_v61, 3 }
 0x111   : > { %v4310_v54 = vpop.f32.mrf.mxu0  ;;  %v824_v5 = vadd.f32 %v4276_v40, %v5426_v58  ;;  %v6118_v40 = vrot.slane %v5216_v19, 3 }
 0x112   : > { %v5549_v15 = vadd.f32 %v4310_v54, %v808_v0  ;;  %v815_v39 = vpop.f32.mrf.mxu1  ;;  %v2951_v0 = vrot.slane %v2949_v33, 2  ;;  %v2946_v3 = vor.u32 %v2945_v2, %v2942_v34  ;;  %v2967_v54 = vshrl.u32 %v5344_v49, 16 }
 0x113   : > { %v1081_v24 = vpop.f32.mrf.mxu0  ;;  %v816_v8 = vadd.f32 %v815_v39, %v5434_v50  ;;  %v2958_v50 = vshrl.u32 %v5340_v52, 16  ;;  %v2970_v33 = vshll.u32 %v5344_v49, 16 }
 0x114   : > { %v5553_v53 = vadd.f32 %v1081_v24, %v800_v31  ;;  %v4279_v58 = vpop.f32.mrf.mxu1  ;;  %4494 = vmatmul.mubr.msk.bf16.vlgmr.msra.gmra.mxu1 %vm472_vm1, %v2929_v1  ;;  %v3361_v24 = vsel %vm3354_vm5, %v6118_v40, %v3360_v62 }
 0x115   : > { %v4313_v57 = vpop.f32.mrf.mxu0  ;;  %4488 = vmatmul.mubr.msk.bf16.gmra.mxu0 %vm472_vm1, %v2622_v45  ;;  %v837_v6 = vadd.f32 %v4279_v58, %v5442_v42  ;;  %4497 = vmatprep.mubr.msk.bf16.mxu1 %vm472_vm1, %v2938_v38  ;;  %v2947_v45 = vsel %vm2903_vm6, %v2937_v37, %v2946_v3  ;;  %v2960_v1 = vrot.slane %v2958_v50, 2  ;;  %v3364_v58 = vrot.slane %v5327_v60, 3 }
 0x116   : > { %v5559_v63 = vadd.f32 %v4313_v57, %v821_v47  ;;  %4531 = vmatprep.mubr.msk.bf16.mxu0 %vm472_vm1, %v5227_v36  ;;  %v2961_v47 = vshll.u32 %v5340_v52, 16  ;;  %v828_v35 = vpop.f32.mrf.mxu1  ;;  %v2955_v36 = vor.u32 %v2954_v21, %v2951_v0  ;;  %v2972_v0 = vrot.slane %v2970_v33, 3 }
 0x117   : > { %v1094_v31 = vpop.f32.mrf.mxu0  ;;  %v829_v25 = vadd.f32 %v828_v35, %v5451_v12  ;;  %v2985_v35 = vshrl.u32 %v5374_v9, 16 }
 0x118   : > { %v5566_v11 = vadd.f32 %v1094_v31, %v813_v28  ;;  %v4280_v42 = vpop.f32.mrf.mxu1  ;;  %v2963_v39 = vrot.slane %v2961_v47, 3  ;;  %v2956_v12 = vsel %vm2903_vm6, %v2946_v3, %v2955_v36  ;;  %v2979_v31 = vshll.u32 %v5366_v55, 16 }
 0x119   : > { %v4314_v41 = vpop.f32.mrf.mxu0  ;;  %v840_v34 = vadd.f32 %v4280_v42, %v5458_v27  ;;  %v3362_v27 = vrot.slane %v5323_v48, 3 }
 0x11a   : > { %v5574_v61 = vadd.f32 %v4314_v41, %v824_v5  ;;  %v831_v57 = vpop.f32.mrf.mxu1  ;;  %v2969_v5 = vrot.slane %v2967_v54, 2  ;;  %v2988_v41 = vshll.u32 %v5374_v9, 16 }
 0x11b   : > { %v1097_v28 = vpop.f32.mrf.mxu0  ;;  %v832_v37 = vadd.f32 %v831_v57, %v5466_v23  ;;  %v2964_v23 = vor.u32 %v2963_v39, %v2960_v1  ;;  %v3363_v33 = vsel %vm3354_vm5, %v3360_v62, %v3362_v27 }
 0x11c   : > { %v5581_v2 = vadd.f32 %v1097_v28, %v816_v8  ;;  %v4283_v21 = vpop.f32.mrf.mxu1  ;;  %4498 = vmatmul.mubr.msk.bf16.gmra.mxu1 %vm472_vm1, %v2947_v45  ;;  %v2973_v48 = vor.u32 %v2972_v0, %v2969_v5  ;;  %v2981_v45 = vrot.slane %v2979_v31, 3  ;;  %v2990_v62 = vrot.slane %v2988_v41, 3 }
 0x11d   : > { %v4317_v38 = vpop.f32.mrf.mxu0  ;;  %4532 = vmatmul.mubr.msk.bf16.vlgmr.msra.gmra.mxu0 %vm472_vm1, %v5235_v44  ;;  %v2976_v44 = vshrl.u32 %v5366_v55, 16  ;;  %v853_v3 = vadd.f32 %v4283_v21, %v5474_v56  ;;  %4501 = vmatprep.mubr.msk.bf16.mxu1 %vm472_vm1, %v2956_v12  ;;  %v2965_v1 = vsel %vm2903_vm6, %v2955_v36, %v2964_v23  ;;  %v2994_v21 = vshrl.u32 %v5398_v30, 16 }
 0x11e   : > { %v5587_v19 = vadd.f32 %v4317_v38, %v837_v6  ;;  %4535 = vmatprep.mubr.msk.bf16.mxu0 %vm472_vm1, %v3361_v24  ;;  %v844_v6 = vpop.f32.mrf.mxu1 }
 0x11f   : > { %v1110_v8 = vpop.f32.mrf.mxu0  ;;  %v845_v60 = vadd.f32 %v844_v6, %v5481_v29  ;;  %v2978_v28 = vrot.slane %v2976_v44, 2  ;;  %v2974_v29 = vsel %vm2903_vm6, %v2964_v23, %v2973_v48 }
 0x120   : > { %v5596_v50 = vadd.f32 %v1110_v8, %v829_v25  ;;  %v4284_v42 = vpop.f32.mrf.mxu1  ;;  %v3365_v25 = vsel %vm3354_vm5, %v3362_v27, %v3364_v58 }
 0x121   : > { %v4318_v47 = vpop.f32.mrf.mxu0  ;;  %v856_v40 = vadd.f32 %v4284_v42, %v5487_v32  ;;  %v3366_v32 = vrot.slane %v5340_v52, 3  ;;  %v2982_v0 = vor.u32 %v2981_v45, %v2978_v28  ;;  %v3003_v52 = vshrl.u32 %v5406_v26, 16 }
 0x122   : > { %v5602_v54 = vadd.f32 %v4318_v47, %v840_v34  ;;  %v847_v39 = vpop.f32.mrf.mxu1  ;;  %v2987_v34 = vrot.slane %v2985_v35, 2  ;;  %v2996_v42 = vrot.slane %v2994_v21, 2  ;;  %v3024_v21 = vshll.u32 %v5438_v51, 16 }
 0x123   : > { %v1113_v56 = vpop.f32.mrf.mxu0  ;;  %v848_v38 = vadd.f32 %v847_v39, %v5498_v7  ;;  %v2997_v7 = vshll.u32 %v5398_v30, 16  ;;  %v3367_v6 = vsel %vm3354_vm5, %v3364_v58, %v3366_v32  ;;  %v2983_v35 = vsel %vm2903_vm6, %v2973_v48, %v2982_v0 }
 0x124   : > { %v5607_v24 = vadd.f32 %v1113_v56, %v832_v37  ;;  %v4287_v5 = vpop.f32.mrf.mxu1  ;;  %4502 = vmatmul.mubr.msk.bf16.gmra.mxu1 %vm472_vm1, %v2965_v1  ;;  %v3368_v37 = vrot.slane %v5344_v49, 3  ;;  %v2991_v31 = vor.u32 %v2990_v62, %v2987_v34  ;;  %v3012_v34 = vshrl.u32 %v5430_v43, 16 }
 0x125   : > { %v4321_v57 = vpop.f32.mrf.mxu0  ;;  %4536 = vmatmul.mubr.msk.bf16.gmra.mxu0 %vm472_vm1, %v3363_v33  ;;  %4505 = vmatprep.mubr.msk.bf16.mxu1 %vm472_vm1, %v2974_v29  ;;  %v2999_v56 = vrot.slane %v2997_v7, 3  ;;  %v3372_v29 = vrot.slane %v5374_v9, 3  ;;  %v3015_v62 = vshll.u32 %v5430_v43, 16 }
 0x126   : > { %v5613_v12 = vadd.f32 %v4321_v57, %v853_v3  ;;  %4539 = vmatprep.mubr.msk.bf16.mxu0 %vm472_vm1, %v3365_v25  ;;  %v860_v8 = vpop.f32.mrf.mxu1  ;;  %v3006_v3 = vshll.u32 %v5406_v26, 16  ;;  %v3369_v41 = vsel %vm3354_vm5, %v3366_v32, %v3368_v37  ;;  %v2992_v45 = vsel %vm2903_vm6, %v2982_v0, %v2991_v31 }
 0x127   : > { %v1126_v36 = vpop.f32.mrf.mxu0  ;;  %v861_v1 = vadd.f32 %v860_v8, %v5360_v20  ;;  %v3000_v20 = vor.u32 %v2999_v56, %v2996_v42  ;;  %v3021_v0 = vshrl.u32 %v5438_v51, 16 }
 0x128   : > { %v5619_v27 = vadd.f32 %v1126_v36, %v845_v60  ;;  %v4288_v49 = vpop.f32.mrf.mxu1  ;;  %v869_v60 = vadd.f32 %v4287_v5, %v5351_v22  ;;  %v3008_v58 = vrot.slane %v3006_v3, 3  ;;  %v3370_v22 = vrot.slane %v5366_v55, 3 }
 0x129   : > { %v4322_v44 = vpop.f32.mrf.mxu0  ;;  %v3014_v3 = vrot.slane %v3012_v34, 2  ;;  %v3023_v42 = vrot.slane %v3021_v0, 2 }
 0x12a   : > { %v5626_v23 = vadd.f32 %v4322_v44, %v856_v40  ;;  %v863_v25 = vpop.f32.mrf.mxu1  ;;  %v3005_v40 = vrot.slane %v3003_v52, 2  ;;  %v3371_v8 = vsel %vm3354_vm5, %v3368_v37, %v3370_v22  ;;  %v3373_v52 = vsel %vm3354_vm5, %v3370_v22, %v3372_v29 }
 0x12b   : > { %v1129_v47 = vpop.f32.mrf.mxu0  ;;  %v864_v9 = vadd.f32 %v863_v25, %v5376_v17  ;;  %v3026_v37 = vrot.slane %v3024_v21, 3 }
 0x12c   : > { %v5632_v33 = vadd.f32 %v1129_v47, %v848_v38  ;;  %v4291_v48 = vpop.f32.mrf.mxu1  ;;  %4506 = vmatmul.mubr.msk.bf16.gmra.mxu1 %vm472_vm1, %v2983_v35  ;;  %v872_v38 = vadd.f32 %v4288_v49, %v5368_v14  ;;  %v3009_v55 = vor.u32 %v3008_v58, %v3005_v40  ;;  %v3001_v35 = vsel %vm2903_vm6, %v2991_v31, %v3000_v20  ;;  %v6119_v58 = vld [vmem:[#allocation2_spill] sm:$0xff] }
 0x12d   : > { %v4325_v28 = vpop.f32.mrf.mxu0  ;;  %4540 = vmatmul.mubr.msk.bf16.gmra.mxu0 %vm472_vm1, %v3367_v6  ;;  %4509 = vmatprep.mubr.msk.bf16.mxu1 %vm472_vm1, %v2992_v45  ;;  %v3017_v6 = vrot.slane %v3015_v62, 3  ;;  %v885_v49 = vadd.f32 %v4291_v48, %v5383_v18  ;;  %v3374_v18 = vrot.slane %v5398_v30, 3  ;;  %v3376_v40 = vrot.slane %v5406_v26, 3 }
 0x12e   : > { %v5637_v39 = vadd.f32 %v4325_v28, %v869_v60  ;;  %4543 = vmatprep.mubr.msk.bf16.mxu0 %vm472_vm1, %v3369_v41  ;;  %v876_v5 = vpop.f32.mrf.mxu1  ;;  %v3010_v17 = vsel %vm2903_vm6, %v3000_v20, %v3009_v55  ;;  %v3027_v30 = vor.u32 %v3026_v37, %v3023_v42  ;;  %v6124_v37 = vld [vmem:[#allocation5_spill] sm:$0xff] }
 0x12f   : > { %v1142_v57 = vpop.f32.mrf.mxu0  ;;  %v877_v56 = vadd.f32 %v876_v5, %v5392_v59  ;;  %v3018_v45 = vor.u32 %v3017_v6, %v3014_v3  ;;  %v6120_v59 = vld [vmem:[#allocation10_spill] sm:$0xff]  ;;  %v3375_v21 = vsel %vm3354_vm5, %v3372_v29, %v3374_v18 }
 0x130   : > { %v5646_v32 = vadd.f32 %v1142_v57, %v861_v1  ;;  %v4292_v44 = vpop.f32.mrf.mxu1  ;;  %v3030_v48 = vshrl.u32 %v6120_v59, 16  ;;  %v3033_v57 = vshll.u32 %v6120_v59, 16 }
 0x131   : > { %v4326_v36 = vpop.f32.mrf.mxu0  ;;  %v888_v1 = vadd.f32 %v4292_v44, %v6119_v58  ;;  %v3019_v44 = vsel %vm2903_vm6, %v3009_v55, %v3018_v45  ;;  %v3378_v55 = vrot.slane %v5430_v43, 3  ;;  %v3380_v58 = vrot.slane %v5438_v51, 3  ;;  %v6127_v51 = vld [vmem:[#allocation7_spill] sm:$0xff] }
 0x132   : > { %v5652_v7 = vadd.f32 %v4326_v36, %v872_v38  ;;  %v879_v41 = vpop.f32.mrf.mxu1  ;;  %v6121_v38 = vld [vmem:[#allocation12_spill] sm:$0xff]  ;;  %v6122_v36 = vld [vmem:[#allocation3_spill] sm:$0xff] }
 0x133   : > { %v1145_v14 = vpop.f32.mrf.mxu0  ;;  %v3039_v20 = vshrl.u32 %v6121_v38, 16  ;;  %v3042_v5 = vshll.u32 %v6121_v38, 16  ;;  %v880_v0 = vadd.f32 %v879_v41, %v6122_v36  ;;  %v3028_v41 = vsel %vm2903_vm6, %v3018_v45, %v3027_v30  ;;  %v6126_v36 = vld [vmem:[#allocation14_spill] sm:$0xff] }
 0x134   : > { %v5657_v47 = vadd.f32 %v1145_v14, %v864_v9  ;;  %v4295_v28 = vpop.f32.mrf.mxu1  ;;  %4510 = vmatmul.mubr.msk.bf16.gmra.mxu1 %vm472_vm1, %v3001_v35  ;;  %v3377_v14 = vsel %vm3354_vm5, %v3374_v18, %v3376_v40  ;;  %v3035_v35 = vrot.slane %v3033_v57, 3  ;;  %v3051_v45 = vshll.u32 %v5496_v46, 16 }
 0x135   : > { %v4329_v60 = vpop.f32.mrf.mxu0  ;;  %4544 = vmatmul.mubr.msk.bf16.gmra.mxu0 %vm472_vm1, %v3371_v8  ;;  %4513 = vmatprep.mubr.msk.bf16.mxu1 %vm472_vm1, %v3010_v17  ;;  %v3041_v42 = vrot.slane %v3039_v20, 2  ;;  %v3044_v29 = vrot.slane %v3042_v5, 3 }
 0x136   : > { %v5663_v25 = vadd.f32 %v4329_v60, %v885_v49  ;;  %4547 = vmatprep.mubr.msk.bf16.mxu0 %vm472_vm1, %v3373_v52  ;;  %v892_v34 = vpop.f32.mrf.mxu1  ;;  %v6123_v52 = vld [vmem:[#allocation4_spill] sm:$0xff]  ;;  %v3032_v49 = vrot.slane %v3030_v48, 2  ;;  %v6125_v48 = vld [vmem:[#allocation6_spill] sm:$0xff] }
 0x137   : > { %v1158_v31 = vpop.f32.mrf.mxu0  ;;  %v901_v3 = vadd.f32 %v4295_v28, %v6123_v52  ;;  %v3045_v5 = vor.u32 %v3044_v29, %v3041_v42 }
 0x138   : > { %v5670_v22 = vadd.f32 %v1158_v31, %v877_v56  ;;  %v4296_v9 = vpop.f32.mrf.mxu1  ;;  %v893_v56 = vadd.f32 %v892_v34, %v6124_v37  ;;  %v3036_v34 = vor.u32 %v3035_v35, %v3032_v49  ;;  %v5709_v49 = vld [vmem:[%s4744_s22 + $0xa0] ss:$0 sps:$4 sm:$0x77]   ;;  %v6128_v35 = vld [vmem:[#allocation8_spill] sm:$0xff] }
 0x139   : > { %v4330_v62 = vpop.f32.mrf.mxu0  ;;  %v904_v57 = vadd.f32 %v4296_v9, %v6125_v48 }
 0x13a   : > { %v5678_v26 = vadd.f32 %v4330_v62, %v888_v1  ;;  %v895_v60 = vpop.f32.mrf.mxu1  ;;  %v3048_v1 = vshrl.u32 %v5496_v46, 16  ;;  %v3037_v37 = vsel %vm2903_vm6, %v3027_v30, %v3036_v34 }
 0x13b   : > { %v1161_v8 = vpop.f32.mrf.mxu0 }
 0x13c   : > { %v5684_v6 = vadd.f32 %v1161_v8, %v880_v0  ;;  %v4299_v18 = vpop.f32.mrf.mxu1  ;;  %4514 = vmatmul.mubr.msk.bf16.gmra.mxu1 %vm472_vm1, %v3019_v44  ;;  %v3057_v0 = vshrl.u32 %v6126_v36, 16  ;;  %v896_v8 = vadd.f32 %v895_v60, %v6127_v51  ;;  %v3384_v51 = vrot.slane %v6121_v38, 3 }
 0x13d   : > { %v4333_v17 = vpop.f32.mrf.mxu0  ;;  %4548 = vmatmul.mubr.msk.bf16.gmra.mxu0 %vm472_vm1, %v3375_v21  ;;  %4517 = vmatprep.mubr.msk.bf16.mxu1 %vm472_vm1, %v3028_v41  ;;  %v3060_v21 = vshll.u32 %v6126_v36, 16  ;;  %v3053_v41 = vrot.slane %v3051_v45, 3  ;;  %v917_v42 = vadd.f32 %v4299_v18, %v6128_v35  ;;  %v3382_v18 = vrot.slane %v6120_v59, 3 }
 0x13e   : > { %v5689_v31 = vadd.f32 %v4333_v17, %v901_v3  ;;  %4551 = vmatprep.mubr.msk.bf16.mxu0 %vm472_vm1, %v3377_v14  ;;  %v908_v20 = vpop.f32.mrf.mxu1  ;;  %v3379_v14 = vsel %vm3354_vm5, %v3376_v40, %v3378_v55  ;;  %v3381_v3 = vsel %vm3354_vm5, %v3378_v55, %v3380_v58  ;;  %v3050_v17 = vrot.slane %v3048_v1, 2 }
 0x13f   : > { %v1174_v28 = vpop.f32.mrf.mxu0  ;;  %v3046_v40 = vsel %vm2903_vm6, %v3036_v34, %v3045_v5  ;;  %v3062_v48 = vrot.slane %v3060_v21, 3  ;;  %v6130_v34 = vld [vmem:[#allocation11_spill] sm:$0xff] }
 0x140   : > { %v5698_v62 = vadd.f32 %v1174_v28, %v893_v56  ;;  %v4300_v9 = vpop.f32.mrf.mxu1  ;;  %v3059_v28 = vrot.slane %v3057_v0, 2  ;;  %v6131_v21 = vld [vmem:[#allocation15_spill] sm:$0xff] }
 0x141   : > { %v4334_v43 = vpop.f32.mrf.mxu0  ;;  %v920_v0 = vadd.f32 %v4300_v9, %v6130_v34 }
 0x142   : > { %v5704_v44 = vadd.f32 %v4334_v43, %v904_v57  ;;  %v911_v56 = vpop.f32.mrf.mxu1  ;;  %v6129_v57 = vld [vmem:[#allocation9_spill] sm:$0xff]  ;;  %v3054_v43 = vor.u32 %v3053_v41, %v3050_v17  ;;  %v3063_v35 = vor.u32 %v3062_v48, %v3059_v28  ;;  %v6133_v17 = vld [vmem:[#allocation16_spill] sm:$0xff] }
 0x143   : > { %v1177_v52 = vpop.f32.mrf.mxu0  ;;  %v909_v55 = vadd.f32 %v908_v20, %v6129_v57 }
 0x144   : > { %v5712_v29 = vadd.f32 %v1177_v52, %v896_v8  ;;  %v4343_v45 = vpop.f32.mrf.mxu1  ;;  %4518 = vmatmul.mubr.msk.bf16.gmra.mxu1 %vm472_vm1, %v3037_v37  ;;  %v3066_v8 = vshrl.u32 %v5709_v49, 16  ;;  %v3069_v52 = vshll.u32 %v5709_v49, 16 }
 0x145   : > { %v4337_v60 = vpop.f32.mrf.mxu0  ;;  %4552 = vmatmul.mubr.msk.bf16.gmra.mxu0 %vm472_vm1, %v3379_v14  ;;  %v1650_v14 = vadd.f32 %v4343_v45, %v6131_v21  ;;  %4521 = vmatprep.mubr.msk.bf16.mxu1 %vm472_vm1, %v3046_v40  ;;  %v3385_v45 = vsel %vm3354_vm5, %v3382_v18, %v3384_v51 }
 0x146   : > { %v5718_v1 = vadd.f32 %v4337_v60, %v917_v42  ;;  %4555 = vmatprep.mubr.msk.bf16.mxu0 %vm472_vm1, %v3381_v3  ;;  %v1505_v59 = vpop.f32.mrf.mxu1  ;;  %v6132_v42 = vld [vmem:[#allocation13_spill] sm:$0xff]  ;;  %v3383_v60 = vsel %vm3354_vm5, %v3380_v58, %v3382_v18  ;;  %v3068_v34 = vrot.slane %v3066_v8, 2  ;;  %v3071_v28 = vrot.slane %v3069_v52, 3 }
 0x147   : > { %v1190_v30 = vpop.f32.mrf.mxu0  ;;  %v912_v37 = vadd.f32 %v911_v56, %v6132_v42  ;;  %v1648_v41 = vadd.f32 %v1505_v59, %v6133_v17  ;;  %v3388_v8 = vrot.slane %v6126_v36, 3 }
 0x148   : > { %v5727_v20 = vadd.f32 %v1190_v30, %v909_v55  ;;  %v4344_v9 = vpop.f32.mrf.mxu1  ;;  %v3055_v55 = vsel %vm2903_vm6, %v3045_v5, %v3054_v43  ;;  %v3386_v5 = vrot.slane %v5496_v46, 3 }
 0x149   : > { %v4338_v3 = vpop.f32.mrf.mxu0  ;;  %v1651_v40 = vadd.f32 %v4344_v9, %v5524_v10 }
 0x14a   : > { %v5733_v38 = vadd.f32 %v4338_v3, %v920_v0  ;;  %v1508_v48 = vpop.f32.mrf.mxu1  ;;  %v3064_v0 = vsel %vm2903_vm6, %v3054_v43, %v3063_v35  ;;  %v3072_v43 = vor.u32 %v3071_v28, %v3068_v34  ;;  %v3387_v46 = vsel %vm3354_vm5, %v3384_v51, %v3386_v5 }
 0x14b   : > { %v1193_v57 = vpop.f32.mrf.mxu0  ;;  %v1649_v58 = vadd.f32 %v1508_v48, %v5530_v16  ;;  %v3390_v51 = vrot.slane %v5709_v49, 3 }
 0x14c   : > { %v5739_v30 = vadd.f32 %v1193_v57, %v912_v37  ;;  %v4347_v18 = vpop.f32.mrf.mxu1  ;;  %4522 = vmatmul.mubr.msk.bf16.gmra.mxu1 %vm472_vm1, %v3055_v55 }
 0x14d   : > { %v4381_v56 = vpop.f32.mrf.mxu0  ;;  %4556 = vmatmul.mubr.msk.bf16.gmra.mxu0 %vm472_vm1, %v3383_v60  ;;  %v1654_v52 = vadd.f32 %v4347_v18, %v5535_v13  ;;  %4525 = vmatprep.mubr.msk.bf16.mxu1 %vm472_vm1, %v3064_v0  ;;  %v3389_v60 = vsel %vm3354_vm5, %v3386_v5, %v3388_v8 }
 0x14e   : > { %v5744_v21 = vadd.f32 %v4381_v56, %v1650_v14  ;;  %4559 = vmatprep.mubr.msk.bf16.mxu0 %vm472_vm1, %v3385_v45  ;;  %v1521_v16 = vpop.f32.mrf.mxu1 }
 0x14f   : > { %v1956_v10 = vpop.f32.mrf.mxu0  ;;  %v1652_v3 = vadd.f32 %v1521_v16, %v5543_v4 }
 0x150   : > { %v5751_v59 = vadd.f32 %v1956_v10, %v1648_v41  ;;  %v4348_v37 = vpop.f32.mrf.mxu1  ;;  %v3073_v41 = vsel %vm2903_vm6, %v3063_v35, %v3072_v43 }
 0x151   : > { %v4382_v14 = vpop.f32.mrf.mxu0  ;;  %v1655_v36 = vadd.f32 %v4348_v37, %v5549_v15 }
 0x152   : > { %v5755_v42 = vadd.f32 %v4382_v14, %v1651_v40  ;;  %v1524_v9 = vpop.f32.mrf.mxu1 }
 0x153   : > { %v1959_v17 = vpop.f32.mrf.mxu0  ;;  %v1653_v4 = vadd.f32 %v1524_v9, %v5553_v53  ;;  %v3391_v53 = vsel %vm3354_vm5, %v3388_v8, %v3390_v51 }
 0x154   : > { %v5760_v13 = vadd.f32 %v1959_v17, %v1649_v58  ;;  %v4351_v45 = vpop.f32.mrf.mxu1  ;;  %4526 = vmatmul.mubr.msk.bf16.gmra.mxu1 %vm472_vm1, %v3073_v41 }
 0x155   : > { %v4385_v57 = vpop.f32.mrf.mxu0  ;;  %4560 = vmatmul.mubr.msk.bf16.gmra.mxu0 %vm472_vm1, %v3387_v46  ;;  %v1658_v40 = vadd.f32 %v4351_v45, %v5559_v63 }
 0x156   : > { %v5765_v55 = vadd.f32 %v4385_v57, %v1654_v52  ;;  %4563 = vmatprep.mubr.msk.bf16.mxu0 %vm472_vm1, %v3389_v60  ;;  %v1537_v35 = vpop.f32.mrf.mxu1 }
 0x157   : > { %v1972_v15 = vpop.f32.mrf.mxu0  ;;  %v1656_v48 = vadd.f32 %v1537_v35, %v5566_v11 }
 0x158   : > { %v5771_v34 = vadd.f32 %v1972_v15, %v1652_v3  ;;  %v4352_v0 = vpop.f32.mrf.mxu1 }
 0x159   : > { %v4386_v28 = vpop.f32.mrf.mxu0  ;;  %v1659_v49 = vadd.f32 %v4352_v0, %v5574_v61 }
 0x15a   : > { %v5774_v56 = vadd.f32 %v4386_v28, %v1655_v36  ;;  %v1540_v18 = vpop.f32.mrf.mxu1 }
 0x15b   : > { %v1975_v58 = vpop.f32.mrf.mxu0  ;;  %v1657_v63 = vadd.f32 %v1540_v18, %v5581_v2 }
 0x15c   : > { %v5778_v5 = vadd.f32 %v1975_v58, %v1653_v4  ;;  %v4355_v43 = vpop.f32.mrf.mxu1 }
 0x15d   : > { %v4389_v10 = vpop.f32.mrf.mxu0  ;;  %4564 = vmatmul.mubr.msk.bf16.gmra.mxu0 %vm472_vm1, %v3391_v53  ;;  %v1662_v16 = vadd.f32 %v4355_v43, %v5587_v19 }
 0x15e   : > { %v5782_v52 = vadd.f32 %v4389_v10, %v1658_v40  ;;  %v1553_v8 = vpop.f32.mrf.mxu1 }
 0x15f   : > { %v1988_v11 = vpop.f32.mrf.mxu0  ;;  %v1660_v61 = vadd.f32 %v1553_v8, %v5596_v50 }
 0x160   : > { %v5785_v14 = vadd.f32 %v1988_v11, %v1656_v48  ;;  %v4356_v37 = vpop.f32.mrf.mxu1 }
 0x161   : > { %v4390_v3 = vpop.f32.mrf.mxu0  ;;  %v1663_v60 = vadd.f32 %v4356_v37, %v5602_v54 }
 0x162   : > { %v5788_v46 = vadd.f32 %v4390_v3, %v1659_v49  ;;  %v1556_v2 = vpop.f32.mrf.mxu1 }
 0x163   : > { %v1991_v17 = vpop.f32.mrf.mxu0  ;;  %v1661_v9 = vadd.f32 %v1556_v2, %v5607_v24 }
 0x164   : > { %v5791_v36 = vadd.f32 %v1991_v17, %v1657_v63  ;;  %v4359_v19 = vpop.f32.mrf.mxu1 }
 0x165   : > { %v4393_v41 = vpop.f32.mrf.mxu0  ;;  %v1666_v51 = vadd.f32 %v4359_v19, %v5613_v12 }
 0x166   : > { %v5794_v57 = vadd.f32 %v4393_v41, %v1662_v16  ;;  %v1569_v50 = vpop.f32.mrf.mxu1 }
 0x167   : > { %v2004_v4 = vpop.f32.mrf.mxu0  ;;  %v1664_v40 = vadd.f32 %v1569_v50, %v5619_v27 }
 0x168   : > { %v5797_v45 = vadd.f32 %v2004_v4, %v1660_v61  ;;  %v4360_v54 = vpop.f32.mrf.mxu1 }
 0x169   : > { %v4394_v15 = vpop.f32.mrf.mxu0  ;;  %v1667_v48 = vadd.f32 %v4360_v54, %v5626_v23 }
 0x16a   : > { %v5800_v35 = vadd.f32 %v4394_v15, %v1663_v60  ;;  %v1572_v24 = vpop.f32.mrf.mxu1 }
 0x16b   : > { %v2007_v28 = vpop.f32.mrf.mxu0  ;;  %v1665_v58 = vadd.f32 %v1572_v24, %v5632_v33 }
 0x16c   : > { %v5803_v53 = vadd.f32 %v2007_v28, %v1661_v9  ;;  %v4363_v12 = vpop.f32.mrf.mxu1 }
 0x16d   : > { %v4397_v0 = vpop.f32.mrf.mxu0  ;;  %v1670_v10 = vadd.f32 %v4363_v12, %v5637_v39 }
 0x16e   : > { %v5806_v49 = vadd.f32 %v4397_v0, %v1666_v51  ;;  %v1585_v27 = vpop.f32.mrf.mxu1 }
 0x16f   : > { %v2020_v18 = vpop.f32.mrf.mxu0  ;;  %v1668_v11 = vadd.f32 %v1585_v27, %v5646_v32 }
 0x170   : > { %v5809_v63 = vadd.f32 %v2020_v18, %v1664_v40  ;;  %v4364_v23 = vpop.f32.mrf.mxu1 }
 0x171   : > { %v4398_v43 = vpop.f32.mrf.mxu0  ;;  %v1671_v3 = vadd.f32 %v4364_v23, %v5652_v7 }
 0x172   : > { %v5812_v16 = vadd.f32 %v4398_v43, %v1667_v48  ;;  %v1588_v33 = vpop.f32.mrf.mxu1 }
 0x173   : > { %v2023_v8 = vpop.f32.mrf.mxu0  ;;  %v1669_v17 = vadd.f32 %v1588_v33, %v5657_v47 }
 0x174   : > { %v5815_v61 = vadd.f32 %v2023_v8, %v1665_v58  ;;  %v4367_v39 = vpop.f32.mrf.mxu1 }
 0x175   : > { %v4401_v37 = vpop.f32.mrf.mxu0  ;;  %v1674_v41 = vadd.f32 %v4367_v39, %v5663_v25 }
 0x176   : > { %v5818_v60 = vadd.f32 %v4401_v37, %v1670_v10  ;;  %v1601_v32 = vpop.f32.mrf.mxu1 }
 0x177   : > { %v2036_v2 = vpop.f32.mrf.mxu0  ;;  %v1672_v4 = vadd.f32 %v1601_v32, %v5670_v22 }
 0x178   : > { %v5821_v9 = vadd.f32 %v2036_v2, %v1668_v11  ;;  %v4368_v7 = vpop.f32.mrf.mxu1 }
 0x179   : > { %v4402_v19 = vpop.f32.mrf.mxu0  ;;  %v1675_v15 = vadd.f32 %v4368_v7, %v5678_v26 }
 0x17a   : > { %v5824_v51 = vadd.f32 %v4402_v19, %v1671_v3  ;;  %v1604_v47 = vpop.f32.mrf.mxu1 }
 0x17b   : > { %v2039_v50 = vpop.f32.mrf.mxu0  ;;  %v1673_v28 = vadd.f32 %v1604_v47, %v5684_v6 }
 0x17c   : > { %v5827_v40 = vadd.f32 %v2039_v50, %v1669_v17  ;;  %v4371_v25 = vpop.f32.mrf.mxu1 }
 0x17d   : > { %v4405_v54 = vpop.f32.mrf.mxu0  ;;  %v1678_v0 = vadd.f32 %v4371_v25, %v5689_v31 }
 0x17e   : > { %v5830_v48 = vadd.f32 %v4405_v54, %v1674_v41  ;;  %v1617_v22 = vpop.f32.mrf.mxu1 }
 0x17f   : > { %v2052_v24 = vpop.f32.mrf.mxu0  ;;  %v1676_v18 = vadd.f32 %v1617_v22, %v5698_v62 }
 0x180   : > { %v5833_v58 = vadd.f32 %v2052_v24, %v1672_v4  ;;  %v4372_v26 = vpop.f32.mrf.mxu1 }
 0x181   : > { %v4406_v12 = vpop.f32.mrf.mxu0  ;;  %v1679_v43 = vadd.f32 %v4372_v26, %v5704_v44 }
 0x182   : > { %v5836_v10 = vadd.f32 %v4406_v12, %v1675_v15  ;;  %v1620_v6 = vpop.f32.mrf.mxu1 }
 0x183   : > { %v2055_v27 = vpop.f32.mrf.mxu0  ;;  %v1677_v8 = vadd.f32 %v1620_v6, %v5712_v29 }
 0x184   : > { %v5839_v11 = vadd.f32 %v2055_v27, %v1673_v28  ;;  %v4375_v31 = vpop.f32.mrf.mxu1 }
 0x185   : > { %v4409_v23 = vpop.f32.mrf.mxu0  ;;  %v1682_v37 = vadd.f32 %v4375_v31, %v5718_v1 }
 0x186   : > { %v5842_v3 = vadd.f32 %v4409_v23, %v1678_v0  ;;  %v1633_v62 = vpop.f32.mrf.mxu1 }
 0x187   : > { %v2068_v33 = vpop.f32.mrf.mxu0  ;;  %v1680_v2 = vadd.f32 %v1633_v62, %v5727_v20 }
 0x188   : > { %v5845_v17 = vadd.f32 %v2068_v33, %v1676_v18  ;;  %v4376_v44 = vpop.f32.mrf.mxu1 }
 0x189   : > { %v4410_v39 = vpop.f32.mrf.mxu0  ;;  %v1683_v19 = vadd.f32 %v4376_v44, %v5733_v38 }
 0x18a   : > { %v5848_v41 = vadd.f32 %v4410_v39, %v1679_v43  ;;  %v1636_v29 = vpop.f32.mrf.mxu1 }
 0x18b   : > { %v2071_v32 = vpop.f32.mrf.mxu0  ;;  %v1681_v50 = vadd.f32 %v1636_v29, %v5739_v30 }
 0x18c   : > { %v5851_v4 = vadd.f32 %v2071_v32, %v1677_v8  ;;  %v4419_v1 = vpop.f32.mrf.mxu1 }
 0x18d   : > { %v4413_v7 = vpop.f32.mrf.mxu0  ;;  %v2419_v54 = vadd.f32 %v4419_v1, %v5744_v21 }
 0x18e   : > { %v5854_v15 = vadd.f32 %v4413_v7, %v1682_v37  ;;  %v2274_v20 = vpop.f32.mrf.mxu1 }
 0x18f   : > { %v2084_v47 = vpop.f32.mrf.mxu0  ;;  %v2417_v24 = vadd.f32 %v2274_v20, %v5751_v59 }
 0x190   : > { %v5857_v28 = vadd.f32 %v2084_v47, %v1680_v2  ;;  %v4420_v38 = vpop.f32.mrf.mxu1 }
 0x191   : > { %v4414_v25 = vpop.f32.mrf.mxu0  ;;  %v2420_v12 = vadd.f32 %v4420_v38, %v5755_v42 }
 0x192   : > { %v5860_v0 = vadd.f32 %v4414_v25, %v1683_v19  ;;  %v2277_v30 = vpop.f32.mrf.mxu1 }
 0x193   : > { %v2087_v22 = vpop.f32.mrf.mxu0  ;;  %v2418_v27 = vadd.f32 %v2277_v30, %v5760_v13 }
 0x194   : > { %v5863_v18 = vadd.f32 %v2087_v22, %v1681_v50  ;;  %v4423_v21 = vpop.f32.mrf.mxu1 }
 0x195   : > { %v4457_v26 = vpop.f32.mrf.mxu0  ;;  %v2423_v23 = vadd.f32 %v4423_v21, %v5765_v55 }
 0x196   : > { %v5866_v43 = vadd.f32 %v4457_v26, %v2419_v54  ;;  %v2290_v59 = vpop.f32.mrf.mxu1 }
 0x197   : > { %v2717_v6 = vpop.f32.mrf.mxu0  ;;  %v2421_v33 = vadd.f32 %v2290_v59, %v5771_v34 }
 0x198   : > { %v5869_v8 = vadd.f32 %v2717_v6, %v2417_v24  ;;  %v4424_v42 = vpop.f32.mrf.mxu1 }
 0x199   : > { %v4458_v31 = vpop.f32.mrf.mxu0  ;;  %v2424_v39 = vadd.f32 %v4424_v42, %v5774_v56 }
 0x19a   : > { %v5872_v37 = vadd.f32 %v4458_v31, %v2420_v12  ;;  %v2293_v13 = vpop.f32.mrf.mxu1 }
 0x19b   : > { %v2720_v62 = vpop.f32.mrf.mxu0  ;;  %v2422_v32 = vadd.f32 %v2293_v13, %v5778_v5 }
 0x19c   : > { %v5875_v2 = vadd.f32 %v2720_v62, %v2418_v27  ;;  %v4427_v55 = vpop.f32.mrf.mxu1 }
 0x19d   : > { %v4461_v44 = vpop.f32.mrf.mxu0  ;;  %v2427_v7 = vadd.f32 %v4427_v55, %v5782_v52 }
 0x19e   : > { %v5878_v19 = vadd.f32 %v4461_v44, %v2423_v23  ;;  %v2306_v34 = vpop.f32.mrf.mxu1 }
 0x19f   : > { %v2733_v29 = vpop.f32.mrf.mxu0  ;;  %v2425_v47 = vadd.f32 %v2306_v34, %v5785_v14 }
 0x1a0   : > { %v5881_v50 = vadd.f32 %v2733_v29, %v2421_v33  ;;  %v4428_v56 = vpop.f32.mrf.mxu1 }
 0x1a1   : > { %v4462_v1 = vpop.f32.mrf.mxu0  ;;  %v2428_v25 = vadd.f32 %v4428_v56, %v5788_v46 }
 0x1a2   : > { %v5884_v54 = vadd.f32 %v4462_v1, %v2424_v39  ;;  %v2309_v5 = vpop.f32.mrf.mxu1 }
 0x1a3   : > { %v2736_v20 = vpop.f32.mrf.mxu0  ;;  %v2426_v22 = vadd.f32 %v2309_v5, %v5791_v36 }
 0x1a4   : > { %v5887_v24 = vadd.f32 %v2736_v20, %v2422_v32  ;;  %v4431_v52 = vpop.f32.mrf.mxu1 }
 0x1a5   : > { %v4465_v38 = vpop.f32.mrf.mxu0  ;;  %v2431_v26 = vadd.f32 %v4431_v52, %v5794_v57 }
 0x1a6   : > { %v5890_v12 = vadd.f32 %v4465_v38, %v2427_v7  ;;  %v2322_v14 = vpop.f32.mrf.mxu1 }
 0x1a7   : > { %v2749_v30 = vpop.f32.mrf.mxu0  ;;  %v2429_v6 = vadd.f32 %v2322_v14, %v5797_v45 }
 0x1a8   : > { %v5893_v27 = vadd.f32 %v2749_v30, %v2425_v47  ;;  %v4432_v46 = vpop.f32.mrf.mxu1 }
 0x1a9   : > { %v4466_v21 = vpop.f32.mrf.mxu0  ;;  %v2432_v31 = vadd.f32 %v4432_v46, %v5800_v35 }
 0x1aa   : > { %v5896_v23 = vadd.f32 %v4466_v21, %v2428_v25  ;;  %v2325_v36 = vpop.f32.mrf.mxu1 }
 0x1ab   : > { %v2752_v59 = vpop.f32.mrf.mxu0  ;;  %v2430_v62 = vadd.f32 %v2325_v36, %v5803_v53 }
 0x1ac   : > { %v5899_v33 = vadd.f32 %v2752_v59, %v2426_v22  ;;  %v4435_v57 = vpop.f32.mrf.mxu1 }
 0x1ad   : > { %v4469_v42 = vpop.f32.mrf.mxu0  ;;  %v2435_v44 = vadd.f32 %v4435_v57, %v5806_v49 }
 0x1ae   : > { %v5902_v39 = vadd.f32 %v4469_v42, %v2431_v26  ;;  %v2338_v45 = vpop.f32.mrf.mxu1 }
 0x1af   : > { %v2765_v13 = vpop.f32.mrf.mxu0  ;;  %v2433_v29 = vadd.f32 %v2338_v45, %v5809_v63 }
 0x1b0   : > { %v5905_v32 = vadd.f32 %v2765_v13, %v2429_v6  ;;  %v4436_v35 = vpop.f32.mrf.mxu1 }
 0x1b1   : > { %v4470_v55 = vpop.f32.mrf.mxu0  ;;  %v2436_v1 = vadd.f32 %v4436_v35, %v5812_v16 }
 0x1b2   : > { %v5908_v7 = vadd.f32 %v4470_v55, %v2432_v31  ;;  %v2341_v53 = vpop.f32.mrf.mxu1 }
 0x1b3   : > { %v2768_v34 = vpop.f32.mrf.mxu0  ;;  %v2434_v20 = vadd.f32 %v2341_v53, %v5815_v61 }
 0x1b4   : > { %v5911_v47 = vadd.f32 %v2768_v34, %v2430_v62  ;;  %v4439_v49 = vpop.f32.mrf.mxu1 }
 0x1b5   : > { %v4473_v56 = vpop.f32.mrf.mxu0  ;;  %v2439_v38 = vadd.f32 %v4439_v49, %v5818_v60 }
 0x1b6   : > { %v5914_v25 = vadd.f32 %v4473_v56, %v2435_v44  ;;  %v2354_v63 = vpop.f32.mrf.mxu1 }
 0x1b7   : > { %v2781_v5 = vpop.f32.mrf.mxu0  ;;  %v2437_v30 = vadd.f32 %v2354_v63, %v5821_v9 }
 0x1b8   : > { %v5917_v22 = vadd.f32 %v2781_v5, %v2433_v29  ;;  %v4440_v16 = vpop.f32.mrf.mxu1 }
 0x1b9   : > { %v4474_v52 = vpop.f32.mrf.mxu0  ;;  %v2440_v21 = vadd.f32 %v4440_v16, %v5824_v51 }
 0x1ba   : > { %v5920_v26 = vadd.f32 %v4474_v52, %v2436_v1  ;;  %v2357_v61 = vpop.f32.mrf.mxu1 }
 0x1bb   : > { %v2784_v14 = vpop.f32.mrf.mxu0  ;;  %v2438_v59 = vadd.f32 %v2357_v61, %v5827_v40 }
 0x1bc   : > { %v5923_v6 = vadd.f32 %v2784_v14, %v2434_v20  ;;  %v4443_v60 = vpop.f32.mrf.mxu1 }
 0x1bd   : > { %v4477_v46 = vpop.f32.mrf.mxu0  ;;  %v2443_v42 = vadd.f32 %v4443_v60, %v5830_v48 }
 0x1be   : > { %v5926_v31 = vadd.f32 %v4477_v46, %v2439_v38  ;;  %v2370_v9 = vpop.f32.mrf.mxu1 }
 0x1bf   : > { %v2797_v36 = vpop.f32.mrf.mxu0  ;;  %v2441_v13 = vadd.f32 %v2370_v9, %v5833_v58 }
 0x1c0   : > { %v5929_v62 = vadd.f32 %v2797_v36, %v2437_v30  ;;  %v4444_v51 = vpop.f32.mrf.mxu1 }
 0x1c1   : > { %v4478_v57 = vpop.f32.mrf.mxu0  ;;  %v2444_v55 = vadd.f32 %v4444_v51, %v5836_v10 }
 0x1c2   : > { %v5932_v44 = vadd.f32 %v4478_v57, %v2440_v21  ;;  %v2373_v40 = vpop.f32.mrf.mxu1 }
 0x1c3   : > { %v2800_v45 = vpop.f32.mrf.mxu0  ;;  %v2442_v34 = vadd.f32 %v2373_v40, %v5839_v11 }
 0x1c4   : > { %v5935_v29 = vadd.f32 %v2800_v45, %v2438_v59  ;;  %v4447_v48 = vpop.f32.mrf.mxu1 }
 0x1c5   : > { %v4481_v35 = vpop.f32.mrf.mxu0  ;;  %v2447_v56 = vadd.f32 %v4447_v48, %v5842_v3 }
 0x1c6   : > { %v5938_v1 = vadd.f32 %v4481_v35, %v2443_v42  ;;  %v2386_v58 = vpop.f32.mrf.mxu1 }
 0x1c7   : > { %v2813_v53 = vpop.f32.mrf.mxu0  ;;  %v2445_v5 = vadd.f32 %v2386_v58, %v5845_v17 }
 0x1c8   : > { %v5941_v20 = vadd.f32 %v2813_v53, %v2441_v13  ;;  %v4448_v10 = vpop.f32.mrf.mxu1 }
 0x1c9   : > { %v4482_v49 = vpop.f32.mrf.mxu0  ;;  %v2448_v52 = vadd.f32 %v4448_v10, %v5848_v41 }
 0x1ca   : > { %v5944_v38 = vadd.f32 %v4482_v49, %v2444_v55  ;;  %v2389_v11 = vpop.f32.mrf.mxu1 }
 0x1cb   : > { %v2816_v63 = vpop.f32.mrf.mxu0  ;;  %v2446_v14 = vadd.f32 %v2389_v11, %v5851_v4 }
 0x1cc   : > { %v5947_v30 = vadd.f32 %v2816_v63, %v2442_v34  ;;  %v4451_v3 = vpop.f32.mrf.mxu1 }
 0x1cd   : > { %v4485_v16 = vpop.f32.mrf.mxu0  ;;  %v2451_v46 = vadd.f32 %v4451_v3, %v5854_v15 }
 0x1ce   : > { %v5950_v21 = vadd.f32 %v4485_v16, %v2447_v56  ;;  %v2402_v17 = vpop.f32.mrf.mxu1 }
 0x1cf   : > { %v2829_v61 = vpop.f32.mrf.mxu0  ;;  %v2449_v36 = vadd.f32 %v2402_v17, %v5857_v28 }
 0x1d0   : > { %v5953_v59 = vadd.f32 %v2829_v61, %v2445_v5  ;;  %v4452_v42 = vpop.f32.mrf.mxu1 }
 0x1d1   : > { %v4486_v60 = vpop.f32.mrf.mxu0  ;;  %v2452_v57 = vadd.f32 %v4452_v42, %v5860_v0 }
 0x1d2   : > { %v5956_v41 = vadd.f32 %v4486_v60, %v2448_v52  ;;  %v2405_v13 = vpop.f32.mrf.mxu1 }
 0x1d3   : > { %v2832_v9 = vpop.f32.mrf.mxu0  ;;  %v2450_v45 = vadd.f32 %v2405_v13, %v5863_v18 }
 0x1d4   : > { %v5959_v4 = vadd.f32 %v2832_v9, %v2446_v14  ;;  %v4495_v55 = vpop.f32.mrf.mxu1 }
 0x1d5   : > { %v4489_v51 = vpop.f32.mrf.mxu0  ;;  %v3313_v0 = vadd.f32 %v4495_v55, %v5866_v43 }
 0x1d6   : > { %v5962_v15 = vadd.f32 %v4489_v51, %v2451_v46  ;;  %v3168_v34 = vpop.f32.mrf.mxu1 }
 0x1d7   : > { %v2845_v40 = vpop.f32.mrf.mxu0  ;;  %v3311_v5 = vadd.f32 %v3168_v34, %v5869_v8 }
 0x1d8   : > { %v5964_v35 = vadd.f32 %v2845_v40, %v2449_v36  ;;  %v4496_v53 = vpop.f32.mrf.mxu1 }
 0x1d9   : > { %v4490_v28 = vpop.f32.mrf.mxu0  ;;  %v3314_v43 = vadd.f32 %v4496_v53, %v5872_v37 }
 0x1da   : > { %v5967_v48 = vadd.f32 %v4490_v28, %v2452_v57  ;;  %v3171_v49 = vpop.f32.mrf.mxu1 }
 0x1db   : > { %v2848_v56 = vpop.f32.mrf.mxu0  ;;  %v3312_v3 = vadd.f32 %v3171_v49, %v5875_v2 }
 0x1dc   : > { %v5970_v58 = vadd.f32 %v2848_v56, %v2450_v45  ;;  %v4499_v63 = vpop.f32.mrf.mxu1 }
 0x1dd   : > { %v4533_v18 = vpop.f32.mrf.mxu0  ;;  %v3317_v8 = vadd.f32 %v4499_v63, %v5878_v19 }
 0x1de   : > { %v3631_v10 = vadd.f32 %v4533_v18, %v3313_v0  ;;  %v3184_v16 = vpop.f32.mrf.mxu1 }
 0x1df   : > { %v3486_v52 = vpop.f32.mrf.mxu0  ;;  %v3315_v42 = vadd.f32 %v3184_v16, %v5881_v50 }
 0x1e0   : > { %3668 = vst.msk [vmem:[%s5975_s14 + $0x10] sm:$0xff] %vm3665_vm7, %v3631_v10  ;;  %v3629_v11 = vadd.f32 %v3486_v52, %v3311_v5  ;;  %v4500_v46 = vpop.f32.mrf.mxu1 }
 0x1e1   : > { %v4534_v14 = vpop.f32.mrf.mxu0  ;;  %v3318_v13 = vadd.f32 %v4500_v46, %v5884_v54 }
 0x1e2   : > { %3666 = vst.msk [vmem:[%s5975_s14] sm:$0xff] %vm3665_vm7, %v3629_v11  ;;  %v3632_v61 = vadd.f32 %v4534_v14, %v3314_v43  ;;  %v3187_v60 = vpop.f32.mrf.mxu1 }
 0x1e3   : > { %v3489_v17 = vpop.f32.mrf.mxu0  ;;  %v3316_v55 = vadd.f32 %v3187_v60, %v5887_v24 }
 0x1e4   : > { %3669 = vst.msk [vmem:[%s5975_s14 + $0x18] sm:$0xff] %vm3665_vm7, %v3632_v61  ;;  %v3630_v37 = vadd.f32 %v3489_v17, %v3312_v3  ;;  %v4503_v9 = vpop.f32.mrf.mxu1 }
 0x1e5   : > { %v4537_v36 = vpop.f32.mrf.mxu0  ;;  %v3321_v28 = vadd.f32 %v4503_v9, %v5890_v12 }
 0x1e6   : > { %3667 = vst.msk [vmem:[%s5975_s14 + $0x8] sm:$0xff] %vm3665_vm7, %v3630_v37  ;;  %v3635_v2 = vadd.f32 %v4537_v36, %v3317_v8  ;;  %v3200_v51 = vpop.f32.mrf.mxu1 }
 0x1e7   : > { %v3502_v57 = vpop.f32.mrf.mxu0  ;;  %v3319_v0 = vadd.f32 %v3200_v51, %v5893_v27 }
 0x1e8   : > { %3672 = vst.msk [vmem:[%s5975_s14 + $0x30] sm:$0xff] %vm3665_vm7, %v3635_v2  ;;  %v3633_v19 = vadd.f32 %v3502_v57, %v3315_v42  ;;  %v4504_v40 = vpop.f32.mrf.mxu1 }
 0x1e9   : > { %v4538_v45 = vpop.f32.mrf.mxu0  ;;  %v3322_v5 = vadd.f32 %v4504_v40, %v5896_v23 }
 0x1ea   : > { %3670 = vst.msk [vmem:[%s5975_s14 + $0x20] sm:$0xff] %vm3665_vm7, %v3633_v19  ;;  %v3636_v50 = vadd.f32 %v4538_v45, %v3318_v13  ;;  %v3203_v53 = vpop.f32.mrf.mxu1 }
 0x1eb   : > { %v3505_v34 = vpop.f32.mrf.mxu0  ;;  %v3320_v52 = vadd.f32 %v3203_v53, %v5899_v33 }
 0x1ec   : > { %3673 = vst.msk [vmem:[%s5975_s14 + $0x38] sm:$0xff] %vm3665_vm7, %v3636_v50  ;;  %v3634_v54 = vadd.f32 %v3505_v34, %v3316_v55  ;;  %v4507_v49 = vpop.f32.mrf.mxu1 }
 0x1ed   : > { %v4541_v56 = vpop.f32.mrf.mxu0  ;;  %v3325_v16 = vadd.f32 %v4507_v49, %v5902_v39 }
 0x1ee   : > { %3671 = vst.msk [vmem:[%s5975_s14 + $0x28] sm:$0xff] %vm3665_vm7, %v3634_v54  ;;  %v3639_v24 = vadd.f32 %v4541_v56, %v3321_v28  ;;  %v3216_v10 = vpop.f32.mrf.mxu1 }
 0x1ef   : > { %v3518_v18 = vpop.f32.mrf.mxu0  ;;  %v3323_v61 = vadd.f32 %v3216_v10, %v5905_v32 }
 0x1f0   : > { %3676 = vst.msk [vmem:[%s5975_s14 + $0x50] sm:$0xff] %vm3665_vm7, %v3639_v24  ;;  %v3637_v12 = vadd.f32 %v3518_v18, %v3319_v0  ;;  %v4508_v43 = vpop.f32.mrf.mxu1 }
 0x1f1   : > { %v4542_v63 = vpop.f32.mrf.mxu0  ;;  %v3326_v8 = vadd.f32 %v4508_v43, %v5908_v7 }
 0x1f2   : > { %3674 = vst.msk [vmem:[%s5975_s14 + $0x40] sm:$0xff] %vm3665_vm7, %v3637_v12  ;;  %v3640_v27 = vadd.f32 %v4542_v63, %v3322_v5  ;;  %v3219_v14 = vpop.f32.mrf.mxu1 }
 0x1f3   : > { %v3521_v11 = vpop.f32.mrf.mxu0  ;;  %v3324_v36 = vadd.f32 %v3219_v14, %v5911_v47 }
 0x1f4   : > { %3677 = vst.msk [vmem:[%s5975_s14 + $0x58] sm:$0xff] %vm3665_vm7, %v3640_v27  ;;  %v3638_v23 = vadd.f32 %v3521_v11, %v3320_v52  ;;  %v4511_v46 = vpop.f32.mrf.mxu1 }
 0x1f5   : > { %v4545_v3 = vpop.f32.mrf.mxu0  ;;  %v3329_v9 = vadd.f32 %v4511_v46, %v5914_v25 }
 0x1f6   : > { %3675 = vst.msk [vmem:[%s5975_s14 + $0x48] sm:$0xff] %vm3665_vm7, %v3638_v23  ;;  %v3643_v33 = vadd.f32 %v4545_v3, %v3325_v16  ;;  %v3232_v37 = vpop.f32.mrf.mxu1 }
 0x1f7   : > { %v3534_v17 = vpop.f32.mrf.mxu0  ;;  %v3327_v19 = vadd.f32 %v3232_v37, %v5917_v22 }
 0x1f8   : > { %3680 = vst.msk [vmem:[%s5975_s14 + $0x70] sm:$0xff] %vm3665_vm7, %v3643_v33  ;;  %v3641_v39 = vadd.f32 %v3534_v17, %v3323_v61  ;;  %v4512_v42 = vpop.f32.mrf.mxu1 }
 0x1f9   : > { %v4546_v60 = vpop.f32.mrf.mxu0  ;;  %v3330_v55 = vadd.f32 %v4512_v42, %v5920_v26 }
 0x1fa   : > { %3678 = vst.msk [vmem:[%s5975_s14 + $0x60] sm:$0xff] %vm3665_vm7, %v3641_v39  ;;  %v3644_v32 = vadd.f32 %v4546_v60, %v3326_v8  ;;  %v3235_v57 = vpop.f32.mrf.mxu1 }
 0x1fb   : > { %v3537_v2 = vpop.f32.mrf.mxu0  ;;  %v3328_v34 = vadd.f32 %v3235_v57, %v5923_v6 }
 0x1fc   : > { %3681 = vst.msk [vmem:[%s5975_s14 + $0x78] sm:$0xff] %vm3665_vm7, %v3644_v32  ;;  %v3642_v7 = vadd.f32 %v3537_v2, %v3324_v36  ;;  %v4515_v51 = vpop.f32.mrf.mxu1 }
 0x1fd   : > { %v4549_v13 = vpop.f32.mrf.mxu0  ;;  %v3333_v53 = vadd.f32 %v4515_v51, %v5926_v31 }
 0x1fe   : > { %3679 = vst.msk [vmem:[%s5975_s14 + $0x68] sm:$0xff] %vm3665_vm7, %v3642_v7  ;;  %v3647_v47 = vadd.f32 %v4549_v13, %v3329_v9  ;;  %v3248_v50 = vpop.f32.mrf.mxu1 }
 0x1ff   : > { %v3550_v45 = vpop.f32.mrf.mxu0  ;;  %v3331_v24 = vadd.f32 %v3248_v50, %v5929_v62 }
 0x200   : > { %3684 = vst.msk [vmem:[%s5975_s14 + $0x90] sm:$0xff] %vm3665_vm7, %v3647_v47  ;;  %v3645_v25 = vadd.f32 %v3550_v45, %v3327_v19  ;;  %v4516_v28 = vpop.f32.mrf.mxu1 }
 0x201   : > { %v4550_v40 = vpop.f32.mrf.mxu0  ;;  %v3334_v5 = vadd.f32 %v4516_v28, %v5932_v44 }
 0x202   : > { %3682 = vst.msk [vmem:[%s5975_s14 + $0x80] sm:$0xff] %vm3665_vm7, %v3645_v25  ;;  %v3648_v22 = vadd.f32 %v4550_v40, %v3330_v55  ;;  %v3251_v56 = vpop.f32.mrf.mxu1 }
 0x203   : > { %v3553_v54 = vpop.f32.mrf.mxu0  ;;  %v3332_v63 = vadd.f32 %v3251_v56, %v5935_v29 }
 0x204   : > { %3685 = vst.msk [vmem:[%s5975_s14 + $0x98] sm:$0xff] %vm3665_vm7, %v3648_v22  ;;  %v3646_v26 = vadd.f32 %v3553_v54, %v3328_v34  ;;  %v4519_v49 = vpop.f32.mrf.mxu1 }
 0x205   : > { %v4553_v0 = vpop.f32.mrf.mxu0  ;;  %v3337_v43 = vadd.f32 %v4519_v49, %v5938_v1 }
 0x206   : > { %3683 = vst.msk [vmem:[%s5975_s14 + $0x88] sm:$0xff] %vm3665_vm7, %v3646_v26  ;;  %v3651_v6 = vadd.f32 %v4553_v0, %v3333_v53  ;;  %v3264_v12 = vpop.f32.mrf.mxu1 }
 0x207   : > { %v3566_v18 = vpop.f32.mrf.mxu0  ;;  %v3335_v23 = vadd.f32 %v3264_v12, %v5941_v20 }
 0x208   : > { %3688 = vst.msk [vmem:[%s5975_s14 + $0xb0] sm:$0xff] %vm3665_vm7, %v3651_v6  ;;  %v3649_v31 = vadd.f32 %v3566_v18, %v3331_v24  ;;  %v4520_v52 = vpop.f32.mrf.mxu1 }
 0x209   : > { %v4554_v10 = vpop.f32.mrf.mxu0  ;;  %v3338_v61 = vadd.f32 %v4520_v52, %v5944_v38 }
 0x20a   : > { %3686 = vst.msk [vmem:[%s5975_s14 + $0xa0] sm:$0xff] %vm3665_vm7, %v3649_v31  ;;  %v3652_v62 = vadd.f32 %v4554_v10, %v3334_v5  ;;  %v3267_v11 = vpop.f32.mrf.mxu1 }
 0x20b   : > { %v3569_v27 = vpop.f32.mrf.mxu0  ;;  %v3336_v17 = vadd.f32 %v3267_v11, %v5947_v30 }
 0x20c   : > { %3689 = vst.msk [vmem:[%s5975_s14 + $0xb8] sm:$0xff] %vm3665_vm7, %v3652_v62  ;;  %v3650_v44 = vadd.f32 %v3569_v27, %v3332_v63  ;;  %v4523_v14 = vpop.f32.mrf.mxu1 }
 0x20d   : > { %v4557_v16 = vpop.f32.mrf.mxu0  ;;  %v3341_v37 = vadd.f32 %v4523_v14, %v5950_v21 }
 0x20e   : > { %3687 = vst.msk [vmem:[%s5975_s14 + $0xa8] sm:$0xff] %vm3665_vm7, %v3650_v44  ;;  %v3655_v29 = vadd.f32 %v4557_v16, %v3337_v43  ;;  %v3280_v33 = vpop.f32.mrf.mxu1 }
 0x20f   : > { %v3582_v3 = vpop.f32.mrf.mxu0  ;;  %v3339_v32 = vadd.f32 %v3280_v33, %v5953_v59 }
 0x210   : > { %3692 = vst.msk [vmem:[%s5975_s14 + $0xd0] sm:$0xff] %vm3665_vm7, %v3655_v29  ;;  %v3653_v1 = vadd.f32 %v3582_v3, %v3335_v23  ;;  %v4524_v8 = vpop.f32.mrf.mxu1 }
 0x211   : > { %v4558_v46 = vpop.f32.mrf.mxu0  ;;  %v3342_v9 = vadd.f32 %v4524_v8, %v5956_v41 }
 0x212   : > { %3690 = vst.msk [vmem:[%s5975_s14 + $0xc0] sm:$0xff] %vm3665_vm7, %v3653_v1  ;;  %v3656_v20 = vadd.f32 %v4558_v46, %v3338_v61  ;;  %v3283_v60 = vpop.f32.mrf.mxu1 }
 0x213   : > { %v3585_v39 = vpop.f32.mrf.mxu0  ;;  %v3340_v13 = vadd.f32 %v3283_v60, %v5959_v4 }
 0x214   : > { %3693 = vst.msk [vmem:[%s5975_s14 + $0xd8] sm:$0xff] %vm3665_vm7, %v3656_v20  ;;  %v3654_v38 = vadd.f32 %v3585_v39, %v3336_v17  ;;  %v4527_v42 = vpop.f32.mrf.mxu1 }
 0x215   : > { %v4561_v36 = vpop.f32.mrf.mxu0  ;;  %v3345_v51 = vadd.f32 %v4527_v42, %v5962_v15 }
 0x216   : > { %3691 = vst.msk [vmem:[%s5975_s14 + $0xc8] sm:$0xff] %vm3665_vm7, %v3654_v38  ;;  %v3659_v30 = vadd.f32 %v4561_v36, %v3341_v37  ;;  %v3296_v7 = vpop.f32.mrf.mxu1 }
 0x217   : > { %v3598_v2 = vpop.f32.mrf.mxu0  ;;  %v3343_v55 = vadd.f32 %v3296_v7, %v5964_v35 }
 0x218   : > { %3696 = vst.msk [vmem:[%s5975_s14 + $0xf0] sm:$0xff] %vm3665_vm7, %v3659_v30  ;;  %v3657_v21 = vadd.f32 %v3598_v2, %v3339_v32  ;;  %v4528_v19 = vpop.f32.mrf.mxu1 }
 0x219   : > { %v4562_v57 = vpop.f32.mrf.mxu0  ;;  %v3346_v40 = vadd.f32 %v4528_v19, %v5967_v48 }
 0x21a   : > { %3694 = vst.msk [vmem:[%s5975_s14 + $0xe0] sm:$0xff] %vm3665_vm7, %v3657_v21  ;;  %v3660_v59 = vadd.f32 %v4562_v57, %v3342_v9  ;;  %v3299_v4 = vpop.f32.mrf.mxu1 }
 0x21b   : > { %v3601_v47 = vpop.f32.mrf.mxu0  ;;  %v3344_v15 = vadd.f32 %v3299_v4, %v5970_v58 }
 0x21c   : > { %3697 = vst.msk [vmem:[%s5975_s14 + $0xf8] sm:$0xff] %vm3665_vm7, %v3660_v59  ;;  %v3658_v41 = vadd.f32 %v3601_v47, %v3340_v13 }
 0x21d   : > { %v4565_v45 = vpop.f32.mrf.mxu0 }
 0x21e   : > { %3695 = vst.msk [vmem:[%s5975_s14 + $0xe8] sm:$0xff] %vm3665_vm7, %v3658_v41  ;;  %v3663_v25 = vadd.f32 %v4565_v45, %v3345_v51 }
 0x21f   : > { %v3614_v50 = vpop.f32.mrf.mxu0 }
 0x220   : > { %3700 = vst.msk [vmem:[%s5975_s14 + $0x110] sm:$0xff] %vm3665_vm7, %v3663_v25  ;;  %v3661_v34 = vadd.f32 %v3614_v50, %v3343_v55 }
 0x221   : > { %v4566_v22 = vpop.f32.mrf.mxu0 }
 0x222   : > { %3698 = vst.msk [vmem:[%s5975_s14 + $0x100] sm:$0xff] %vm3665_vm7, %v3661_v34  ;;  %v3664_v28 = vadd.f32 %v4566_v22, %v3346_v40 }
 0x223   : > { %v3617_v54 = vpop.f32.mrf.mxu0 }
 0x224   : > { %3701 = vst.msk [vmem:[%s5975_s14 + $0x118] sm:$0xff] %vm3665_vm7, %v3664_v28  ;;  %v3662_v35 = vadd.f32 %v3617_v54, %v3344_v15 }
 0x226   : > { %3699 = vst.msk [vmem:[%s5975_s14 + $0x108] sm:$0xff] %vm3665_vm7, %v3662_v35 }
 0x227 PF: > { %s12_s11 = sadd.s32 1, %s4688_s11   ;;  %s6134_s9 = smov %s4684_s10 }
 0x228   : > { %p9_p5 = scmp.ge.s32.totalorder %s12_s11, 4   ;;  %s6135_s10 = smov %s6137_s12 }
 0x22a   :  { %11 = sbr.rel (!%p9_p5) target bundleno = 2 (0x2), region = 69 }

</bundles_post_ra>
